<compile_context>
chip_gen: v6e
topology: v6e:2x2x1
jax: 0.10.0
libtpu: 0.0.40
codegen_flags: <defaults>
</compile_context>

<pallas_src>
import jax
import jax.numpy as jnp
from jax.experimental import pallas as pl
from jax.experimental.pallas import tpu as pltpu


_BN_EPS = 1e-3


def _cdiv(a, b):
    return -(-a // b)


# ----------------------------------------------------------------------------
# In-kernel helpers
# ----------------------------------------------------------------------------
def _sigmoid(y):
    # exp on EUP + approximate reciprocal on EUP (frees VALU slots vs divide).
    # 1/(1+exp(-y)) never produces NaN in f32 (exp(-y)->inf => result 0).
    return pl.reciprocal(1.0 + jnp.exp(-y), approx=True)


# ----------------------------------------------------------------------------
# Pallas kernels
# ----------------------------------------------------------------------------
def _matmul_shift_sigmoid_kernel(x_ref, w_ref, shift_ref, o_ref):
    """out = sigmoid(x @ w + shift) — fused 1x1 conv(s) + BN + Sigmoid.

    BN scale is already folded into w; shift carries conv-bias + BN beta/mean.
    """
    acc = jnp.dot(x_ref[...], w_ref[...], preferred_element_type=jnp.float32)
    o_ref[...] = _sigmoid(acc + shift_ref[...]).astype(o_ref.dtype)


def _convkxk_shift_sigmoid_kernel(x_ref, w_ref, shift_ref, o_ref):
    """k x k conv (stride 1) + BN-shift + sigmoid on one padded NHWC image.

    x_ref:     (1, H+k-1, W+k-1, Cin)   zero-padded input
    w_ref:     (k*k, Cin, Cout)         BN-scale already folded in
    shift_ref: (1, Cout)
    o_ref:     (1, H, W, Cout)
    The k*k taps are shifted in-VMEM views — no im2col intermediate in HBM.
    """
    _, hp, wp, cin = x_ref.shape
    _, h, w, cout = o_ref.shape
    k = hp - h + 1
    x = x_ref[0]                                   # (Hp, Wp, Cin)
    acc = jnp.zeros((h * w, cout), jnp.float32)
    for i in range(k):
        for j in range(k):
            tap = x[i:i + h, j:j + w, :].reshape(h * w, cin)
            acc = acc + jnp.dot(tap, w_ref[i * k + j],
                                preferred_element_type=jnp.float32)
    y = _sigmoid(acc + shift_ref[...])
    o_ref[0] = y.reshape(h, w, cout).astype(o_ref.dtype)


def _maxpool3x3_conv1x1_kernel(x_ref, w_ref, shift_ref, o_ref):
    """Fused 3x3/stride-1 max-pool (pad 1, -inf) + 1x1 conv + BN-shift + sigmoid.

    x_ref:     (1, H+2, W+2, Cin)  padded with -inf
    w_ref:     (Cin, Cout)
    shift_ref: (1, Cout)
    o_ref:     (1, H, W, Cout)
    """
    _, h, w, cout = o_ref.shape
    cin = x_ref.shape[-1]
    x = x_ref[0]                                   # (H+2, W+2, Cin)
    m = x[0:h, 0:w, :]
    for i in range(3):
        for j in range(3):
            if i == 0 and j == 0:
                continue
            m = jnp.maximum(m, x[i:i + h, j:j + w, :])
    y = jnp.dot(m.reshape(h * w, cin), w_ref[...],
                preferred_element_type=jnp.float32) + shift_ref[...]
    o_ref[0] = _sigmoid(y).reshape(h, w, cout).astype(o_ref.dtype)


# ----------------------------------------------------------------------------
# pallas_call wrappers
# ----------------------------------------------------------------------------
def _choose_block_m(m, target=512):
    """Large M tile (amortize per-step overhead) but keep >= 2 grid steps so
    both TensorCores of a v7x chip get work."""
    bm = min(target, m)
    if m >= 16 and _cdiv(m, bm) < 2:
        bm = min(((_cdiv(m, 2) + 7) // 8) * 8, m)
    return max(int(bm), 1)


def matmul_shift_sigmoid(x2d, w2d, shift):
    """x2d: (M, K), w2d: (K, Cout), shift: (1, Cout) -> sigmoid(x@w + shift)."""
    m, k = x2d.shape
    cout = w2d.shape[1]
    bm = _choose_block_m(m)
    grid = (_cdiv(m, bm),)
    return pl.pallas_call(
        _matmul_shift_sigmoid_kernel,
        out_shape=jax.ShapeDtypeStruct((m, cout), jnp.float32),
        grid_spec=pltpu.PrefetchScalarGridSpec(
            num_scalar_prefetch=0,
            grid=grid,
            in_specs=[
                pl.BlockSpec((bm, k), lambda i: (i, 0)),
                pl.BlockSpec((k, cout), lambda i: (0, 0)),
                pl.BlockSpec((1, cout), lambda i: (0, 0)),
            ],
            out_specs=pl.BlockSpec((bm, cout), lambda i: (i, 0)),
        ),
        compiler_params=pltpu.CompilerParams(dimension_semantics=("parallel",)),
    )(x2d, w2d, shift)


def convkxk_shift_sigmoid(x_nhwc, w3d, shift, *, k, pad):
    """k x k 'same' conv + BN-shift + sigmoid; grid over batch images."""
    n, h, w, cin = x_nhwc.shape
    cout = w3d.shape[-1]
    xp = jnp.pad(x_nhwc, ((0, 0), (pad, pad), (pad, pad), (0, 0)))
    hp, wp = h + 2 * pad, w + 2 * pad
    return pl.pallas_call(
        _convkxk_shift_sigmoid_kernel,
        out_shape=jax.ShapeDtypeStruct((n, h, w, cout), jnp.float32),
        grid_spec=pltpu.PrefetchScalarGridSpec(
            num_scalar_prefetch=0,
            grid=(n,),
            in_specs=[
                pl.BlockSpec((1, hp, wp, cin), lambda b: (b, 0, 0, 0)),
                pl.BlockSpec((k * k, cin, cout), lambda b: (0, 0, 0)),
                pl.BlockSpec((1, cout), lambda b: (0, 0)),
            ],
            out_specs=pl.BlockSpec((1, h, w, cout), lambda b: (b, 0, 0, 0)),
        ),
        compiler_params=pltpu.CompilerParams(dimension_semantics=("parallel",)),
    )(xp, w3d, shift)


def maxpool3x3_conv1x1(x_nhwc, w2d, shift):
    """Fused branch-4: 3x3/stride-1 max-pool (pad 1) + 1x1 conv + BN + sigmoid."""
    n, h, w, cin = x_nhwc.shape
    cout = w2d.shape[1]
    xp = jnp.pad(x_nhwc, ((0, 0), (1, 1), (1, 1), (0, 0)),
                 constant_values=-jnp.inf)   # PyTorch MaxPool2d pads with -inf
    return pl.pallas_call(
        _maxpool3x3_conv1x1_kernel,
        out_shape=jax.ShapeDtypeStruct((n, h, w, cout), jnp.float32),
        grid_spec=pltpu.PrefetchScalarGridSpec(
            num_scalar_prefetch=0,
            grid=(n,),
            in_specs=[
                pl.BlockSpec((1, h + 2, w + 2, cin), lambda b: (b, 0, 0, 0)),
                pl.BlockSpec((cin, cout), lambda b: (0, 0)),
                pl.BlockSpec((1, cout), lambda b: (0, 0)),
            ],
            out_specs=pl.BlockSpec((1, h, w, cout), lambda b: (b, 0, 0, 0)),
        ),
        compiler_params=pltpu.CompilerParams(dimension_semantics=("parallel",)),
    )(xp, w2d, shift)


# ----------------------------------------------------------------------------
# Host-side weight prep: fold BN scale into weights, keep only the shift
# ----------------------------------------------------------------------------
def _fold_scale_shift(conv_bias, bn):
    gamma, beta, mean, var = bn
    s = gamma * jax.lax.rsqrt(var + _BN_EPS)
    shift = (conv_bias - mean) * s + beta
    return s.astype(jnp.float32), shift.astype(jnp.float32)


def _prep_1x1(w, b, bn):
    # w: (Cout, Cin, 1, 1) -> (Cin, Cout) with BN scale folded in.
    s, shift = _fold_scale_shift(b, bn)
    w2 = jnp.transpose(w[:, :, 0, 0], (1, 0)).astype(jnp.float32) * s[None, :]
    return w2, shift.reshape(1, -1)


def _prep_kxk(w, b, bn):
    # w: (Cout, Cin, k, k) -> (k*k, Cin, Cout) with BN scale folded in.
    cout, cin, k, _ = w.shape
    s, shift = _fold_scale_shift(b, bn)
    w2 = jnp.transpose(w, (2, 3, 1, 0)).reshape(k * k, cin, cout)
    w2 = w2.astype(jnp.float32) * s[None, None, :]
    return w2, shift.reshape(1, -1)


# ----------------------------------------------------------------------------
# Forward pass
# ----------------------------------------------------------------------------
@jax.jit
def inception3b_forward(x_nchw, params):
    x = jnp.transpose(x_nchw, (0, 2, 3, 1)).astype(jnp.float32)   # NHWC
    n, h, w, cin = x.shape
    m = n * h * w
    x_flat = x.reshape(m, cin)

    # --- fused 1x1 convs that read x: branch1, branch2-reduce, branch3-reduce
    w1, sh1 = _prep_1x1(params["w1"], params["b1"], params["bn1"])
    w2a, sh2a = _prep_1x1(params["w2a"], params["b2a"], params["bn2a"])
    w3a, sh3a = _prep_1x1(params["w3a"], params["b3a"], params["bn3a"])
    c1, c2a, c3a = w1.shape[1], w2a.shape[1], w3a.shape[1]
    w_cat = jnp.concatenate([w1, w2a, w3a], axis=1)
    sh_cat = jnp.concatenate([sh1, sh2a, sh3a], axis=1)
    fused = matmul_shift_sigmoid(x_flat, w_cat, sh_cat)
    b1 = fused[:, :c1].reshape(n, h, w, c1)
    b2a = fused[:, c1:c1 + c2a].reshape(n, h, w, c2a)
    b3a = fused[:, c1 + c2a:c1 + c2a + c3a].reshape(n, h, w, c3a)

    # --- branch 2: 3x3 conv (pad 1), in-kernel tap loop (no HBM im2col)
    w2b, sh2b = _prep_kxk(params["w2b"], params["b2b"], params["bn2b"])
    b2 = convkxk_shift_sigmoid(b2a, w2b, sh2b, k=3, pad=1)

    # --- branch 3: 5x5 conv (pad 2)
    w3b, sh3b = _prep_kxk(params["w3b"], params["b3b"], params["bn3b"])
    b3 = convkxk_shift_sigmoid(b3a, w3b, sh3b, k=5, pad=2)

    # --- branch 4: fused 3x3 max-pool + 1x1 conv
    w4, sh4 = _prep_1x1(params["w4"], params["b4"], params["bn4"])
    b4 = maxpool3x3_conv1x1(x, w4, sh4)

    y = jnp.concatenate([b1, b2, b3, b4], axis=-1)
    return jnp.transpose(y, (0, 3, 1, 2))             # back to NCHW


# ----------------------------------------------------------------------------
# Deterministic parameter construction
# ----------------------------------------------------------------------------
def _make_params(key, in1_1, out1_1, out2_1, out2_2, out3_1, out3_2, out4_1):
    ks = iter(jax.random.split(key, 64))

    def conv_w(cout, cin, k):
        return 0.1 * jax.random.normal(next(ks), (cout, cin, k, k), jnp.float32)

    def conv_b(cout):
        return 0.05 * jax.random.normal(next(ks), (cout,), jnp.float32)

    def bn(cout):
        gamma = 1.0 + 0.1 * jax.random.normal(next(ks), (cout,), jnp.float32)
        beta = 0.1 * jax.random.normal(next(ks), (cout,), jnp.float32)
        mean = 0.1 * jax.random.normal(next(ks), (cout,), jnp.float32)
        var = 0.5 + jnp.abs(jax.random.normal(next(ks), (cout,), jnp.float32))
        return (gamma, beta, mean, var)

    return {
        "w1": conv_w(out1_1, in1_1, 1), "b1": conv_b(out1_1), "bn1": bn(out1_1),
        "w2a": conv_w(out2_1, in1_1, 1), "b2a": conv_b(out2_1), "bn2a": bn(out2_1),
        "w2b": conv_w(out2_2, out2_1, 3), "b2b": conv_b(out2_2), "bn2b": bn(out2_2),
        "w3a": conv_w(out3_1, in1_1, 1), "b3a": conv_b(out3_1), "bn3a": bn(out3_1),
        "w3b": conv_w(out3_2, out3_1, 5), "b3b": conv_b(out3_2), "bn3b": bn(out3_2),
        "w4": conv_w(out4_1, in1_1, 1), "b4": conv_b(out4_1), "bn4": bn(out4_1),
    }


if __name__ == "__main__":
    key = jax.random.PRNGKey(0)
    k_x, k_p = jax.random.split(key)

    # Small shapes: batch=2, in_channels=4, spatial=16x16.
    N, Cin, H, W = 2, 4, 16, 16
    out1_1, out2_1, out2_2, out3_1, out3_2, out4_1 = 8, 4, 8, 4, 8, 8

    x = jax.random.normal(k_x, (N, Cin, H, W), jnp.float32)
    params = _make_params(k_p, Cin, out1_1, out2_1, out2_2, out3_1, out3_2, out4_1)

    y = inception3b_forward(x, params)
    jax.block_until_ready(y)

    expected_c = out1_1 + out2_2 + out3_2 + out4_1
    assert y.shape == (N, expected_c, H, W), y.shape
    assert bool(jnp.all(jnp.isfinite(y)))
    print("KERNEL_OK")
</pallas_src>

<mosaic_0001>
module attributes {stable_mosaic.version = 11 : i64} {
  func.func @_matmul_shift_sigmoid_kernel(%arg0: i32, %arg1: memref<256x4xf32, #tpu.memory_space<vmem>>, %arg2: memref<4x16xf32, #tpu.memory_space<vmem>>, %arg3: memref<1x16xf32, #tpu.memory_space<vmem>>, %arg4: memref<256x16xf32, #tpu.memory_space<vmem>>) attributes {dimension_semantics = [#tpu.dimension_semantics<parallel>], iteration_bounds = array<i64: 2>, scalar_prefetch = 0 : i64, scratch_operands = 0 : i64, tpu.core_type = #tpu.core_type<tc>, window_params = [{transform_indices = @transform_0, window_bounds = array<i64: 256, 4>}, {pipeline_mode = #tpu.pipeline_mode<synchronous>, transform_indices = @transform_1, window_bounds = array<i64: 4, 16>}, {pipeline_mode = #tpu.pipeline_mode<synchronous>, transform_indices = @transform_2, window_bounds = array<i64: 1, 16>}, {transform_indices = @transform_3, window_bounds = array<i64: 256, 16>}]} {
    %c0 = arith.constant 0 : index
    %c0_0 = arith.constant 0 : index
    %0 = vector.load %arg1[%c0, %c0_0] : memref<256x4xf32, #tpu.memory_space<vmem>>, vector<256x4xf32>
    %c0_1 = arith.constant 0 : index
    %c0_2 = arith.constant 0 : index
    %1 = vector.load %arg2[%c0_1, %c0_2] : memref<4x16xf32, #tpu.memory_space<vmem>>, vector<4x16xf32>
    %cst = arith.constant dense<0.000000e+00> : vector<256x16xf32>
    %2 = tpu.matmul %0, %1, %cst {dimension_numbers = #tpu.dot_dimension_numbers<[1], [0], [0], [1], [0, 0, 1, 1], [], []>} : vector<256x4xf32>, vector<4x16xf32>, vector<256x16xf32> -> vector<256x16xf32>
    %c0_3 = arith.constant 0 : index
    %c0_4 = arith.constant 0 : index
    %3 = vector.load %arg3[%c0_3, %c0_4] : memref<1x16xf32, #tpu.memory_space<vmem>>, vector<1x16xf32>
    %4 = vector.broadcast %3 : vector<1x16xf32> to vector<256x16xf32>
    %5 = arith.addf %2, %4 : vector<256x16xf32>
    %cst_5 = arith.constant 0.000000e+00 : f32
    %6 = vector.broadcast %cst_5 : f32 to vector<256x16xf32>
    %7 = arith.subf %6, %5 : vector<256x16xf32>
    %8 = math.exp %7 : vector<256x16xf32>
    %cst_6 = arith.constant 1.000000e+00 : f32
    %9 = vector.broadcast %cst_6 : f32 to vector<256x16xf32>
    %10 = arith.addf %9, %8 : vector<256x16xf32>
    %11 = tpu.reciprocal %10 {approx = true} : vector<256x16xf32> -> vector<256x16xf32>
    %c0_7 = arith.constant 0 : index
    %c0_8 = arith.constant 0 : index
    %12 = vector.load %arg4[%c0_7, %c0_8] : memref<256x16xf32, #tpu.memory_space<vmem>>, vector<256x16xf32>
    tpu.vector_store %arg4[%c0_7, %c0_8], %11 {strides = array<i32>} : memref<256x16xf32, #tpu.memory_space<vmem>>, vector<256x16xf32>,
    return
  }
  func.func @transform_0(%arg0: i32) -> (i32, i32) {
    %c0_i32 = arith.constant 0 : i32
    %c0_i32_0 = arith.constant 0 : i32
    return %arg0, %c0_i32 : i32, i32
  }
  func.func @transform_1(%arg0: i32) -> (i32, i32) {
    %c0_i32 = arith.constant 0 : i32
    %c0_i32_0 = arith.constant 0 : i32
    %c0_i32_1 = arith.constant 0 : i32
    return %c0_i32, %c0_i32_0 : i32, i32
  }
  func.func @transform_2(%arg0: i32) -> (i32, i32) {
    %c0_i32 = arith.constant 0 : i32
    %c0_i32_0 = arith.constant 0 : i32
    %c0_i32_1 = arith.constant 0 : i32
    return %c0_i32, %c0_i32_0 : i32, i32
  }
  func.func @transform_3(%arg0: i32) -> (i32, i32) {
    %c0_i32 = arith.constant 0 : i32
    %c0_i32_0 = arith.constant 0 : i32
    return %arg0, %c0_i32 : i32, i32
  }
}

module attributes {stable_mosaic.version = 11 : i64} {
  func.func @_maxpool3x3_conv1x1_kernel(%arg0: i32, %arg1: memref<1x18x18x4xf32, #tpu.memory_space<vmem>>, %arg2: memref<4x8xf32, #tpu.memory_space<vmem>>, %arg3: memref<1x8xf32, #tpu.memory_space<vmem>>, %arg4: memref<1x16x16x8xf32, #tpu.memory_space<vmem>>) attributes {dimension_semantics = [#tpu.dimension_semantics<parallel>], iteration_bounds = array<i64: 2>, scalar_prefetch = 0 : i64, scratch_operands = 0 : i64, tpu.core_type = #tpu.core_type<tc>, window_params = [{transform_indices = @transform_0, window_bounds = array<i64: 1, 18, 18, 4>}, {pipeline_mode = #tpu.pipeline_mode<synchronous>, transform_indices = @transform_1, window_bounds = array<i64: 4, 8>}, {pipeline_mode = #tpu.pipeline_mode<synchronous>, transform_indices = @transform_2, window_bounds = array<i64: 1, 8>}, {transform_indices = @transform_3, window_bounds = array<i64: 1, 16, 16, 8>}]} {
    %c0 = arith.constant 0 : index
    %c0_0 = arith.constant 0 : index
    %c0_1 = arith.constant 0 : index
    %c0_2 = arith.constant 0 : index
    %0 = vector.load %arg1[%c0, %c0_0, %c0_1, %c0_2] : memref<1x18x18x4xf32, #tpu.memory_space<vmem>>, vector<1x18x18x4xf32>
    %1 = vector.shape_cast %0 : vector<1x18x18x4xf32> to vector<18x18x4xf32>
    %2 = vector.extract_strided_slice %1 {offsets = [0, 0, 0], sizes = [16, 16, 4], strides = [1, 1, 1]} : vector<18x18x4xf32> to vector<16x16x4xf32>
    %3 = vector.extract_strided_slice %1 {offsets = [0, 1, 0], sizes = [16, 16, 4], strides = [1, 1, 1]} : vector<18x18x4xf32> to vector<16x16x4xf32>
    %4 = arith.maximumf %2, %3 : vector<16x16x4xf32>
    %5 = vector.extract_strided_slice %1 {offsets = [0, 2, 0], sizes = [16, 16, 4], strides = [1, 1, 1]} : vector<18x18x4xf32> to vector<16x16x4xf32>
    %6 = arith.maximumf %4, %5 : vector<16x16x4xf32>
    %7 = vector.extract_strided_slice %1 {offsets = [1, 0, 0], sizes = [16, 16, 4], strides = [1, 1, 1]} : vector<18x18x4xf32> to vector<16x16x4xf32>
    %8 = arith.maximumf %6, %7 : vector<16x16x4xf32>
    %9 = vector.extract_strided_slice %1 {offsets = [1, 1, 0], sizes = [16, 16, 4], strides = [1, 1, 1]} : vector<18x18x4xf32> to vector<16x16x4xf32>
    %10 = arith.maximumf %8, %9 : vector<16x16x4xf32>
    %11 = vector.extract_strided_slice %1 {offsets = [1, 2, 0], sizes = [16, 16, 4], strides = [1, 1, 1]} : vector<18x18x4xf32> to vector<16x16x4xf32>
    %12 = arith.maximumf %10, %11 : vector<16x16x4xf32>
    %13 = vector.extract_strided_slice %1 {offsets = [2, 0, 0], sizes = [16, 16, 4], strides = [1, 1, 1]} : vector<18x18x4xf32> to vector<16x16x4xf32>
    %14 = arith.maximumf %12, %13 : vector<16x16x4xf32>
    %15 = vector.extract_strided_slice %1 {offsets = [2, 1, 0], sizes = [16, 16, 4], strides = [1, 1, 1]} : vector<18x18x4xf32> to vector<16x16x4xf32>
    %16 = arith.maximumf %14, %15 : vector<16x16x4xf32>
    %17 = vector.extract_strided_slice %1 {offsets = [2, 2, 0], sizes = [16, 16, 4], strides = [1, 1, 1]} : vector<18x18x4xf32> to vector<16x16x4xf32>
    %18 = arith.maximumf %16, %17 : vector<16x16x4xf32>
    %19 = vector.shape_cast %18 : vector<16x16x4xf32> to vector<256x4xf32>
    %c0_3 = arith.constant 0 : index
    %c0_4 = arith.constant 0 : index
    %20 = vector.load %arg2[%c0_3, %c0_4] : memref<4x8xf32, #tpu.memory_space<vmem>>, vector<4x8xf32>
    %cst = arith.constant dense<0.000000e+00> : vector<256x8xf32>
    %21 = tpu.matmul %19, %20, %cst {dimension_numbers = #tpu.dot_dimension_numbers<[1], [0], [0], [1], [0, 0, 1, 1], [], []>} : vector<256x4xf32>, vector<4x8xf32>, vector<256x8xf32> -> vector<256x8xf32>
    %c0_5 = arith.constant 0 : index
    %c0_6 = arith.constant 0 : index
    %22 = vector.load %arg3[%c0_5, %c0_6] : memref<1x8xf32, #tpu.memory_space<vmem>>, vector<1x8xf32>
    %23 = vector.broadcast %22 : vector<1x8xf32> to vector<256x8xf32>
    %24 = arith.addf %21, %23 : vector<256x8xf32>
    %cst_7 = arith.constant 0.000000e+00 : f32
    %25 = vector.broadcast %cst_7 : f32 to vector<256x8xf32>
    %26 = arith.subf %25, %24 : vector<256x8xf32>
    %27 = math.exp %26 : vector<256x8xf32>
    %cst_8 = arith.constant 1.000000e+00 : f32
    %28 = vector.broadcast %cst_8 : f32 to vector<256x8xf32>
    %29 = arith.addf %28, %27 : vector<256x8xf32>
    %30 = tpu.reciprocal %29 {approx = true} : vector<256x8xf32> -> vector<256x8xf32>
    %31 = vector.shape_cast %30 : vector<256x8xf32> to vector<16x16x8xf32>
    %c0_9 = arith.constant 0 : index
    %c0_10 = arith.constant 0 : index
    %c0_11 = arith.constant 0 : index
    %c0_12 = arith.constant 0 : index
    %32 = vector.load %arg4[%c0_9, %c0_10, %c0_11, %c0_12] : memref<1x16x16x8xf32, #tpu.memory_space<vmem>>, vector<1x16x16x8xf32>
    %33 = vector.shape_cast %32 : vector<1x16x16x8xf32> to vector<16x16x8xf32>
    %34 = vector.shape_cast %31 : vector<16x16x8xf32> to vector<1x16x16x8xf32>
    tpu.vector_store %arg4[%c0_9, %c0_10, %c0_11, %c0_12], %34 {strides = array<i32>} : memref<1x16x16x8xf32, #tpu.memory_space<vmem>>, vector<1x16x16x8xf32>,
    return
  }
  func.func @transform_0(%arg0: i32) -> (i32, i32, i32, i32) {
    %c0_i32 = arith.constant 0 : i32
    %c0_i32_0 = arith.constant 0 : i32
    %c0_i32_1 = arith.constant 0 : i32
    %c0_i32_2 = arith.constant 0 : i32
    return %arg0, %c0_i32, %c0_i32_0, %c0_i32_1 : i32, i32, i32, i32
  }
  func.func @transform_1(%arg0: i32) -> (i32, i32) {
    %c0_i32 = arith.constant 0 : i32
    %c0_i32_0 = arith.constant 0 : i32
    %c0_i32_1 = arith.constant 0 : i32
    return %c0_i32, %c0_i32_0 : i32, i32
  }
  func.func @transform_2(%arg0: i32) -> (i32, i32) {
    %c0_i32 = arith.constant 0 : i32
    %c0_i32_0 = arith.constant 0 : i32
    %c0_i32_1 = arith.constant 0 : i32
    return %c0_i32, %c0_i32_0 : i32, i32
  }
  func.func @transform_3(%arg0: i32) -> (i32, i32, i32, i32) {
    %c0_i32 = arith.constant 0 : i32
    %c0_i32_0 = arith.constant 0 : i32
    %c0_i32_1 = arith.constant 0 : i32
    %c0_i32_2 = arith.constant 0 : i32
    return %arg0, %c0_i32, %c0_i32_0, %c0_i32_1 : i32, i32, i32, i32
  }
}

module attributes {stable_mosaic.version = 11 : i64} {
  func.func @_convkxk_shift_sigmoid_kernel(%arg0: i32, %arg1: memref<1x18x18x4xf32, #tpu.memory_space<vmem>>, %arg2: memref<9x4x8xf32, #tpu.memory_space<vmem>>, %arg3: memref<1x8xf32, #tpu.memory_space<vmem>>, %arg4: memref<1x16x16x8xf32, #tpu.memory_space<vmem>>) attributes {dimension_semantics = [#tpu.dimension_semantics<parallel>], iteration_bounds = array<i64: 2>, scalar_prefetch = 0 : i64, scratch_operands = 0 : i64, tpu.core_type = #tpu.core_type<tc>, window_params = [{transform_indices = @transform_0, window_bounds = array<i64: 1, 18, 18, 4>}, {pipeline_mode = #tpu.pipeline_mode<synchronous>, transform_indices = @transform_1, window_bounds = array<i64: 9, 4, 8>}, {pipeline_mode = #tpu.pipeline_mode<synchronous>, transform_indices = @transform_2, window_bounds = array<i64: 1, 8>}, {transform_indices = @transform_3, window_bounds = array<i64: 1, 16, 16, 8>}]} {
    %c0 = arith.constant 0 : index
    %c0_0 = arith.constant 0 : index
    %c0_1 = arith.constant 0 : index
    %c0_2 = arith.constant 0 : index
    %0 = vector.load %arg1[%c0, %c0_0, %c0_1, %c0_2] : memref<1x18x18x4xf32, #tpu.memory_space<vmem>>, vector<1x18x18x4xf32>
    %1 = vector.shape_cast %0 : vector<1x18x18x4xf32> to vector<18x18x4xf32>
    %cst = arith.constant 0.000000e+00 : f32
    %2 = vector.broadcast %cst : f32 to vector<256x8xf32>
    %3 = vector.extract_strided_slice %1 {offsets = [0, 0, 0], sizes = [16, 16, 4], strides = [1, 1, 1]} : vector<18x18x4xf32> to vector<16x16x4xf32>
    %4 = vector.shape_cast %3 : vector<16x16x4xf32> to vector<256x4xf32>
    %c0_3 = arith.constant 0 : index
    %c0_4 = arith.constant 0 : index
    %c0_5 = arith.constant 0 : index
    %5 = vector.load %arg2[%c0_3, %c0_4, %c0_5] : memref<9x4x8xf32, #tpu.memory_space<vmem>>, vector<1x4x8xf32>
    %6 = vector.shape_cast %5 : vector<1x4x8xf32> to vector<4x8xf32>
    %cst_6 = arith.constant dense<0.000000e+00> : vector<256x8xf32>
    %7 = tpu.matmul %4, %6, %cst_6 {dimension_numbers = #tpu.dot_dimension_numbers<[1], [0], [0], [1], [0, 0, 1, 1], [], []>} : vector<256x4xf32>, vector<4x8xf32>, vector<256x8xf32> -> vector<256x8xf32>
    %8 = arith.addf %2, %7 : vector<256x8xf32>
    %9 = vector.extract_strided_slice %1 {offsets = [0, 1, 0], sizes = [16, 16, 4], strides = [1, 1, 1]} : vector<18x18x4xf32> to vector<16x16x4xf32>
    %10 = vector.shape_cast %9 : vector<16x16x4xf32> to vector<256x4xf32>
    %c1 = arith.constant 1 : index
    %c0_7 = arith.constant 0 : index
    %c0_8 = arith.constant 0 : index
    %11 = vector.load %arg2[%c1, %c0_7, %c0_8] : memref<9x4x8xf32, #tpu.memory_space<vmem>>, vector<1x4x8xf32>
    %12 = vector.shape_cast %11 : vector<1x4x8xf32> to vector<4x8xf32>
    %cst_9 = arith.constant dense<0.000000e+00> : vector<256x8xf32>
    %13 = tpu.matmul %10, %12, %cst_9 {dimension_numbers = #tpu.dot_dimension_numbers<[1], [0], [0], [1], [0, 0, 1, 1], [], []>} : vector<256x4xf32>, vector<4x8xf32>, vector<256x8xf32> -> vector<256x8xf32>
    %14 = arith.addf %8, %13 : vector<256x8xf32>
    %15 = vector.extract_strided_slice %1 {offsets = [0, 2, 0], sizes = [16, 16, 4], strides = [1, 1, 1]} : vector<18x18x4xf32> to vector<16x16x4xf32>
    %16 = vector.shape_cast %15 : vector<16x16x4xf32> to vector<256x4xf32>
    %c2 = arith.constant 2 : index
    %c0_10 = arith.constant 0 : index
    %c0_11 = arith.constant 0 : index
    %17 = vector.load %arg2[%c2, %c0_10, %c0_11] : memref<9x4x8xf32, #tpu.memory_space<vmem>>, vector<1x4x8xf32>
    %18 = vector.shape_cast %17 : vector<1x4x8xf32> to vector<4x8xf32>
    %cst_12 = arith.constant dense<0.000000e+00> : vector<256x8xf32>
    %19 = tpu.matmul %16, %18, %cst_12 {dimension_numbers = #tpu.dot_dimension_numbers<[1], [0], [0], [1], [0, 0, 1, 1], [], []>} : vector<256x4xf32>, vector<4x8xf32>, vector<256x8xf32> -> vector<256x8xf32>
    %20 = arith.addf %14, %19 : vector<256x8xf32>
    %21 = vector.extract_strided_slice %1 {offsets = [1, 0, 0], sizes = [16, 16, 4], strides = [1, 1, 1]} : vector<18x18x4xf32> to vector<16x16x4xf32>
    %22 = vector.shape_cast %21 : vector<16x16x4xf32> to vector<256x4xf32>
    %c3 = arith.constant 3 : index
    %c0_13 = arith.constant 0 : index
    %c0_14 = arith.constant 0 : index
    %23 = vector.load %arg2[%c3, %c0_13, %c0_14] : memref<9x4x8xf32, #tpu.memory_space<vmem>>, vector<1x4x8xf32>
    %24 = vector.shape_cast %23 : vector<1x4x8xf32> to vector<4x8xf32>
    %cst_15 = arith.constant dense<0.000000e+00> : vector<256x8xf32>
    %25 = tpu.matmul %22, %24, %cst_15 {dimension_numbers = #tpu.dot_dimension_numbers<[1], [0], [0], [1], [0, 0, 1, 1], [], []>} : vector<256x4xf32>, vector<4x8xf32>, vector<256x8xf32> -> vector<256x8xf32>
    %26 = arith.addf %20, %25 : vector<256x8xf32>
    %27 = vector.extract_strided_slice %1 {offsets = [1, 1, 0], sizes = [16, 16, 4], strides = [1, 1, 1]} : vector<18x18x4xf32> to vector<16x16x4xf32>
    %28 = vector.shape_cast %27 : vector<16x16x4xf32> to vector<256x4xf32>
    %c4 = arith.constant 4 : index
    %c0_16 = arith.constant 0 : index
    %c0_17 = arith.constant 0 : index
    %29 = vector.load %arg2[%c4, %c0_16, %c0_17] : memref<9x4x8xf32, #tpu.memory_space<vmem>>, vector<1x4x8xf32>
    %30 = vector.shape_cast %29 : vector<1x4x8xf32> to vector<4x8xf32>
    %cst_18 = arith.constant dense<0.000000e+00> : vector<256x8xf32>
    %31 = tpu.matmul %28, %30, %cst_18 {dimension_numbers = #tpu.dot_dimension_numbers<[1], [0], [0], [1], [0, 0, 1, 1], [], []>} : vector<256x4xf32>, vector<4x8xf32>, vector<256x8xf32> -> vector<256x8xf32>
    %32 = arith.addf %26, %31 : vector<256x8xf32>
    %33 = vector.extract_strided_slice %1 {offsets = [1, 2, 0], sizes = [16, 16, 4], strides = [1, 1, 1]} : vector<18x18x4xf32> to vector<16x16x4xf32>
    %34 = vector.shape_cast %33 : vector<16x16x4xf32> to vector<256x4xf32>
    %c5 = arith.constant 5 : index
    %c0_19 = arith.constant 0 : index
    %c0_20 = arith.constant 0 : index
    %35 = vector.load %arg2[%c5, %c0_19, %c0_20] : memref<9x4x8xf32, #tpu.memory_space<vmem>>, vector<1x4x8xf32>
    %36 = vector.shape_cast %35 : vector<1x4x8xf32> to vector<4x8xf32>
    %cst_21 = arith.constant dense<0.000000e+00> : vector<256x8xf32>
    %37 = tpu.matmul %34, %36, %cst_21 {dimension_numbers = #tpu.dot_dimension_numbers<[1], [0], [0], [1], [0, 0, 1, 1], [], []>} : vector<256x4xf32>, vector<4x8xf32>, vector<256x8xf32> -> vector<256x8xf32>
    %38 = arith.addf %32, %37 : vector<256x8xf32>
    %39 = vector.extract_strided_slice %1 {offsets = [2, 0, 0], sizes = [16, 16, 4], strides = [1, 1, 1]} : vector<18x18x4xf32> to vector<16x16x4xf32>
    %40 = vector.shape_cast %39 : vector<16x16x4xf32> to vector<256x4xf32>
    %c6 = arith.constant 6 : index
    %c0_22 = arith.constant 0 : index
    %c0_23 = arith.constant 0 : index
    %41 = vector.load %arg2[%c6, %c0_22, %c0_23] : memref<9x4x8xf32, #tpu.memory_space<vmem>>, vector<1x4x8xf32>
    %42 = vector.shape_cast %41 : vector<1x4x8xf32> to vector<4x8xf32>
    %cst_24 = arith.constant dense<0.000000e+00> : vector<256x8xf32>
    %43 = tpu.matmul %40, %42, %cst_24 {dimension_numbers = #tpu.dot_dimension_numbers<[1], [0], [0], [1], [0, 0, 1, 1], [], []>} : vector<256x4xf32>, vector<4x8xf32>, vector<256x8xf32> -> vector<256x8xf32>
    %44 = arith.addf %38, %43 : vector<256x8xf32>
    %45 = vector.extract_strided_slice %1 {offsets = [2, 1, 0], sizes = [16, 16, 4], strides = [1, 1, 1]} : vector<18x18x4xf32> to vector<16x16x4xf32>
    %46 = vector.shape_cast %45 : vector<16x16x4xf32> to vector<256x4xf32>
    %c7 = arith.constant 7 : index
    %c0_25 = arith.constant 0 : index
    %c0_26 = arith.constant 0 : index
    %47 = vector.load %arg2[%c7, %c0_25, %c0_26] : memref<9x4x8xf32, #tpu.memory_space<vmem>>, vector<1x4x8xf32>
    %48 = vector.shape_cast %47 : vector<1x4x8xf32> to vector<4x8xf32>
    %cst_27 = arith.constant dense<0.000000e+00> : vector<256x8xf32>
    %49 = tpu.matmul %46, %48, %cst_27 {dimension_numbers = #tpu.dot_dimension_numbers<[1], [0], [0], [1], [0, 0, 1, 1], [], []>} : vector<256x4xf32>, vector<4x8xf32>, vector<256x8xf32> -> vector<256x8xf32>
    %50 = arith.addf %44, %49 : vector<256x8xf32>
    %51 = vector.extract_strided_slice %1 {offsets = [2, 2, 0], sizes = [16, 16, 4], strides = [1, 1, 1]} : vector<18x18x4xf32> to vector<16x16x4xf32>
    %52 = vector.shape_cast %51 : vector<16x16x4xf32> to vector<256x4xf32>
    %c8 = arith.constant 8 : index
    %c0_28 = arith.constant 0 : index
    %c0_29 = arith.constant 0 : index
    %53 = vector.load %arg2[%c8, %c0_28, %c0_29] : memref<9x4x8xf32, #tpu.memory_space<vmem>>, vector<1x4x8xf32>
    %54 = vector.shape_cast %53 : vector<1x4x8xf32> to vector<4x8xf32>
    %cst_30 = arith.constant dense<0.000000e+00> : vector<256x8xf32>
    %55 = tpu.matmul %52, %54, %cst_30 {dimension_numbers = #tpu.dot_dimension_numbers<[1], [0], [0], [1], [0, 0, 1, 1], [], []>} : vector<256x4xf32>, vector<4x8xf32>, vector<256x8xf32> -> vector<256x8xf32>
    %56 = arith.addf %50, %55 : vector<256x8xf32>
    %c0_31 = arith.constant 0 : index
    %c0_32 = arith.constant 0 : index
    %57 = vector.load %arg3[%c0_31, %c0_32] : memref<1x8xf32, #tpu.memory_space<vmem>>, vector<1x8xf32>
    %58 = vector.broadcast %57 : vector<1x8xf32> to vector<256x8xf32>
    %59 = arith.addf %56, %58 : vector<256x8xf32>
    %cst_33 = arith.constant 0.000000e+00 : f32
    %60 = vector.broadcast %cst_33 : f32 to vector<256x8xf32>
    %61 = arith.subf %60, %59 : vector<256x8xf32>
    %62 = math.exp %61 : vector<256x8xf32>
    %cst_34 = arith.constant 1.000000e+00 : f32
    %63 = vector.broadcast %cst_34 : f32 to vector<256x8xf32>
    %64 = arith.addf %63, %62 : vector<256x8xf32>
    %65 = tpu.reciprocal %64 {approx = true} : vector<256x8xf32> -> vector<256x8xf32>
    %66 = vector.shape_cast %65 : vector<256x8xf32> to vector<16x16x8xf32>
    %c0_35 = arith.constant 0 : index
    %c0_36 = arith.constant 0 : index
    %c0_37 = arith.constant 0 : index
    %c0_38 = arith.constant 0 : index
    %67 = vector.load %arg4[%c0_35, %c0_36, %c0_37, %c0_38] : memref<1x16x16x8xf32, #tpu.memory_space<vmem>>, vector<1x16x16x8xf32>
    %68 = vector.shape_cast %67 : vector<1x16x16x8xf32> to vector<16x16x8xf32>
    %69 = vector.shape_cast %66 : vector<16x16x8xf32> to vector<1x16x16x8xf32>
    tpu.vector_store %arg4[%c0_35, %c0_36, %c0_37, %c0_38], %69 {strides = array<i32>} : memref<1x16x16x8xf32, #tpu.memory_space<vmem>>, vector<1x16x16x8xf32>,
    return
  }
  func.func @transform_0(%arg0: i32) -> (i32, i32, i32, i32) {
    %c0_i32 = arith.constant 0 : i32
    %c0_i32_0 = arith.constant 0 : i32
    %c0_i32_1 = arith.constant 0 : i32
    %c0_i32_2 = arith.constant 0 : i32
    return %arg0, %c0_i32, %c0_i32_0, %c0_i32_1 : i32, i32, i32, i32
  }
  func.func @transform_1(%arg0: i32) -> (i32, i32, i32) {
    %c0_i32 = arith.constant 0 : i32
    %c0_i32_0 = arith.constant 0 : i32
    %c0_i32_1 = arith.constant 0 : i32
    %c0_i32_2 = arith.constant 0 : i32
    return %c0_i32, %c0_i32_0, %c0_i32_1 : i32, i32, i32
  }
  func.func @transform_2(%arg0: i32) -> (i32, i32) {
    %c0_i32 = arith.constant 0 : i32
    %c0_i32_0 = arith.constant 0 : i32
    %c0_i32_1 = arith.constant 0 : i32
    return %c0_i32, %c0_i32_0 : i32, i32
  }
  func.func @transform_3(%arg0: i32) -> (i32, i32, i32, i32) {
    %c0_i32 = arith.constant 0 : i32
    %c0_i32_0 = arith.constant 0 : i32
    %c0_i32_1 = arith.constant 0 : i32
    %c0_i32_2 = arith.constant 0 : i32
    return %arg0, %c0_i32, %c0_i32_0, %c0_i32_1 : i32, i32, i32, i32
  }
}

module attributes {stable_mosaic.version = 11 : i64} {
  func.func @_convkxk_shift_sigmoid_kernel(%arg0: i32, %arg1: memref<1x20x20x4xf32, #tpu.memory_space<vmem>>, %arg2: memref<25x4x8xf32, #tpu.memory_space<vmem>>, %arg3: memref<1x8xf32, #tpu.memory_space<vmem>>, %arg4: memref<1x16x16x8xf32, #tpu.memory_space<vmem>>) attributes {dimension_semantics = [#tpu.dimension_semantics<parallel>], iteration_bounds = array<i64: 2>, scalar_prefetch = 0 : i64, scratch_operands = 0 : i64, tpu.core_type = #tpu.core_type<tc>, window_params = [{transform_indices = @transform_0, window_bounds = array<i64: 1, 20, 20, 4>}, {pipeline_mode = #tpu.pipeline_mode<synchronous>, transform_indices = @transform_1, window_bounds = array<i64: 25, 4, 8>}, {pipeline_mode = #tpu.pipeline_mode<synchronous>, transform_indices = @transform_2, window_bounds = array<i64: 1, 8>}, {transform_indices = @transform_3, window_bounds = array<i64: 1, 16, 16, 8>}]} {
    %c0 = arith.constant 0 : index
    %c0_0 = arith.constant 0 : index
    %c0_1 = arith.constant 0 : index
    %c0_2 = arith.constant 0 : index
    %0 = vector.load %arg1[%c0, %c0_0, %c0_1, %c0_2] : memref<1x20x20x4xf32, #tpu.memory_space<vmem>>, vector<1x20x20x4xf32>
    %1 = vector.shape_cast %0 : vector<1x20x20x4xf32> to vector<20x20x4xf32>
    %cst = arith.constant 0.000000e+00 : f32
    %2 = vector.broadcast %cst : f32 to vector<256x8xf32>
    %3 = vector.extract_strided_slice %1 {offsets = [0, 0, 0], sizes = [16, 16, 4], strides = [1, 1, 1]} : vector<20x20x4xf32> to vector<16x16x4xf32>
    %4 = vector.shape_cast %3 : vector<16x16x4xf32> to vector<256x4xf32>
    %c0_3 = arith.constant 0 : index
    %c0_4 = arith.constant 0 : index
    %c0_5 = arith.constant 0 : index
    %5 = vector.load %arg2[%c0_3, %c0_4, %c0_5] : memref<25x4x8xf32, #tpu.memory_space<vmem>>, vector<1x4x8xf32>
    %6 = vector.shape_cast %5 : vector<1x4x8xf32> to vector<4x8xf32>
    %cst_6 = arith.constant dense<0.000000e+00> : vector<256x8xf32>
    %7 = tpu.matmul %4, %6, %cst_6 {dimension_numbers = #tpu.dot_dimension_numbers<[1], [0], [0], [1], [0, 0, 1, 1], [], []>} : vector<256x4xf32>, vector<4x8xf32>, vector<256x8xf32> -> vector<256x8xf32>
    %8 = arith.addf %2, %7 : vector<256x8xf32>
    %9 = vector.extract_strided_slice %1 {offsets = [0, 1, 0], sizes = [16, 16, 4], strides = [1, 1, 1]} : vector<20x20x4xf32> to vector<16x16x4xf32>
    %10 = vector.shape_cast %9 : vector<16x16x4xf32> to vector<256x4xf32>
    %c1 = arith.constant 1 : index
    %c0_7 = arith.constant 0 : index
    %c0_8 = arith.constant 0 : index
    %11 = vector.load %arg2[%c1, %c0_7, %c0_8] : memref<25x4x8xf32, #tpu.memory_space<vmem>>, vector<1x4x8xf32>
    %12 = vector.shape_cast %11 : vector<1x4x8xf32> to vector<4x8xf32>
    %cst_9 = arith.constant dense<0.000000e+00> : vector<256x8xf32>
    %13 = tpu.matmul %10, %12, %cst_9 {dimension_numbers = #tpu.dot_dimension_numbers<[1], [0], [0], [1], [0, 0, 1, 1], [], []>} : vector<256x4xf32>, vector<4x8xf32>, vector<256x8xf32> -> vector<256x8xf32>
    %14 = arith.addf %8, %13 : vector<256x8xf32>
    %15 = vector.extract_strided_slice %1 {offsets = [0, 2, 0], sizes = [16, 16, 4], strides = [1, 1, 1]} : vector<20x20x4xf32> to vector<16x16x4xf32>
    %16 = vector.shape_cast %15 : vector<16x16x4xf32> to vector<256x4xf32>
    %c2 = arith.constant 2 : index
    %c0_10 = arith.constant 0 : index
    %c0_11 = arith.constant 0 : index
    %17 = vector.load %arg2[%c2, %c0_10, %c0_11] : memref<25x4x8xf32, #tpu.memory_space<vmem>>, vector<1x4x8xf32>
    %18 = vector.shape_cast %17 : vector<1x4x8xf32> to vector<4x8xf32>
    %cst_12 = arith.constant dense<0.000000e+00> : vector<256x8xf32>
    %19 = tpu.matmul %16, %18, %cst_12 {dimension_numbers = #tpu.dot_dimension_numbers<[1], [0], [0], [1], [0, 0, 1, 1], [], []>} : vector<256x4xf32>, vector<4x8xf32>, vector<256x8xf32> -> vector<256x8xf32>
    %20 = arith.addf %14, %19 : vector<256x8xf32>
    %21 = vector.extract_strided_slice %1 {offsets = [0, 3, 0], sizes = [16, 16, 4], strides = [1, 1, 1]} : vector<20x20x4xf32> to vector<16x16x4xf32>
    %22 = vector.shape_cast %21 : vector<16x16x4xf32> to vector<256x4xf32>
    %c3 = arith.constant 3 : index
    %c0_13 = arith.constant 0 : index
    %c0_14 = arith.constant 0 : index
    %23 = vector.load %arg2[%c3, %c0_13, %c0_14] : memref<25x4x8xf32, #tpu.memory_space<vmem>>, vector<1x4x8xf32>
    %24 = vector.shape_cast %23 : vector<1x4x8xf32> to vector<4x8xf32>
    %cst_15 = arith.constant dense<0.000000e+00> : vector<256x8xf32>
    %25 = tpu.matmul %22, %24, %cst_15 {dimension_numbers = #tpu.dot_dimension_numbers<[1], [0], [0], [1], [0, 0, 1, 1], [], []>} : vector<256x4xf32>, vector<4x8xf32>, vector<256x8xf32> -> vector<256x8xf32>
    %26 = arith.addf %20, %25 : vector<256x8xf32>
    %27 = vector.extract_strided_slice %1 {offsets = [0, 4, 0], sizes = [16, 16, 4], strides = [1, 1, 1]} : vector<20x20x4xf32> to vector<16x16x4xf32>
    %28 = vector.shape_cast %27 : vector<16x16x4xf32> to vector<256x4xf32>
    %c4 = arith.constant 4 : index
    %c0_16 = arith.constant 0 : index
    %c0_17 = arith.constant 0 : index
    %29 = vector.load %arg2[%c4, %c0_16, %c0_17] : memref<25x4x8xf32, #tpu.memory_space<vmem>>, vector<1x4x8xf32>
    %30 = vector.shape_cast %29 : vector<1x4x8xf32> to vector<4x8xf32>
    %cst_18 = arith.constant dense<0.000000e+00> : vector<256x8xf32>
    %31 = tpu.matmul %28, %30, %cst_18 {dimension_numbers = #tpu.dot_dimension_numbers<[1], [0], [0], [1], [0, 0, 1, 1], [], []>} : vector<256x4xf32>, vector<4x8xf32>, vector<256x8xf32> -> vector<256x8xf32>
    %32 = arith.addf %26, %31 : vector<256x8xf32>
    %33 = vector.extract_strided_slice %1 {offsets = [1, 0, 0], sizes = [16, 16, 4], strides = [1, 1, 1]} : vector<20x20x4xf32> to vector<16x16x4xf32>
    %34 = vector.shape_cast %33 : vector<16x16x4xf32> to vector<256x4xf32>
    %c5 = arith.constant 5 : index
    %c0_19 = arith.constant 0 : index
    %c0_20 = arith.constant 0 : index
    %35 = vector.load %arg2[%c5, %c0_19, %c0_20] : memref<25x4x8xf32, #tpu.memory_space<vmem>>, vector<1x4x8xf32>
    %36 = vector.shape_cast %35 : vector<1x4x8xf32> to vector<4x8xf32>
    %cst_21 = arith.constant dense<0.000000e+00> : vector<256x8xf32>
    %37 = tpu.matmul %34, %36, %cst_21 {dimension_numbers = #tpu.dot_dimension_numbers<[1], [0], [0], [1], [0, 0, 1, 1], [], []>} : vector<256x4xf32>, vector<4x8xf32>, vector<256x8xf32> -> vector<256x8xf32>
    %38 = arith.addf %32, %37 : vector<256x8xf32>
    %39 = vector.extract_strided_slice %1 {offsets = [1, 1, 0], sizes = [16, 16, 4], strides = [1, 1, 1]} : vector<20x20x4xf32> to vector<16x16x4xf32>
    %40 = vector.shape_cast %39 : vector<16x16x4xf32> to vector<256x4xf32>
    %c6 = arith.constant 6 : index
    %c0_22 = arith.constant 0 : index
    %c0_23 = arith.constant 0 : index
    %41 = vector.load %arg2[%c6, %c0_22, %c0_23] : memref<25x4x8xf32, #tpu.memory_space<vmem>>, vector<1x4x8xf32>
    %42 = vector.shape_cast %41 : vector<1x4x8xf32> to vector<4x8xf32>
    %cst_24 = arith.constant dense<0.000000e+00> : vector<256x8xf32>
    %43 = tpu.matmul %40, %42, %cst_24 {dimension_numbers = #tpu.dot_dimension_numbers<[1], [0], [0], [1], [0, 0, 1, 1], [], []>} : vector<256x4xf32>, vector<4x8xf32>, vector<256x8xf32> -> vector<256x8xf32>
    %44 = arith.addf %38, %43 : vector<256x8xf32>
    %45 = vector.extract_strided_slice %1 {offsets = [1, 2, 0], sizes = [16, 16, 4], strides = [1, 1, 1]} : vector<20x20x4xf32> to vector<16x16x4xf32>
    %46 = vector.shape_cast %45 : vector<16x16x4xf32> to vector<256x4xf32>
    %c7 = arith.constant 7 : index
    %c0_25 = arith.constant 0 : index
    %c0_26 = arith.constant 0 : index
    %47 = vector.load %arg2[%c7, %c0_25, %c0_26] : memref<25x4x8xf32, #tpu.memory_space<vmem>>, vector<1x4x8xf32>
    %48 = vector.shape_cast %47 : vector<1x4x8xf32> to vector<4x8xf32>
    %cst_27 = arith.constant dense<0.000000e+00> : vector<256x8xf32>
    %49 = tpu.matmul %46, %48, %cst_27 {dimension_numbers = #tpu.dot_dimension_numbers<[1], [0], [0], [1], [0, 0, 1, 1], [], []>} : vector<256x4xf32>, vector<4x8xf32>, vector<256x8xf32> -> vector<256x8xf32>
    %50 = arith.addf %44, %49 : vector<256x8xf32>
    %51 = vector.extract_strided_slice %1 {offsets = [1, 3, 0], sizes = [16, 16, 4], strides = [1, 1, 1]} : vector<20x20x4xf32> to vector<16x16x4xf32>
    %52 = vector.shape_cast %51 : vector<16x16x4xf32> to vector<256x4xf32>
    %c8 = arith.constant 8 : index
    %c0_28 = arith.constant 0 : index
    %c0_29 = arith.constant 0 : index
    %53 = vector.load %arg2[%c8, %c0_28, %c0_29] : memref<25x4x8xf32, #tpu.memory_space<vmem>>, vector<1x4x8xf32>
    %54 = vector.shape_cast %53 : vector<1x4x8xf32> to vector<4x8xf32>
    %cst_30 = arith.constant dense<0.000000e+00> : vector<256x8xf32>
    %55 = tpu.matmul %52, %54, %cst_30 {dimension_numbers = #tpu.dot_dimension_numbers<[1], [0], [0], [1], [0, 0, 1, 1], [], []>} : vector<256x4xf32>, vector<4x8xf32>, vector<256x8xf32> -> vector<256x8xf32>
    %56 = arith.addf %50, %55 : vector<256x8xf32>
    %57 = vector.extract_strided_slice %1 {offsets = [1, 4, 0], sizes = [16, 16, 4], strides = [1, 1, 1]} : vector<20x20x4xf32> to vector<16x16x4xf32>
    %58 = vector.shape_cast %57 : vector<16x16x4xf32> to vector<256x4xf32>
    %c9 = arith.constant 9 : index
    %c0_31 = arith.constant 0 : index
    %c0_32 = arith.constant 0 : index
    %59 = vector.load %arg2[%c9, %c0_31, %c0_32] : memref<25x4x8xf32, #tpu.memory_space<vmem>>, vector<1x4x8xf32>
    %60 = vector.shape_cast %59 : vector<1x4x8xf32> to vector<4x8xf32>
    %cst_33 = arith.constant dense<0.000000e+00> : vector<256x8xf32>
    %61 = tpu.matmul %58, %60, %cst_33 {dimension_numbers = #tpu.dot_dimension_numbers<[1], [0], [0], [1], [0, 0, 1, 1], [], []>} : vector<256x4xf32>, vector<4x8xf32>, vector<256x8xf32> -> vector<256x8xf32>
    %62 = arith.addf %56, %61 : vector<256x8xf32>
    %63 = vector.extract_strided_slice %1 {offsets = [2, 0, 0], sizes = [16, 16, 4], strides = [1, 1, 1]} : vector<20x20x4xf32> to vector<16x16x4xf32>
    %64 = vector.shape_cast %63 : vector<16x16x4xf32> to vector<256x4xf32>
    %c10 = arith.constant 10 : index
    %c0_34 = arith.constant 0 : index
    %c0_35 = arith.constant 0 : index
    %65 = vector.load %arg2[%c10, %c0_34, %c0_35] : memref<25x4x8xf32, #tpu.memory_space<vmem>>, vector<1x4x8xf32>
    %66 = vector.shape_cast %65 : vector<1x4x8xf32> to vector<4x8xf32>
    %cst_36 = arith.constant dense<0.000000e+00> : vector<256x8xf32>
    %67 = tpu.matmul %64, %66, %cst_36 {dimension_numbers = #tpu.dot_dimension_numbers<[1], [0], [0], [1], [0, 0, 1, 1], [], []>} : vector<256x4xf32>, vector<4x8xf32>, vector<256x8xf32> -> vector<256x8xf32>
    %68 = arith.addf %62, %67 : vector<256x8xf32>
    %69 = vector.extract_strided_slice %1 {offsets = [2, 1, 0], sizes = [16, 16, 4], strides = [1, 1, 1]} : vector<20x20x4xf32> to vector<16x16x4xf32>
    %70 = vector.shape_cast %69 : vector<16x16x4xf32> to vector<256x4xf32>
    %c11 = arith.constant 11 : index
    %c0_37 = arith.constant 0 : index
    %c0_38 = arith.constant 0 : index
    %71 = vector.load %arg2[%c11, %c0_37, %c0_38] : memref<25x4x8xf32, #tpu.memory_space<vmem>>, vector<1x4x8xf32>
    %72 = vector.shape_cast %71 : vector<1x4x8xf32> to vector<4x8xf32>
    %cst_39 = arith.constant dense<0.000000e+00> : vector<256x8xf32>
    %73 = tpu.matmul %70, %72, %cst_39 {dimension_numbers = #tpu.dot_dimension_numbers<[1], [0], [0], [1], [0, 0, 1, 1], [], []>} : vector<256x4xf32>, vector<4x8xf32>, vector<256x8xf32> -> vector<256x8xf32>
    %74 = arith.addf %68, %73 : vector<256x8xf32>
    %75 = vector.extract_strided_slice %1 {offsets = [2, 2, 0], sizes = [16, 16, 4], strides = [1, 1, 1]} : vector<20x20x4xf32> to vector<16x16x4xf32>
    %76 = vector.shape_cast %75 : vector<16x16x4xf32> to vector<256x4xf32>
    %c12 = arith.constant 12 : index
    %c0_40 = arith.constant 0 : index
    %c0_41 = arith.constant 0 : index
    %77 = vector.load %arg2[%c12, %c0_40, %c0_41] : memref<25x4x8xf32, #tpu.memory_space<vmem>>, vector<1x4x8xf32>
    %78 = vector.shape_cast %77 : vector<1x4x8xf32> to vector<4x8xf32>
    %cst_42 = arith.constant dense<0.000000e+00> : vector<256x8xf32>
    %79 = tpu.matmul %76, %78, %cst_42 {dimension_numbers = #tpu.dot_dimension_numbers<[1], [0], [0], [1], [0, 0, 1, 1], [], []>} : vector<256x4xf32>, vector<4x8xf32>, vector<256x8xf32> -> vector<256x8xf32>
    %80 = arith.addf %74, %79 : vector<256x8xf32>
    %81 = vector.extract_strided_slice %1 {offsets = [2, 3, 0], sizes = [16, 16, 4], strides = [1, 1, 1]} : vector<20x20x4xf32> to vector<16x16x4xf32>
    %82 = vector.shape_cast %81 : vector<16x16x4xf32> to vector<256x4xf32>
    %c13 = arith.constant 13 : index
    %c0_43 = arith.constant 0 : index
    %c0_44 = arith.constant 0 : index
    %83 = vector.load %arg2[%c13, %c0_43, %c0_44] : memref<25x4x8xf32, #tpu.memory_space<vmem>>, vector<1x4x8xf32>
    %84 = vector.shape_cast %83 : vector<1x4x8xf32> to vector<4x8xf32>
    %cst_45 = arith.constant dense<0.000000e+00> : vector<256x8xf32>
    %85 = tpu.matmul %82, %84, %cst_45 {dimension_numbers = #tpu.dot_dimension_numbers<[1], [0], [0], [1], [0, 0, 1, 1], [], []>} : vector<256x4xf32>, vector<4x8xf32>, vector<256x8xf32> -> vector<256x8xf32>
    %86 = arith.addf %80, %85 : vector<256x8xf32>
    %87 = vector.extract_strided_slice %1 {offsets = [2, 4, 0], sizes = [16, 16, 4], strides = [1, 1, 1]} : vector<20x20x4xf32> to vector<16x16x4xf32>
    %88 = vector.shape_cast %87 : vector<16x16x4xf32> to vector<256x4xf32>
    %c14 = arith.constant 14 : index
    %c0_46 = arith.constant 0 : index
    %c0_47 = arith.constant 0 : index
    %89 = vector.load %arg2[%c14, %c0_46, %c0_47] : memref<25x4x8xf32, #tpu.memory_space<vmem>>, vector<1x4x8xf32>
    %90 = vector.shape_cast %89 : vector<1x4x8xf32> to vector<4x8xf32>
    %cst_48 = arith.constant dense<0.000000e+00> : vector<256x8xf32>
    %91 = tpu.matmul %88, %90, %cst_48 {dimension_numbers = #tpu.dot_dimension_numbers<[1], [0], [0], [1], [0, 0, 1, 1], [], []>} : vector<256x4xf32>, vector<4x8xf32>, vector<256x8xf32> -> vector<256x8xf32>
    %92 = arith.addf %86, %91 : vector<256x8xf32>
    %93 = vector.extract_strided_slice %1 {offsets = [3, 0, 0], sizes = [16, 16, 4], strides = [1, 1, 1]} : vector<20x20x4xf32> to vector<16x16x4xf32>
    %94 = vector.shape_cast %93 : vector<16x16x4xf32> to vector<256x4xf32>
    %c15 = arith.constant 15 : index
    %c0_49 = arith.constant 0 : index
    %c0_50 = arith.constant 0 : index
    %95 = vector.load %arg2[%c15, %c0_49, %c0_50] : memref<25x4x8xf32, #tpu.memory_space<vmem>>, vector<1x4x8xf32>
    %96 = vector.shape_cast %95 : vector<1x4x8xf32> to vector<4x8xf32>
    %cst_51 = arith.constant dense<0.000000e+00> : vector<256x8xf32>
    %97 = tpu.matmul %94, %96, %cst_51 {dimension_numbers = #tpu.dot_dimension_numbers<[1], [0], [0], [1], [0, 0, 1, 1], [], []>} : vector<256x4xf32>, vector<4x8xf32>, vector<256x8xf32> -> vector<256x8xf32>
    %98 = arith.addf %92, %97 : vector<256x8xf32>
    %99 = vector.extract_strided_slice %1 {offsets = [3, 1, 0], sizes = [16, 16, 4], strides = [1, 1, 1]} : vector<20x20x4xf32> to vector<16x16x4xf32>
    %100 = vector.shape_cast %99 : vector<16x16x4xf32> to vector<256x4xf32>
    %c16 = arith.constant 16 : index
    %c0_52 = arith.constant 0 : index
    %c0_53 = arith.constant 0 : index
    %101 = vector.load %arg2[%c16, %c0_52, %c0_53] : memref<25x4x8xf32, #tpu.memory_space<vmem>>, vector<1x4x8xf32>
    %102 = vector.shape_cast %101 : vector<1x4x8xf32> to vector<4x8xf32>
    %cst_54 = arith.constant dense<0.000000e+00> : vector<256x8xf32>
    %103 = tpu.matmul %100, %102, %cst_54 {dimension_numbers = #tpu.dot_dimension_numbers<[1], [0], [0], [1], [0, 0, 1, 1], [], []>} : vector<256x4xf32>, vector<4x8xf32>, vector<256x8xf32> -> vector<256x8xf32>
    %104 = arith.addf %98, %103 : vector<256x8xf32>
    %105 = vector.extract_strided_slice %1 {offsets = [3, 2, 0], sizes = [16, 16, 4], strides = [1, 1, 1]} : vector<20x20x4xf32> to vector<16x16x4xf32>
    %106 = vector.shape_cast %105 : vector<16x16x4xf32> to vector<256x4xf32>
    %c17 = arith.constant 17 : index
    %c0_55 = arith.constant 0 : index
    %c0_56 = arith.constant 0 : index
    %107 = vector.load %arg2[%c17, %c0_55, %c0_56] : memref<25x4x8xf32, #tpu.memory_space<vmem>>, vector<1x4x8xf32>
    %108 = vector.shape_cast %107 : vector<1x4x8xf32> to vector<4x8xf32>
    %cst_57 = arith.constant dense<0.000000e+00> : vector<256x8xf32>
    %109 = tpu.matmul %106, %108, %cst_57 {dimension_numbers = #tpu.dot_dimension_numbers<[1], [0], [0], [1], [0, 0, 1, 1], [], []>} : vector<256x4xf32>, vector<4x8xf32>, vector<256x8xf32> -> vector<256x8xf32>
    %110 = arith.addf %104, %109 : vector<256x8xf32>
    %111 = vector.extract_strided_slice %1 {offsets = [3, 3, 0], sizes = [16, 16, 4], strides = [1, 1, 1]} : vector<20x20x4xf32> to vector<16x16x4xf32>
    %112 = vector.shape_cast %111 : vector<16x16x4xf32> to vector<256x4xf32>
    %c18 = arith.constant 18 : index
    %c0_58 = arith.constant 0 : index
    %c0_59 = arith.constant 0 : index
    %113 = vector.load %arg2[%c18, %c0_58, %c0_59] : memref<25x4x8xf32, #tpu.memory_space<vmem>>, vector<1x4x8xf32>
    %114 = vector.shape_cast %113 : vector<1x4x8xf32> to vector<4x8xf32>
    %cst_60 = arith.constant dense<0.000000e+00> : vector<256x8xf32>
    %115 = tpu.matmul %112, %114, %cst_60 {dimension_numbers = #tpu.dot_dimension_numbers<[1], [0], [0], [1], [0, 0, 1, 1], [], []>} : vector<256x4xf32>, vector<4x8xf32>, vector<256x8xf32> -> vector<256x8xf32>
    %116 = arith.addf %110, %115 : vector<256x8xf32>
    %117 = vector.extract_strided_slice %1 {offsets = [3, 4, 0], sizes = [16, 16, 4], strides = [1, 1, 1]} : vector<20x20x4xf32> to vector<16x16x4xf32>
    %118 = vector.shape_cast %117 : vector<16x16x4xf32> to vector<256x4xf32>
    %c19 = arith.constant 19 : index
    %c0_61 = arith.constant 0 : index
    %c0_62 = arith.constant 0 : index
    %119 = vector.load %arg2[%c19, %c0_61, %c0_62] : memref<25x4x8xf32, #tpu.memory_space<vmem>>, vector<1x4x8xf32>
    %120 = vector.shape_cast %119 : vector<1x4x8xf32> to vector<4x8xf32>
    %cst_63 = arith.constant dense<0.000000e+00> : vector<256x8xf32>
    %121 = tpu.matmul %118, %120, %cst_63 {dimension_numbers = #tpu.dot_dimension_numbers<[1], [0], [0], [1], [0, 0, 1, 1], [], []>} : vector<256x4xf32>, vector<4x8xf32>, vector<256x8xf32> -> vector<256x8xf32>
    %122 = arith.addf %116, %121 : vector<256x8xf32>
    %123 = vector.extract_strided_slice %1 {offsets = [4, 0, 0], sizes = [16, 16, 4], strides = [1, 1, 1]} : vector<20x20x4xf32> to vector<16x16x4xf32>
    %124 = vector.shape_cast %123 : vector<16x16x4xf32> to vector<256x4xf32>
    %c20 = arith.constant 20 : index
    %c0_64 = arith.constant 0 : index
    %c0_65 = arith.constant 0 : index
    %125 = vector.load %arg2[%c20, %c0_64, %c0_65] : memref<25x4x8xf32, #tpu.memory_space<vmem>>, vector<1x4x8xf32>
    %126 = vector.shape_cast %125 : vector<1x4x8xf32> to vector<4x8xf32>
    %cst_66 = arith.constant dense<0.000000e+00> : vector<256x8xf32>
    %127 = tpu.matmul %124, %126, %cst_66 {dimension_numbers = #tpu.dot_dimension_numbers<[1], [0], [0], [1], [0, 0, 1, 1], [], []>} : vector<256x4xf32>, vector<4x8xf32>, vector<256x8xf32> -> vector<256x8xf32>
    %128 = arith.addf %122, %127 : vector<256x8xf32>
    %129 = vector.extract_strided_slice %1 {offsets = [4, 1, 0], sizes = [16, 16, 4], strides = [1, 1, 1]} : vector<20x20x4xf32> to vector<16x16x4xf32>
    %130 = vector.shape_cast %129 : vector<16x16x4xf32> to vector<256x4xf32>
    %c21 = arith.constant 21 : index
    %c0_67 = arith.constant 0 : index
    %c0_68 = arith.constant 0 : index
    %131 = vector.load %arg2[%c21, %c0_67, %c0_68] : memref<25x4x8xf32, #tpu.memory_space<vmem>>, vector<1x4x8xf32>
    %132 = vector.shape_cast %131 : vector<1x4x8xf32> to vector<4x8xf32>
    %cst_69 = arith.constant dense<0.000000e+00> : vector<256x8xf32>
    %133 = tpu.matmul %130, %132, %cst_69 {dimension_numbers = #tpu.dot_dimension_numbers<[1], [0], [0], [1], [0, 0, 1, 1], [], []>} : vector<256x4xf32>, vector<4x8xf32>, vector<256x8xf32> -> vector<256x8xf32>
    %134 = arith.addf %128, %133 : vector<256x8xf32>
    %135 = vector.extract_strided_slice %1 {offsets = [4, 2, 0], sizes = [16, 16, 4], strides = [1, 1, 1]} : vector<20x20x4xf32> to vector<16x16x4xf32>
    %136 = vector.shape_cast %135 : vector<16x16x4xf32> to vector<256x4xf32>
    %c22 = arith.constant 22 : index
    %c0_70 = arith.constant 0 : index
    %c0_71 = arith.constant 0 : index
    %137 = vector.load %arg2[%c22, %c0_70, %c0_71] : memref<25x4x8xf32, #tpu.memory_space<vmem>>, vector<1x4x8xf32>
    %138 = vector.shape_cast %137 : vector<1x4x8xf32> to vector<4x8xf32>
    %cst_72 = arith.constant dense<0.000000e+00> : vector<256x8xf32>
    %139 = tpu.matmul %136, %138, %cst_72 {dimension_numbers = #tpu.dot_dimension_numbers<[1], [0], [0], [1], [0, 0, 1, 1], [], []>} : vector<256x4xf32>, vector<4x8xf32>, vector<256x8xf32> -> vector<256x8xf32>
    %140 = arith.addf %134, %139 : vector<256x8xf32>
    %141 = vector.extract_strided_slice %1 {offsets = [4, 3, 0], sizes = [16, 16, 4], strides = [1, 1, 1]} : vector<20x20x4xf32> to vector<16x16x4xf32>
    %142 = vector.shape_cast %141 : vector<16x16x4xf32> to vector<256x4xf32>
    %c23 = arith.constant 23 : index
    %c0_73 = arith.constant 0 : index
    %c0_74 = arith.constant 0 : index
    %143 = vector.load %arg2[%c23, %c0_73, %c0_74] : memref<25x4x8xf32, #tpu.memory_space<vmem>>, vector<1x4x8xf32>
    %144 = vector.shape_cast %143 : vector<1x4x8xf32> to vector<4x8xf32>
    %cst_75 = arith.constant dense<0.000000e+00> : vector<256x8xf32>
    %145 = tpu.matmul %142, %144, %cst_75 {dimension_numbers = #tpu.dot_dimension_numbers<[1], [0], [0], [1], [0, 0, 1, 1], [], []>} : vector<256x4xf32>, vector<4x8xf32>, vector<256x8xf32> -> vector<256x8xf32>
    %146 = arith.addf %140, %145 : vector<256x8xf32>
    %147 = vector.extract_strided_slice %1 {offsets = [4, 4, 0], sizes = [16, 16, 4], strides = [1, 1, 1]} : vector<20x20x4xf32> to vector<16x16x4xf32>
    %148 = vector.shape_cast %147 : vector<16x16x4xf32> to vector<256x4xf32>
    %c24 = arith.constant 24 : index
    %c0_76 = arith.constant 0 : index
    %c0_77 = arith.constant 0 : index
    %149 = vector.load %arg2[%c24, %c0_76, %c0_77] : memref<25x4x8xf32, #tpu.memory_space<vmem>>, vector<1x4x8xf32>
    %150 = vector.shape_cast %149 : vector<1x4x8xf32> to vector<4x8xf32>
    %cst_78 = arith.constant dense<0.000000e+00> : vector<256x8xf32>
    %151 = tpu.matmul %148, %150, %cst_78 {dimension_numbers = #tpu.dot_dimension_numbers<[1], [0], [0], [1], [0, 0, 1, 1], [], []>} : vector<256x4xf32>, vector<4x8xf32>, vector<256x8xf32> -> vector<256x8xf32>
    %152 = arith.addf %146, %151 : vector<256x8xf32>
    %c0_79 = arith.constant 0 : index
    %c0_80 = arith.constant 0 : index
    %153 = vector.load %arg3[%c0_79, %c0_80] : memref<1x8xf32, #tpu.memory_space<vmem>>, vector<1x8xf32>
    %154 = vector.broadcast %153 : vector<1x8xf32> to vector<256x8xf32>
    %155 = arith.addf %152, %154 : vector<256x8xf32>
    %cst_81 = arith.constant 0.000000e+00 : f32
    %156 = vector.broadcast %cst_81 : f32 to vector<256x8xf32>
    %157 = arith.subf %156, %155 : vector<256x8xf32>
    %158 = math.exp %157 : vector<256x8xf32>
    %cst_82 = arith.constant 1.000000e+00 : f32
    %159 = vector.broadcast %cst_82 : f32 to vector<256x8xf32>
    %160 = arith.addf %159, %158 : vector<256x8xf32>
    %161 = tpu.reciprocal %160 {approx = true} : vector<256x8xf32> -> vector<256x8xf32>
    %162 = vector.shape_cast %161 : vector<256x8xf32> to vector<16x16x8xf32>
    %c0_83 = arith.constant 0 : index
    %c0_84 = arith.constant 0 : index
    %c0_85 = arith.constant 0 : index
    %c0_86 = arith.constant 0 : index
    %163 = vector.load %arg4[%c0_83, %c0_84, %c0_85, %c0_86] : memref<1x16x16x8xf32, #tpu.memory_space<vmem>>, vector<1x16x16x8xf32>
    %164 = vector.shape_cast %163 : vector<1x16x16x8xf32> to vector<16x16x8xf32>
    %165 = vector.shape_cast %162 : vector<16x16x8xf32> to vector<1x16x16x8xf32>
    tpu.vector_store %arg4[%c0_83, %c0_84, %c0_85, %c0_86], %165 {strides = array<i32>} : memref<1x16x16x8xf32, #tpu.memory_space<vmem>>, vector<1x16x16x8xf32>,
    return
  }
  func.func @transform_0(%arg0: i32) -> (i32, i32, i32, i32) {
    %c0_i32 = arith.constant 0 : i32
    %c0_i32_0 = arith.constant 0 : i32
    %c0_i32_1 = arith.constant 0 : i32
    %c0_i32_2 = arith.constant 0 : i32
    return %arg0, %c0_i32, %c0_i32_0, %c0_i32_1 : i32, i32, i32, i32
  }
  func.func @transform_1(%arg0: i32) -> (i32, i32, i32) {
    %c0_i32 = arith.constant 0 : i32
    %c0_i32_0 = arith.constant 0 : i32
    %c0_i32_1 = arith.constant 0 : i32
    %c0_i32_2 = arith.constant 0 : i32
    return %c0_i32, %c0_i32_0, %c0_i32_1 : i32, i32, i32
  }
  func.func @transform_2(%arg0: i32) -> (i32, i32) {
    %c0_i32 = arith.constant 0 : i32
    %c0_i32_0 = arith.constant 0 : i32
    %c0_i32_1 = arith.constant 0 : i32
    return %c0_i32, %c0_i32_0 : i32, i32
  }
  func.func @transform_3(%arg0: i32) -> (i32, i32, i32, i32) {
    %c0_i32 = arith.constant 0 : i32
    %c0_i32_0 = arith.constant 0 : i32
    %c0_i32_1 = arith.constant 0 : i32
    %c0_i32_2 = arith.constant 0 : i32
    return %arg0, %c0_i32, %c0_i32_0, %c0_i32_1 : i32, i32, i32, i32
  }
}

</mosaic_0001>

<bundles_post_ra>
// kernel: inception3b_forward.4
= control target key start
LH: loop header
LB: loop body
LE: loop exit
PB: predicated region body
PF: predicated region fallthrough
CT: control target
= control target key end

     0   :  { %s1083_s12 = smov 0   ;;  %s1279_s0 = inlined_call_operand.vmem [shape: f32[512,4], index: 0, kind: input, shape index: {}]   ;;  %s1280_s1 = inlined_call_operand.vmem [shape: f32[4,16], index: 1, kind: input, shape index: {}]   ;;  %s1281_s2 = inlined_call_operand.vmem [shape: f32[1,16], index: 2, kind: input, shape index: {}]   ;;  %s1282_s3 = inlined_call_operand.vmem [shape: f32[512,16], index: 3, kind: output, shape index: {}]  }
   0x1 LB: > { %s789_s13 = sadd.s32 4294967295, %s1061_s12   ;;  %p793_p0 = scmp.ge.s32.totalorder %s1061_s12, 1  ;;  %s1061_s12 = sphi %s1083_s12, %s13_s12  }
   0x2   : > { %p138_p1 = scmp.lt.s32.totalorder %s1061_s12, 3 }
   0x4   : > { %p139_p2 = pnand %p793_p0, %p138_p1 }
   0x5   : > { %s794_s16 = sshll.u32 (!%p139_p2), %s789_s13, 5 }
   0x6   : > { %142 = sbr.rel (%p139_p2) target bundleno = 298 (0x12a), region = 32  ;;  %p163_p3 = scmp.lt.s32.totalorder (!%p139_p2), %s794_s16, 63 }
   0xb   : > { %v206_v0 = vld [vmem:[%s1280_s1] sm:$0xf]  ;;  %vm311_vm0 = vcmask 1043456   ;;  %s1284_s16 = smov (!%p163_p3, %s794_s16), 63  ;;  %vm214_vm1 = vcmask 31744   ;;  %vm700_vm2 = vcmask 130048  }
   0xc   : > { %867 = vmatprep.subr.msk.mxu0 %vm311_vm0, %v206_v0  ;;  %917 = vmatprep.subr.msk.mxu1 %vm311_vm0, %v206_v0  ;;  %s795_s17 = sshll.u32 %s1284_s16, 3  ;;  %v1171_v33 = vld [vmem:[%s1281_s2] ss:$0 sm:$0xff] }
   0xd   : > { %868 = vmatpush3.msk.msra.mxu0 %vm311_vm0, %v206_v0  ;;  %918 = vmatpush3.msk.msra.mxu1 %vm311_vm0, %v206_v0  ;;  %s1102_s20 = scalar_lea.vmem %s1279_s0, %s795_s17  ;;  %s1200_s25 = scalar_lea.vmem %s1282_s3, %s795_s17 }
   0xe   : > { %v174_v1 = vld [vmem:[%s1102_s20] sm:$0xff]  ;;  %v175_v3 = vld [vmem:[%s1102_s20 + $0x8] sm:$0xff]  ;;  %v176_v5 = vld [vmem:[%s1102_s20 + $0x10] sm:$0xff] }
   0xf   : > { %v190_v2 = vld [vmem:[%s1102_s20 + $0x80] sm:$0xff]  ;;  %869 = vmatprep.mubr.msk.f32.mxu0 %vm214_vm1, %v174_v1  ;;  %v191_v4 = vld [vmem:[%s1102_s20 + $0x88] sm:$0xff]  ;;  %v192_v6 = vld [vmem:[%s1102_s20 + $0x90] sm:$0xff] }
  0x10   : > { %893 = vmatprep.mubr.msk.f32.mxu1 %vm214_vm1, %v190_v2  ;;  %870 = vmatmul.mubr.msk.f32.vlgmr.msra.gmra.mxu0 %vm214_vm1, %v175_v3  ;;  %v177_v7 = vld [vmem:[%s1102_s20 + $0x18] sm:$0xff]  ;;  %v178_v9 = vld [vmem:[%s1102_s20 + $0x20] sm:$0xff]  ;;  %v179_v11 = vld [vmem:[%s1102_s20 + $0x28] sm:$0xff] }
  0x11   : > { %894 = vmatmul.mubr.msk.f32.vlgmr.msra.gmra.mxu1 %vm214_vm1, %v191_v4  ;;  %872 = vmatprep.mubr.msk.f32.mxu0 %vm214_vm1, %v176_v5  ;;  %v193_v8 = vld [vmem:[%s1102_s20 + $0x98] sm:$0xff]  ;;  %v194_v10 = vld [vmem:[%s1102_s20 + $0xa0] sm:$0xff]  ;;  %v195_v12 = vld [vmem:[%s1102_s20 + $0xa8] sm:$0xff] }
  0x12   : > { %896 = vmatprep.mubr.msk.f32.mxu1 %vm214_vm1, %v192_v6  ;;  %v180_v13 = vld [vmem:[%s1102_s20 + $0x30] sm:$0xff]  ;;  %v181_v15 = vld [vmem:[%s1102_s20 + $0x38] sm:$0xff]  ;;  %v182_v17 = vld [vmem:[%s1102_s20 + $0x40] sm:$0xff] }
  0x13   : > { %v196_v14 = vld [vmem:[%s1102_s20 + $0xb0] sm:$0xff]  ;;  %v197_v16 = vld [vmem:[%s1102_s20 + $0xb8] sm:$0xff]  ;;  %v198_v18 = vld [vmem:[%s1102_s20 + $0xc0] sm:$0xff] }
  0x14   : > { %873 = vmatmul.mubr.msk.f32.gmra.mxu0 %vm214_vm1, %v177_v7  ;;  %v183_v19 = vld [vmem:[%s1102_s20 + $0x48] sm:$0xff]  ;;  %v184_v21 = vld [vmem:[%s1102_s20 + $0x50] sm:$0xff]  ;;  %v185_v23 = vld [vmem:[%s1102_s20 + $0x58] sm:$0xff] }
  0x15   : > { %897 = vmatmul.mubr.msk.f32.gmra.mxu1 %vm214_vm1, %v193_v8  ;;  %875 = vmatprep.mubr.msk.f32.mxu0 %vm214_vm1, %v178_v9  ;;  %v199_v20 = vld [vmem:[%s1102_s20 + $0xc8] sm:$0xff]  ;;  %v200_v22 = vld [vmem:[%s1102_s20 + $0xd0] sm:$0xff]  ;;  %v201_v24 = vld [vmem:[%s1102_s20 + $0xd8] sm:$0xff] }
  0x16   : > { %899 = vmatprep.mubr.msk.f32.mxu1 %vm214_vm1, %v194_v10  ;;  %v186_v25 = vld [vmem:[%s1102_s20 + $0x60] sm:$0xff]  ;;  %v187_v27 = vld [vmem:[%s1102_s20 + $0x68] sm:$0xff]  ;;  %v188_v29 = vld [vmem:[%s1102_s20 + $0x70] sm:$0xff] }
  0x17   : > { %v202_v26 = vld [vmem:[%s1102_s20 + $0xe0] sm:$0xff]  ;;  %v203_v28 = vld [vmem:[%s1102_s20 + $0xe8] sm:$0xff]  ;;  %v204_v30 = vld [vmem:[%s1102_s20 + $0xf0] sm:$0xff] }
  0x18   : > { %876 = vmatmul.mubr.msk.f32.gmra.mxu0 %vm214_vm1, %v179_v11  ;;  %v189_v31 = vld [vmem:[%s1102_s20 + $0x78] sm:$0xff] }
  0x19   : > { %900 = vmatmul.mubr.msk.f32.gmra.mxu1 %vm214_vm1, %v195_v12  ;;  %878 = vmatprep.mubr.msk.f32.mxu0 %vm214_vm1, %v180_v13  ;;  %v205_v32 = vld [vmem:[%s1102_s20 + $0xf8] sm:$0xff] }
  0x1a   : > { %902 = vmatprep.mubr.msk.f32.mxu1 %vm214_vm1, %v196_v14 }
  0x1c   : > { %879 = vmatmul.mubr.msk.f32.gmra.mxu0 %vm214_vm1, %v181_v15 }
  0x1d   : > { %903 = vmatmul.mubr.msk.f32.gmra.mxu1 %vm214_vm1, %v197_v16  ;;  %881 = vmatprep.mubr.msk.f32.mxu0 %vm214_vm1, %v182_v17 }
  0x1e   : > { %905 = vmatprep.mubr.msk.f32.mxu1 %vm214_vm1, %v198_v18 }
  0x20   : > { %882 = vmatmul.mubr.msk.f32.gmra.mxu0 %vm214_vm1, %v183_v19 }
  0x21   : > { %906 = vmatmul.mubr.msk.f32.gmra.mxu1 %vm214_vm1, %v199_v20  ;;  %884 = vmatprep.mubr.msk.f32.mxu0 %vm214_vm1, %v184_v21 }
  0x22   : > { %908 = vmatprep.mubr.msk.f32.mxu1 %vm214_vm1, %v200_v22 }
  0x24   : > { %885 = vmatmul.mubr.msk.f32.gmra.mxu0 %vm214_vm1, %v185_v23 }
  0x25   : > { %909 = vmatmul.mubr.msk.f32.gmra.mxu1 %vm214_vm1, %v201_v24  ;;  %887 = vmatprep.mubr.msk.f32.mxu0 %vm214_vm1, %v186_v25 }
  0x26   : > { %911 = vmatprep.mubr.msk.f32.mxu1 %vm214_vm1, %v202_v26 }
  0x28   : > { %888 = vmatmul.mubr.msk.f32.gmra.mxu0 %vm214_vm1, %v187_v27 }
  0x29   : > { %912 = vmatmul.mubr.msk.f32.gmra.mxu1 %vm214_vm1, %v203_v28  ;;  %890 = vmatprep.mubr.msk.f32.mxu0 %vm214_vm1, %v188_v29 }
  0x2a   : > { %914 = vmatprep.mubr.msk.f32.mxu1 %vm214_vm1, %v204_v30 }
  0x2c   : > { %891 = vmatmul.mubr.msk.f32.gmra.mxu0 %vm214_vm1, %v189_v31 }
  0x2d   : > { %915 = vmatmul.mubr.msk.f32.gmra.mxu1 %vm214_vm1, %v205_v32 }
  0xd0   : > { %v871_v34 = vpop.f32.mrf.mxu0 }
  0xd1   : > { %v895_v35 = vpop.f32.mrf.mxu1  ;;  %v387_v36 = vadd.f32 %v871_v34, %v1171_v33 }
  0xd2   : > { %v467_v37 = vadd.f32 %v895_v35, %v1171_v33  ;;  %v381_v38 = vpop.f32.mrf.mxu0 }
  0xd3   : > { %v461_v39 = vpop.f32.mrf.mxu1  ;;  %v541_v40 = vsub.f32 0.0, %v387_v36  ;;  %v382_v42 = vadd.f32 %v1171_v33, %v381_v38 }
  0xd4   : > { %v557_v41 = vsub.f32 0.0, %v467_v37  ;;  %v462_v43 = vadd.f32 %v1171_v33, %v461_v39  ;;  %v874_v44 = vpop.f32.mrf.mxu0 }
  0xd5   : > { %v898_v45 = vpop.f32.mrf.mxu1  ;;  %v574_v46 = vmul.f32 1.442695, %v541_v40  ;;  %v540_v48 = vsub.f32 0.0, %v382_v42  ;;  %v397_v50 = vadd.f32 %v874_v44, %v1171_v33 }
  0xd6   : > { %v606_v47 = vmul.f32 1.442695, %v557_v41  ;;  %v556_v49 = vsub.f32 0.0, %v462_v43  ;;  %v477_v51 = vadd.f32 %v898_v45, %v1171_v33  ;;  %v391_v52 = vpop.f32.mrf.mxu0 }
  0xd7   : > { %v471_v53 = vpop.f32.mrf.mxu1  ;;  %927 = vpow2.f32 %v574_v46  ;;  %v572_v54 = vmul.f32 1.442695, %v540_v48  ;;  %v392_v56 = vadd.f32 %v1171_v33, %v391_v52  ;;  %v543_v57 = vsub.f32 0.0, %v397_v50 }
  0xd8   : > { %v604_v55 = vmul.f32 1.442695, %v556_v49  ;;  %929 = vpow2.f32 %v606_v47  ;;  %v559_v58 = vsub.f32 0.0, %v477_v51  ;;  %v472_v59 = vadd.f32 %v1171_v33, %v471_v53  ;;  %v877_v60 = vpop.f32.mrf.mxu0 }
  0xd9   : > { %v901_v61 = vpop.f32.mrf.mxu1  ;;  %931 = vpow2.f32 %v572_v54  ;;  %v542_v62 = vsub.f32 0.0, %v392_v56  ;;  %v407_v63 = vadd.f32 %v877_v60, %v1171_v33  ;;  %v578_v1 = vmul.f32 1.442695, %v543_v57 }
  0xda   : > { %v487_v0 = vadd.f32 %v901_v61, %v1171_v33  ;;  %933 = vpow2.f32 %v604_v55  ;;  %v610_v2 = vmul.f32 1.442695, %v559_v58  ;;  %v558_v3 = vsub.f32 0.0, %v472_v59  ;;  %v401_v4 = vpop.f32.mrf.mxu0 }
  0xdb   : > { %v481_v5 = vpop.f32.mrf.mxu1  ;;  %v576_v6 = vmul.f32 1.442695, %v542_v62  ;;  %v545_v7 = vsub.f32 0.0, %v407_v63  ;;  %v402_v9 = vadd.f32 %v1171_v33, %v401_v4  ;;  %935 = vpow2.f32 %v578_v1 }
  0xdc   : > { %v561_v8 = vsub.f32 0.0, %v487_v0  ;;  %v608_v10 = vmul.f32 1.442695, %v558_v3  ;;  %v482_v11 = vadd.f32 %v1171_v33, %v481_v5  ;;  %v880_v12 = vpop.f32.mrf.mxu0  ;;  %937 = vpow2.f32 %v610_v2 }
  0xdd   : > { %v904_v13 = vpop.f32.mrf.mxu1  ;;  %v582_v14 = vmul.f32 1.442695, %v545_v7  ;;  %v544_v16 = vsub.f32 0.0, %v402_v9  ;;  %939 = vpow2.f32 %v576_v6  ;;  %v417_v18 = vadd.f32 %v880_v12, %v1171_v33 }
  0xde   : > { %v614_v15 = vmul.f32 1.442695, %v561_v8  ;;  %v560_v17 = vsub.f32 0.0, %v482_v11  ;;  %v497_v19 = vadd.f32 %v904_v13, %v1171_v33  ;;  %v411_v20 = vpop.f32.mrf.mxu0  ;;  %941 = vpow2.f32 %v608_v10 }
  0xdf   : > { %v491_v21 = vpop.f32.mrf.mxu1  ;;  %v580_v22 = vmul.f32 1.442695, %v544_v16  ;;  %v412_v23 = vadd.f32 %v1171_v33, %v411_v20  ;;  %943 = vpow2.f32 %v582_v14  ;;  %v547_v26 = vsub.f32 0.0, %v417_v18 }
  0xe0   : > { %v492_v24 = vadd.f32 %v1171_v33, %v491_v21  ;;  %v612_v25 = vmul.f32 1.442695, %v560_v17  ;;  %v563_v27 = vsub.f32 0.0, %v497_v19  ;;  %v883_v28 = vpop.f32.mrf.mxu0  ;;  %945 = vpow2.f32 %v614_v15 }
  0xe1   : > { %v907_v29 = vpop.f32.mrf.mxu1  ;;  %v546_v30 = vsub.f32 0.0, %v412_v23  ;;  %947 = vpow2.f32 %v580_v22  ;;  %v586_v31 = vmul.f32 1.442695, %v547_v26  ;;  %v427_v50 = vadd.f32 %v883_v28, %v1171_v33 }
  0xe2   : > { %v618_v32 = vmul.f32 1.442695, %v563_v27  ;;  %v421_v34 = vpop.f32.mrf.mxu0  ;;  %949 = vpow2.f32 %v612_v25  ;;  %v562_v37 = vsub.f32 0.0, %v492_v24  ;;  %v507_v52 = vadd.f32 %v907_v29, %v1171_v33 }
  0xe3   : > { %v501_v35 = vpop.f32.mrf.mxu1  ;;  %v584_v36 = vmul.f32 1.442695, %v546_v30  ;;  %951 = vpow2.f32 %v586_v31  ;;  %v549_v61 = vsub.f32 0.0, %v427_v50  ;;  %v422_v1 = vadd.f32 %v1171_v33, %v421_v34 }
  0xe4   : > { %v928_v38 = vpop.eup %927  ;;  %v886_v39 = vpop.f32.mrf.mxu0  ;;  %953 = vpow2.f32 %v618_v32  ;;  %v616_v47 = vmul.f32 1.442695, %v562_v37  ;;  %v565_v0 = vsub.f32 0.0, %v507_v52  ;;  %v502_v4 = vadd.f32 %v1171_v33, %v501_v35 }
  0xe5   : > { %v930_v40 = vpop.eup %929  ;;  %v637_v41 = vadd.f32 1.0, %v928_v38  ;;  %955 = vpow2.f32 %v584_v36  ;;  %v910_v44 = vpop.f32.mrf.mxu1  ;;  %v437_v8 = vadd.f32 %v886_v39, %v1171_v33  ;;  %v590_v12 = vmul.f32 1.442695, %v549_v61 }
  0xe6   : > { %v932_v42 = vpop.eup %931  ;;  %v653_v43 = vadd.f32 1.0, %v930_v40  ;;  %v431_v48 = vpop.f32.mrf.mxu0  ;;  %v517_v13 = vadd.f32 %v910_v44, %v1171_v33  ;;  %v622_v16 = vmul.f32 1.442695, %v565_v0  ;;  %v548_v17 = vsub.f32 0.0, %v422_v1 }
  0xe7   : > { %v934_v45 = vpop.eup %933  ;;  %957 = vrcp.f32 %v637_v41  ;;  %v636_v46 = vadd.f32 1.0, %v932_v42  ;;  %v511_v55 = vpop.f32.mrf.mxu1  ;;  %v564_v20 = vsub.f32 0.0, %v502_v4  ;;  %v432_v21 = vadd.f32 %v1171_v33, %v431_v48 }
  0xe8   : > { %959 = vrcp.f32 %v653_v43  ;;  %v652_v49 = vadd.f32 1.0, %v934_v45  ;;  %v936_v51 = vpop.eup %935  ;;  %v889_v58 = vpop.f32.mrf.mxu0  ;;  %v551_v25 = vsub.f32 0.0, %v437_v8  ;;  %v512_v26 = vadd.f32 %v1171_v33, %v511_v55 }
  0xe9   : > { %961 = vrcp.f32 %v636_v46  ;;  %v938_v53 = vpop.eup %937  ;;  %v639_v54 = vadd.f32 1.0, %v936_v51  ;;  %v913_v5 = vpop.f32.mrf.mxu1  ;;  %v567_v30 = vsub.f32 0.0, %v517_v13  ;;  %v447_v31 = vadd.f32 %v889_v58, %v1171_v33 }
  0xea   : > { %963 = vrcp.f32 %v652_v49  ;;  %v940_v56 = vpop.eup %939  ;;  %v655_v57 = vadd.f32 1.0, %v938_v53  ;;  %v441_v9 = vpop.f32.mrf.mxu0  ;;  %v588_v34 = vmul.f32 1.442695, %v548_v17  ;;  %v527_v35 = vadd.f32 %v913_v5, %v1171_v33 }
  0xeb   : > { %965 = vpow2.f32 %v616_v47  ;;  %v942_v59 = vpop.eup %941  ;;  %v638_v60 = vadd.f32 1.0, %v940_v56  ;;  %v521_v22 = vpop.f32.mrf.mxu1  ;;  %v620_v37 = vmul.f32 1.442695, %v564_v20  ;;  %v550_v38 = vsub.f32 0.0, %v432_v21 }
  0xec   : > { %967 = vrcp.f32 %v639_v54  ;;  %v944_v62 = vpop.eup %943  ;;  %v654_v63 = vadd.f32 1.0, %v942_v59  ;;  %v892_v27 = vpop.f32.mrf.mxu0  ;;  %v442_v39 = vadd.f32 %v1171_v33, %v441_v9  ;;  %v594_v42 = vmul.f32 1.442695, %v551_v25 }
  0xed   : > { %969 = vrcp.f32 %v655_v57  ;;  %v946_v2 = vpop.eup %945  ;;  %v641_v3 = vadd.f32 1.0, %v944_v62  ;;  %v916_v40 = vpop.f32.mrf.mxu1  ;;  %v566_v43 = vsub.f32 0.0, %v512_v26  ;;  %v522_v44 = vadd.f32 %v1171_v33, %v521_v22 }
  0xee   : > { %971 = vrcp.f32 %v638_v60  ;;  %v948_v6 = vpop.eup %947  ;;  %v657_v7 = vadd.f32 1.0, %v946_v2  ;;  %v451_v45 = vpop.f32.mrf.mxu0  ;;  %v626_v47 = vmul.f32 1.442695, %v567_v30  ;;  %v553_v48 = vsub.f32 0.0, %v447_v31 }
  0xef   : > { %973 = vrcp.f32 %v654_v63  ;;  %v950_v10 = vpop.eup %949  ;;  %v640_v11 = vadd.f32 1.0, %v948_v6  ;;  %v457_v49 = vadd.f32 %v892_v27, %v1171_v33  ;;  %v569_v52 = vsub.f32 0.0, %v527_v35  ;;  %v531_v0 = vpop.f32.mrf.mxu1 }
  0xf0   : > { %975 = vrcp.f32 %v641_v3  ;;  %v952_v14 = vpop.eup %951  ;;  %v656_v15 = vadd.f32 1.0, %v950_v10  ;;  %v537_v53 = vadd.f32 %v916_v40, %v1171_v33  ;;  %v592_v55 = vmul.f32 1.442695, %v550_v38 }
  0xf1   : > { %977 = vrcp.f32 %v657_v7  ;;  %v954_v18 = vpop.eup %953  ;;  %v643_v19 = vadd.f32 1.0, %v952_v14  ;;  %v552_v56 = vsub.f32 0.0, %v442_v39  ;;  %v452_v57 = vadd.f32 %v1171_v33, %v451_v45 }
  0xf2   : > { %979 = vrcp.f32 %v640_v11  ;;  %v956_v23 = vpop.eup %955  ;;  %v659_v24 = vadd.f32 1.0, %v954_v18  ;;  %v624_v59 = vmul.f32 1.442695, %v566_v43  ;;  %v568_v60 = vsub.f32 0.0, %v522_v44 }
  0xf3   : > { %981 = vrcp.f32 %v656_v15  ;;  %v642_v29 = vadd.f32 1.0, %v956_v23  ;;  %v598_v62 = vmul.f32 1.442695, %v553_v48  ;;  %v555_v63 = vsub.f32 0.0, %v457_v49 }
  0xf4   : > { %v958_v28 = vpop.eup %957  ;;  %983 = vrcp.f32 %v643_v19  ;;  %v630_v2 = vmul.f32 1.442695, %v569_v52  ;;  %v571_v3 = vsub.f32 0.0, %v537_v53  ;;  %v596_v5 = vmul.f32 1.442695, %v552_v56 }
  0xf5   : > { %v960_v32 = vpop.eup %959  ;;  %702 = vst.msk [vmem:[%s1200_s25 + $0x8] sm:$0xff] %vm700_vm2, %v958_v28  ;;  %985 = vrcp.f32 %v659_v24  ;;  %v554_v6 = vsub.f32 0.0, %v452_v57  ;;  %v628_v8 = vmul.f32 1.442695, %v568_v60  ;;  %v532_v9 = vadd.f32 %v1171_v33, %v531_v0 }
  0xf6   : > { %v962_v36 = vpop.eup %961  ;;  %718 = vst.msk [vmem:[%s1200_s25 + $0x88] sm:$0xff] %vm700_vm2, %v960_v32  ;;  %987 = vrcp.f32 %v642_v29  ;;  %v602_v11 = vmul.f32 1.442695, %v555_v63  ;;  %v634_v13 = vmul.f32 1.442695, %v571_v3 }
  0xf7   : > { %v964_v41 = vpop.eup %963  ;;  %701 = vst.msk [vmem:[%s1200_s25] sm:$0xff] %vm700_vm2, %v962_v36  ;;  %989 = vpow2.f32 %v590_v12  ;;  %v600_v15 = vmul.f32 1.442695, %v554_v6  ;;  %v570_v33 = vsub.f32 0.0, %v532_v9 }
  0xf8   : > { %v966_v46 = vpop.eup %965  ;;  %717 = vst.msk [vmem:[%s1200_s25 + $0x80] sm:$0xff] %vm700_vm2, %v964_v41  ;;  %991 = vpow2.f32 %v622_v16 }
  0xf9   : > { %v968_v50 = vpop.eup %967  ;;  %v658_v51 = vadd.f32 1.0, %v966_v46  ;;  %993 = vpow2.f32 %v588_v34  ;;  %v632_v24 = vmul.f32 1.442695, %v570_v33 }
  0xfa   : > { %v970_v54 = vpop.eup %969  ;;  %704 = vst.msk [vmem:[%s1200_s25 + $0x18] sm:$0xff] %vm700_vm2, %v968_v50  ;;  %995 = vpow2.f32 %v620_v37 }
  0xfb   : > { %v972_v58 = vpop.eup %971  ;;  %720 = vst.msk [vmem:[%s1200_s25 + $0x98] sm:$0xff] %vm700_vm2, %v970_v54  ;;  %997 = vrcp.f32 %v658_v51 }
  0xfc   : > { %v974_v61 = vpop.eup %973  ;;  %703 = vst.msk [vmem:[%s1200_s25 + $0x10] sm:$0xff] %vm700_vm2, %v972_v58  ;;  %999 = vpow2.f32 %v594_v42 }
  0xfd   : > { %v976_v1 = vpop.eup %975  ;;  %719 = vst.msk [vmem:[%s1200_s25 + $0x90] sm:$0xff] %vm700_vm2, %v974_v61  ;;  %1001 = vpow2.f32 %v626_v47 }
  0xfe   : > { %v978_v4 = vpop.eup %977  ;;  %706 = vst.msk [vmem:[%s1200_s25 + $0x28] sm:$0xff] %vm700_vm2, %v976_v1  ;;  %1003 = vpow2.f32 %v592_v55 }
  0xff   : > { %v980_v7 = vpop.eup %979  ;;  %722 = vst.msk [vmem:[%s1200_s25 + $0xa8] sm:$0xff] %vm700_vm2, %v978_v4  ;;  %1005 = vpow2.f32 %v624_v59 }
 0x100   : > { %v982_v10 = vpop.eup %981  ;;  %705 = vst.msk [vmem:[%s1200_s25 + $0x20] sm:$0xff] %vm700_vm2, %v980_v7  ;;  %1007 = vpow2.f32 %v598_v62 }
 0x101   : > { %v984_v12 = vpop.eup %983  ;;  %721 = vst.msk [vmem:[%s1200_s25 + $0xa0] sm:$0xff] %vm700_vm2, %v982_v10  ;;  %1009 = vpow2.f32 %v630_v2 }
 0x102   : > { %v986_v14 = vpop.eup %985  ;;  %708 = vst.msk [vmem:[%s1200_s25 + $0x38] sm:$0xff] %vm700_vm2, %v984_v12  ;;  %1011 = vpow2.f32 %v596_v5 }
 0x103   : > { %v988_v16 = vpop.eup %987  ;;  %724 = vst.msk [vmem:[%s1200_s25 + $0xb8] sm:$0xff] %vm700_vm2, %v986_v14  ;;  %1013 = vpow2.f32 %v628_v8 }
 0x104   : > { %v990_v17 = vpop.eup %989  ;;  %707 = vst.msk [vmem:[%s1200_s25 + $0x30] sm:$0xff] %vm700_vm2, %v988_v16  ;;  %1015 = vpow2.f32 %v602_v11 }
 0x105   : > { %v992_v18 = vpop.eup %991  ;;  %v645_v19 = vadd.f32 1.0, %v990_v17  ;;  %1017 = vpow2.f32 %v634_v13 }
 0x106   : > { %v994_v20 = vpop.eup %993  ;;  %v661_v21 = vadd.f32 1.0, %v992_v18  ;;  %1019 = vpow2.f32 %v600_v15 }
 0x107   : > { %v996_v22 = vpop.eup %995  ;;  %1021 = vrcp.f32 %v645_v19  ;;  %v644_v23 = vadd.f32 1.0, %v994_v20 }
 0x108   : > { %v998_v25 = vpop.eup %997  ;;  %1023 = vrcp.f32 %v661_v21  ;;  %v660_v26 = vadd.f32 1.0, %v996_v22 }
 0x109   : > { %v1000_v27 = vpop.eup %999  ;;  %723 = vst.msk [vmem:[%s1200_s25 + $0xb0] sm:$0xff] %vm700_vm2, %v998_v25  ;;  %1025 = vrcp.f32 %v644_v23 }
 0x10a   : > { %v1002_v28 = vpop.eup %1001  ;;  %1027 = vrcp.f32 %v660_v26  ;;  %v647_v29 = vadd.f32 1.0, %v1000_v27 }
 0x10b   : > { %v1004_v30 = vpop.eup %1003  ;;  %v663_v31 = vadd.f32 1.0, %v1002_v28  ;;  %1029 = vpow2.f32 %v632_v24 }
 0x10c   : > { %v1006_v32 = vpop.eup %1005  ;;  %1031 = vrcp.f32 %v647_v29  ;;  %v646_v34 = vadd.f32 1.0, %v1004_v30 }
 0x10d   : > { %v1008_v35 = vpop.eup %1007  ;;  %1033 = vrcp.f32 %v663_v31  ;;  %v662_v36 = vadd.f32 1.0, %v1006_v32 }
 0x10e   : > { %v1010_v37 = vpop.eup %1009  ;;  %1035 = vrcp.f32 %v646_v34  ;;  %v649_v38 = vadd.f32 1.0, %v1008_v35 }
 0x10f   : > { %v1012_v39 = vpop.eup %1011  ;;  %1037 = vrcp.f32 %v662_v36  ;;  %v665_v40 = vadd.f32 1.0, %v1010_v37 }
 0x110   : > { %v1014_v41 = vpop.eup %1013  ;;  %1039 = vrcp.f32 %v649_v38  ;;  %v648_v42 = vadd.f32 1.0, %v1012_v39 }
 0x111   : > { %v1016_v43 = vpop.eup %1015  ;;  %1041 = vrcp.f32 %v665_v40  ;;  %v664_v44 = vadd.f32 1.0, %v1014_v41 }
 0x112   : > { %v1018_v45 = vpop.eup %1017  ;;  %1043 = vrcp.f32 %v648_v42  ;;  %v651_v46 = vadd.f32 1.0, %v1016_v43 }
 0x113   : > { %v1020_v47 = vpop.eup %1019  ;;  %1045 = vrcp.f32 %v664_v44  ;;  %v667_v48 = vadd.f32 1.0, %v1018_v45 }
 0x114   : > { %v1022_v49 = vpop.eup %1021  ;;  %1047 = vrcp.f32 %v651_v46  ;;  %v650_v50 = vadd.f32 1.0, %v1020_v47 }
 0x115   : > { %v1024_v51 = vpop.eup %1023  ;;  %710 = vst.msk [vmem:[%s1200_s25 + $0x48] sm:$0xff] %vm700_vm2, %v1022_v49  ;;  %1049 = vrcp.f32 %v667_v48 }
 0x116   : > { %v1026_v52 = vpop.eup %1025  ;;  %726 = vst.msk [vmem:[%s1200_s25 + $0xc8] sm:$0xff] %vm700_vm2, %v1024_v51  ;;  %1051 = vrcp.f32 %v650_v50 }
 0x117   : > { %v1028_v53 = vpop.eup %1027  ;;  %709 = vst.msk [vmem:[%s1200_s25 + $0x40] sm:$0xff] %vm700_vm2, %v1026_v52 }
 0x118   : > { %v1030_v54 = vpop.eup %1029  ;;  %725 = vst.msk [vmem:[%s1200_s25 + $0xc0] sm:$0xff] %vm700_vm2, %v1028_v53 }
 0x119   : > { %v1032_v55 = vpop.eup %1031  ;;  %v666_v56 = vadd.f32 1.0, %v1030_v54 }
 0x11a   : > { %v1034_v57 = vpop.eup %1033  ;;  %712 = vst.msk [vmem:[%s1200_s25 + $0x58] sm:$0xff] %vm700_vm2, %v1032_v55 }
 0x11b   : > { %v1036_v58 = vpop.eup %1035  ;;  %728 = vst.msk [vmem:[%s1200_s25 + $0xd8] sm:$0xff] %vm700_vm2, %v1034_v57  ;;  %1053 = vrcp.f32 %v666_v56 }
 0x11c   : > { %v1038_v59 = vpop.eup %1037  ;;  %711 = vst.msk [vmem:[%s1200_s25 + $0x50] sm:$0xff] %vm700_vm2, %v1036_v58 }
 0x11d   : > { %v1040_v60 = vpop.eup %1039  ;;  %727 = vst.msk [vmem:[%s1200_s25 + $0xd0] sm:$0xff] %vm700_vm2, %v1038_v59 }
 0x11e   : > { %v1042_v61 = vpop.eup %1041  ;;  %714 = vst.msk [vmem:[%s1200_s25 + $0x68] sm:$0xff] %vm700_vm2, %v1040_v60 }
 0x11f   : > { %v1044_v62 = vpop.eup %1043  ;;  %730 = vst.msk [vmem:[%s1200_s25 + $0xe8] sm:$0xff] %vm700_vm2, %v1042_v61 }
 0x120   : > { %v1046_v63 = vpop.eup %1045  ;;  %713 = vst.msk [vmem:[%s1200_s25 + $0x60] sm:$0xff] %vm700_vm2, %v1044_v62 }
 0x121   : > { %v1048_v0 = vpop.eup %1047  ;;  %729 = vst.msk [vmem:[%s1200_s25 + $0xe0] sm:$0xff] %vm700_vm2, %v1046_v63 }
 0x122   : > { %v1050_v1 = vpop.eup %1049  ;;  %716 = vst.msk [vmem:[%s1200_s25 + $0x78] sm:$0xff] %vm700_vm2, %v1048_v0 }
 0x123   : > { %v1052_v2 = vpop.eup %1051  ;;  %732 = vst.msk [vmem:[%s1200_s25 + $0xf8] sm:$0xff] %vm700_vm2, %v1050_v1 }
 0x124   : > { %715 = vst.msk [vmem:[%s1200_s25 + $0x70] sm:$0xff] %vm700_vm2, %v1052_v2 }
 0x128   : > { %v1054_v3 = vpop.eup %1053 }
 0x129   : > { %731 = vst.msk [vmem:[%s1200_s25 + $0xf0] sm:$0xff] %vm700_vm2, %v1054_v3 }
 0x12a PF: > { %s13_s12 = sadd.s32 1, %s1061_s12  }
 0x12b   : > { %p10_p4 = scmp.ge.s32.totalorder %s13_s12, 4  }
 0x12d   :  { %12 = sbr.rel (!%p10_p4) target bundleno = 1 (0x1), region = 62 }

// kernel: inception3b_forward.7
= control target key start
LH: loop header
LB: loop body
LE: loop exit
PB: predicated region body
PF: predicated region fallthrough
CT: control target
= control target key end

     0   :  { %s1666_s12 = smov 0   ;;  %s2321_s0 = inlined_call_operand.vmem [shape: f32[2,18,18,4], index: 0, kind: input, shape index: {}]   ;;  %s2322_s1 = inlined_call_operand.vmem [shape: f32[4,8], index: 1, kind: input, shape index: {}]   ;;  %s2323_s2 = inlined_call_operand.vmem [shape: f32[1,8], index: 2, kind: input, shape index: {}]   ;;  %s2324_s3 = inlined_call_operand.vmem [shape: f32[2,16,16,8], index: 3, kind: output, shape index: {}]  }
   0x1 LB: > { %s1371_s13 = sadd.s32 4294967295, %s1644_s12   ;;  %p1375_p0 = scmp.ge.s32.totalorder %s1644_s12, 1  ;;  %s1644_s12 = sphi %s1666_s12, %s13_s12  }
   0x2   : > { %p137_p1 = scmp.lt.s32.totalorder %s1644_s12, 3 }
   0x4   : > { %p138_p2 = pnand %p1375_p0, %p137_p1 }
   0x5   : > { %p161_p3 = scmp.lt.s32.totalorder (!%p138_p2), %s1371_s13, 1 }
   0x6   : > { %141 = sbr.rel (%p138_p2) target bundleno = 365 (0x16d), region = 32 }
   0xb   : > { %v789_v0 = vld [vmem:[%s2322_s1] sm:$0xf]  ;;  %vm894_vm0 = vcmask 1043456   ;;  %s2326_s13 = smov (!%p161_p3, %s1371_s13), 1  ;;  %vm273_vm1 = vcmask 1046528   ;;  %vm418_vm2 = vcmask 1045504  }
   0xc   : > { %1449 = vmatprep.subr.msk.mxu0 %vm894_vm0, %v789_v0  ;;  %1499 = vmatprep.subr.msk.mxu1 %vm894_vm0, %v789_v0  ;;  %s1501_s16 = smul.u32 432, %s2326_s13  ;;  %vm797_vm3 = vcmask 31744   ;;  %s1415_s22 = sshll.u32 %s2326_s13, 8  ;;  %vm1283_vm4 = vcmask 64512  }
   0xd   : > { %1450 = vmatpush3.msk.msra.mxu0 %vm894_vm0, %v789_v0  ;;  %1500 = vmatpush3.msk.msra.mxu1 %vm894_vm0, %v789_v0  ;;  %s2232_s25 = scalar_lea.vmem %s2324_s3, %s1415_s22 }
   0xe   : > { %s1683_s19 = scalar_lea.vmem %s2321_s0, %s1501_s16 }
   0xf   : > { %v171_v1 = vld [vmem:[%s1683_s19] sm:$0xff]  ;;  %v1687_v2 = vld [vmem:[%s1683_s19 + $0x8] sm:$0xff]  ;;  %v174_v3 = vld [vmem:[%s1683_s19 + $0x18] sm:$0xff] }
  0x10   : > { %v1691_v4 = vld [vmem:[%s1683_s19 + $0x20] sm:$0xff]  ;;  %v1694_v5 = vld [vmem:[%s1683_s19 + $0x30] sm:$0xff]  ;;  %v1697_v6 = vld [vmem:[%s1683_s19 + $0x38] sm:$0xff]  ;;  %v274_v7 = vrot.slane %v171_v1, 1  ;;  %v275_v8 = vrot.slane %v1687_v2, 1  ;;  %v279_v9 = vrot.slane %v174_v3, 1 }
  0x11   : > { %v1701_v10 = vld [vmem:[%s1683_s19 + $0x48] sm:$0xff]  ;;  %v1704_v11 = vld [vmem:[%s1683_s19 + $0x50] sm:$0xff]  ;;  %v280_v12 = vrot.slane %v1691_v4, 1  ;;  %v284_v13 = vrot.slane %v1694_v5, 1  ;;  %v285_v14 = vrot.slane %v1697_v6, 1  ;;  %v419_v15 = vrot.slane %v171_v1, 2 }
  0x12   : > { %v276_v16 = vsel %vm273_vm1, %v274_v7, %v275_v8  ;;  %v289_v17 = vrot.slane %v1701_v10, 1  ;;  %v290_v18 = vrot.slane %v1704_v11, 1  ;;  %v420_v19 = vrot.slane %v1687_v2, 2  ;;  %v1716_v20 = vld [vmem:[%s1683_s19 + $0xc0] sm:$0xff]  ;;  %v1727_v25 = vld [vmem:[%s1683_s19 + $0xc8] sm:$0xff]  ;;  %v1730_v26 = vld [vmem:[%s1683_s19 + $0xd8] sm:$0xff] }
  0x13   : > { %v281_v21 = vsel %vm273_vm1, %v279_v9, %v280_v12  ;;  %v1724_v22 = vsel %vm273_vm1, %v284_v13, %v285_v14  ;;  %v386_v23 = vmax.f32 %v171_v1, %v276_v16  ;;  %v424_v24 = vrot.slane %v174_v3, 2  ;;  %v1733_v27 = vld [vmem:[%s1683_s19 + $0xe0] sm:$0xff]  ;;  %v1746_v32 = vld [vmem:[%s1683_s19 + $0xf0] sm:$0xff]  ;;  %v1752_v37 = vld [vmem:[%s1683_s19 + $0xf8] sm:$0xff] }
  0x14   : > { %v1738_v28 = vsel %vm273_vm1, %v289_v17, %v290_v18  ;;  %v388_v29 = vmax.f32 %v174_v3, %v281_v21  ;;  %v390_v30 = vmax.f32 %v1694_v5, %v1724_v22  ;;  %v421_v31 = vsel %vm418_vm2, %v419_v15, %v420_v19  ;;  %v1755_v38 = vld [vmem:[%s1683_s19 + $0x108] sm:$0xff]  ;;  %v1758_v39 = vld [vmem:[%s1683_s19 + $0x110] sm:$0xff] }
  0x15   : > { %v425_v33 = vrot.slane %v1691_v4, 2  ;;  %v429_v34 = vrot.slane %v1694_v5, 2  ;;  %v430_v35 = vrot.slane %v1697_v6, 2  ;;  %v531_v36 = vmax.f32 %v386_v23, %v421_v31  ;;  %v173_v0 = vld [vmem:[%s1683_s19 + $0x10] sm:$0x3] }
  0x16   : > { %v314_v40 = vrot.slane %v1716_v20, 1  ;;  %v315_v41 = vrot.slane %v1727_v25, 1  ;;  %v319_v42 = vrot.slane %v1730_v26, 1  ;;  %v320_v43 = vrot.slane %v1733_v27, 1  ;;  %v176_v13 = vld [vmem:[%s1683_s19 + $0x28] sm:$0x3] }
  0x17   : > { %v426_v44 = vsel %vm418_vm2, %v424_v24, %v425_v33  ;;  %v431_v45 = vsel %vm418_vm2, %v429_v34, %v430_v35  ;;  %v563_v46 = vmax.f32 %v531_v36, %v174_v3  ;;  %v324_v47 = vrot.slane %v1746_v32, 1  ;;  %v179_v36 = vld [vmem:[%s1683_s19 + $0x40] sm:$0x3] }
  0x18   : > { %v533_v48 = vmax.f32 %v388_v29, %v426_v44  ;;  %v535_v49 = vmax.f32 %v390_v30, %v431_v45  ;;  %v1774_v50 = vsel %vm273_vm1, %v314_v40, %v315_v41  ;;  %v1779_v51 = vsel %vm273_vm1, %v319_v42, %v320_v43 }
  0x19   : > { %v605_v52 = vmax.f32 %v563_v46, %v281_v21  ;;  %v325_v53 = vrot.slane %v1752_v37, 1  ;;  %v329_v54 = vrot.slane %v1755_v38, 1  ;;  %v330_v55 = vrot.slane %v1758_v39, 1 }
  0x1a   : > { %v565_v56 = vmax.f32 %v533_v48, %v1694_v5  ;;  %v567_v57 = vmax.f32 %v535_v49, %v1701_v10  ;;  %v402_v58 = vmax.f32 %v1716_v20, %v1774_v50  ;;  %v404_v59 = vmax.f32 %v1730_v26, %v1779_v51 }
  0x1b   : > { %v644_v60 = vmax.f32 %v605_v52, %v426_v44  ;;  %v1793_v61 = vsel %vm273_vm1, %v324_v47, %v325_v53  ;;  %v1798_v62 = vsel %vm273_vm1, %v329_v54, %v330_v55  ;;  %v459_v63 = vrot.slane %v1716_v20, 2  ;;  %v197_v54 = vld [vmem:[%s1683_s19 + $0xd0] sm:$0x3] }
  0x1c   : > { %v607_v1 = vmax.f32 %v565_v56, %v1724_v22  ;;  %v1804_v3 = vmax.f32 %v567_v57, %v1738_v28  ;;  %v406_v7 = vmax.f32 %v1746_v32, %v1793_v61  ;;  %v460_v9 = vrot.slane %v1727_v25, 2 }
  0x1d   : > { %v676_v15 = vmax.f32 %v644_v60, %v1694_v5  ;;  %v464_v16 = vrot.slane %v1730_v26, 2  ;;  %v465_v17 = vrot.slane %v1733_v27, 2  ;;  %v469_v21 = vrot.slane %v1746_v32, 2 }
  0x1e   : > { %v646_v23 = vmax.f32 %v607_v1, %v431_v45  ;;  %v1817_v24 = vsel %vm418_vm2, %v459_v63, %v460_v9  ;;  %v470_v29 = vrot.slane %v1752_v37, 2  ;;  %v277_v30 = vrot.slane %v173_v0, 1 }
  0x1f   : > { %v718_v31 = vmax.f32 %v676_v15, %v1724_v22  ;;  %v1824_v5 = vsel %vm418_vm2, %v464_v16, %v465_v17  ;;  %v547_v34 = vmax.f32 %v402_v58, %v1817_v24  ;;  %v282_v40 = vrot.slane %v176_v13, 1 }
  0x20   : > { %v1829_v42 = vmax.f32 %v646_v23, %v1701_v10  ;;  %v471_v44 = vsel %vm418_vm2, %v469_v21, %v470_v29  ;;  %v549_v46 = vmax.f32 %v404_v59, %v1824_v5  ;;  %v278_v22 = vsel %vm273_vm1, %v275_v8, %v277_v30  ;;  %v203_v30 = vld [vmem:[%s1683_s19 + $0x100] sm:$0x3] }
  0x21   : > { %v757_v47 = vmax.f32 %v718_v31, %v431_v45  ;;  %v551_v48 = vmax.f32 %v406_v7, %v471_v44  ;;  %v579_v49 = vmax.f32 %v547_v34, %v1730_v26  ;;  %v283_v52 = vsel %vm273_vm1, %v280_v12, %v282_v40 }
  0x22   : > { %v581_v56 = vmax.f32 %v549_v46, %v1746_v32  ;;  %v287_v57 = vrot.slane %v179_v36, 1  ;;  %v387_v58 = vmax.f32 %v1687_v2, %v278_v22  ;;  %v389_v59 = vmax.f32 %v1691_v4, %v283_v52 }
  0x23   : > { %1451 = vmatprep.mubr.msk.f32.mxu0 %vm797_vm3, %v757_v47  ;;  %v583_v8 = vmax.f32 %v551_v48, %v1755_v38  ;;  %v621_v45 = vmax.f32 %v579_v49, %v1779_v51  ;;  %v422_v60 = vrot.slane %v173_v0, 2  ;;  %v427_v63 = vrot.slane %v176_v13, 2  ;;  %v200_v13 = vld [vmem:[%s1683_s19 + $0xe8] sm:$0x3] }
  0x24   : > { %v623_v12 = vmax.f32 %v581_v56, %v1793_v61  ;;  %v288_v1 = vsel %vm273_vm1, %v285_v14, %v287_v57  ;;  %v432_v7 = vrot.slane %v179_v36, 2  ;;  %v317_v15 = vrot.slane %v197_v54, 1 }
  0x25   : > { %v1854_v16 = vmax.f32 %v583_v8, %v1798_v62  ;;  %v660_v21 = vmax.f32 %v621_v45, %v1824_v5  ;;  %v391_v23 = vmax.f32 %v1697_v6, %v288_v1  ;;  %v423_v0 = vsel %vm418_vm2, %v420_v19, %v422_v60 }
  0x26   : > { %v662_v31 = vmax.f32 %v623_v12, %v471_v44  ;;  %v428_v14 = vsel %vm418_vm2, %v425_v33, %v427_v63  ;;  %v1869_v34 = vsel %vm418_vm2, %v430_v35, %v432_v7  ;;  %v532_v36 = vmax.f32 %v387_v58, %v423_v0 }
  0x27   : > { %v692_v40 = vmax.f32 %v660_v21, %v1746_v32  ;;  %v534_v46 = vmax.f32 %v389_v59, %v428_v14  ;;  %v1873_v2 = vmax.f32 %v391_v23, %v1869_v34  ;;  %v1878_v19 = vsel %vm273_vm1, %v315_v41, %v317_v15 }
  0x28   : > { %v1881_v22 = vmax.f32 %v662_v31, %v1755_v38  ;;  %v564_v33 = vmax.f32 %v532_v36, %v1691_v4  ;;  %v322_v47 = vrot.slane %v200_v13, 1  ;;  %v327_v35 = vrot.slane %v203_v30, 1 }
  0x29   : > { %v734_v48 = vmax.f32 %v692_v40, %v1793_v61  ;;  %v566_v32 = vmax.f32 %v534_v46, %v1697_v6  ;;  %v568_v49 = vmax.f32 %v1873_v2, %v1704_v11  ;;  %v403_v56 = vmax.f32 %v1727_v25, %v1878_v19 }
  0x2a   : > { %v606_v57 = vmax.f32 %v564_v33, %v283_v52  ;;  %v1893_v41 = vsel %vm273_vm1, %v320_v43, %v322_v47  ;;  %v1898_v4 = vsel %vm273_vm1, %v325_v53, %v327_v35  ;;  %v462_v61 = vrot.slane %v197_v54, 2 }
  0x2b   : > { %v773_v58 = vmax.f32 %v734_v48, %v471_v44  ;;  %v608_v59 = vmax.f32 %v566_v32, %v288_v1  ;;  %v405_v8 = vmax.f32 %v1733_v27, %v1893_v41  ;;  %v407_v45 = vmax.f32 %v1752_v37, %v1898_v4  ;;  %v206_v32 = vld [vmem:[%s1683_s19 + $0x118] sm:$0x3] }
  0x2c   : > { %v645_v52 = vmax.f32 %v606_v57, %v428_v14  ;;  %v1907_v43 = vsel %vm418_vm2, %v460_v9, %v462_v61  ;;  %v467_v60 = vrot.slane %v200_v13, 2  ;;  %v472_v63 = vrot.slane %v203_v30, 2 }
  0x2d   : > { %1475 = vmatprep.mubr.msk.f32.mxu1 %vm797_vm3, %v773_v58  ;;  %v647_v53 = vmax.f32 %v608_v59, %v1869_v34  ;;  %v548_v44 = vmax.f32 %v403_v56, %v1907_v43  ;;  %v392_v54 = vmax.f32 %v1701_v10, %v1738_v28  ;;  %v434_v12 = vrot.slane %v1701_v10, 2 }
  0x2e   : > { %v677_v7 = vmax.f32 %v645_v52, %v1697_v6  ;;  %v1919_v9 = vsel %vm418_vm2, %v465_v17, %v467_v60  ;;  %v473_v15 = vsel %vm418_vm2, %v470_v29, %v472_v63  ;;  %v435_v21 = vrot.slane %v1704_v11, 2  ;;  %v1964_v52 = vld [vmem:[%s1683_s19 + $0x120] sm:$0xff] }
  0x2f   : > { %v550_v23 = vmax.f32 %v405_v8, %v1919_v9  ;;  %v552_v0 = vmax.f32 %v407_v45, %v473_v15  ;;  %v580_v10 = vmax.f32 %v548_v44, %v1733_v27  ;;  %v720_v6 = vmax.f32 %v1829_v42, %v1738_v28  ;;  %v182_v28 = vld [vmem:[%s1683_s19 + $0x58] sm:$0x3] }
  0x30   : > { %v719_v13 = vmax.f32 %v677_v7, %v288_v1  ;;  %v1930_v30 = vsel %vm418_vm2, %v434_v12, %v435_v21  ;;  %v408_v17 = vmax.f32 %v1755_v38, %v1798_v62  ;;  %v474_v29 = vrot.slane %v1755_v38, 2  ;;  %v1944_v1 = vld [vmem:[%s1683_s19 + $0x60] sm:$0xff] }
  0x31   : > { %v582_v31 = vmax.f32 %v550_v23, %v1752_v37  ;;  %v584_v14 = vmax.f32 %v552_v0, %v1758_v39  ;;  %v622_v36 = vmax.f32 %v580_v10, %v1893_v41  ;;  %v1939_v40 = vmax.f32 %v392_v54, %v1930_v30  ;;  %v1981_v54 = vld [vmem:[%s1683_s19 + $0x68] sm:$0xff] }
  0x32   : > { %v758_v42 = vmax.f32 %v719_v13, %v1869_v34  ;;  %v648_v46 = vmax.f32 %v1804_v3, %v1930_v30  ;;  %v759_v33 = vmax.f32 %v720_v6, %v1930_v30  ;;  %v475_v38 = vrot.slane %v1758_v39, 2  ;;  %v1996_v13 = vld [vmem:[%s1683_s19 + $0x128] sm:$0xff] }
  0x33   : > { %v624_v47 = vmax.f32 %v582_v31, %v1898_v4  ;;  %v661_v35 = vmax.f32 %v622_v36, %v1919_v9  ;;  %v569_v48 = vmax.f32 %v1939_v40, %v1944_v1  ;;  %v736_v34 = vmax.f32 %v1881_v22, %v1798_v62 }
  0x34   : > { %1452 = vmatmul.mubr.msk.f32.vlgmr.msra.gmra.mxu0 %vm797_vm3, %v758_v42  ;;  %v476_v3 = vsel %vm418_vm2, %v474_v29, %v475_v38  ;;  %v292_v56 = vrot.slane %v182_v28, 1  ;;  %v437_v57 = vrot.slane %v182_v28, 2  ;;  %v679_v61 = vmax.f32 %v647_v53, %v1704_v11 }
  0x35   : > { %v663_v58 = vmax.f32 %v624_v47, %v473_v15  ;;  %v693_v59 = vmax.f32 %v661_v35, %v1752_v37  ;;  %1454 = vmatprep.mubr.msk.f32.mxu0 %vm797_vm3, %v759_v33  ;;  %v553_v8 = vmax.f32 %v408_v17, %v476_v3  ;;  %v664_v45 = vmax.f32 %v1854_v16, %v476_v3  ;;  %v185_v33 = vld [vmem:[%s1683_s19 + $0x70] sm:$0x3] }
  0x36   : > { %v775_v62 = vmax.f32 %v736_v34, %v476_v3  ;;  %v293_v22 = vsel %vm273_vm1, %v290_v18, %v292_v56  ;;  %v1970_v60 = vsel %vm418_vm2, %v435_v21, %v437_v57  ;;  %v332_v63 = vrot.slane %v206_v32, 1 }
  0x37   : > { %v735_v53 = vmax.f32 %v693_v59, %v1898_v4  ;;  %v585_v37 = vmax.f32 %v553_v8, %v1964_v52  ;;  %v393_v44 = vmax.f32 %v1704_v11, %v293_v22  ;;  %v1978_v16 = vmax.f32 %v568_v49, %v293_v22  ;;  %v186_v59 = vld [vmem:[%s1683_s19 + $0x78] sm:$0xff] }
  0x38   : > { %v721_v12 = vmax.f32 %v679_v61, %v293_v22  ;;  %v333_v18 = vsel %vm273_vm1, %v330_v55, %v332_v63  ;;  %v477_v7 = vrot.slane %v206_v32, 2  ;;  %v695_v4 = vmax.f32 %v663_v58, %v1758_v39 }
  0x39   : > { %v774_v21 = vmax.f32 %v735_v53, %v473_v15  ;;  %v538_v23 = vmax.f32 %v393_v44, %v1970_v60  ;;  %v649_v0 = vmax.f32 %v1978_v16, %v1970_v60  ;;  %v409_v11 = vmax.f32 %v1758_v39, %v333_v18 }
  0x3a   : > { %v760_v2 = vmax.f32 %v721_v12, %v1970_v60  ;;  %v478_v49 = vsel %vm418_vm2, %v475_v38, %v477_v7  ;;  %v626_v10 = vmax.f32 %v584_v14, %v333_v18  ;;  %v737_v6 = vmax.f32 %v695_v4, %v333_v18  ;;  %v209_v60 = vld [vmem:[%s1683_s19 + $0x130] sm:$0x3] }
  0x3b   : > { %1476 = vmatmul.mubr.msk.f32.vlgmr.msra.gmra.mxu1 %vm797_vm3, %v774_v21  ;;  %v570_v55 = vmax.f32 %v538_v23, %v1981_v54  ;;  %v554_v15 = vmax.f32 %v409_v11, %v478_v49  ;;  %v294_v30 = vrot.slane %v1944_v1, 1  ;;  %v295_v17 = vrot.slane %v1981_v54, 1 }
  0x3c   : > { %1478 = vmatprep.mubr.msk.f32.mxu1 %vm797_vm3, %v775_v62  ;;  %1455 = vmatmul.mubr.msk.f32.gmra.mxu0 %vm797_vm3, %v760_v2  ;;  %v665_v39 = vmax.f32 %v626_v10, %v478_v49  ;;  %v776_v29 = vmax.f32 %v737_v6, %v478_v49  ;;  %v439_v31 = vrot.slane %v1944_v1, 2  ;;  %v440_v14 = vrot.slane %v1981_v54, 2  ;;  %v2038_v2 = vld [vmem:[%s1683_s19 + $0x80] sm:$0xff] }
  0x3d   : > { %v586_v36 = vmax.f32 %v554_v15, %v1996_v13  ;;  %v296_v40 = vsel %vm273_vm1, %v294_v30, %v295_v17  ;;  %v680_v28 = vmax.f32 %v648_v46, %v1944_v1  ;;  %v334_v42 = vrot.slane %v1964_v52, 1 }
  0x3e   : > { %v394_v38 = vmax.f32 %v1944_v1, %v296_v40  ;;  %v441_v47 = vsel %vm418_vm2, %v439_v31, %v440_v14  ;;  %v611_v35 = vmax.f32 %v569_v48, %v296_v40  ;;  %v335_v34 = vrot.slane %v1996_v13, 1  ;;  %v2046_v31 = vld [vmem:[%s1683_s19 + $0x140] sm:$0xff] }
  0x3f   : > { %1479 = vmatmul.mubr.msk.f32.gmra.mxu1 %vm797_vm3, %v776_v29  ;;  %v722_v32 = vmax.f32 %v680_v28, %v296_v40  ;;  %v479_v3 = vrot.slane %v1964_v52, 2  ;;  %v480_v56 = vrot.slane %v1996_v13, 2  ;;  %v696_v46 = vmax.f32 %v664_v45, %v1964_v52 }
  0x40   : > { %v539_v57 = vmax.f32 %v394_v38, %v441_v47  ;;  %v650_v61 = vmax.f32 %v611_v35, %v441_v47  ;;  %v336_v58 = vsel %vm273_vm1, %v334_v42, %v335_v34  ;;  %v297_v1 = vrot.slane %v185_v33, 1 }
  0x41   : > { %v761_v48 = vmax.f32 %v722_v32, %v441_v47  ;;  %v410_v8 = vmax.f32 %v1964_v52, %v336_v58  ;;  %v2020_v62 = vsel %vm418_vm2, %v479_v3, %v480_v56  ;;  %v2022_v22 = vmax.f32 %v585_v37, %v336_v58  ;;  %v210_v37 = vld [vmem:[%s1683_s19 + $0x138] sm:$0xff] }
  0x42   : > { %v571_v63 = vmax.f32 %v539_v57, %v186_v59  ;;  %v738_v53 = vmax.f32 %v696_v46, %v336_v58  ;;  %v298_v45 = vsel %vm273_vm1, %v295_v17, %v297_v1  ;;  %v442_v44 = vrot.slane %v185_v33, 2  ;;  %v188_v58 = vld [vmem:[%s1683_s19 + $0x88] sm:$0x3] }
  0x43   : > { %1457 = vmatprep.mubr.msk.f32.mxu0 %vm797_vm3, %v761_v48  ;;  %v555_v16 = vmax.f32 %v410_v8, %v2020_v62  ;;  %v666_v12 = vmax.f32 %v2022_v22, %v2020_v62  ;;  %v395_v52 = vmax.f32 %v1981_v54, %v298_v45  ;;  %v2031_v18 = vmax.f32 %v570_v55, %v298_v45 }
  0x44   : > { %v777_v7 = vmax.f32 %v738_v53, %v2020_v62  ;;  %v443_v4 = vsel %vm418_vm2, %v440_v14, %v442_v44  ;;  %v681_v21 = vmax.f32 %v649_v0, %v1981_v54  ;;  %v337_v23 = vrot.slane %v209_v60, 1 }
  0x45   : > { %v587_v11 = vmax.f32 %v555_v16, %v210_v37  ;;  %v540_v49 = vmax.f32 %v395_v52, %v443_v4  ;;  %v651_v10 = vmax.f32 %v2031_v18, %v443_v4  ;;  %v482_v6 = vrot.slane %v209_v60, 2 }
  0x46   : > { %1481 = vmatprep.mubr.msk.f32.mxu1 %vm797_vm3, %v777_v7  ;;  %v723_v55 = vmax.f32 %v681_v21, %v298_v45  ;;  %v338_v15 = vsel %vm273_vm1, %v335_v34, %v337_v23  ;;  %v697_v30 = vmax.f32 %v665_v39, %v1996_v13  ;;  %v299_v17 = vrot.slane %v186_v59, 1  ;;  %v212_v45 = vld [vmem:[%s1683_s19 + $0x148] sm:$0x3]  ;;  %v213_v23 = vld [vmem:[%s1683_s19 + $0x150] sm:$0xff] }
  0x47   : > { %v572_v29 = vmax.f32 %v540_v49, %v2038_v2  ;;  %v411_v54 = vmax.f32 %v1996_v13, %v338_v15  ;;  %v2050_v0 = vsel %vm418_vm2, %v480_v56, %v482_v6  ;;  %v628_v14 = vmax.f32 %v586_v36, %v338_v15 }
  0x48   : > { %v762_v40 = vmax.f32 %v723_v55, %v443_v4  ;;  %v739_v28 = vmax.f32 %v697_v30, %v338_v15  ;;  %v300_v42 = vrot.slane %v2038_v2, 1  ;;  %v444_v33 = vrot.slane %v186_v59, 2 }
  0x49   : > { %v556_v38 = vmax.f32 %v411_v54, %v2050_v0  ;;  %v667_v39 = vmax.f32 %v628_v14, %v2050_v0  ;;  %v445_v47 = vrot.slane %v2038_v2, 2  ;;  %v682_v35 = vmax.f32 %v650_v61, %v186_v59  ;;  %v2084_v54 = vld [vmem:[%s1683_s19 + $0x98] sm:$0xff] }
  0x4a   : > { %1458 = vmatmul.mubr.msk.f32.gmra.mxu0 %vm797_vm3, %v762_v40  ;;  %v778_v13 = vmax.f32 %v739_v28, %v2050_v0  ;;  %v301_v34 = vsel %vm273_vm1, %v299_v17, %v300_v42  ;;  %v339_v36 = vrot.slane %v210_v37, 1  ;;  %v340_v32 = vrot.slane %v2046_v31, 1 }
  0x4b   : > { %v588_v3 = vmax.f32 %v556_v38, %v2046_v31  ;;  %v396_v56 = vmax.f32 %v186_v59, %v301_v34  ;;  %v446_v46 = vsel %vm418_vm2, %v444_v33, %v445_v47  ;;  %v613_v57 = vmax.f32 %v571_v63, %v301_v34  ;;  %v189_v59 = vld [vmem:[%s1683_s19 + $0x90] sm:$0xff]  ;;  %v2092_v38 = vld [vmem:[%s1683_s19 + $0x158] sm:$0xff] }
  0x4c   : > { %1482 = vmatmul.mubr.msk.f32.gmra.mxu1 %vm797_vm3, %v778_v13  ;;  %v724_v61 = vmax.f32 %v682_v35, %v301_v34  ;;  %v341_v1 = vsel %vm273_vm1, %v339_v36, %v340_v32  ;;  %v484_v48 = vrot.slane %v210_v37, 2  ;;  %v485_v8 = vrot.slane %v2046_v31, 2 }
  0x4d   : > { %v541_v62 = vmax.f32 %v396_v56, %v446_v46  ;;  %v652_v22 = vmax.f32 %v613_v57, %v446_v46  ;;  %v412_v60 = vmax.f32 %v210_v37, %v341_v1  ;;  %v2066_v53 = vmax.f32 %v587_v11, %v341_v1 }
  0x4e   : > { %v763_v44 = vmax.f32 %v724_v61, %v446_v46  ;;  %v2071_v63 = vsel %vm418_vm2, %v484_v48, %v485_v8  ;;  %v698_v16 = vmax.f32 %v666_v12, %v210_v37  ;;  %v302_v52 = vrot.slane %v188_v58, 1 }
  0x4f   : > { %v573_v18 = vmax.f32 %v541_v62, %v189_v59  ;;  %v557_v7 = vmax.f32 %v412_v60, %v2071_v63  ;;  %v668_v4 = vmax.f32 %v2066_v53, %v2071_v63  ;;  %v447_v21 = vrot.slane %v188_v58, 2  ;;  %v191_v60 = vld [vmem:[%s1683_s19 + $0xa0] sm:$0x3] }
  0x50   : > { %1460 = vmatprep.mubr.msk.f32.mxu0 %vm797_vm3, %v763_v44  ;;  %v740_v11 = vmax.f32 %v698_v16, %v341_v1  ;;  %v303_v49 = vsel %vm273_vm1, %v300_v42, %v302_v52  ;;  %v683_v6 = vmax.f32 %v651_v10, %v2038_v2  ;;  %v342_v55 = vrot.slane %v212_v45, 1 }
  0x51   : > { %v589_v12 = vmax.f32 %v557_v7, %v213_v23  ;;  %v397_v37 = vmax.f32 %v2038_v2, %v303_v49  ;;  %v448_v15 = vsel %vm418_vm2, %v445_v47, %v447_v21  ;;  %v614_v30 = vmax.f32 %v572_v29, %v303_v49  ;;  %v215_v21 = vld [vmem:[%s1683_s19 + $0x160] sm:$0x3] }
  0x52   : > { %v779_v17 = vmax.f32 %v740_v11, %v2071_v63  ;;  %v725_v0 = vmax.f32 %v683_v6, %v303_v49  ;;  %v343_v14 = vsel %vm273_vm1, %v340_v32, %v342_v55  ;;  %v487_v40 = vrot.slane %v212_v45, 2 }
  0x53   : > { %v542_v28 = vmax.f32 %v397_v37, %v448_v15  ;;  %v653_v42 = vmax.f32 %v614_v30, %v448_v15  ;;  %v413_v10 = vmax.f32 %v2046_v31, %v343_v14  ;;  %v2088_v33 = vmax.f32 %v588_v3, %v343_v14 }
  0x54   : > { %1484 = vmatprep.mubr.msk.f32.mxu1 %vm797_vm3, %v779_v17  ;;  %v764_v2 = vmax.f32 %v725_v0, %v448_v15  ;;  %v2095_v29 = vsel %vm418_vm2, %v485_v8, %v487_v40  ;;  %v699_v47 = vmax.f32 %v667_v39, %v2046_v31  ;;  %v304_v35 = vrot.slane %v189_v59, 1 }
  0x55   : > { %v574_v13 = vmax.f32 %v542_v28, %v2084_v54  ;;  %v558_v34 = vmax.f32 %v413_v10, %v2095_v29  ;;  %v669_v36 = vmax.f32 %v2088_v33, %v2095_v29  ;;  %v305_v32 = vrot.slane %v2084_v54, 1 }
  0x56   : > { %1461 = vmatmul.mubr.msk.f32.gmra.mxu0 %vm797_vm3, %v764_v2  ;;  %v741_v3 = vmax.f32 %v699_v47, %v343_v14  ;;  %v449_v56 = vrot.slane %v189_v59, 2  ;;  %v450_v46 = vrot.slane %v2084_v54, 2  ;;  %v684_v57 = vmax.f32 %v652_v22, %v189_v59  ;;  %v2132_v2 = vld [vmem:[%s1683_s19 + $0xb0] sm:$0xff] }
  0x57   : > { %v590_v31 = vmax.f32 %v558_v34, %v2092_v38  ;;  %v306_v39 = vsel %vm273_vm1, %v304_v35, %v305_v32  ;;  %v344_v58 = vrot.slane %v213_v23, 1  ;;  %v345_v61 = vrot.slane %v2092_v38, 1 }
  0x58   : > { %v780_v1 = vmax.f32 %v741_v3, %v2095_v29  ;;  %v398_v48 = vmax.f32 %v189_v59, %v306_v39  ;;  %v451_v8 = vsel %vm418_vm2, %v449_v56, %v450_v46  ;;  %v615_v62 = vmax.f32 %v573_v18, %v306_v39  ;;  %v192_v59 = vld [vmem:[%s1683_s19 + $0xa8] sm:$0xff] }
  0x59   : > { %v726_v53 = vmax.f32 %v684_v57, %v306_v39  ;;  %v346_v45 = vsel %vm273_vm1, %v344_v58, %v345_v61  ;;  %v489_v22 = vrot.slane %v213_v23, 2  ;;  %v490_v44 = vrot.slane %v2092_v38, 2 }
  0x5a   : > { %1485 = vmatmul.mubr.msk.f32.gmra.mxu1 %vm797_vm3, %v780_v1  ;;  %v543_v63 = vmax.f32 %v398_v48, %v451_v8  ;;  %v654_v16 = vmax.f32 %v615_v62, %v451_v8  ;;  %v414_v52 = vmax.f32 %v213_v23, %v346_v45  ;;  %v2114_v7 = vmax.f32 %v589_v12, %v346_v45  ;;  %v216_v12 = vld [vmem:[%s1683_s19 + $0x168] sm:$0xff] }
  0x5b   : > { %v765_v11 = vmax.f32 %v726_v53, %v451_v8  ;;  %v2119_v18 = vsel %vm418_vm2, %v489_v22, %v490_v44  ;;  %v700_v49 = vmax.f32 %v668_v4, %v213_v23  ;;  %v307_v6 = vrot.slane %v191_v60, 1 }
  0x5c   : > { %v575_v55 = vmax.f32 %v543_v63, %v192_v59  ;;  %v559_v37 = vmax.f32 %v414_v52, %v2119_v18  ;;  %v670_v15 = vmax.f32 %v2114_v7, %v2119_v18  ;;  %v452_v30 = vrot.slane %v191_v60, 2  ;;  %v194_v52 = vld [vmem:[%s1683_s19 + $0xb8] sm:$0x3] }
  0x5d   : > { %1463 = vmatprep.mubr.msk.f32.mxu0 %vm797_vm3, %v765_v11  ;;  %v742_v17 = vmax.f32 %v700_v49, %v346_v45  ;;  %v308_v0 = vsel %vm273_vm1, %v305_v32, %v307_v6  ;;  %v685_v14 = vmax.f32 %v653_v42, %v2084_v54  ;;  %v347_v40 = vrot.slane %v215_v21, 1 }
  0x5e   : > { %v591_v4 = vmax.f32 %v559_v37, %v216_v12  ;;  %v399_v23 = vmax.f32 %v2084_v54, %v308_v0  ;;  %v453_v28 = vsel %vm418_vm2, %v450_v46, %v452_v30  ;;  %v616_v10 = vmax.f32 %v574_v13, %v308_v0  ;;  %v2138_v54 = vld [vmem:[%s1683_s19 + $0x170] sm:$0xff]  ;;  %v218_v30 = vld [vmem:[%s1683_s19 + $0x178] sm:$0x3] }
  0x5f   : > { %v781_v33 = vmax.f32 %v742_v17, %v2119_v18  ;;  %v727_v29 = vmax.f32 %v685_v14, %v308_v0  ;;  %v348_v47 = vsel %vm273_vm1, %v345_v61, %v347_v40  ;;  %v492_v35 = vrot.slane %v215_v21, 2 }
  0x60   : > { %v544_v34 = vmax.f32 %v399_v23, %v453_v28  ;;  %v655_v32 = vmax.f32 %v616_v10, %v453_v28  ;;  %v415_v42 = vmax.f32 %v2092_v38, %v348_v47  ;;  %v632_v3 = vmax.f32 %v590_v31, %v348_v47 }
  0x61   : > { %1487 = vmatprep.mubr.msk.f32.mxu1 %vm797_vm3, %v781_v33  ;;  %v766_v56 = vmax.f32 %v727_v29, %v453_v28  ;;  %v493_v13 = vsel %vm418_vm2, %v490_v44, %v492_v35  ;;  %v701_v46 = vmax.f32 %v669_v36, %v2092_v38  ;;  %v309_v57 = vrot.slane %v192_v59, 1 }
  0x62   : > { %v576_v39 = vmax.f32 %v544_v34, %v2132_v2  ;;  %v560_v58 = vmax.f32 %v415_v42, %v493_v13  ;;  %v671_v61 = vmax.f32 %v632_v3, %v493_v13  ;;  %v310_v1 = vrot.slane %v2132_v2, 1 }
  0x63   : > { %1464 = vmatmul.mubr.msk.f32.gmra.mxu0 %vm797_vm3, %v766_v56  ;;  %v743_v31 = vmax.f32 %v701_v46, %v348_v47  ;;  %v454_v48 = vrot.slane %v192_v59, 2  ;;  %v455_v8 = vrot.slane %v2132_v2, 2  ;;  %v686_v62 = vmax.f32 %v654_v16, %v192_v59 }
  0x64   : > { %v592_v60 = vmax.f32 %v560_v58, %v2138_v54  ;;  %v311_v53 = vsel %vm273_vm1, %v309_v57, %v310_v1  ;;  %v349_v38 = vrot.slane %v216_v12, 1  ;;  %v350_v36 = vrot.slane %v2138_v54, 1 }
  0x65   : > { %v782_v45 = vmax.f32 %v743_v31, %v493_v13  ;;  %v400_v22 = vmax.f32 %v192_v59, %v311_v53  ;;  %v456_v44 = vsel %vm418_vm2, %v454_v48, %v455_v8  ;;  %v617_v63 = vmax.f32 %v575_v55, %v311_v53  ;;  %v219_v13 = vld [vmem:[%s1683_s19 + $0x180] sm:$0xff] }
  0x66   : > { %v728_v7 = vmax.f32 %v686_v62, %v311_v53  ;;  %v351_v21 = vsel %vm273_vm1, %v349_v38, %v350_v36  ;;  %v494_v11 = vrot.slane %v216_v12, 2  ;;  %v495_v16 = vrot.slane %v2138_v54, 2  ;;  %v221_v38 = vld [vmem:[%s1683_s19 + $0x190] sm:$0x3] }
  0x67   : > { %1488 = vmatmul.mubr.msk.f32.gmra.mxu1 %vm797_vm3, %v782_v45  ;;  %v2154_v18 = vmax.f32 %v400_v22, %v456_v44  ;;  %v656_v49 = vmax.f32 %v617_v63, %v456_v44  ;;  %v416_v6 = vmax.f32 %v216_v12, %v351_v21  ;;  %v633_v37 = vmax.f32 %v591_v4, %v351_v21 }
  0x68   : > { %v767_v17 = vmax.f32 %v728_v7, %v456_v44  ;;  %v496_v59 = vsel %vm418_vm2, %v494_v11, %v495_v16  ;;  %v702_v0 = vmax.f32 %v670_v15, %v216_v12  ;;  %v312_v55 = vrot.slane %v194_v52, 1 }
  0x69   : > { %v577_v14 = vmax.f32 %v2154_v18, %v1716_v20  ;;  %v561_v40 = vmax.f32 %v416_v6, %v496_v59  ;;  %v672_v23 = vmax.f32 %v633_v37, %v496_v59  ;;  %v457_v28 = vrot.slane %v194_v52, 2  ;;  %v222_v37 = vld [vmem:[%s1683_s19 + $0x198] sm:$0xff] }
  0x6a   : > { %1466 = vmatprep.mubr.msk.f32.mxu0 %vm797_vm3, %v767_v17  ;;  %v744_v10 = vmax.f32 %v702_v0, %v351_v21  ;;  %v313_v33 = vsel %vm273_vm1, %v310_v1, %v312_v55  ;;  %v687_v4 = vmax.f32 %v655_v32, %v2132_v2  ;;  %v352_v29 = vrot.slane %v218_v30, 1  ;;  %v220_v1 = vld [vmem:[%s1683_s19 + $0x188] sm:$0xff]  ;;  %v223_v0 = vld [vmem:[%s1683_s19 + $0x1a0] sm:$0xff] }
  0x6b   : > { %v401_v47 = vmax.f32 %v2132_v2, %v313_v33  ;;  %v458_v15 = vsel %vm418_vm2, %v455_v8, %v457_v28  ;;  %v618_v12 = vmax.f32 %v576_v39, %v313_v33  ;;  %v497_v35 = vrot.slane %v218_v30, 2 }
  0x6c   : > { %v783_v34 = vmax.f32 %v744_v10, %v496_v59  ;;  %v729_v42 = vmax.f32 %v687_v4, %v313_v33  ;;  %v353_v3 = vsel %vm273_vm1, %v350_v36, %v352_v29  ;;  %v703_v56 = vmax.f32 %v671_v61, %v2138_v54 }
  0x6d   : > { %v546_v46 = vmax.f32 %v401_v47, %v458_v15  ;;  %v657_v57 = vmax.f32 %v618_v12, %v458_v15  ;;  %v417_v58 = vmax.f32 %v2138_v54, %v353_v3  ;;  %v498_v32 = vsel %vm418_vm2, %v495_v16, %v497_v35  ;;  %v224_v47 = vld [vmem:[%s1683_s19 + $0x1a8] sm:$0x3] }
  0x6e   : > { %1490 = vmatprep.mubr.msk.f32.mxu1 %vm797_vm3, %v783_v34  ;;  %v768_v2 = vmax.f32 %v729_v42, %v458_v15  ;;  %v634_v39 = vmax.f32 %v592_v60, %v353_v3  ;;  %v745_v31 = vmax.f32 %v703_v56, %v353_v3  ;;  %v688_v48 = vmax.f32 %v656_v49, %v1716_v20 }
  0x6f   : > { %v578_v8 = vmax.f32 %v546_v46, %v1727_v25  ;;  %v562_v62 = vmax.f32 %v417_v58, %v498_v32  ;;  %v593_v61 = vmax.f32 %v561_v40, %v219_v13  ;;  %v598_v53 = vrot.slane %v219_v13, 1 }
  0x70   : > { %1467 = vmatmul.mubr.msk.f32.gmra.mxu0 %vm797_vm3, %v768_v2  ;;  %v673_v36 = vmax.f32 %v634_v39, %v498_v32  ;;  %v784_v54 = vmax.f32 %v745_v31, %v498_v32  ;;  %v730_v45 = vmax.f32 %v688_v48, %v1774_v50  ;;  %v599_v22 = vrot.slane %v220_v1, 1 }
  0x71   : > { %v637_v44 = vrot.slane %v219_v13, 2  ;;  %v638_v63 = vrot.slane %v220_v1, 2  ;;  %v704_v60 = vmax.f32 %v672_v23, %v219_v13  ;;  %v689_v52 = vmax.f32 %v657_v57, %v1727_v25 }
  0x72   : > { %1491 = vmatmul.mubr.msk.f32.gmra.mxu1 %vm797_vm3, %v784_v54  ;;  %v769_v20 = vmax.f32 %v730_v45, %v1817_v24  ;;  %v600_v7 = vsel %vm273_vm1, %v598_v53, %v599_v22  ;;  %v594_v21 = vmax.f32 %v562_v62, %v220_v1  ;;  %v601_v11 = vrot.slane %v221_v38, 1 }
  0x73   : > { %v635_v16 = vmax.f32 %v593_v61, %v600_v7  ;;  %v639_v18 = vsel %vm418_vm2, %v637_v44, %v638_v63  ;;  %v746_v49 = vmax.f32 %v704_v60, %v600_v7  ;;  %v731_v6 = vmax.f32 %v689_v52, %v1878_v19 }
  0x74   : > { %1469 = vmatprep.mubr.msk.f32.mxu0 %vm797_vm3, %v769_v20  ;;  %v602_v25 = vsel %vm273_vm1, %v599_v22, %v601_v11  ;;  %v640_v30 = vrot.slane %v221_v38, 2  ;;  %v705_v17 = vmax.f32 %v673_v36, %v220_v1  ;;  %v619_v59 = vmax.f32 %v577_v14, %v1774_v50 }
  0x75   : > { %v674_v55 = vmax.f32 %v635_v16, %v639_v18  ;;  %v785_v40 = vmax.f32 %v746_v49, %v639_v18  ;;  %v770_v23 = vmax.f32 %v731_v6, %v1907_v43  ;;  %v636_v28 = vmax.f32 %v594_v21, %v602_v25 }
  0x76   : > { %v641_v10 = vsel %vm418_vm2, %v638_v63, %v640_v30  ;;  %v747_v33 = vmax.f32 %v705_v17, %v602_v25  ;;  %v658_v4 = vmax.f32 %v619_v59, %v1817_v24  ;;  %v711_v29 = vrot.slane %v222_v37, 1 }
  0x77   : > { %1493 = vmatprep.mubr.msk.f32.mxu1 %vm797_vm3, %v785_v40  ;;  %1470 = vmatmul.mubr.msk.f32.gmra.mxu0 %vm797_vm3, %v770_v23  ;;  %v675_v15 = vmax.f32 %v636_v28, %v641_v10  ;;  %v706_v12 = vmax.f32 %v674_v55, %v222_v37  ;;  %v712_v50 = vrot.slane %v223_v0, 1  ;;  %v750_v14 = vrot.slane %v222_v37, 2 }
  0x78   : > { %v786_v35 = vmax.f32 %v747_v33, %v641_v10  ;;  %v690_v34 = vmax.f32 %v658_v4, %v1730_v26  ;;  %v751_v42 = vrot.slane %v223_v0, 2  ;;  %v620_v3 = vmax.f32 %v578_v8, %v1878_v19 }
  0x79   : > { %v713_v56 = vsel %vm273_vm1, %v711_v29, %v712_v50  ;;  %v707_v13 = vmax.f32 %v675_v15, %v223_v0  ;;  %v714_v24 = vrot.slane %v224_v47, 1  ;;  %v753_v46 = vrot.slane %v224_v47, 2 }
  0x7a   : > { %1494 = vmatmul.mubr.msk.f32.gmra.mxu1 %vm797_vm3, %v786_v35  ;;  %v732_v57 = vmax.f32 %v690_v34, %v1779_v51  ;;  %v748_v58 = vmax.f32 %v706_v12, %v713_v56  ;;  %v752_v32 = vsel %vm418_vm2, %v750_v14, %v751_v42  ;;  %v659_v1 = vmax.f32 %v620_v3, %v1907_v43 }
  0x7b   : > { %v715_v2 = vsel %vm273_vm1, %v712_v50, %v714_v24  ;;  %v754_v26 = vsel %vm418_vm2, %v751_v42, %v753_v46 }
  0x7c   : > { %v771_v19 = vmax.f32 %v732_v57, %v1824_v5  ;;  %v787_v39 = vmax.f32 %v748_v58, %v752_v32  ;;  %v691_v31 = vmax.f32 %v659_v1, %v1733_v27  ;;  %v749_v48 = vmax.f32 %v707_v13, %v715_v2  ;;  %v2214_v5 = vld [vmem:[%s2323_s2] ss:$0 sm:$0xff] }
  0x7e   : > { %1472 = vmatprep.mubr.msk.f32.mxu0 %vm797_vm3, %v771_v19  ;;  %1496 = vmatprep.mubr.msk.f32.mxu1 %vm797_vm3, %v787_v39  ;;  %v733_v51 = vmax.f32 %v691_v31, %v1893_v41  ;;  %v788_v8 = vmax.f32 %v749_v48, %v754_v26 }
  0x80   : > { %v772_v62 = vmax.f32 %v733_v51, %v1919_v9  ;;  %1497 = vmatmul.mubr.msk.f32.gmra.mxu1 %vm797_vm3, %v788_v8 }
  0x82   : > { %1473 = vmatmul.mubr.msk.f32.gmra.mxu0 %vm797_vm3, %v772_v62 }
  0xf4   : > { %v1453_v27 = vpop.f32.mrf.mxu0 }
  0xf5   : > { %v970_v43 = vadd.f32 %v1453_v27, %v2214_v5 }
  0xf6   : > { %v964_v61 = vpop.f32.mrf.mxu0 }
  0xf7   : > { %v1124_v53 = vsub.f32 0.0, %v970_v43  ;;  %v965_v38 = vadd.f32 %v2214_v5, %v964_v61 }
  0xf9   : > { %v1157_v41 = vmul.f32 1.442695, %v1124_v53  ;;  %v1123_v36 = vsub.f32 0.0, %v965_v38 }
  0xfb   : > { %1510 = vpow2.f32 %v1157_v41  ;;  %v1477_v9 = vpop.f32.mrf.mxu1  ;;  %v1155_v54 = vmul.f32 1.442695, %v1123_v36 }
  0xfc   : > { %v1050_v45 = vadd.f32 %v1477_v9, %v2214_v5  ;;  %v1456_v22 = vpop.f32.mrf.mxu0 }
  0xfd   : > { %1512 = vpow2.f32 %v1155_v54  ;;  %v1044_v44 = vpop.f32.mrf.mxu1  ;;  %v980_v63 = vadd.f32 %v1456_v22, %v2214_v5 }
  0xfe   : > { %v1140_v60 = vsub.f32 0.0, %v1050_v45  ;;  %v1045_v52 = vadd.f32 %v2214_v5, %v1044_v44  ;;  %v974_v20 = vpop.f32.mrf.mxu0 }
  0xff   : > { %v1126_v7 = vsub.f32 0.0, %v980_v63  ;;  %v1480_v21 = vpop.f32.mrf.mxu1  ;;  %v975_v11 = vadd.f32 %v2214_v5, %v974_v20 }
 0x100   : > { %v1189_v16 = vmul.f32 1.442695, %v1140_v60  ;;  %v1139_v18 = vsub.f32 0.0, %v1045_v52  ;;  %v1060_v49 = vadd.f32 %v1480_v21, %v2214_v5 }
 0x101   : > { %v1161_v6 = vmul.f32 1.442695, %v1126_v7  ;;  %v1125_v37 = vsub.f32 0.0, %v975_v11  ;;  %v1054_v25 = vpop.f32.mrf.mxu1 }
 0x102   : > { %1514 = vpow2.f32 %v1189_v16  ;;  %v1187_v30 = vmul.f32 1.442695, %v1139_v18  ;;  %v1142_v17 = vsub.f32 0.0, %v1060_v49  ;;  %v1055_v59 = vadd.f32 %v2214_v5, %v1054_v25 }
 0x103   : > { %1516 = vpow2.f32 %v1161_v6  ;;  %v1159_v0 = vmul.f32 1.442695, %v1125_v37 }
 0x104   : > { %1518 = vpow2.f32 %v1187_v30  ;;  %v1193_v55 = vmul.f32 1.442695, %v1142_v17  ;;  %v1141_v40 = vsub.f32 0.0, %v1055_v59 }
 0x105   : > { %1520 = vpow2.f32 %v1159_v0 }
 0x106   : > { %1522 = vpow2.f32 %v1193_v55  ;;  %v1191_v23 = vmul.f32 1.442695, %v1141_v40 }
 0x108   : > { %v1511_v28 = vpop.eup %1510  ;;  %1524 = vpow2.f32 %v1191_v23 }
 0x109   : > { %v1220_v10 = vadd.f32 1.0, %v1511_v28 }
 0x10a   : > { %v1513_v33 = vpop.eup %1512  ;;  %v1459_v4 = vpop.f32.mrf.mxu0 }
 0x10b   : > { %1526 = vrcp.f32 %v1220_v10  ;;  %v1219_v29 = vadd.f32 1.0, %v1513_v33  ;;  %v990_v47 = vadd.f32 %v1459_v4, %v2214_v5 }
 0x10c   : > { %v1483_v15 = vpop.f32.mrf.mxu1  ;;  %v984_v12 = vpop.f32.mrf.mxu0 }
 0x10d   : > { %1528 = vrcp.f32 %v1219_v29  ;;  %v1128_v50 = vsub.f32 0.0, %v990_v47  ;;  %v1070_v14 = vadd.f32 %v1483_v15, %v2214_v5  ;;  %v985_v35 = vadd.f32 %v2214_v5, %v984_v12 }
 0x10e   : > { %v1064_v34 = vpop.f32.mrf.mxu1 }
 0x10f   : > { %v1515_v42 = vpop.eup %1514  ;;  %v1165_v3 = vmul.f32 1.442695, %v1128_v50  ;;  %v1144_v56 = vsub.f32 0.0, %v1070_v14  ;;  %v1065_v13 = vadd.f32 %v2214_v5, %v1064_v34  ;;  %v1127_v32 = vsub.f32 0.0, %v985_v35 }
 0x110   : > { %v1517_v24 = vpop.eup %1516  ;;  %v1236_v46 = vadd.f32 1.0, %v1515_v42 }
 0x111   : > { %v1519_v57 = vpop.eup %1518  ;;  %v1222_v58 = vadd.f32 1.0, %v1517_v24  ;;  %1530 = vpow2.f32 %v1165_v3  ;;  %v1143_v26 = vsub.f32 0.0, %v1065_v13  ;;  %v1197_v31 = vmul.f32 1.442695, %v1144_v56 }
 0x112   : > { %v1521_v1 = vpop.eup %1520  ;;  %1532 = vrcp.f32 %v1236_v46  ;;  %v1235_v2 = vadd.f32 1.0, %v1519_v57  ;;  %v1163_v8 = vmul.f32 1.442695, %v1127_v32 }
 0x113   : > { %v1523_v19 = vpop.eup %1522  ;;  %1534 = vrcp.f32 %v1222_v58  ;;  %v1221_v39 = vadd.f32 1.0, %v1521_v1  ;;  %v1195_v27 = vmul.f32 1.442695, %v1143_v26 }
 0x114   : > { %1536 = vrcp.f32 %v1235_v2  ;;  %v1238_v48 = vadd.f32 1.0, %v1523_v19 }
 0x115   : > { %v1525_v51 = vpop.eup %1524  ;;  %1538 = vrcp.f32 %v1221_v39 }
 0x116   : > { %1540 = vrcp.f32 %v1238_v48  ;;  %v1237_v62 = vadd.f32 1.0, %v1525_v51  ;;  %v1462_v43 = vpop.f32.mrf.mxu0 }
 0x117   : > { %1542 = vpow2.f32 %v1197_v31  ;;  %v1000_v61 = vadd.f32 %v1462_v43, %v2214_v5 }
 0x118   : > { %v1527_v53 = vpop.eup %1526  ;;  %1544 = vrcp.f32 %v1237_v62  ;;  %v994_v38 = vpop.f32.mrf.mxu0 }
 0x119   : > { %1285 = vst.msk [vmem:[%s2232_s25 + $0x8] sm:$0xff] %vm1283_vm4, %v1527_v53  ;;  %1546 = vpow2.f32 %v1163_v8  ;;  %v1130_v41 = vsub.f32 0.0, %v1000_v61  ;;  %v995_v36 = vadd.f32 %v2214_v5, %v994_v38 }
 0x11a   : > { %v1529_v9 = vpop.eup %1528  ;;  %1548 = vpow2.f32 %v1195_v27  ;;  %v1486_v54 = vpop.f32.mrf.mxu1 }
 0x11b   : > { %1284 = vst.msk [vmem:[%s2232_s25] sm:$0xff] %vm1283_vm4, %v1529_v9  ;;  %v1169_v45 = vmul.f32 1.442695, %v1130_v41  ;;  %v1080_v22 = vadd.f32 %v1486_v54, %v2214_v5  ;;  %v1129_v44 = vsub.f32 0.0, %v995_v36 }
 0x11c   : > { %v1074_v63 = vpop.f32.mrf.mxu1 }
 0x11d   : > { %1550 = vpow2.f32 %v1169_v45  ;;  %v1146_v60 = vsub.f32 0.0, %v1080_v22  ;;  %v1167_v52 = vmul.f32 1.442695, %v1129_v44  ;;  %v1075_v20 = vadd.f32 %v2214_v5, %v1074_v63 }
 0x11e   : > { %v1531_v7 = vpop.eup %1530 }
 0x11f   : > { %v1533_v21 = vpop.eup %1532  ;;  %v1224_v11 = vadd.f32 1.0, %v1531_v7  ;;  %v1201_v16 = vmul.f32 1.442695, %v1146_v60  ;;  %1552 = vpow2.f32 %v1167_v52  ;;  %v1145_v18 = vsub.f32 0.0, %v1075_v20 }
 0x120   : > { %v1535_v49 = vpop.eup %1534  ;;  %1301 = vst.msk [vmem:[%s2232_s25 + $0x88] sm:$0xff] %vm1283_vm4, %v1533_v21 }
 0x121   : > { %v1537_v6 = vpop.eup %1536  ;;  %1287 = vst.msk [vmem:[%s2232_s25 + $0x18] sm:$0xff] %vm1283_vm4, %v1535_v49  ;;  %1554 = vrcp.f32 %v1224_v11  ;;  %v1199_v37 = vmul.f32 1.442695, %v1145_v18 }
 0x122   : > { %v1539_v25 = vpop.eup %1538  ;;  %1300 = vst.msk [vmem:[%s2232_s25 + $0x80] sm:$0xff] %vm1283_vm4, %v1537_v6  ;;  %1556 = vpow2.f32 %v1201_v16 }
 0x123   : > { %v1541_v30 = vpop.eup %1540  ;;  %1286 = vst.msk [vmem:[%s2232_s25 + $0x10] sm:$0xff] %vm1283_vm4, %v1539_v25  ;;  %1558 = vpow2.f32 %v1199_v37  ;;  %v1465_v17 = vpop.f32.mrf.mxu0 }
 0x124   : > { %v1543_v59 = vpop.eup %1542  ;;  %1303 = vst.msk [vmem:[%s2232_s25 + $0x98] sm:$0xff] %vm1283_vm4, %v1541_v30  ;;  %v1010_v0 = vadd.f32 %v1465_v17, %v2214_v5 }
 0x125   : > { %v1545_v55 = vpop.eup %1544  ;;  %v1240_v40 = vadd.f32 1.0, %v1543_v59  ;;  %v1004_v23 = vpop.f32.mrf.mxu0 }
 0x126   : > { %v1547_v28 = vpop.eup %1546  ;;  %1302 = vst.msk [vmem:[%s2232_s25 + $0x90] sm:$0xff] %vm1283_vm4, %v1545_v55  ;;  %v1132_v10 = vsub.f32 0.0, %v1010_v0  ;;  %v1005_v33 = vadd.f32 %v2214_v5, %v1004_v23 }
 0x127   : > { %v1549_v4 = vpop.eup %1548  ;;  %1560 = vrcp.f32 %v1240_v40  ;;  %v1223_v29 = vadd.f32 1.0, %v1547_v28  ;;  %v1489_v47 = vpop.f32.mrf.mxu1 }
 0x128   : > { %v1239_v15 = vadd.f32 1.0, %v1549_v4  ;;  %v1173_v12 = vmul.f32 1.442695, %v1132_v10  ;;  %v1090_v50 = vadd.f32 %v1489_v47, %v2214_v5  ;;  %v1131_v14 = vsub.f32 0.0, %v1005_v33 }
 0x129   : > { %1562 = vrcp.f32 %v1223_v29  ;;  %v1084_v35 = vpop.f32.mrf.mxu1 }
 0x12a   : > { %v1551_v34 = vpop.eup %1550  ;;  %1564 = vrcp.f32 %v1239_v15  ;;  %v1148_v42 = vsub.f32 0.0, %v1090_v50  ;;  %v1171_v3 = vmul.f32 1.442695, %v1131_v14  ;;  %v1085_v56 = vadd.f32 %v2214_v5, %v1084_v35 }
 0x12b   : > { %v1226_v13 = vadd.f32 1.0, %v1551_v34  ;;  %1566 = vpow2.f32 %v1173_v12 }
 0x12c   : > { %v1553_v24 = vpop.eup %1552  ;;  %v1205_v46 = vmul.f32 1.442695, %v1148_v42  ;;  %1568 = vpow2.f32 %v1171_v3  ;;  %v1147_v57 = vsub.f32 0.0, %v1085_v56 }
 0x12d   : > { %1570 = vrcp.f32 %v1226_v13  ;;  %v1225_v58 = vadd.f32 1.0, %v1553_v24 }
 0x12e   : > { %v1555_v32 = vpop.eup %1554  ;;  %1572 = vpow2.f32 %v1205_v46  ;;  %v1203_v1 = vmul.f32 1.442695, %v1147_v57 }
 0x12f   : > { %v1557_v2 = vpop.eup %1556  ;;  %1289 = vst.msk [vmem:[%s2232_s25 + $0x28] sm:$0xff] %vm1283_vm4, %v1555_v32  ;;  %1574 = vrcp.f32 %v1225_v58 }
 0x130   : > { %v1559_v26 = vpop.eup %1558  ;;  %v1242_v19 = vadd.f32 1.0, %v1557_v2  ;;  %1576 = vpow2.f32 %v1203_v1  ;;  %v1468_v39 = vpop.f32.mrf.mxu0 }
 0x131   : > { %v1241_v31 = vadd.f32 1.0, %v1559_v26  ;;  %v1020_v48 = vadd.f32 %v1468_v39, %v2214_v5 }
 0x132   : > { %1578 = vrcp.f32 %v1242_v19  ;;  %v1492_v51 = vpop.f32.mrf.mxu1  ;;  %v1014_v8 = vpop.f32.mrf.mxu0 }
 0x133   : > { %1580 = vrcp.f32 %v1241_v31  ;;  %v1134_v62 = vsub.f32 0.0, %v1020_v48  ;;  %v1100_v27 = vadd.f32 %v1492_v51, %v2214_v5  ;;  %v1015_v43 = vadd.f32 %v2214_v5, %v1014_v8 }
 0x134   : > { %v1561_v61 = vpop.eup %1560  ;;  %v1094_v53 = vpop.f32.mrf.mxu1 }
 0x135   : > { %1305 = vst.msk [vmem:[%s2232_s25 + $0xa8] sm:$0xff] %vm1283_vm4, %v1561_v61  ;;  %v1177_v38 = vmul.f32 1.442695, %v1134_v62  ;;  %v1150_v41 = vsub.f32 0.0, %v1100_v27  ;;  %v1133_v36 = vsub.f32 0.0, %v1015_v43  ;;  %v1095_v9 = vadd.f32 %v2214_v5, %v1094_v53 }
 0x136   : > { %v1563_v54 = vpop.eup %1562 }
 0x137   : > { %v1565_v45 = vpop.eup %1564  ;;  %1288 = vst.msk [vmem:[%s2232_s25 + $0x20] sm:$0xff] %vm1283_vm4, %v1563_v54  ;;  %1582 = vpow2.f32 %v1177_v38  ;;  %v1209_v22 = vmul.f32 1.442695, %v1150_v41  ;;  %v1175_v44 = vmul.f32 1.442695, %v1133_v36  ;;  %v1149_v63 = vsub.f32 0.0, %v1095_v9  ;;  %v1471_v60 = vpop.f32.mrf.mxu0 }
 0x138   : > { %v1567_v52 = vpop.eup %1566  ;;  %1304 = vst.msk [vmem:[%s2232_s25 + $0xa0] sm:$0xff] %vm1283_vm4, %v1565_v45  ;;  %v1030_v20 = vadd.f32 %v1471_v60, %v2214_v5 }
 0x139   : > { %v1569_v7 = vpop.eup %1568  ;;  %v1228_v21 = vadd.f32 1.0, %v1567_v52  ;;  %1584 = vpow2.f32 %v1209_v22  ;;  %v1207_v11 = vmul.f32 1.442695, %v1149_v63  ;;  %v1024_v16 = vpop.f32.mrf.mxu0 }
 0x13a   : > { %v1571_v18 = vpop.eup %1570  ;;  %v1227_v49 = vadd.f32 1.0, %v1569_v7  ;;  %1586 = vpow2.f32 %v1175_v44  ;;  %v1136_v6 = vsub.f32 0.0, %v1030_v20  ;;  %v1495_v37 = vpop.f32.mrf.mxu1  ;;  %v1025_v25 = vadd.f32 %v2214_v5, %v1024_v16 }
 0x13b   : > { %v1573_v30 = vpop.eup %1572  ;;  %1291 = vst.msk [vmem:[%s2232_s25 + $0x38] sm:$0xff] %vm1283_vm4, %v1571_v18  ;;  %1588 = vrcp.f32 %v1228_v21  ;;  %v1110_v17 = vadd.f32 %v1495_v37, %v2214_v5 }
 0x13c   : > { %v1575_v59 = vpop.eup %1574  ;;  %v1244_v0 = vadd.f32 1.0, %v1573_v30  ;;  %1590 = vrcp.f32 %v1227_v49  ;;  %v1181_v55 = vmul.f32 1.442695, %v1136_v6  ;;  %v1135_v40 = vsub.f32 0.0, %v1025_v25  ;;  %v1104_v23 = vpop.f32.mrf.mxu1 }
 0x13d   : > { %v1577_v28 = vpop.eup %1576  ;;  %1290 = vst.msk [vmem:[%s2232_s25 + $0x30] sm:$0xff] %vm1283_vm4, %v1575_v59  ;;  %1592 = vpow2.f32 %v1207_v11  ;;  %v1152_v10 = vsub.f32 0.0, %v1110_v17  ;;  %v1105_v33 = vadd.f32 %v2214_v5, %v1104_v23 }
 0x13e   : > { %1594 = vrcp.f32 %v1244_v0  ;;  %v1243_v4 = vadd.f32 1.0, %v1577_v28  ;;  %v1179_v29 = vmul.f32 1.442695, %v1135_v40 }
 0x13f   : > { %v1579_v47 = vpop.eup %1578  ;;  %1596 = vpow2.f32 %v1181_v55  ;;  %v1213_v15 = vmul.f32 1.442695, %v1152_v10  ;;  %v1151_v12 = vsub.f32 0.0, %v1105_v33 }
 0x140   : > { %v1581_v50 = vpop.eup %1580  ;;  %1307 = vst.msk [vmem:[%s2232_s25 + $0xb8] sm:$0xff] %vm1283_vm4, %v1579_v47  ;;  %1598 = vrcp.f32 %v1243_v4  ;;  %v1498_v14 = vpop.f32.mrf.mxu1 }
 0x141   : > { %1306 = vst.msk [vmem:[%s2232_s25 + $0xb0] sm:$0xff] %vm1283_vm4, %v1581_v50  ;;  %1600 = vpow2.f32 %v1213_v15  ;;  %v1211_v35 = vmul.f32 1.442695, %v1151_v12  ;;  %v1120_v34 = vadd.f32 %v1498_v14, %v2214_v5 }
 0x142   : > { %1602 = vpow2.f32 %v1179_v29  ;;  %v1474_v42 = vpop.f32.mrf.mxu0  ;;  %v1114_v3 = vpop.f32.mrf.mxu1 }
 0x143   : > { %1604 = vpow2.f32 %v1211_v35  ;;  %v1040_v56 = vadd.f32 %v1474_v42, %v2214_v5  ;;  %v1154_v13 = vsub.f32 0.0, %v1120_v34  ;;  %v1115_v24 = vadd.f32 %v2214_v5, %v1114_v3 }
 0x144   : > { %v1583_v46 = vpop.eup %1582  ;;  %v1034_v57 = vpop.f32.mrf.mxu0 }
 0x145   : > { %v1230_v58 = vadd.f32 1.0, %v1583_v46  ;;  %v1138_v32 = vsub.f32 0.0, %v1040_v56  ;;  %v1217_v1 = vmul.f32 1.442695, %v1154_v13  ;;  %v1035_v2 = vadd.f32 %v2214_v5, %v1034_v57 }
 0x146   : > { %v1585_v26 = vpop.eup %1584  ;;  %v1153_v19 = vsub.f32 0.0, %v1115_v24 }
 0x147   : > { %v1587_v39 = vpop.eup %1586  ;;  %1606 = vrcp.f32 %v1230_v58  ;;  %v1246_v31 = vadd.f32 1.0, %v1585_v26  ;;  %v1185_v48 = vmul.f32 1.442695, %v1138_v32  ;;  %v1137_v51 = vsub.f32 0.0, %v1035_v2 }
 0x148   : > { %v1589_v8 = vpop.eup %1588  ;;  %v1229_v62 = vadd.f32 1.0, %v1587_v39  ;;  %1608 = vpow2.f32 %v1217_v1  ;;  %v1215_v5 = vmul.f32 1.442695, %v1153_v19 }
 0x149   : > { %v1591_v27 = vpop.eup %1590  ;;  %1293 = vst.msk [vmem:[%s2232_s25 + $0x48] sm:$0xff] %vm1283_vm4, %v1589_v8  ;;  %1610 = vrcp.f32 %v1246_v31  ;;  %v1183_v43 = vmul.f32 1.442695, %v1137_v51 }
 0x14a   : > { %v1593_v61 = vpop.eup %1592  ;;  %1292 = vst.msk [vmem:[%s2232_s25 + $0x40] sm:$0xff] %vm1283_vm4, %v1591_v27  ;;  %1612 = vrcp.f32 %v1229_v62 }
 0x14b   : > { %v1595_v53 = vpop.eup %1594  ;;  %v1245_v38 = vadd.f32 1.0, %v1593_v61  ;;  %1614 = vpow2.f32 %v1185_v48 }
 0x14c   : > { %v1597_v41 = vpop.eup %1596  ;;  %1309 = vst.msk [vmem:[%s2232_s25 + $0xc8] sm:$0xff] %vm1283_vm4, %v1595_v53  ;;  %1616 = vpow2.f32 %v1183_v43 }
 0x14d   : > { %v1599_v36 = vpop.eup %1598  ;;  %1618 = vrcp.f32 %v1245_v38  ;;  %v1232_v9 = vadd.f32 1.0, %v1597_v41 }
 0x14e   : > { %v1601_v54 = vpop.eup %1600  ;;  %1308 = vst.msk [vmem:[%s2232_s25 + $0xc0] sm:$0xff] %vm1283_vm4, %v1599_v36  ;;  %1620 = vpow2.f32 %v1215_v5 }
 0x14f   : > { %v1603_v45 = vpop.eup %1602  ;;  %1622 = vrcp.f32 %v1232_v9  ;;  %v1248_v22 = vadd.f32 1.0, %v1601_v54 }
 0x150   : > { %v1605_v44 = vpop.eup %1604  ;;  %v1231_v63 = vadd.f32 1.0, %v1603_v45 }
 0x151   : > { %1624 = vrcp.f32 %v1248_v22  ;;  %v1247_v60 = vadd.f32 1.0, %v1605_v44 }
 0x152   : > { %1626 = vrcp.f32 %v1231_v63 }
 0x153   : > { %1628 = vrcp.f32 %v1247_v60 }
 0x154   : > { %v1607_v52 = vpop.eup %1606 }
 0x155   : > { %v1609_v20 = vpop.eup %1608  ;;  %1295 = vst.msk [vmem:[%s2232_s25 + $0x58] sm:$0xff] %vm1283_vm4, %v1607_v52 }
 0x156   : > { %v1611_v7 = vpop.eup %1610  ;;  %v1250_v21 = vadd.f32 1.0, %v1609_v20 }
 0x157   : > { %v1613_v11 = vpop.eup %1612  ;;  %1311 = vst.msk [vmem:[%s2232_s25 + $0xd8] sm:$0xff] %vm1283_vm4, %v1611_v7 }
 0x158   : > { %v1615_v16 = vpop.eup %1614  ;;  %1294 = vst.msk [vmem:[%s2232_s25 + $0x50] sm:$0xff] %vm1283_vm4, %v1613_v11  ;;  %1630 = vrcp.f32 %v1250_v21 }
 0x159   : > { %v1617_v18 = vpop.eup %1616  ;;  %v1234_v49 = vadd.f32 1.0, %v1615_v16 }
 0x15a   : > { %v1619_v6 = vpop.eup %1618  ;;  %v1233_v37 = vadd.f32 1.0, %v1617_v18 }
 0x15b   : > { %v1621_v25 = vpop.eup %1620  ;;  %1310 = vst.msk [vmem:[%s2232_s25 + $0xd0] sm:$0xff] %vm1283_vm4, %v1619_v6  ;;  %1632 = vrcp.f32 %v1234_v49 }
 0x15c   : > { %v1623_v30 = vpop.eup %1622  ;;  %1634 = vrcp.f32 %v1233_v37  ;;  %v1249_v17 = vadd.f32 1.0, %v1621_v25 }
 0x15d   : > { %1297 = vst.msk [vmem:[%s2232_s25 + $0x68] sm:$0xff] %vm1283_vm4, %v1623_v30 }
 0x15e   : > { %v1625_v59 = vpop.eup %1624  ;;  %1636 = vrcp.f32 %v1249_v17 }
 0x15f   : > { %v1627_v0 = vpop.eup %1626  ;;  %1313 = vst.msk [vmem:[%s2232_s25 + $0xe8] sm:$0xff] %vm1283_vm4, %v1625_v59 }
 0x160   : > { %v1629_v55 = vpop.eup %1628  ;;  %1296 = vst.msk [vmem:[%s2232_s25 + $0x60] sm:$0xff] %vm1283_vm4, %v1627_v0 }
 0x161   : > { %1312 = vst.msk [vmem:[%s2232_s25 + $0xe0] sm:$0xff] %vm1283_vm4, %v1629_v55 }
 0x165   : > { %v1631_v40 = vpop.eup %1630 }
 0x166   : > { %1315 = vst.msk [vmem:[%s2232_s25 + $0xf8] sm:$0xff] %vm1283_vm4, %v1631_v40 }
 0x168   : > { %v1633_v23 = vpop.eup %1632 }
 0x169   : > { %v1635_v28 = vpop.eup %1634  ;;  %1299 = vst.msk [vmem:[%s2232_s25 + $0x78] sm:$0xff] %vm1283_vm4, %v1633_v23 }
 0x16a   : > { %1298 = vst.msk [vmem:[%s2232_s25 + $0x70] sm:$0xff] %vm1283_vm4, %v1635_v28 }
 0x16b   : > { %v1637_v10 = vpop.eup %1636 }
 0x16c   : > { %1314 = vst.msk [vmem:[%s2232_s25 + $0xf0] sm:$0xff] %vm1283_vm4, %v1637_v10 }
 0x16d PF: > { %s13_s12 = sadd.s32 1, %s1644_s12  }
 0x16e   : > { %p10_p4 = scmp.ge.s32.totalorder %s13_s12, 4  }
 0x170   :  { %12 = sbr.rel (!%p10_p4) target bundleno = 1 (0x1), region = 62 }

// kernel: inception3b_forward.5
= control target key start
LH: loop header
LB: loop body
LE: loop exit
PB: predicated region body
PF: predicated region fallthrough
CT: control target
= control target key end

     0   :  { %s4490_s12 = smov 0   ;;  %s6240_s0 = inlined_call_operand.vmem [shape: f32[2,18,18,4], index: 0, kind: input, shape index: {}]   ;;  %s6241_s1 = inlined_call_operand.vmem [shape: f32[9,4,8], index: 1, kind: input, shape index: {}]   ;;  %s6242_s2 = inlined_call_operand.vmem [shape: f32[1,8], index: 2, kind: input, shape index: {}]   ;;  %s6243_s3 = inlined_call_operand.vmem [shape: f32[2,16,16,8], index: 3, kind: output, shape index: {}]  }
   0x1 LB: > { %s3259_s13 = sadd.s32 4294967295, %s4468_s12   ;;  %p3263_p0 = scmp.ge.s32.totalorder %s4468_s12, 1  ;;  %s4468_s12 = sphi %s4490_s12, %s13_s12  }
   0x2   : > { %p137_p1 = scmp.lt.s32.totalorder %s4468_s12, 3 }
   0x4   : > { %p138_p2 = pnand %p3263_p0, %p137_p1 }
   0x6   : > { %141 = sbr.rel (%p138_p2) target bundleno = 545 (0x221), region = 32 }
   0xb   : > { %v3267_v0 = vld [vmem:[%s6241_s1 + $0x4] sm:$0xf]  ;;  %vm422_vm0 = vcmask 1043456   ;;  %p161_p3 = scmp.lt.s32.totalorder %s3259_s13, 1  ;;  %v225_v1 = vld [vmem:[%s6241_s1] sm:$0xf] }
   0xc   : > { %4323 = vmatprep.subr.msk.mxu1 %vm422_vm0, %v3267_v0  ;;  %3873 = vmatprep.subr.msk.mxu0 %vm422_vm0, %v3267_v0  ;;  %v3334_v2 = vld [vmem:[%s6241_s1 + $0x8] sm:$0xf]  ;;  %vm274_vm1 = vcmask 1046528   ;;  %vm357_vm2 = vcmask 31744   ;;  %v4562_v21 = vld [vmem:[%s6241_s1 + $0xc] sm:$0xf] }
   0xd   : > { %4324 = vmatpush3.msk.msra.mxu1 %vm422_vm0, %v3267_v0  ;;  %3874 = vmatpush3.msk.msra.mxu0 %vm422_vm0, %v3267_v0  ;;  %s6525_s13 = smov (!%p161_p3, %s3259_s13), 1  ;;  %v4580_v28 = vld [vmem:[%s6241_s1 + $0x10] sm:$0xf]  ;;  %vm943_vm3 = vcmask 1045504   ;;  %vm3171_vm4 = vcmask 64512  }
   0xe   : > { %3923 = vmatprep.subr.msk.mxu1 %vm422_vm0, %v225_v1  ;;  %3973 = vmatprep.subr.msk.mxu0 %vm422_vm0, %v3334_v2  ;;  %s4325_s20 = smul.u32 432, %s6525_s13  ;;  %s3575_s11 = sshll.u32 %s6525_s13, 8 }
   0xf   : > { %s6136_s15 = scalar_lea.vmem %s6243_s3, %s3575_s11 }
  0x10   : > { %s4519_s23 = scalar_lea.vmem %s6240_s0, %s4325_s20 }
  0x11   : > { %v4522_v3 = vld [vmem:[%s4519_s23] sm:$0xff]  ;;  %v4525_v4 = vld [vmem:[%s4519_s23 + $0x8] sm:$0xff]  ;;  %v4537_v10 = vld [vmem:[%s4519_s23 + $0x10] sm:$0x3] }
  0x12   : > { %v4528_v5 = vld [vmem:[%s4519_s23 + $0xc0] sm:$0xff]  ;;  %v275_v6 = vrot.slane %v4522_v3, 1  ;;  %v276_v7 = vrot.slane %v4525_v4, 1  ;;  %v4533_v8 = vld [vmem:[%s4519_s23 + $0xc8] sm:$0xff]  ;;  %v278_v12 = vrot.slane %v4537_v10, 1  ;;  %v4545_v14 = vld [vmem:[%s4519_s23 + $0x18] sm:$0xff] }
  0x13   : > { %v315_v9 = vrot.slane %v4528_v5, 1  ;;  %v316_v11 = vrot.slane %v4533_v8, 1  ;;  %v4542_v13 = vld [vmem:[%s4519_s23 + $0xd0] sm:$0x3]  ;;  %v4550_v17 = vld [vmem:[%s4519_s23 + $0x20] sm:$0xff]  ;;  %v280_v18 = vrot.slane %v4545_v14, 1 }
  0x14   : > { %v277_v15 = vsel %vm274_vm1, %v275_v6, %v276_v7  ;;  %v318_v16 = vrot.slane %v4542_v13, 1  ;;  %v4554_v19 = vld [vmem:[%s4519_s23 + $0xd8] sm:$0xff]  ;;  %v4557_v20 = vld [vmem:[%s4519_s23 + $0xe0] sm:$0xff]  ;;  %v279_v23 = vsel %vm274_vm1, %v276_v7, %v278_v12  ;;  %v281_v24 = vrot.slane %v4550_v17, 1  ;;  %v4572_v26 = vld [vmem:[%s4519_s23 + $0x28] sm:$0x3] }
  0x15   : > { %3875 = vmatprep.mubr.msk.f32.mxu0 %vm357_vm2, %v277_v15  ;;  %v4566_v22 = vsel %vm274_vm1, %v315_v9, %v316_v11  ;;  %v320_v25 = vrot.slane %v4554_v19, 1  ;;  %v4575_v27 = vld [vmem:[%s4519_s23 + $0xe8] sm:$0x3]  ;;  %v321_v30 = vrot.slane %v4557_v20, 1  ;;  %v283_v31 = vrot.slane %v4572_v26, 1  ;;  %v4592_v33 = vld [vmem:[%s4519_s23 + $0x30] sm:$0xff] }
  0x16   : > { %6326 = vst [vmem:[#allocation2_spill] sm:$0xff] %v4566_v22  ;;  %3899 = vmatprep.mubr.msk.f32.mxu1 %vm357_vm2, %v4566_v22  ;;  %3876 = vmatmul.mubr.msk.f32.vlgmr.msra.gmra.mxu0 %vm357_vm2, %v279_v23  ;;  %v4586_v29 = vsel %vm274_vm1, %v316_v11, %v318_v16  ;;  %v323_v32 = vrot.slane %v4575_v27, 1  ;;  %v4595_v34 = vld [vmem:[%s4519_s23 + $0x38] sm:$0xff]  ;;  %v4598_v35 = vld [vmem:[%s4519_s23 + $0xf0] sm:$0xff]  ;;  %v4604_v36 = vsel %vm274_vm1, %v280_v18, %v281_v24  ;;  %v285_v37 = vrot.slane %v4592_v33, 1  ;;  %v4632_v47 = vld [vmem:[%s4519_s23 + $0x48] sm:$0xff] }
  0x17   : > { %6327 = vst [vmem:[#allocation3_spill] sm:$0xff] %v4586_v29  ;;  %3900 = vmatmul.mubr.msk.f32.vlgmr.msra.gmra.mxu1 %vm357_vm2, %v4586_v29  ;;  %3974 = vmatpush3.msk.msra.mxu0 %vm422_vm0, %v3334_v2  ;;  %6328 = vst [vmem:[#allocation4_spill] sm:$0xff] %v4604_v36  ;;  %v286_v38 = vrot.slane %v4595_v34, 1  ;;  %v4609_v39 = vld [vmem:[%s4519_s23 + $0xf8] sm:$0xff]  ;;  %v325_v40 = vrot.slane %v4598_v35, 1  ;;  %v4619_v42 = vsel %vm274_vm1, %v320_v25, %v321_v30  ;;  %v4635_v48 = vld [vmem:[%s4519_s23 + $0x50] sm:$0xff] }
  0x18   : > { %v4613_v41 = vld [vmem:[%s4519_s23 + $0x40] sm:$0x3]  ;;  %3924 = vmatpush3.msk.msra.mxu1 %vm422_vm0, %v225_v1  ;;  %3878 = vmatprep.mubr.msk.f32.mxu0 %vm357_vm2, %v4604_v36  ;;  %6329 = vst [vmem:[#allocation5_spill] sm:$0xff] %v4619_v42  ;;  %v4622_v43 = vsel %vm274_vm1, %v281_v24, %v283_v31  ;;  %v4625_v44 = vsel %vm274_vm1, %v321_v30, %v323_v32  ;;  %v326_v45 = vrot.slane %v4609_v39, 1  ;;  %v290_v52 = vrot.slane %v4632_v47, 1  ;;  %v4646_v53 = vld [vmem:[%s4519_s23 + $0x108] sm:$0xff] }
  0x19   : > { %6330 = vst [vmem:[#allocation6_spill] sm:$0xff] %v4622_v43  ;;  %6331 = vst [vmem:[#allocation7_spill] sm:$0xff] %v4625_v44  ;;  %v4629_v46 = vld [vmem:[%s4519_s23 + $0x100] sm:$0x3]  ;;  %3902 = vmatprep.mubr.msk.f32.mxu1 %vm357_vm2, %v4619_v42  ;;  %v4640_v49 = vsel %vm274_vm1, %v285_v37, %v286_v38  ;;  %v288_v50 = vrot.slane %v4613_v41, 1  ;;  %v4649_v54 = vld [vmem:[%s4519_s23 + $0x110] sm:$0xff]  ;;  %4023 = vmatprep.subr.msk.mxu1 %vm422_vm0, %v4562_v21 }
  0x1a   : > { %6332 = vst [vmem:[#allocation8_spill] sm:$0xff] %v4640_v49  ;;  %v328_v51 = vrot.slane %v4629_v46, 1  ;;  %v4652_v55 = vld [vmem:[%s4519_s23 + $0x60] sm:$0xff]  ;;  %3879 = vmatmul.mubr.msk.f32.gmra.mxu0 %vm357_vm2, %v4622_v43  ;;  %v4659_v56 = vsel %vm274_vm1, %v325_v40, %v326_v45  ;;  %v291_v57 = vrot.slane %v4635_v48, 1  ;;  %v330_v58 = vrot.slane %v4646_v53, 1  ;;  %v4668_v61 = vld [vmem:[%s4519_s23 + $0x68] sm:$0xff]  ;;  %4073 = vmatprep.subr.msk.mxu0 %vm422_vm0, %v4580_v28 }
  0x1b   : > { %6333 = vst [vmem:[#allocation9_spill] sm:$0xff] %v4659_v56  ;;  %v331_v59 = vrot.slane %v4649_v54, 1  ;;  %v4665_v60 = vld [vmem:[%s4519_s23 + $0x58] sm:$0x3]  ;;  %3903 = vmatmul.mubr.msk.f32.gmra.mxu1 %vm357_vm2, %v4625_v44  ;;  %3881 = vmatprep.mubr.msk.f32.mxu0 %vm357_vm2, %v4640_v49  ;;  %v4677_v62 = vsel %vm274_vm1, %v286_v38, %v288_v50  ;;  %v295_v1 = vrot.slane %v4652_v55, 1  ;;  %v4685_v2 = vld [vmem:[%s4519_s23 + $0x120] sm:$0xff] }
  0x1c   : > { %6334 = vst [vmem:[#allocation10_spill] sm:$0xff] %v4677_v62  ;;  %v293_v63 = vrot.slane %v4665_v60, 1  ;;  %v4681_v0 = vld [vmem:[%s4519_s23 + $0x118] sm:$0x3]  ;;  %v4688_v6 = vld [vmem:[%s4519_s23 + $0x128] sm:$0xff]  ;;  %3905 = vmatprep.mubr.msk.f32.mxu1 %vm357_vm2, %v4659_v56  ;;  %v4693_v7 = vsel %vm274_vm1, %v326_v45, %v328_v51  ;;  %v4696_v9 = vsel %vm274_vm1, %v290_v52, %v291_v57  ;;  %v296_v12 = vrot.slane %v4668_v61, 1 }
  0x1d   : > { %6335 = vst [vmem:[#allocation11_spill] sm:$0xff] %v4693_v7  ;;  %6336 = vst [vmem:[#allocation12_spill] sm:$0xff] %v4696_v9  ;;  %v333_v11 = vrot.slane %v4681_v0, 1  ;;  %v4701_v15 = vld [vmem:[%s4519_s23 + $0x70] sm:$0x3]  ;;  %v4707_v18 = vsel %vm274_vm1, %v330_v58, %v331_v59  ;;  %v335_v23 = vrot.slane %v4685_v2, 1 }
  0x1e   : > { %v4704_v16 = vld [vmem:[%s4519_s23 + $0x130] sm:$0x3]  ;;  %6337 = vst [vmem:[#allocation13_spill] sm:$0xff] %v4707_v18  ;;  %v336_v24 = vrot.slane %v4688_v6, 1  ;;  %v4712_v25 = vld [vmem:[%s4519_s23 + $0x78] sm:$0xff]  ;;  %v4715_v30 = vld [vmem:[%s4519_s23 + $0x80] sm:$0xff]  ;;  %3882 = vmatmul.mubr.msk.f32.gmra.mxu0 %vm357_vm2, %v4677_v62  ;;  %v4730_v37 = vsel %vm274_vm1, %v291_v57, %v293_v63  ;;  %v4740_v50 = vsel %vm274_vm1, %v295_v1, %v296_v12 }
  0x1f   : > { %v4720_v31 = vld [vmem:[%s4519_s23 + $0x138] sm:$0xff]  ;;  %v4723_v32 = vld [vmem:[%s4519_s23 + $0x140] sm:$0xff]  ;;  %3906 = vmatmul.mubr.msk.f32.gmra.mxu1 %vm357_vm2, %v4693_v7  ;;  %3884 = vmatprep.mubr.msk.f32.mxu0 %vm357_vm2, %v4696_v9  ;;  %6338 = vst [vmem:[#allocation14_spill] sm:$0xff] %v4730_v37  ;;  %v298_v38 = vrot.slane %v4701_v15, 1  ;;  %v338_v40 = vrot.slane %v4704_v16, 1  ;;  %v4737_v45 = vsel %vm274_vm1, %v331_v59, %v333_v11  ;;  %6340 = vst [vmem:[#allocation16_spill] sm:$0xff] %v4740_v50 }
  0x20   : > { %3908 = vmatprep.mubr.msk.f32.mxu1 %vm357_vm2, %v4707_v18  ;;  %6339 = vst [vmem:[#allocation15_spill] sm:$0xff] %v4737_v45  ;;  %v300_v51 = vrot.slane %v4712_v25, 1  ;;  %v301_v52 = vrot.slane %v4715_v30, 1  ;;  %v4745_v57 = vld [vmem:[%s4519_s23 + $0x88] sm:$0x3]  ;;  %v4751_v63 = vsel %vm274_vm1, %v335_v23, %v336_v24  ;;  %v340_v7 = vrot.slane %v4720_v31, 1 }
  0x21   : > { %v4748_v58 = vld [vmem:[%s4519_s23 + $0x148] sm:$0x3]  ;;  %6341 = vst [vmem:[#allocation17_spill] sm:$0xff] %v4751_v63  ;;  %v341_v18 = vrot.slane %v4723_v32, 1  ;;  %v4756_v59 = vld [vmem:[%s4519_s23 + $0x90] sm:$0xff]  ;;  %v4759_v1 = vld [vmem:[%s4519_s23 + $0x98] sm:$0xff]  ;;  %v4774_v23 = vsel %vm274_vm1, %v296_v12, %v298_v38  ;;  %v4781_v29 = vsel %vm274_vm1, %v336_v24, %v338_v40 }
  0x22   : > { %3885 = vmatmul.mubr.msk.f32.gmra.mxu0 %vm357_vm2, %v4730_v37  ;;  %v4764_v11 = vld [vmem:[%s4519_s23 + $0x150] sm:$0xff]  ;;  %v4767_v56 = vld [vmem:[%s4519_s23 + $0x158] sm:$0xff]  ;;  %6343 = vst [vmem:[#allocation19_spill] sm:$0xff] %v4774_v23  ;;  %v303_v44 = vrot.slane %v4745_v57, 1  ;;  %v343_v42 = vrot.slane %v4748_v58, 1  ;;  %6344 = vst [vmem:[#allocation20_spill] sm:$0xff] %v4781_v29 }
  0x23   : > { %6342 = vst [vmem:[#allocation18_spill] sm:$0xff] %v4767_v56  ;;  %3909 = vmatmul.mubr.msk.f32.gmra.mxu1 %vm357_vm2, %v4737_v45  ;;  %3887 = vmatprep.mubr.msk.f32.mxu0 %vm357_vm2, %v4740_v50  ;;  %v4784_v45 = vsel %vm274_vm1, %v300_v51, %v301_v52  ;;  %v305_v22 = vrot.slane %v4756_v59, 1  ;;  %v306_v12 = vrot.slane %v4759_v1, 1  ;;  %v4789_v38 = vld [vmem:[%s4519_s23 + $0xa0] sm:$0x3]  ;;  %v4792_v50 = vsel %vm274_vm1, %v340_v7, %v341_v18  ;;  %v4800_v24 = vld [vmem:[%s4519_s23 + $0xa8] sm:$0xff] }
  0x24   : > { %3911 = vmatprep.mubr.msk.f32.mxu1 %vm357_vm2, %v4751_v63  ;;  %6345 = vst [vmem:[#allocation21_spill] sm:$0xff] %v4784_v45  ;;  %6346 = vst [vmem:[#allocation22_spill] sm:$0xff] %v4792_v50  ;;  %v345_v37 = vrot.slane %v4764_v11, 1  ;;  %v346_v9 = vrot.slane %v4767_v56, 1  ;;  %v4797_v63 = vld [vmem:[%s4519_s23 + $0x160] sm:$0x3]  ;;  %v4818_v7 = vsel %vm274_vm1, %v301_v52, %v303_v44  ;;  %v4821_v49 = vsel %vm274_vm1, %v341_v18, %v343_v42 }
  0x25   : > { %v4803_v40 = vld [vmem:[%s4519_s23 + $0xb0] sm:$0xff]  ;;  %v4808_v51 = vld [vmem:[%s4519_s23 + $0x168] sm:$0xff]  ;;  %6348 = vst [vmem:[#allocation24_spill] sm:$0xff] %v4818_v7  ;;  %6349 = vst [vmem:[#allocation25_spill] sm:$0xff] %v4821_v49  ;;  %v308_v43 = vrot.slane %v4789_v38, 1  ;;  %v348_v36 = vrot.slane %v4797_v63, 1 }
  0x26   : > { %3888 = vmatmul.mubr.msk.f32.gmra.mxu0 %vm357_vm2, %v4774_v23  ;;  %v4811_v62 = vld [vmem:[%s4519_s23 + $0x170] sm:$0xff]  ;;  %v4827_v23 = vsel %vm274_vm1, %v305_v22, %v306_v12  ;;  %v4833_v56 = vld [vmem:[%s4519_s23 + $0xb8] sm:$0x3]  ;;  %v4836_v44 = vsel %vm274_vm1, %v345_v37, %v346_v9  ;;  %v350_v42 = vrot.slane %v4808_v51, 1 }
  0x27   : > { %6347 = vst [vmem:[#allocation23_spill] sm:$0xff] %v4811_v62  ;;  %3912 = vmatmul.mubr.msk.f32.gmra.mxu1 %vm357_vm2, %v4781_v29  ;;  %3890 = vmatprep.mubr.msk.f32.mxu0 %vm357_vm2, %v4784_v45  ;;  %6350 = vst [vmem:[#allocation26_spill] sm:$0xff] %v4827_v23  ;;  %v310_v29 = vrot.slane %v4800_v24, 1  ;;  %v311_v45 = vrot.slane %v4803_v40, 1  ;;  %v351_v18 = vrot.slane %v4811_v62, 1  ;;  %v4850_v22 = vsel %vm274_vm1, %v306_v12, %v308_v43 }
  0x28   : > { %3914 = vmatprep.mubr.msk.f32.mxu1 %vm357_vm2, %v4792_v50  ;;  %6351 = vst [vmem:[#allocation27_spill] sm:$0xff] %v4836_v44  ;;  %v4841_v52 = vld [vmem:[%s4519_s23 + $0x178] sm:$0x3]  ;;  %6352 = vst [vmem:[#allocation28_spill] sm:$0xff] %v4850_v22  ;;  %v313_v37 = vrot.slane %v4833_v56, 1  ;;  %v944_v50 = vrot.slane %v4522_v3, 2  ;;  %v4857_v62 = vsel %vm274_vm1, %v346_v9, %v348_v36 }
  0x29   : > { %6353 = vst [vmem:[#allocation29_spill] sm:$0xff] %v4857_v62  ;;  %v4865_v43 = vsel %vm274_vm1, %v350_v42, %v351_v18  ;;  %v947_v12 = vrot.slane %v4537_v10, 2  ;;  %v949_v10 = vrot.slane %v4545_v14, 2  ;;  %v950_v42 = vrot.slane %v4550_v17, 2 }
  0x2a   : > { %3891 = vmatmul.mubr.msk.f32.gmra.mxu0 %vm357_vm2, %v4818_v7  ;;  %v4860_v7 = vsel %vm274_vm1, %v310_v29, %v311_v45  ;;  %6355 = vst [vmem:[#allocation31_spill] sm:$0xff] %v4865_v43  ;;  %v4875_v29 = vsel %vm274_vm1, %v311_v45, %v313_v37  ;;  %v952_v37 = vrot.slane %v4572_v26, 2  ;;  %v957_v26 = vrot.slane %v4613_v41, 2 }
  0x2b   : > { %3915 = vmatmul.mubr.msk.f32.gmra.mxu1 %vm357_vm2, %v4821_v49  ;;  %3893 = vmatprep.mubr.msk.f32.mxu0 %vm357_vm2, %v4827_v23  ;;  %6354 = vst [vmem:[#allocation30_spill] sm:$0xff] %v4860_v7  ;;  %v353_v49 = vrot.slane %v4841_v52, 1  ;;  %v945_v23 = vrot.slane %v4525_v4, 2  ;;  %6356 = vst [vmem:[#allocation32_spill] sm:$0xff] %v4875_v29  ;;  %v962_v41 = vrot.slane %v4665_v60, 2 }
  0x2c   : > { %3917 = vmatprep.mubr.msk.f32.mxu1 %vm357_vm2, %v4836_v44 }
  0x2d   : > { %v4880_v36 = vsel %vm274_vm1, %v351_v18, %v353_v49  ;;  %v946_v9 = vsel %vm943_vm3, %v944_v50, %v945_v23  ;;  %v948_v45 = vsel %vm943_vm3, %v945_v23, %v947_v12  ;;  %v954_v49 = vrot.slane %v4592_v33, 2  ;;  %v4916_v23 = vld [vmem:[%s6241_s1 + $0x18] sm:$0xf] }
  0x2e   : > { %3894 = vmatmul.mubr.msk.f32.gmra.mxu0 %vm357_vm2, %v4850_v22  ;;  %6357 = vst [vmem:[#allocation33_spill] sm:$0xff] %v4880_v36  ;;  %v955_v50 = vrot.slane %v4595_v34, 2  ;;  %v4898_v18 = vsel %vm943_vm3, %v949_v10, %v950_v42  ;;  %v960_v12 = vrot.slane %v4635_v48, 2 }
  0x2f   : > { %3918 = vmatmul.mubr.msk.f32.gmra.mxu1 %vm357_vm2, %v4857_v62  ;;  %3896 = vmatprep.mubr.msk.f32.mxu0 %vm357_vm2, %v4860_v7 }
  0x30   : > { %3920 = vmatprep.mubr.msk.f32.mxu1 %vm357_vm2, %v4865_v43  ;;  %v4957_v60 = vsel %vm943_vm3, %v960_v12, %v962_v41  ;;  %v974_v41 = vrot.slane %v4756_v59, 2 }
  0x32   : > { %3897 = vmatmul.mubr.msk.f32.gmra.mxu0 %vm357_vm2, %v4875_v29 }
  0x33   : > { %3921 = vmatmul.mubr.msk.f32.gmra.mxu1 %vm357_vm2, %v4880_v36  ;;  %3975 = vmatprep.mubr.msk.f32.mxu0 %vm357_vm2, %v946_v9  ;;  %v4903_v9 = vld [vmem:[%s6241_s1 + $0x14] sm:$0xf] }
  0x34   : > { %3925 = vmatprep.mubr.msk.f32.mxu1 %vm357_vm2, %v4522_v3  ;;  %v4910_v3 = vsel %vm943_vm3, %v950_v42, %v952_v37  ;;  %v964_v42 = vrot.slane %v4652_v55, 2  ;;  %v967_v37 = vrot.slane %v4701_v15, 2 }
  0x36   : > { %3976 = vmatmul.mubr.msk.f32.vlgmr.msra.gmra.mxu0 %vm357_vm2, %v948_v45  ;;  %v965_v45 = vrot.slane %v4668_v61, 2 }
  0x37   : > { %3926 = vmatmul.mubr.msk.f32.vlgmr.msra.gmra.mxu1 %vm357_vm2, %v4525_v4  ;;  %4074 = vmatpush3.msk.msra.mxu0 %vm422_vm0, %v4580_v28  ;;  %v4923_v4 = vsel %vm943_vm3, %v954_v49, %v955_v50  ;;  %v959_v28 = vrot.slane %v4632_v47, 2 }
  0x38   : > { %4024 = vmatpush3.msk.msra.mxu1 %vm422_vm0, %v4562_v21  ;;  %3928 = vmatprep.mubr.msk.f32.mxu1 %vm357_vm2, %v4545_v14  ;;  %v4940_v21 = vsel %vm943_vm3, %v955_v50, %v957_v26  ;;  %v4963_v49 = vsel %vm943_vm3, %v964_v42, %v965_v45  ;;  %v969_v50 = vrot.slane %v4712_v25, 2  ;;  %v970_v26 = vrot.slane %v4715_v30, 2 }
  0x39   : > { %3978 = vmatprep.mubr.msk.f32.mxu0 %vm357_vm2, %v4898_v18  ;;  %4123 = vmatprep.subr.msk.mxu1 %vm422_vm0, %v4903_v9  ;;  %v4946_v10 = vsel %vm943_vm3, %v959_v28, %v960_v12  ;;  %v4974_v15 = vsel %vm943_vm3, %v965_v45, %v967_v37  ;;  %v972_v28 = vrot.slane %v4745_v57, 2  ;;  %v975_v42 = vrot.slane %v4759_v1, 2 }
  0x3a   : > { %3979 = vmatmul.mubr.msk.f32.gmra.mxu0 %vm357_vm2, %v4910_v3  ;;  %4173 = vmatprep.subr.msk.mxu0 %vm422_vm0, %v4916_v23  ;;  %6358 = vst [vmem:[#allocation34_spill] sm:$0xff] %v4974_v15  ;;  %v4980_v12 = vsel %vm943_vm3, %v969_v50, %v970_v26  ;;  %v977_v45 = vrot.slane %v4789_v38, 2  ;;  %v979_v50 = vrot.slane %v4800_v24, 2 }
  0x3b   : > { %3929 = vmatmul.mubr.msk.f32.gmra.mxu1 %vm357_vm2, %v4550_v17  ;;  %3981 = vmatprep.mubr.msk.f32.mxu0 %vm357_vm2, %v4923_v4  ;;  %v4991_v57 = vsel %vm943_vm3, %v970_v26, %v972_v28  ;;  %v4997_v37 = vsel %vm943_vm3, %v974_v41, %v975_v42  ;;  %v982_v26 = vrot.slane %v4833_v56, 2  ;;  %v984_v41 = vrot.slane %v4528_v5, 2 }
  0x3c   : > { %3931 = vmatprep.mubr.msk.f32.mxu1 %vm357_vm2, %v4592_v33  ;;  %6359 = vst [vmem:[#allocation35_spill] sm:$0xff] %v4991_v57  ;;  %v5008_v38 = vsel %vm943_vm3, %v975_v42, %v977_v45  ;;  %v987_v42 = vrot.slane %v4542_v13, 2 }
  0x3d   : > { %6360 = vst [vmem:[#allocation36_spill] sm:$0xff] %v5008_v38 }
  0x3e   : > { %3982 = vmatmul.mubr.msk.f32.gmra.mxu0 %vm357_vm2, %v4940_v21 }
  0x3f   : > { %3932 = vmatmul.mubr.msk.f32.gmra.mxu1 %vm357_vm2, %v4595_v34  ;;  %3984 = vmatprep.mubr.msk.f32.mxu0 %vm357_vm2, %v4946_v10 }
  0x40   : > { %3934 = vmatprep.mubr.msk.f32.mxu1 %vm357_vm2, %v4632_v47 }
  0x42   : > { %3985 = vmatmul.mubr.msk.f32.gmra.mxu0 %vm357_vm2, %v4957_v60 }
  0x43   : > { %3935 = vmatmul.mubr.msk.f32.gmra.mxu1 %vm357_vm2, %v4635_v48  ;;  %3987 = vmatprep.mubr.msk.f32.mxu0 %vm357_vm2, %v4963_v49 }
  0x44   : > { %3937 = vmatprep.mubr.msk.f32.mxu1 %vm357_vm2, %v4652_v55 }
  0x46   : > { %3988 = vmatmul.mubr.msk.f32.gmra.mxu0 %vm357_vm2, %v4974_v15  ;;  %v980_v15 = vrot.slane %v4803_v40, 2 }
  0x47   : > { %3938 = vmatmul.mubr.msk.f32.gmra.mxu1 %vm357_vm2, %v4668_v61  ;;  %3990 = vmatprep.mubr.msk.f32.mxu0 %vm357_vm2, %v4980_v12 }
  0x48   : > { %3940 = vmatprep.mubr.msk.f32.mxu1 %vm357_vm2, %v4712_v25  ;;  %v5014_v28 = vsel %vm943_vm3, %v979_v50, %v980_v15  ;;  %v5025_v56 = vsel %vm943_vm3, %v980_v15, %v982_v26  ;;  %v989_v50 = vrot.slane %v4554_v19, 2  ;;  %v992_v15 = vrot.slane %v4575_v27, 2 }
  0x49   : > { %6361 = vst [vmem:[#allocation37_spill] sm:$0xff] %v5025_v56 }
  0x4a   : > { %3991 = vmatmul.mubr.msk.f32.gmra.mxu0 %vm357_vm2, %v4991_v57  ;;  %v985_v57 = vrot.slane %v4533_v8, 2 }
  0x4b   : > { %3941 = vmatmul.mubr.msk.f32.gmra.mxu1 %vm357_vm2, %v4715_v30  ;;  %3993 = vmatprep.mubr.msk.f32.mxu0 %vm357_vm2, %v4997_v37 }
  0x4c   : > { %3943 = vmatprep.mubr.msk.f32.mxu1 %vm357_vm2, %v4756_v59  ;;  %v5031_v45 = vsel %vm943_vm3, %v984_v41, %v985_v57  ;;  %v5042_v13 = vsel %vm943_vm3, %v985_v57, %v987_v42  ;;  %v994_v41 = vrot.slane %v4598_v35, 2  ;;  %v997_v57 = vrot.slane %v4629_v46, 2 }
  0x4d   : > { %6362 = vst [vmem:[#allocation38_spill] sm:$0xff] %v5042_v13 }
  0x4e   : > { %3994 = vmatmul.mubr.msk.f32.gmra.mxu0 %vm357_vm2, %v5008_v38  ;;  %v990_v38 = vrot.slane %v4557_v20, 2 }
  0x4f   : > { %3944 = vmatmul.mubr.msk.f32.gmra.mxu1 %vm357_vm2, %v4759_v1  ;;  %3996 = vmatprep.mubr.msk.f32.mxu0 %vm357_vm2, %v5014_v28 }
  0x50   : > { %3946 = vmatprep.mubr.msk.f32.mxu1 %vm357_vm2, %v4800_v24  ;;  %v5048_v26 = vsel %vm943_vm3, %v989_v50, %v990_v38  ;;  %v5059_v27 = vsel %vm943_vm3, %v990_v38, %v992_v15  ;;  %v999_v50 = vrot.slane %v4646_v53, 2  ;;  %v1002_v38 = vrot.slane %v4681_v0, 2 }
  0x51   : > { %6363 = vst [vmem:[#allocation39_spill] sm:$0xff] %v5059_v27 }
  0x52   : > { %3997 = vmatmul.mubr.msk.f32.gmra.mxu0 %vm357_vm2, %v5025_v56  ;;  %v995_v56 = vrot.slane %v4609_v39, 2 }
  0x53   : > { %3947 = vmatmul.mubr.msk.f32.gmra.mxu1 %vm357_vm2, %v4803_v40  ;;  %3999 = vmatprep.mubr.msk.f32.mxu0 %vm357_vm2, %v5031_v45 }
  0x54   : > { %3949 = vmatprep.mubr.msk.f32.mxu1 %vm357_vm2, %v4528_v5  ;;  %v5065_v42 = vsel %vm943_vm3, %v994_v41, %v995_v56  ;;  %v5076_v46 = vsel %vm943_vm3, %v995_v56, %v997_v57  ;;  %v1004_v41 = vrot.slane %v4685_v2, 2  ;;  %v1007_v56 = vrot.slane %v4704_v16, 2 }
  0x55   : > { %6364 = vst [vmem:[#allocation40_spill] sm:$0xff] %v5076_v46 }
  0x56   : > { %4000 = vmatmul.mubr.msk.f32.gmra.mxu0 %vm357_vm2, %v5042_v13  ;;  %v1000_v13 = vrot.slane %v4649_v54, 2 }
  0x57   : > { %3950 = vmatmul.mubr.msk.f32.gmra.mxu1 %vm357_vm2, %v4533_v8  ;;  %4002 = vmatprep.mubr.msk.f32.mxu0 %vm357_vm2, %v5048_v26 }
  0x58   : > { %3952 = vmatprep.mubr.msk.f32.mxu1 %vm357_vm2, %v4554_v19  ;;  %v5082_v15 = vsel %vm943_vm3, %v999_v50, %v1000_v13  ;;  %v5093_v0 = vsel %vm943_vm3, %v1000_v13, %v1002_v38  ;;  %v1009_v50 = vrot.slane %v4720_v31, 2  ;;  %v1012_v13 = vrot.slane %v4748_v58, 2 }
  0x59   : > { %6365 = vst [vmem:[#allocation41_spill] sm:$0xff] %v5082_v15  ;;  %6366 = vst [vmem:[#allocation42_spill] sm:$0xff] %v5093_v0 }
  0x5a   : > { %4003 = vmatmul.mubr.msk.f32.gmra.mxu0 %vm357_vm2, %v5059_v27  ;;  %v1005_v27 = vrot.slane %v4688_v6, 2 }
  0x5b   : > { %3953 = vmatmul.mubr.msk.f32.gmra.mxu1 %vm357_vm2, %v4557_v20  ;;  %4005 = vmatprep.mubr.msk.f32.mxu0 %vm357_vm2, %v5065_v42 }
  0x5c   : > { %3955 = vmatprep.mubr.msk.f32.mxu1 %vm357_vm2, %v4598_v35  ;;  %v5099_v57 = vsel %vm943_vm3, %v1004_v41, %v1005_v27  ;;  %v5110_v16 = vsel %vm943_vm3, %v1005_v27, %v1007_v56  ;;  %v1014_v41 = vrot.slane %v4764_v11, 2  ;;  %v1017_v27 = vrot.slane %v4797_v63, 2 }
  0x5d   : > { %6367 = vst [vmem:[#allocation43_spill] sm:$0xff] %v5099_v57  ;;  %6368 = vst [vmem:[#allocation44_spill] sm:$0xff] %v5110_v16 }
  0x5e   : > { %4006 = vmatmul.mubr.msk.f32.gmra.mxu0 %vm357_vm2, %v5076_v46  ;;  %v1010_v46 = vrot.slane %v4723_v32, 2 }
  0x5f   : > { %3956 = vmatmul.mubr.msk.f32.gmra.mxu1 %vm357_vm2, %v4609_v39  ;;  %4008 = vmatprep.mubr.msk.f32.mxu0 %vm357_vm2, %v5082_v15 }
  0x60   : > { %3958 = vmatprep.mubr.msk.f32.mxu1 %vm357_vm2, %v4646_v53  ;;  %v5116_v38 = vsel %vm943_vm3, %v1009_v50, %v1010_v46  ;;  %v5127_v58 = vsel %vm943_vm3, %v1010_v46, %v1012_v13  ;;  %v1019_v50 = vrot.slane %v4808_v51, 2  ;;  %v1022_v46 = vrot.slane %v4841_v52, 2  ;;  %v6372_v52 = vld [vmem:[#allocation4_spill] sm:$0xff] }
  0x62   : > { %4009 = vmatmul.mubr.msk.f32.gmra.mxu0 %vm357_vm2, %v5093_v0  ;;  %v6369_v0 = vld [vmem:[#allocation18_spill] sm:$0xff] }
  0x63   : > { %3959 = vmatmul.mubr.msk.f32.gmra.mxu1 %vm357_vm2, %v4649_v54  ;;  %4011 = vmatprep.mubr.msk.f32.mxu0 %vm357_vm2, %v5099_v57  ;;  %v1015_v15 = vrot.slane %v6369_v0, 2 }
  0x64   : > { %3961 = vmatprep.mubr.msk.f32.mxu1 %vm357_vm2, %v4685_v2 }
  0x65   : > { %v5133_v56 = vsel %vm943_vm3, %v1014_v41, %v1015_v15  ;;  %v5144_v63 = vsel %vm943_vm3, %v1015_v15, %v1017_v27  ;;  %v6373_v41 = vld [vmem:[#allocation6_spill] sm:$0xff] }
  0x66   : > { %4012 = vmatmul.mubr.msk.f32.gmra.mxu0 %vm357_vm2, %v5110_v16  ;;  %v6370_v16 = vld [vmem:[#allocation23_spill] sm:$0xff]  ;;  %v5185_v27 = vld [vmem:[%s6241_s1 + $0x20] sm:$0xf] }
  0x67   : > { %3962 = vmatmul.mubr.msk.f32.gmra.mxu1 %vm357_vm2, %v4688_v6  ;;  %4014 = vmatprep.mubr.msk.f32.mxu0 %vm357_vm2, %v5116_v38  ;;  %v1020_v57 = vrot.slane %v6370_v16, 2 }
  0x68   : > { %3964 = vmatprep.mubr.msk.f32.mxu1 %vm357_vm2, %v4720_v31 }
  0x69   : > { %v5150_v13 = vsel %vm943_vm3, %v1019_v50, %v1020_v57  ;;  %v5159_v15 = vsel %vm943_vm3, %v1020_v57, %v1022_v46  ;;  %v5176_v57 = vld [vmem:[%s6241_s1 + $0x1c] sm:$0xf]  ;;  %v6378_v50 = vld [vmem:[#allocation16_spill] sm:$0xff]  ;;  %v6379_v46 = vld [vmem:[#allocation19_spill] sm:$0xff] }
  0x6a   : > { %4015 = vmatmul.mubr.msk.f32.gmra.mxu0 %vm357_vm2, %v5127_v58  ;;  %6371 = vst [vmem:[#allocation18_spill] sm:$0xff] %v5159_v15 }
  0x6b   : > { %3965 = vmatmul.mubr.msk.f32.gmra.mxu1 %vm357_vm2, %v4723_v32  ;;  %4017 = vmatprep.mubr.msk.f32.mxu0 %vm357_vm2, %v5133_v56 }
  0x6c   : > { %3967 = vmatprep.mubr.msk.f32.mxu1 %vm357_vm2, %v4764_v11 }
  0x6e   : > { %4018 = vmatmul.mubr.msk.f32.gmra.mxu0 %vm357_vm2, %v5144_v63 }
  0x6f   : > { %3968 = vmatmul.mubr.msk.f32.gmra.mxu1 %vm357_vm2, %v6369_v0  ;;  %4020 = vmatprep.mubr.msk.f32.mxu0 %vm357_vm2, %v5150_v13 }
  0x70   : > { %3970 = vmatprep.mubr.msk.f32.mxu1 %vm357_vm2, %v4808_v51 }
  0x72   : > { %4021 = vmatmul.mubr.msk.f32.gmra.mxu0 %vm357_vm2, %v5159_v15 }
  0x73   : > { %3971 = vmatmul.mubr.msk.f32.gmra.mxu1 %vm357_vm2, %v6370_v16  ;;  %4075 = vmatprep.mubr.msk.f32.mxu0 %vm357_vm2, %v6372_v52  ;;  %v6380_v52 = vld [vmem:[#allocation21_spill] sm:$0xff] }
  0x74   : > { %4025 = vmatprep.mubr.msk.f32.mxu1 %vm357_vm2, %v4545_v14  ;;  %v6374_v14 = vld [vmem:[#allocation8_spill] sm:$0xff] }
  0x76   : > { %4076 = vmatmul.mubr.msk.f32.vlgmr.msra.gmra.mxu0 %vm357_vm2, %v6373_v41  ;;  %v6381_v41 = vld [vmem:[#allocation24_spill] sm:$0xff] }
  0x77   : > { %4026 = vmatmul.mubr.msk.f32.vlgmr.msra.gmra.mxu1 %vm357_vm2, %v4550_v17  ;;  %4174 = vmatpush3.msk.msra.mxu0 %vm422_vm0, %v4916_v23  ;;  %v6375_v17 = vld [vmem:[#allocation10_spill] sm:$0xff]  ;;  %v6376_v23 = vld [vmem:[#allocation12_spill] sm:$0xff] }
  0x78   : > { %4124 = vmatpush3.msk.msra.mxu1 %vm422_vm0, %v4903_v9  ;;  %4028 = vmatprep.mubr.msk.f32.mxu1 %vm357_vm2, %v4592_v33  ;;  %v6377_v9 = vld [vmem:[#allocation14_spill] sm:$0xff] }
  0x79   : > { %4078 = vmatprep.mubr.msk.f32.mxu0 %vm357_vm2, %v6374_v14  ;;  %4223 = vmatprep.subr.msk.mxu1 %vm422_vm0, %v5176_v57 }
  0x7a   : > { %4079 = vmatmul.mubr.msk.f32.gmra.mxu0 %vm357_vm2, %v6375_v17  ;;  %4273 = vmatprep.subr.msk.mxu0 %vm422_vm0, %v5185_v27 }
  0x7b   : > { %4029 = vmatmul.mubr.msk.f32.gmra.mxu1 %vm357_vm2, %v4595_v34  ;;  %4081 = vmatprep.mubr.msk.f32.mxu0 %vm357_vm2, %v6376_v23 }
  0x7c   : > { %4031 = vmatprep.mubr.msk.f32.mxu1 %vm357_vm2, %v4632_v47 }
  0x7e   : > { %4082 = vmatmul.mubr.msk.f32.gmra.mxu0 %vm357_vm2, %v6377_v9 }
  0x7f   : > { %4032 = vmatmul.mubr.msk.f32.gmra.mxu1 %vm357_vm2, %v4635_v48  ;;  %4084 = vmatprep.mubr.msk.f32.mxu0 %vm357_vm2, %v6378_v50  ;;  %v6382_v50 = vld [vmem:[#allocation26_spill] sm:$0xff] }
  0x80   : > { %4034 = vmatprep.mubr.msk.f32.mxu1 %vm357_vm2, %v4652_v55 }
  0x82   : > { %4085 = vmatmul.mubr.msk.f32.gmra.mxu0 %vm357_vm2, %v6379_v46 }
  0x83   : > { %4035 = vmatmul.mubr.msk.f32.gmra.mxu1 %vm357_vm2, %v4668_v61  ;;  %4087 = vmatprep.mubr.msk.f32.mxu0 %vm357_vm2, %v6380_v52  ;;  %v5302_v52 = vld [vmem:[%s4519_s23 + $0x190] sm:$0x3] }
  0x84   : > { %4037 = vmatprep.mubr.msk.f32.mxu1 %vm357_vm2, %v4712_v25 }
  0x86   : > { %4088 = vmatmul.mubr.msk.f32.gmra.mxu0 %vm357_vm2, %v6381_v41  ;;  %v5289_v41 = vld [vmem:[%s4519_s23 + $0x188] sm:$0xff] }
  0x87   : > { %4038 = vmatmul.mubr.msk.f32.gmra.mxu1 %vm357_vm2, %v4715_v30  ;;  %4090 = vmatprep.mubr.msk.f32.mxu0 %vm357_vm2, %v6382_v50  ;;  %v6383_v50 = vld [vmem:[#allocation2_spill] sm:$0xff] }
  0x88   : > { %4040 = vmatprep.mubr.msk.f32.mxu1 %vm357_vm2, %v4756_v59 }
  0x8a   : > { %4091 = vmatmul.mubr.msk.f32.gmra.mxu0 %vm357_vm2, %v4850_v22  ;;  %v6384_v22 = vld [vmem:[#allocation3_spill] sm:$0xff] }
  0x8b   : > { %4041 = vmatmul.mubr.msk.f32.gmra.mxu1 %vm357_vm2, %v4759_v1  ;;  %4093 = vmatprep.mubr.msk.f32.mxu0 %vm357_vm2, %v4860_v7  ;;  %v6385_v7 = vld [vmem:[#allocation5_spill] sm:$0xff] }
  0x8c   : > { %4043 = vmatprep.mubr.msk.f32.mxu1 %vm357_vm2, %v4800_v24 }
  0x8e   : > { %4094 = vmatmul.mubr.msk.f32.gmra.mxu0 %vm357_vm2, %v4875_v29  ;;  %v6386_v29 = vld [vmem:[#allocation7_spill] sm:$0xff] }
  0x8f   : > { %4044 = vmatmul.mubr.msk.f32.gmra.mxu1 %vm357_vm2, %v4803_v40  ;;  %4096 = vmatprep.mubr.msk.f32.mxu0 %vm357_vm2, %v6383_v50  ;;  %v6387_v50 = vld [vmem:[#allocation9_spill] sm:$0xff] }
  0x90   : > { %4046 = vmatprep.mubr.msk.f32.mxu1 %vm357_vm2, %v4528_v5 }
  0x92   : > { %4097 = vmatmul.mubr.msk.f32.gmra.mxu0 %vm357_vm2, %v6384_v22  ;;  %v6388_v22 = vld [vmem:[#allocation11_spill] sm:$0xff] }
  0x93   : > { %4047 = vmatmul.mubr.msk.f32.gmra.mxu1 %vm357_vm2, %v4533_v8  ;;  %4099 = vmatprep.mubr.msk.f32.mxu0 %vm357_vm2, %v6385_v7  ;;  %v6389_v7 = vld [vmem:[#allocation13_spill] sm:$0xff] }
  0x94   : > { %4049 = vmatprep.mubr.msk.f32.mxu1 %vm357_vm2, %v4554_v19 }
  0x96   : > { %4100 = vmatmul.mubr.msk.f32.gmra.mxu0 %vm357_vm2, %v6386_v29  ;;  %v6390_v29 = vld [vmem:[#allocation15_spill] sm:$0xff] }
  0x97   : > { %4050 = vmatmul.mubr.msk.f32.gmra.mxu1 %vm357_vm2, %v4557_v20  ;;  %4102 = vmatprep.mubr.msk.f32.mxu0 %vm357_vm2, %v6387_v50  ;;  %v6391_v50 = vld [vmem:[#allocation17_spill] sm:$0xff] }
  0x98   : > { %4052 = vmatprep.mubr.msk.f32.mxu1 %vm357_vm2, %v4598_v35 }
  0x9a   : > { %4103 = vmatmul.mubr.msk.f32.gmra.mxu0 %vm357_vm2, %v6388_v22  ;;  %v6392_v22 = vld [vmem:[#allocation20_spill] sm:$0xff] }
  0x9b   : > { %4053 = vmatmul.mubr.msk.f32.gmra.mxu1 %vm357_vm2, %v4609_v39  ;;  %4105 = vmatprep.mubr.msk.f32.mxu0 %vm357_vm2, %v6389_v7  ;;  %v6393_v7 = vld [vmem:[#allocation22_spill] sm:$0xff] }
  0x9c   : > { %4055 = vmatprep.mubr.msk.f32.mxu1 %vm357_vm2, %v4646_v53 }
  0x9e   : > { %4106 = vmatmul.mubr.msk.f32.gmra.mxu0 %vm357_vm2, %v6390_v29  ;;  %v5286_v29 = vld [vmem:[%s4519_s23 + $0x180] sm:$0xff] }
  0x9f   : > { %4056 = vmatmul.mubr.msk.f32.gmra.mxu1 %vm357_vm2, %v4649_v54  ;;  %4108 = vmatprep.mubr.msk.f32.mxu0 %vm357_vm2, %v6391_v50  ;;  %v6394_v50 = vld [vmem:[#allocation25_spill] sm:$0xff] }
  0xa0   : > { %4058 = vmatprep.mubr.msk.f32.mxu1 %vm357_vm2, %v4685_v2 }
  0xa2   : > { %4109 = vmatmul.mubr.msk.f32.gmra.mxu0 %vm357_vm2, %v6392_v22  ;;  %v1620_v22 = vrot.slane %v5289_v41, 1 }
  0xa3   : > { %4059 = vmatmul.mubr.msk.f32.gmra.mxu1 %vm357_vm2, %v4688_v6  ;;  %4111 = vmatprep.mubr.msk.f32.mxu0 %vm357_vm2, %v6393_v7  ;;  %v1619_v7 = vrot.slane %v5286_v29, 1 }
  0xa4   : > { %4061 = vmatprep.mubr.msk.f32.mxu1 %vm357_vm2, %v4720_v31 }
  0xa6   : > { %4112 = vmatmul.mubr.msk.f32.gmra.mxu0 %vm357_vm2, %v6394_v50  ;;  %v5314_v50 = vsel %vm274_vm1, %v1619_v7, %v1620_v22 }
  0xa7   : > { %4062 = vmatmul.mubr.msk.f32.gmra.mxu1 %vm357_vm2, %v4723_v32  ;;  %4114 = vmatprep.mubr.msk.f32.mxu0 %vm357_vm2, %v4836_v44  ;;  %v1622_v44 = vrot.slane %v5302_v52, 1  ;;  %6395 = vst [vmem:[#allocation23_spill] sm:$0xff] %v5314_v50 }
  0xa8   : > { %4064 = vmatprep.mubr.msk.f32.mxu1 %vm357_vm2, %v4764_v11 }
  0xaa   : > { %4115 = vmatmul.mubr.msk.f32.gmra.mxu0 %vm357_vm2, %v4857_v62  ;;  %v5323_v62 = vsel %vm274_vm1, %v1620_v22, %v1622_v44  ;;  %v6407_v22 = vld [vmem:[#allocation44_spill] sm:$0xff] }
  0xab   : > { %4065 = vmatmul.mubr.msk.f32.gmra.mxu1 %vm357_vm2, %v6369_v0  ;;  %4117 = vmatprep.mubr.msk.f32.mxu0 %vm357_vm2, %v4865_v43  ;;  %6396 = vst [vmem:[#allocation4_spill] sm:$0xff] %v5323_v62 }
  0xac   : > { %4067 = vmatprep.mubr.msk.f32.mxu1 %vm357_vm2, %v4808_v51 }
  0xae   : > { %4118 = vmatmul.mubr.msk.f32.gmra.mxu0 %vm357_vm2, %v4880_v36  ;;  %v5500_v36 = vld [vmem:[%s4519_s23 + $0x198] sm:$0xff] }
  0xaf   : > { %4068 = vmatmul.mubr.msk.f32.gmra.mxu1 %vm357_vm2, %v6370_v16  ;;  %4120 = vmatprep.mubr.msk.f32.mxu0 %vm357_vm2, %v5314_v50 }
  0xb0   : > { %4070 = vmatprep.mubr.msk.f32.mxu1 %vm357_vm2, %v5286_v29 }
  0xb2   : > { %4121 = vmatmul.mubr.msk.f32.gmra.mxu0 %vm357_vm2, %v5323_v62 }
  0xb3   : > { %4071 = vmatmul.mubr.msk.f32.gmra.mxu1 %vm357_vm2, %v5289_v41  ;;  %4175 = vmatprep.mubr.msk.f32.mxu0 %vm357_vm2, %v4592_v33  ;;  %v6397_v33 = vld [vmem:[#allocation34_spill] sm:$0xff] }
  0xb4   : > { %4125 = vmatprep.mubr.msk.f32.mxu1 %vm357_vm2, %v4898_v18 }
  0xb6   : > { %4176 = vmatmul.mubr.msk.f32.vlgmr.msra.gmra.mxu0 %vm357_vm2, %v4595_v34  ;;  %v6398_v34 = vld [vmem:[#allocation35_spill] sm:$0xff] }
  0xb7   : > { %4126 = vmatmul.mubr.msk.f32.vlgmr.msra.gmra.mxu1 %vm357_vm2, %v4910_v3  ;;  %4274 = vmatpush3.msk.msra.mxu0 %vm422_vm0, %v5185_v27 }
  0xb8   : > { %4224 = vmatpush3.msk.msra.mxu1 %vm422_vm0, %v5176_v57  ;;  %4128 = vmatprep.mubr.msk.f32.mxu1 %vm357_vm2, %v4923_v4  ;;  %v1890_v57 = vrot.slane %v5286_v29, 2 }
  0xb9   : > { %4178 = vmatprep.mubr.msk.f32.mxu0 %vm357_vm2, %v4632_v47  ;;  %v6399_v47 = vld [vmem:[#allocation36_spill] sm:$0xff] }
  0xba   : > { %4179 = vmatmul.mubr.msk.f32.gmra.mxu0 %vm357_vm2, %v4635_v48  ;;  %v6400_v48 = vld [vmem:[#allocation37_spill] sm:$0xff] }
  0xbb   : > { %4129 = vmatmul.mubr.msk.f32.gmra.mxu1 %vm357_vm2, %v4940_v21  ;;  %4181 = vmatprep.mubr.msk.f32.mxu0 %vm357_vm2, %v4652_v55  ;;  %v6401_v55 = vld [vmem:[#allocation38_spill] sm:$0xff] }
  0xbc   : > { %4131 = vmatprep.mubr.msk.f32.mxu1 %vm357_vm2, %v4946_v10 }
  0xbe   : > { %4182 = vmatmul.mubr.msk.f32.gmra.mxu0 %vm357_vm2, %v4668_v61 }
  0xbf   : > { %4132 = vmatmul.mubr.msk.f32.gmra.mxu1 %vm357_vm2, %v4957_v60  ;;  %4184 = vmatprep.mubr.msk.f32.mxu0 %vm357_vm2, %v4712_v25  ;;  %v6403_v25 = vld [vmem:[#allocation40_spill] sm:$0xff] }
  0xc0   : > { %4134 = vmatprep.mubr.msk.f32.mxu1 %vm357_vm2, %v4963_v49 }
  0xc2   : > { %4185 = vmatmul.mubr.msk.f32.gmra.mxu0 %vm357_vm2, %v4715_v30  ;;  %v6404_v30 = vld [vmem:[#allocation41_spill] sm:$0xff] }
  0xc3   : > { %4135 = vmatmul.mubr.msk.f32.gmra.mxu1 %vm357_vm2, %v6397_v33  ;;  %4187 = vmatprep.mubr.msk.f32.mxu0 %vm357_vm2, %v4756_v59 }
  0xc4   : > { %4137 = vmatprep.mubr.msk.f32.mxu1 %vm357_vm2, %v4980_v12 }
  0xc6   : > { %4188 = vmatmul.mubr.msk.f32.gmra.mxu0 %vm357_vm2, %v4759_v1 }
  0xc7   : > { %4138 = vmatmul.mubr.msk.f32.gmra.mxu1 %vm357_vm2, %v6398_v34  ;;  %4190 = vmatprep.mubr.msk.f32.mxu0 %vm357_vm2, %v4800_v24  ;;  %v6405_v24 = vld [vmem:[#allocation42_spill] sm:$0xff] }
  0xc8   : > { %4140 = vmatprep.mubr.msk.f32.mxu1 %vm357_vm2, %v4997_v37 }
  0xca   : > { %4191 = vmatmul.mubr.msk.f32.gmra.mxu0 %vm357_vm2, %v4803_v40  ;;  %v6406_v40 = vld [vmem:[#allocation43_spill] sm:$0xff] }
  0xcb   : > { %4141 = vmatmul.mubr.msk.f32.gmra.mxu1 %vm357_vm2, %v6399_v47  ;;  %4193 = vmatprep.mubr.msk.f32.mxu0 %vm357_vm2, %v4528_v5 }
  0xcc   : > { %4143 = vmatprep.mubr.msk.f32.mxu1 %vm357_vm2, %v5014_v28 }
  0xce   : > { %4194 = vmatmul.mubr.msk.f32.gmra.mxu0 %vm357_vm2, %v4533_v8 }
  0xcf   : > { %4144 = vmatmul.mubr.msk.f32.gmra.mxu1 %vm357_vm2, %v6400_v48  ;;  %4196 = vmatprep.mubr.msk.f32.mxu0 %vm357_vm2, %v4554_v19  ;;  %v6402_v19 = vld [vmem:[#allocation39_spill] sm:$0xff] }
  0xd0   : > { %4146 = vmatprep.mubr.msk.f32.mxu1 %vm357_vm2, %v5031_v45 }
  0xd2   : > { %4197 = vmatmul.mubr.msk.f32.gmra.mxu0 %vm357_vm2, %v4557_v20 }
  0xd3   : > { %4147 = vmatmul.mubr.msk.f32.gmra.mxu1 %vm357_vm2, %v6401_v55  ;;  %4199 = vmatprep.mubr.msk.f32.mxu0 %vm357_vm2, %v4598_v35 }
  0xd4   : > { %4149 = vmatprep.mubr.msk.f32.mxu1 %vm357_vm2, %v5048_v26 }
  0xd6   : > { %v5403_v5 = vpop.f32.mrf.mxu0  ;;  %4200 = vmatmul.mubr.msk.f32.gmra.mxu0 %vm357_vm2, %v4609_v39 }
  0xd7   : > { %v5407_v8 = vpop.f32.mrf.mxu1  ;;  %4150 = vmatmul.mubr.msk.f32.gmra.mxu1 %vm357_vm2, %v6402_v19  ;;  %4202 = vmatprep.mubr.msk.f32.mxu0 %vm357_vm2, %v4646_v53 }
  0xd8   : > { %v5413_v20 = vpop.f32.mrf.mxu0  ;;  %4152 = vmatprep.mubr.msk.f32.mxu1 %vm357_vm2, %v5065_v42 }
  0xd9   : > { %v5417_v35 = vpop.f32.mrf.mxu1 }
  0xda   : > { %v5419_v61 = vpop.f32.mrf.mxu0  ;;  %4203 = vmatmul.mubr.msk.f32.gmra.mxu0 %vm357_vm2, %v4649_v54 }
  0xdb   : > { %v5423_v39 = vpop.f32.mrf.mxu1  ;;  %4153 = vmatmul.mubr.msk.f32.gmra.mxu1 %vm357_vm2, %v6403_v25  ;;  %4205 = vmatprep.mubr.msk.f32.mxu0 %vm357_vm2, %v4685_v2 }
  0xdc   : > { %v5429_v53 = vpop.f32.mrf.mxu0  ;;  %4155 = vmatprep.mubr.msk.f32.mxu1 %vm357_vm2, %v6404_v30 }
  0xdd   : > { %v5433_v59 = vpop.f32.mrf.mxu1 }
  0xde   : > { %v5435_v1 = vpop.f32.mrf.mxu0  ;;  %4206 = vmatmul.mubr.msk.f32.gmra.mxu0 %vm357_vm2, %v4688_v6 }
  0xdf   : > { %v5439_v54 = vpop.f32.mrf.mxu1  ;;  %4156 = vmatmul.mubr.msk.f32.gmra.mxu1 %vm357_vm2, %v6405_v24  ;;  %4208 = vmatprep.mubr.msk.f32.mxu0 %vm357_vm2, %v4720_v31 }
  0xe0   : > { %v5445_v2 = vpop.f32.mrf.mxu0  ;;  %4158 = vmatprep.mubr.msk.f32.mxu1 %vm357_vm2, %v6406_v40 }
  0xe1   : > { %v5449_v7 = vpop.f32.mrf.mxu1 }
  0xe2   : > { %v5451_v44 = vpop.f32.mrf.mxu0  ;;  %4209 = vmatmul.mubr.msk.f32.gmra.mxu0 %vm357_vm2, %v4723_v32 }
  0xe3   : > { %v5455_v6 = vpop.f32.mrf.mxu1  ;;  %4159 = vmatmul.mubr.msk.f32.gmra.mxu1 %vm357_vm2, %v6407_v22  ;;  %4211 = vmatprep.mubr.msk.f32.mxu0 %vm357_vm2, %v4764_v11 }
  0xe4   : > { %v5461_v31 = vpop.f32.mrf.mxu0  ;;  %4161 = vmatprep.mubr.msk.f32.mxu1 %vm357_vm2, %v5116_v38 }
  0xe5   : > { %v5465_v18 = vpop.f32.mrf.mxu1 }
  0xe6   : > { %v5467_v3 = vpop.f32.mrf.mxu0  ;;  %4212 = vmatmul.mubr.msk.f32.gmra.mxu0 %vm357_vm2, %v6369_v0  ;;  %v1891_v0 = vrot.slane %v5289_v41, 2 }
  0xe7   : > { %v5471_v32 = vpop.f32.mrf.mxu1  ;;  %4162 = vmatmul.mubr.msk.f32.gmra.mxu1 %vm357_vm2, %v5127_v58  ;;  %4214 = vmatprep.mubr.msk.f32.mxu0 %vm357_vm2, %v4808_v51 }
  0xe8   : > { %6408 = vst [vmem:[#allocation6_spill] sm:$0xff] %v5471_v32  ;;  %v5477_v11 = vpop.f32.mrf.mxu0  ;;  %4164 = vmatprep.mubr.msk.f32.mxu1 %vm357_vm2, %v5133_v56  ;;  %v5519_v32 = vld [vmem:[%s4519_s23 + $0x1a0] sm:$0xff] }
  0xe9   : > { %v5482_v27 = vpop.f32.mrf.mxu1 }
  0xea   : > { %6409 = vst [vmem:[#allocation8_spill] sm:$0xff] %v5482_v27  ;;  %v5485_v62 = vpop.f32.mrf.mxu0  ;;  %4215 = vmatmul.mubr.msk.f32.gmra.mxu0 %vm357_vm2, %v6370_v16  ;;  %v1893_v27 = vrot.slane %v5302_v52, 2  ;;  %v5506_v16 = vsel %vm943_vm3, %v1890_v57, %v1891_v0 }
  0xeb   : > { %v5489_v50 = vpop.f32.mrf.mxu1  ;;  %4165 = vmatmul.mubr.msk.f32.gmra.mxu1 %vm357_vm2, %v5144_v63  ;;  %4217 = vmatprep.mubr.msk.f32.mxu0 %vm357_vm2, %v5286_v29  ;;  %6412 = vst [vmem:[#allocation14_spill] sm:$0xff] %v5506_v16 }
  0xec   : > { %6410 = vst [vmem:[#allocation10_spill] sm:$0xff] %v5489_v50  ;;  %v5495_v51 = vpop.f32.mrf.mxu0  ;;  %4167 = vmatprep.mubr.msk.f32.mxu1 %vm357_vm2, %v5150_v13  ;;  %v5526_v57 = vsel %vm943_vm3, %v1891_v0, %v1893_v27 }
  0xed   : > { %v5503_v43 = vpop.f32.mrf.mxu1  ;;  %6414 = vst [vmem:[#allocation34_spill] sm:$0xff] %v5526_v57 }
  0xee   : > { %6411 = vst [vmem:[#allocation12_spill] sm:$0xff] %v5503_v43  ;;  %v5508_v50 = vpop.f32.mrf.mxu0  ;;  %4218 = vmatmul.mubr.msk.f32.gmra.mxu0 %vm357_vm2, %v5289_v41 }
  0xef   : > { %v5512_v29 = vpop.f32.mrf.mxu1  ;;  %4168 = vmatmul.mubr.msk.f32.gmra.mxu1 %vm357_vm2, %v5159_v15  ;;  %4220 = vmatprep.mubr.msk.f32.mxu0 %vm357_vm2, %v5500_v36 }
  0xf0   : > { %6413 = vst [vmem:[#allocation19_spill] sm:$0xff] %v5512_v29  ;;  %v5521_v52 = vpop.f32.mrf.mxu0  ;;  %4170 = vmatprep.mubr.msk.f32.mxu1 %vm357_vm2, %v5506_v16 }
  0xf1   : > { %v5528_v43 = vpop.f32.mrf.mxu1 }
  0xf2   : > { %6415 = vst [vmem:[#allocation35_spill] sm:$0xff] %v5528_v43  ;;  %v5530_v41 = vpop.f32.mrf.mxu0  ;;  %4221 = vmatmul.mubr.msk.f32.gmra.mxu0 %vm357_vm2, %v5519_v32 }
  0xf3   : > { %v5534_v29 = vpop.f32.mrf.mxu1  ;;  %4171 = vmatmul.mubr.msk.f32.gmra.mxu1 %vm357_vm2, %v5526_v57  ;;  %4275 = vmatprep.mubr.msk.f32.mxu0 %vm357_vm2, %v4923_v4 }
  0xf4   : > { %6416 = vst [vmem:[#allocation36_spill] sm:$0xff] %v5534_v29  ;;  %v5540_v15 = vpop.f32.mrf.mxu0  ;;  %4225 = vmatprep.mubr.msk.f32.mxu1 %vm357_vm2, %v6374_v14 }
  0xf5   : > { %v5544_v27 = vpop.f32.mrf.mxu1 }
  0xf6   : > { %6417 = vst [vmem:[#allocation37_spill] sm:$0xff] %v5544_v27  ;;  %v3977_v0 = vpop.f32.mrf.mxu0  ;;  %4276 = vmatmul.mubr.msk.f32.vlgmr.msra.gmra.mxu0 %vm357_vm2, %v4940_v21 }
  0xf7   : > { %v3927_v43 = vpop.f32.mrf.mxu1  ;;  %4226 = vmatmul.mubr.msk.f32.vlgmr.msra.gmra.mxu1 %vm357_vm2, %v6375_v17  ;;  %4278 = vmatprep.mubr.msk.f32.mxu0 %vm357_vm2, %v4946_v10 }
  0xf8   : > { %v790_v4 = vadd.f32 %v3927_v43, %v5403_v5  ;;  %v1159_v29 = vpop.f32.mrf.mxu0  ;;  %4228 = vmatprep.mubr.msk.f32.mxu1 %vm357_vm2, %v6376_v23  ;;  %v6418_v23 = vld [vmem:[#allocation16_spill] sm:$0xff] }
  0xf9   : > { %v784_v14 = vpop.f32.mrf.mxu1 }
  0xfa   : > { %v5555_v57 = vadd.f32 %v3977_v0, %v790_v4  ;;  %v785_v27 = vadd.f32 %v784_v14, %v5413_v20  ;;  %v3980_v16 = vpop.f32.mrf.mxu0  ;;  %4279 = vmatmul.mubr.msk.f32.gmra.mxu0 %vm357_vm2, %v4957_v60  ;;  %v6420_v14 = vld [vmem:[#allocation24_spill] sm:$0xff] }
  0xfb   : > { %v3930_v21 = vpop.f32.mrf.mxu1  ;;  %4229 = vmatmul.mubr.msk.f32.gmra.mxu1 %vm357_vm2, %v6377_v9  ;;  %4281 = vmatprep.mubr.msk.f32.mxu0 %vm357_vm2, %v4963_v49 }
  0xfc   : > { %v5564_v43 = vadd.f32 %v1159_v29, %v785_v27  ;;  %v800_v10 = vadd.f32 %v3930_v21, %v5419_v61  ;;  %v1169_v17 = vpop.f32.mrf.mxu0  ;;  %4231 = vmatprep.mubr.msk.f32.mxu1 %vm357_vm2, %v6418_v23 }
  0xfd   : > { %v794_v5 = vpop.f32.mrf.mxu1 }
  0xfe   : > { %v5569_v20 = vadd.f32 %v3980_v16, %v800_v10  ;;  %v795_v60 = vadd.f32 %v794_v5, %v5429_v53  ;;  %v3983_v0 = vpop.f32.mrf.mxu0  ;;  %4282 = vmatmul.mubr.msk.f32.gmra.mxu0 %vm357_vm2, %v6397_v33  ;;  %v6419_v16 = vld [vmem:[#allocation21_spill] sm:$0xff]  ;;  %v6421_v10 = vld [vmem:[#allocation26_spill] sm:$0xff] }
  0xff   : > { %v3933_v9 = vpop.f32.mrf.mxu1  ;;  %4232 = vmatmul.mubr.msk.f32.gmra.mxu1 %vm357_vm2, %v6379_v46  ;;  %4284 = vmatprep.mubr.msk.f32.mxu0 %vm357_vm2, %v4980_v12 }
 0x100   : > { %v5578_v49 = vadd.f32 %v1169_v17, %v795_v60  ;;  %v810_v61 = vadd.f32 %v3933_v9, %v5435_v1  ;;  %v1179_v29 = vpop.f32.mrf.mxu0  ;;  %4234 = vmatprep.mubr.msk.f32.mxu1 %vm357_vm2, %v6419_v16  ;;  %v6422_v60 = vld [vmem:[#allocation28_spill] sm:$0xff]  ;;  %v6423_v9 = vld [vmem:[#allocation30_spill] sm:$0xff] }
 0x101   : > { %v804_v53 = vpop.f32.mrf.mxu1 }
 0x102   : > { %v5583_v27 = vadd.f32 %v3983_v0, %v810_v61  ;;  %v805_v33 = vadd.f32 %v804_v53, %v5445_v2  ;;  %v3986_v4 = vpop.f32.mrf.mxu0  ;;  %4285 = vmatmul.mubr.msk.f32.gmra.mxu0 %vm357_vm2, %v6398_v34  ;;  %v6424_v53 = vld [vmem:[#allocation32_spill] sm:$0xff] }
 0x103   : > { %v3936_v46 = vpop.f32.mrf.mxu1  ;;  %4235 = vmatmul.mubr.msk.f32.gmra.mxu1 %vm357_vm2, %v6420_v14  ;;  %4287 = vmatprep.mubr.msk.f32.mxu0 %vm357_vm2, %v4997_v37 }
 0x104   : > { %v5592_v12 = vadd.f32 %v1179_v29, %v805_v33  ;;  %v820_v1 = vadd.f32 %v3936_v46, %v5451_v44  ;;  %v1189_v21 = vpop.f32.mrf.mxu0  ;;  %4237 = vmatprep.mubr.msk.f32.mxu1 %vm357_vm2, %v6421_v10 }
 0x105   : > { %v814_v2 = vpop.f32.mrf.mxu1 }
 0x106   : > { %v5597_v17 = vadd.f32 %v3986_v4, %v820_v1  ;;  %v815_v34 = vadd.f32 %v814_v2, %v5461_v31  ;;  %v3989_v23 = vpop.f32.mrf.mxu0  ;;  %4288 = vmatmul.mubr.msk.f32.gmra.mxu0 %vm357_vm2, %v6399_v47  ;;  %v6425_v4 = vld [vmem:[#allocation2_spill] sm:$0xff]  ;;  %v6427_v2 = vld [vmem:[#allocation5_spill] sm:$0xff] }
 0x107   : > { %v3939_v5 = vpop.f32.mrf.mxu1  ;;  %4238 = vmatmul.mubr.msk.f32.gmra.mxu1 %vm357_vm2, %v6422_v60  ;;  %4290 = vmatprep.mubr.msk.f32.mxu0 %vm357_vm2, %v5014_v28  ;;  %v6428_v60 = vld [vmem:[#allocation7_spill] sm:$0xff] }
 0x108   : > { %v5606_v37 = vadd.f32 %v1189_v21, %v815_v34  ;;  %v830_v44 = vadd.f32 %v3939_v5, %v5467_v3  ;;  %v1199_v0 = vpop.f32.mrf.mxu0  ;;  %4240 = vmatprep.mubr.msk.f32.mxu1 %vm357_vm2, %v6423_v9  ;;  %v6426_v21 = vld [vmem:[#allocation3_spill] sm:$0xff] }
 0x109   : > { %v824_v31 = vpop.f32.mrf.mxu1 }
 0x10a   : > { %v5611_v61 = vadd.f32 %v3989_v23, %v830_v44  ;;  %v825_v47 = vadd.f32 %v824_v31, %v5477_v11  ;;  %v3992_v29 = vpop.f32.mrf.mxu0  ;;  %4291 = vmatmul.mubr.msk.f32.gmra.mxu0 %vm357_vm2, %v6400_v48 }
 0x10b   : > { %v3942_v16 = vpop.f32.mrf.mxu1  ;;  %4241 = vmatmul.mubr.msk.f32.gmra.mxu1 %vm357_vm2, %v6424_v53  ;;  %4293 = vmatprep.mubr.msk.f32.mxu0 %vm357_vm2, %v5031_v45  ;;  %v6431_v53 = vld [vmem:[#allocation13_spill] sm:$0xff] }
 0x10c   : > { %v5620_v28 = vadd.f32 %v1199_v0, %v825_v47  ;;  %v840_v3 = vadd.f32 %v3942_v16, %v5485_v62  ;;  %v1209_v33 = vpop.f32.mrf.mxu0  ;;  %4243 = vmatprep.mubr.msk.f32.mxu1 %vm357_vm2, %v6425_v4  ;;  %v6429_v0 = vld [vmem:[#allocation9_spill] sm:$0xff] }
 0x10d   : > { %v834_v11 = vpop.f32.mrf.mxu1 }
 0x10e   : > { %v5625_v46 = vadd.f32 %v3992_v29, %v840_v3  ;;  %v835_v48 = vadd.f32 %v834_v11, %v5495_v51  ;;  %v3995_v14 = vpop.f32.mrf.mxu0  ;;  %4294 = vmatmul.mubr.msk.f32.gmra.mxu0 %vm357_vm2, %v6401_v55  ;;  %v6430_v29 = vld [vmem:[#allocation11_spill] sm:$0xff] }
 0x10f   : > { %v3945_v1 = vpop.f32.mrf.mxu1  ;;  %4244 = vmatmul.mubr.msk.f32.gmra.mxu1 %vm357_vm2, %v6426_v21  ;;  %4296 = vmatprep.mubr.msk.f32.mxu0 %vm357_vm2, %v5048_v26  ;;  %v6432_v11 = vld [vmem:[#allocation15_spill] sm:$0xff] }
 0x110   : > { %v5634_v62 = vadd.f32 %v1209_v33, %v835_v48  ;;  %v850_v45 = vadd.f32 %v3945_v1, %v5508_v50  ;;  %v1219_v10 = vpop.f32.mrf.mxu0  ;;  %4246 = vmatprep.mubr.msk.f32.mxu1 %vm357_vm2, %v6427_v2 }
 0x111   : > { %v844_v51 = vpop.f32.mrf.mxu1 }
 0x112   : > { %v5639_v34 = vadd.f32 %v3995_v14, %v850_v45  ;;  %v845_v55 = vadd.f32 %v844_v51, %v5521_v52  ;;  %v3998_v23 = vpop.f32.mrf.mxu0  ;;  %4297 = vmatmul.mubr.msk.f32.gmra.mxu0 %vm357_vm2, %v6402_v19  ;;  %v6433_v14 = vld [vmem:[#allocation17_spill] sm:$0xff]  ;;  %v6435_v51 = vld [vmem:[#allocation22_spill] sm:$0xff] }
 0x113   : > { %v3948_v5 = vpop.f32.mrf.mxu1  ;;  %4247 = vmatmul.mubr.msk.f32.gmra.mxu1 %vm357_vm2, %v6428_v60  ;;  %4299 = vmatprep.mubr.msk.f32.mxu0 %vm357_vm2, %v5065_v42  ;;  %v6436_v60 = vld [vmem:[#allocation25_spill] sm:$0xff] }
 0x114   : > { %v5648_v26 = vadd.f32 %v1219_v10, %v845_v55  ;;  %v860_v50 = vadd.f32 %v3948_v5, %v5530_v41  ;;  %v1229_v44 = vpop.f32.mrf.mxu0  ;;  %4249 = vmatprep.mubr.msk.f32.mxu1 %vm357_vm2, %v6429_v0  ;;  %v6434_v10 = vld [vmem:[#allocation20_spill] sm:$0xff] }
 0x115   : > { %v854_v52 = vpop.f32.mrf.mxu1 }
 0x116   : > { %v5653_v9 = vadd.f32 %v3998_v23, %v860_v50  ;;  %v855_v19 = vadd.f32 %v854_v52, %v5540_v15  ;;  %v4001_v31 = vpop.f32.mrf.mxu0  ;;  %4300 = vmatmul.mubr.msk.f32.gmra.mxu0 %vm357_vm2, %v6403_v25 }
 0x117   : > { %v3951_v47 = vpop.f32.mrf.mxu1  ;;  %4250 = vmatmul.mubr.msk.f32.gmra.mxu1 %vm357_vm2, %v6430_v29  ;;  %4302 = vmatprep.mubr.msk.f32.mxu0 %vm357_vm2, %v6404_v30  ;;  %v6439_v29 = vld [vmem:[#allocation6_spill] sm:$0xff] }
 0x118   : > { %v5662_v42 = vadd.f32 %v1229_v44, %v855_v19  ;;  %v870_v41 = vadd.f32 %v3951_v47, %v5407_v8  ;;  %v1239_v16 = vpop.f32.mrf.mxu0  ;;  %4252 = vmatprep.mubr.msk.f32.mxu1 %vm357_vm2, %v6431_v53  ;;  %v6437_v44 = vld [vmem:[#allocation27_spill] sm:$0xff]  ;;  %v2430_v53 = vrot.slane %v5500_v36, 1 }
 0x119   : > { %v864_v15 = vpop.f32.mrf.mxu1 }
 0x11a   : > { %v5667_v3 = vadd.f32 %v4001_v31, %v870_v41  ;;  %v865_v25 = vadd.f32 %v864_v15, %v5417_v35  ;;  %v4004_v33 = vpop.f32.mrf.mxu0  ;;  %4303 = vmatmul.mubr.msk.f32.gmra.mxu0 %vm357_vm2, %v6405_v24  ;;  %v2702_v31 = vrot.slane %v5519_v32, 2  ;;  %v2431_v15 = vrot.slane %v5519_v32, 1  ;;  %v6445_v32 = vld [vmem:[#allocation10_spill] sm:$0xff] }
 0x11b   : > { %v3954_v4 = vpop.f32.mrf.mxu1  ;;  %4253 = vmatmul.mubr.msk.f32.gmra.mxu1 %vm357_vm2, %v6432_v11  ;;  %4305 = vmatprep.mubr.msk.f32.mxu0 %vm357_vm2, %v6406_v40 }
 0x11c   : > { %v5676_v8 = vadd.f32 %v1239_v16, %v865_v25  ;;  %v880_v30 = vadd.f32 %v3954_v4, %v5423_v39  ;;  %v1249_v48 = vpop.f32.mrf.mxu0  ;;  %4255 = vmatprep.mubr.msk.f32.mxu1 %vm357_vm2, %v6433_v14  ;;  %v6440_v16 = vld [vmem:[#allocation31_spill] sm:$0xff]  ;;  %v6443_v14 = vld [vmem:[#allocation33_spill] sm:$0xff] }
 0x11d   : > { %v874_v35 = vpop.f32.mrf.mxu1 }
 0x11e   : > { %v5681_v1 = vadd.f32 %v4004_v33, %v880_v30  ;;  %v875_v24 = vadd.f32 %v874_v35, %v5433_v59  ;;  %v4007_v21 = vpop.f32.mrf.mxu0  ;;  %4306 = vmatmul.mubr.msk.f32.gmra.mxu0 %vm357_vm2, %v6407_v22  ;;  %v6442_v30 = vld [vmem:[#allocation18_spill] sm:$0xff] }
 0x11f   : > { %v3957_v45 = vpop.f32.mrf.mxu1  ;;  %4256 = vmatmul.mubr.msk.f32.gmra.mxu1 %vm357_vm2, %v6434_v10  ;;  %4308 = vmatprep.mubr.msk.f32.mxu0 %vm357_vm2, %v5116_v38  ;;  %v6444_v35 = vld [vmem:[#allocation14_spill] sm:$0xff]  ;;  %v6446_v10 = vld [vmem:[#allocation23_spill] sm:$0xff] }
 0x120   : > { %v5690_v39 = vadd.f32 %v1249_v48, %v875_v24  ;;  %v890_v40 = vadd.f32 %v3957_v45, %v5439_v54  ;;  %v1259_v2 = vpop.f32.mrf.mxu0  ;;  %4258 = vmatprep.mubr.msk.f32.mxu1 %vm357_vm2, %v6435_v51 }
 0x121   : > { %v884_v59 = vpop.f32.mrf.mxu1 }
 0x122   : > { %v5695_v55 = vadd.f32 %v4007_v21, %v890_v40  ;;  %v885_v22 = vadd.f32 %v884_v59, %v5449_v7  ;;  %v4010_v23 = vpop.f32.mrf.mxu0  ;;  %4309 = vmatmul.mubr.msk.f32.gmra.mxu0 %vm357_vm2, %v5127_v58  ;;  %v2432_v59 = vsel %vm274_vm1, %v2430_v53, %v2431_v15 }
 0x123   : > { %v3960_v5 = vpop.f32.mrf.mxu1  ;;  %4259 = vmatmul.mubr.msk.f32.gmra.mxu1 %vm357_vm2, %v6436_v60  ;;  %4311 = vmatprep.mubr.msk.f32.mxu0 %vm357_vm2, %v5133_v56  ;;  %v6438_v56 = vld [vmem:[#allocation29_spill] sm:$0xff] }
 0x124   : > { %v5704_v38 = vadd.f32 %v1259_v2, %v885_v22  ;;  %v900_v54 = vadd.f32 %v3960_v5, %v5455_v6  ;;  %v1269_v50 = vpop.f32.mrf.mxu0  ;;  %4261 = vmatprep.mubr.msk.f32.mxu1 %vm357_vm2, %v6437_v44  ;;  %v2701_v6 = vrot.slane %v5500_v36, 2  ;;  %v6449_v44 = vld [vmem:[#allocation4_spill] sm:$0xff] }
 0x125   : > { %v894_v7 = vpop.f32.mrf.mxu1 }
 0x126   : > { %v5709_v0 = vadd.f32 %v4010_v23, %v900_v54  ;;  %v895_v58 = vadd.f32 %v894_v7, %v5465_v18  ;;  %v4013_v52 = vpop.f32.mrf.mxu0  ;;  %4312 = vmatmul.mubr.msk.f32.gmra.mxu0 %vm357_vm2, %v5144_v63  ;;  %v224_v63 = vld [vmem:[%s4519_s23 + $0x1a8] sm:$0x3]  ;;  %v2703_v40 = vsel %vm943_vm3, %v2701_v6, %v2702_v31  ;;  %v6447_v23 = vld [vmem:[#allocation12_spill] sm:$0xff]  ;;  %v6448_v54 = vld [vmem:[#allocation34_spill] sm:$0xff] }
 0x127   : > { %v3963_v19 = vpop.f32.mrf.mxu1  ;;  %4262 = vmatmul.mubr.msk.f32.gmra.mxu1 %vm357_vm2, %v6438_v56  ;;  %4314 = vmatprep.mubr.msk.f32.mxu0 %vm357_vm2, %v5150_v13  ;;  %v6441_v13 = vld [vmem:[#allocation8_spill] sm:$0xff]  ;;  %v2704_v24 = vrot.slane %v224_v63, 2  ;;  %v2433_v2 = vrot.slane %v224_v63, 1 }
 0x128   : > { %v5720_v47 = vadd.f32 %v1269_v50, %v895_v58  ;;  %v910_v41 = vadd.f32 %v3963_v19, %v6439_v29  ;;  %v1279_v18 = vpop.f32.mrf.mxu0  ;;  %4264 = vmatprep.mubr.msk.f32.mxu1 %vm357_vm2, %v6440_v16 }
 0x129   : > { %v904_v25 = vpop.f32.mrf.mxu1  ;;  %v2705_v7 = vsel %vm943_vm3, %v2702_v31, %v2704_v24  ;;  %v2434_v6 = vsel %vm274_vm1, %v2431_v15, %v2433_v2  ;;  %v6453_v15 = vld [vmem:[#allocation37_spill] sm:$0xff] }
 0x12a   : > { %v5728_v33 = vadd.f32 %v4013_v52, %v910_v41  ;;  %v905_v4 = vadd.f32 %v904_v25, %v6441_v13  ;;  %v4016_v11 = vpop.f32.mrf.mxu0  ;;  %4315 = vmatmul.mubr.msk.f32.gmra.mxu0 %vm357_vm2, %v6442_v30  ;;  %v6450_v52 = vld [vmem:[#allocation19_spill] sm:$0xff]  ;;  %v6452_v25 = vld [vmem:[#allocation36_spill] sm:$0xff] }
 0x12b   : > { %v3966_v48 = vpop.f32.mrf.mxu1  ;;  %4265 = vmatmul.mubr.msk.f32.gmra.mxu1 %vm357_vm2, %v6443_v14  ;;  %4317 = vmatprep.mubr.msk.f32.mxu0 %vm357_vm2, %v6444_v35 }
 0x12c   : > { %v5737_v36 = vadd.f32 %v1279_v18, %v905_v4  ;;  %v920_v21 = vadd.f32 %v3966_v48, %v6445_v32  ;;  %v1289_v45 = vpop.f32.mrf.mxu0  ;;  %4267 = vmatprep.mubr.msk.f32.mxu1 %vm357_vm2, %v6446_v10  ;;  %v6451_v18 = vld [vmem:[#allocation35_spill] sm:$0xff] }
 0x12d   : > { %v914_v51 = vpop.f32.mrf.mxu1 }
 0x12e   : > { %v5744_v22 = vadd.f32 %v4016_v11, %v920_v21  ;;  %v915_v5 = vadd.f32 %v914_v51, %v6447_v23  ;;  %v4019_v60 = vpop.f32.mrf.mxu0  ;;  %4318 = vmatmul.mubr.msk.f32.gmra.mxu0 %vm357_vm2, %v6448_v54 }
 0x12f   : > { %v3969_v50 = vpop.f32.mrf.mxu1  ;;  %4268 = vmatmul.mubr.msk.f32.gmra.mxu1 %vm357_vm2, %v6449_v44  ;;  %4320 = vmatprep.mubr.msk.f32.mxu0 %vm357_vm2, %v2703_v40 }
 0x130   : > { %v5753_v58 = vadd.f32 %v1289_v45, %v915_v5  ;;  %v930_v19 = vadd.f32 %v3969_v50, %v6450_v52  ;;  %v1299_v56 = vpop.f32.mrf.mxu0  ;;  %4270 = vmatprep.mubr.msk.f32.mxu1 %vm357_vm2, %v2432_v59 }
 0x131   : > { %v924_v29 = vpop.f32.mrf.mxu1 }
 0x132   : > { %v5758_v41 = vadd.f32 %v4019_v60, %v930_v19  ;;  %v925_v16 = vadd.f32 %v924_v29, %v6451_v18  ;;  %v4022_v63 = vpop.f32.mrf.mxu0  ;;  %4321 = vmatmul.mubr.msk.f32.gmra.mxu0 %vm357_vm2, %v2705_v7 }
 0x133   : > { %v3972_v53 = vpop.f32.mrf.mxu1  ;;  %4271 = vmatmul.mubr.msk.f32.gmra.mxu1 %vm357_vm2, %v2434_v6 }
 0x134   : > { %v5763_v31 = vadd.f32 %v1299_v56, %v925_v16  ;;  %v940_v13 = vadd.f32 %v3972_v53, %v6452_v25  ;;  %v1309_v4 = vpop.f32.mrf.mxu0 }
 0x135   : > { %v934_v11 = vpop.f32.mrf.mxu1 }
 0x136   : > { %v5766_v30 = vadd.f32 %v4022_v63, %v940_v13  ;;  %v935_v48 = vadd.f32 %v934_v11, %v6453_v15  ;;  %v4077_v14 = vpop.f32.mrf.mxu0 }
 0x137   : > { %v4027_v35 = vpop.f32.mrf.mxu1 }
 0x138   : > { %v5769_v24 = vadd.f32 %v1309_v4, %v935_v48  ;;  %v1587_v32 = vadd.f32 %v4027_v35, %v5555_v57  ;;  %v1699_v21 = vpop.f32.mrf.mxu0 }
 0x139   : > { %v1427_v45 = vpop.f32.mrf.mxu1 }
 0x13a   : > { %v5772_v10 = vadd.f32 %v4077_v14, %v1587_v32  ;;  %v1586_v40 = vadd.f32 %v1427_v45, %v5564_v43  ;;  %v4080_v2 = vpop.f32.mrf.mxu0 }
 0x13b   : > { %v4030_v51 = vpop.f32.mrf.mxu1 }
 0x13c   : > { %v5775_v59 = vadd.f32 %v1699_v21, %v1586_v40  ;;  %v1589_v23 = vadd.f32 %v4030_v51, %v5569_v20  ;;  %v1709_v5 = vpop.f32.mrf.mxu0 }
 0x13d   : > { %v1437_v60 = vpop.f32.mrf.mxu1 }
 0x13e   : > { %v5778_v54 = vadd.f32 %v4080_v2, %v1589_v23  ;;  %v1588_v50 = vadd.f32 %v1437_v60, %v5578_v49  ;;  %v4083_v44 = vpop.f32.mrf.mxu0 }
 0x13f   : > { %v4033_v57 = vpop.f32.mrf.mxu1 }
 0x140   : > { %v5781_v7 = vadd.f32 %v1709_v5, %v1588_v50  ;;  %v1591_v52 = vadd.f32 %v4033_v57, %v5583_v27  ;;  %v1719_v19 = vpop.f32.mrf.mxu0 }
 0x141   : > { %v1447_v43 = vpop.f32.mrf.mxu1 }
 0x142   : > { %v5784_v56 = vadd.f32 %v4083_v44, %v1591_v52  ;;  %v1590_v6 = vadd.f32 %v1447_v43, %v5592_v12  ;;  %v4086_v29 = vpop.f32.mrf.mxu0 }
 0x143   : > { %v4036_v20 = vpop.f32.mrf.mxu1 }
 0x144   : > { %v5787_v18 = vadd.f32 %v1719_v19, %v1590_v6  ;;  %v1593_v16 = vadd.f32 %v4036_v20, %v5597_v17  ;;  %v1729_v63 = vpop.f32.mrf.mxu0 }
 0x145   : > { %v1457_v49 = vpop.f32.mrf.mxu1 }
 0x146   : > { %v5790_v53 = vadd.f32 %v4086_v29, %v1593_v16  ;;  %v1592_v25 = vadd.f32 %v1457_v49, %v5606_v37  ;;  %v4089_v13 = vpop.f32.mrf.mxu0 }
 0x147   : > { %v4039_v27 = vpop.f32.mrf.mxu1 }
 0x148   : > { %v5793_v4 = vadd.f32 %v1729_v63, %v1592_v25  ;;  %v1595_v11 = vadd.f32 %v4039_v27, %v5611_v61  ;;  %v1739_v15 = vpop.f32.mrf.mxu0 }
 0x149   : > { %v1467_v12 = vpop.f32.mrf.mxu1 }
 0x14a   : > { %v5796_v48 = vadd.f32 %v4089_v13, %v1595_v11  ;;  %v1594_v14 = vadd.f32 %v1467_v12, %v5620_v28  ;;  %v4092_v35 = vpop.f32.mrf.mxu0 }
 0x14b   : > { %v4042_v17 = vpop.f32.mrf.mxu1 }
 0x14c   : > { %v5799_v32 = vadd.f32 %v1739_v15, %v1594_v14  ;;  %v1597_v21 = vadd.f32 %v4042_v17, %v5625_v46  ;;  %v1749_v45 = vpop.f32.mrf.mxu0 }
 0x14d   : > { %v1477_v37 = vpop.f32.mrf.mxu1 }
 0x14e   : > { %v5802_v40 = vadd.f32 %v4092_v35, %v1597_v21  ;;  %v1596_v2 = vadd.f32 %v1477_v37, %v5634_v62  ;;  %v4095_v51 = vpop.f32.mrf.mxu0 }
 0x14f   : > { %v4045_v61 = vpop.f32.mrf.mxu1 }
 0x150   : > { %v5805_v23 = vadd.f32 %v1749_v45, %v1596_v2  ;;  %v1599_v5 = vadd.f32 %v4045_v61, %v5639_v34  ;;  %v1759_v60 = vpop.f32.mrf.mxu0 }
 0x151   : > { %v1487_v28 = vpop.f32.mrf.mxu1 }
 0x152   : > { %v5808_v50 = vadd.f32 %v4095_v51, %v1599_v5  ;;  %v1598_v44 = vadd.f32 %v1487_v28, %v5648_v26  ;;  %v4098_v57 = vpop.f32.mrf.mxu0 }
 0x153   : > { %v4048_v46 = vpop.f32.mrf.mxu1 }
 0x154   : > { %v5811_v52 = vadd.f32 %v1759_v60, %v1598_v44  ;;  %v1601_v19 = vadd.f32 %v4048_v46, %v5653_v9  ;;  %v1769_v43 = vpop.f32.mrf.mxu0 }
 0x155   : > { %v1497_v62 = vpop.f32.mrf.mxu1 }
 0x156   : > { %v5814_v6 = vadd.f32 %v4098_v57, %v1601_v19  ;;  %v1600_v29 = vadd.f32 %v1497_v62, %v5662_v42  ;;  %v4101_v20 = vpop.f32.mrf.mxu0 }
 0x157   : > { %v4051_v34 = vpop.f32.mrf.mxu1 }
 0x158   : > { %v5817_v16 = vadd.f32 %v1769_v43, %v1600_v29  ;;  %v1603_v63 = vadd.f32 %v4051_v34, %v5667_v3  ;;  %v1779_v49 = vpop.f32.mrf.mxu0 }
 0x159   : > { %v1507_v26 = vpop.f32.mrf.mxu1 }
 0x15a   : > { %v5820_v25 = vadd.f32 %v4101_v20, %v1603_v63  ;;  %v1602_v13 = vadd.f32 %v1507_v26, %v5676_v8  ;;  %v4104_v27 = vpop.f32.mrf.mxu0 }
 0x15b   : > { %v4054_v9 = vpop.f32.mrf.mxu1 }
 0x15c   : > { %v5823_v11 = vadd.f32 %v1779_v49, %v1602_v13  ;;  %v1605_v15 = vadd.f32 %v4054_v9, %v5681_v1  ;;  %v1789_v12 = vpop.f32.mrf.mxu0 }
 0x15d   : > { %v1517_v42 = vpop.f32.mrf.mxu1 }
 0x15e   : > { %v5826_v14 = vadd.f32 %v4104_v27, %v1605_v15  ;;  %v1604_v35 = vadd.f32 %v1517_v42, %v5690_v39  ;;  %v4107_v17 = vpop.f32.mrf.mxu0 }
 0x15f   : > { %v4057_v3 = vpop.f32.mrf.mxu1 }
 0x160   : > { %6454 = vst [vmem:[#allocation38_spill] sm:$0xff] %v5826_v14  ;;  %v5829_v21 = vadd.f32 %v1789_v12, %v1604_v35  ;;  %v1607_v45 = vadd.f32 %v4057_v3, %v5695_v55  ;;  %v1799_v37 = vpop.f32.mrf.mxu0 }
 0x161   : > { %v1527_v8 = vpop.f32.mrf.mxu1 }
 0x162   : > { %6455 = vst [vmem:[#allocation39_spill] sm:$0xff] %v5829_v21  ;;  %v5832_v2 = vadd.f32 %v4107_v17, %v1607_v45  ;;  %v1606_v51 = vadd.f32 %v1527_v8, %v5704_v38  ;;  %v4110_v61 = vpop.f32.mrf.mxu0 }
 0x163   : > { %v4060_v1 = vpop.f32.mrf.mxu1 }
 0x164   : > { %6456 = vst [vmem:[#allocation40_spill] sm:$0xff] %v5832_v2  ;;  %v5835_v5 = vadd.f32 %v1799_v37, %v1606_v51  ;;  %v1609_v60 = vadd.f32 %v4060_v1, %v5709_v0  ;;  %v1809_v28 = vpop.f32.mrf.mxu0 }
 0x165   : > { %v1537_v39 = vpop.f32.mrf.mxu1 }
 0x166   : > { %6457 = vst [vmem:[#allocation41_spill] sm:$0xff] %v5835_v5  ;;  %v5838_v44 = vadd.f32 %v4110_v61, %v1609_v60  ;;  %v1608_v57 = vadd.f32 %v1537_v39, %v5720_v47  ;;  %v4113_v46 = vpop.f32.mrf.mxu0 }
 0x167   : > { %v4063_v55 = vpop.f32.mrf.mxu1 }
 0x168   : > { %6458 = vst [vmem:[#allocation42_spill] sm:$0xff] %v5838_v44  ;;  %v5841_v19 = vadd.f32 %v1809_v28, %v1608_v57  ;;  %v1611_v43 = vadd.f32 %v4063_v55, %v5728_v33  ;;  %v1819_v62 = vpop.f32.mrf.mxu0 }
 0x169   : > { %v1547_v38 = vpop.f32.mrf.mxu1 }
 0x16a   : > { %6459 = vst [vmem:[#allocation43_spill] sm:$0xff] %v5841_v19  ;;  %v5844_v29 = vadd.f32 %v4113_v46, %v1611_v43  ;;  %v1610_v20 = vadd.f32 %v1547_v38, %v5737_v36  ;;  %v4116_v34 = vpop.f32.mrf.mxu0 }
 0x16b   : > { %v4066_v0 = vpop.f32.mrf.mxu1 }
 0x16c   : > { %6460 = vst [vmem:[#allocation44_spill] sm:$0xff] %v5844_v29  ;;  %v5847_v63 = vadd.f32 %v1819_v62, %v1610_v20  ;;  %v1613_v49 = vadd.f32 %v4066_v0, %v5744_v22  ;;  %v1829_v26 = vpop.f32.mrf.mxu0 }
 0x16d   : > { %v1557_v47 = vpop.f32.mrf.mxu1 }
 0x16e   : > { %6461 = vst [vmem:[#allocation16_spill] sm:$0xff] %v5847_v63  ;;  %v5850_v13 = vadd.f32 %v4116_v34, %v1613_v49  ;;  %v1612_v27 = vadd.f32 %v1557_v47, %v5753_v58  ;;  %v4119_v9 = vpop.f32.mrf.mxu0 }
 0x16f   : > { %v4069_v33 = vpop.f32.mrf.mxu1 }
 0x170   : > { %6462 = vst [vmem:[#allocation21_spill] sm:$0xff] %v5850_v13  ;;  %v5853_v15 = vadd.f32 %v1829_v26, %v1612_v27  ;;  %v1615_v12 = vadd.f32 %v4069_v33, %v5758_v41  ;;  %v1839_v42 = vpop.f32.mrf.mxu0 }
 0x171   : > { %v1567_v36 = vpop.f32.mrf.mxu1 }
 0x172   : > { %v5856_v35 = vadd.f32 %v4119_v9, %v1615_v12  ;;  %v1614_v17 = vadd.f32 %v1567_v36, %v5763_v31  ;;  %v4122_v3 = vpop.f32.mrf.mxu0 }
 0x173   : > { %v4072_v22 = vpop.f32.mrf.mxu1 }
 0x174   : > { %v5859_v45 = vadd.f32 %v1839_v42, %v1614_v17  ;;  %v1617_v37 = vadd.f32 %v4072_v22, %v5766_v30  ;;  %v1849_v8 = vpop.f32.mrf.mxu0 }
 0x175   : > { %v1577_v58 = vpop.f32.mrf.mxu1 }
 0x176   : > { %6463 = vst [vmem:[#allocation24_spill] sm:$0xff] %v5859_v45  ;;  %v5862_v51 = vadd.f32 %v4122_v3, %v1617_v37  ;;  %v1616_v61 = vadd.f32 %v1577_v58, %v5769_v24  ;;  %v5865_v1 = vpop.f32.mrf.mxu0 }
 0x177   : > { %v5867_v41 = vpop.f32.mrf.mxu1 }
 0x178   : > { %6464 = vst [vmem:[#allocation26_spill] sm:$0xff] %v5862_v51  ;;  %v5869_v60 = vadd.f32 %v1849_v8, %v1616_v61  ;;  %v5871_v28 = vpop.f32.mrf.mxu0 }
 0x179   : > { %v5873_v31 = vpop.f32.mrf.mxu1 }
 0x17a   : > { %6465 = vst [vmem:[#allocation28_spill] sm:$0xff] %v5869_v60  ;;  %v5875_v39 = vpop.f32.mrf.mxu0 }
 0x17b   : > { %v4130_v57 = vpop.f32.mrf.mxu1 }
 0x17c   : > { %v5877_v30 = vpop.f32.mrf.mxu0 }
 0x17d   : > { %v1980_v46 = vpop.f32.mrf.mxu1 }
 0x17e   : > { %v5879_v55 = vpop.f32.mrf.mxu0 }
 0x17f   : > { %v4133_v43 = vpop.f32.mrf.mxu1 }
 0x180   : > { %v5881_v24 = vpop.f32.mrf.mxu0 }
 0x181   : > { %v1990_v62 = vpop.f32.mrf.mxu1 }
 0x182   : > { %v5883_v38 = vpop.f32.mrf.mxu0 }
 0x183   : > { %v4136_v20 = vpop.f32.mrf.mxu1 }
 0x184   : > { %v5885_v34 = vpop.f32.mrf.mxu0 }
 0x185   : > { %v2000_v0 = vpop.f32.mrf.mxu1 }
 0x186   : > { %v5887_v49 = vpop.f32.mrf.mxu0 }
 0x187   : > { %v4139_v26 = vpop.f32.mrf.mxu1 }
 0x188   : > { %v5889_v47 = vpop.f32.mrf.mxu0 }
 0x189   : > { %v2010_v27 = vpop.f32.mrf.mxu1 }
 0x18a   : > { %v5891_v9 = vpop.f32.mrf.mxu0 }
 0x18b   : > { %v4142_v33 = vpop.f32.mrf.mxu1 }
 0x18c   : > { %v5893_v12 = vpop.f32.mrf.mxu0 }
 0x18d   : > { %v5895_v42 = vpop.f32.mrf.mxu1 }
 0x18e   : > { %v5897_v36 = vpop.f32.mrf.mxu0 }
 0x18f   : > { %v5899_v17 = vpop.f32.mrf.mxu1 }
 0x190   : > { %v5901_v3 = vpop.f32.mrf.mxu0 }
 0x191   : > { %6466 = vst [vmem:[#allocation30_spill] sm:$0xff] %v5901_v3  ;;  %v5903_v22 = vpop.f32.mrf.mxu1 }
 0x192   : > { %v5905_v37 = vpop.f32.mrf.mxu0 }
 0x193   : > { %6467 = vst [vmem:[#allocation32_spill] sm:$0xff] %v5905_v37  ;;  %v5907_v8 = vpop.f32.mrf.mxu1 }
 0x194   : > { %v5909_v58 = vpop.f32.mrf.mxu0 }
 0x195   : > { %6468 = vst [vmem:[#allocation2_spill] sm:$0xff] %v5909_v58  ;;  %v5911_v61 = vpop.f32.mrf.mxu1 }
 0x196   : > { %v5913_v60 = vpop.f32.mrf.mxu0 }
 0x197   : > { %6469 = vst [vmem:[#allocation3_spill] sm:$0xff] %v5913_v60  ;;  %v5915_v51 = vpop.f32.mrf.mxu1 }
 0x198   : > { %v5917_v45 = vpop.f32.mrf.mxu0 }
 0x199   : > { %6470 = vst [vmem:[#allocation5_spill] sm:$0xff] %v5917_v45  ;;  %v5919_v13 = vpop.f32.mrf.mxu1 }
 0x19a   : > { %v5921_v63 = vpop.f32.mrf.mxu0 }
 0x19b   : > { %6471 = vst [vmem:[#allocation7_spill] sm:$0xff] %v5921_v63  ;;  %v5923_v29 = vpop.f32.mrf.mxu1 }
 0x19c   : > { %6472 = vst [vmem:[#allocation9_spill] sm:$0xff] %v5923_v29  ;;  %v5925_v19 = vpop.f32.mrf.mxu0 }
 0x19d   : > { %6473 = vst [vmem:[#allocation11_spill] sm:$0xff] %v5925_v19  ;;  %v5927_v44 = vpop.f32.mrf.mxu1 }
 0x19e   : > { %6474 = vst [vmem:[#allocation13_spill] sm:$0xff] %v5927_v44  ;;  %v5929_v5 = vpop.f32.mrf.mxu0 }
 0x19f   : > { %6475 = vst [vmem:[#allocation15_spill] sm:$0xff] %v5929_v5  ;;  %v5931_v2 = vpop.f32.mrf.mxu1 }
 0x1a0   : > { %6476 = vst [vmem:[#allocation17_spill] sm:$0xff] %v5931_v2  ;;  %v5933_v58 = vpop.f32.mrf.mxu0 }
 0x1a1   : > { %6477 = vst [vmem:[#allocation20_spill] sm:$0xff] %v5933_v58  ;;  %v5935_v60 = vpop.f32.mrf.mxu1 }
 0x1a2   : > { %6478 = vst [vmem:[#allocation22_spill] sm:$0xff] %v5935_v60  ;;  %v5937_v37 = vpop.f32.mrf.mxu0 }
 0x1a3   : > { %6479 = vst [vmem:[#allocation25_spill] sm:$0xff] %v5937_v37  ;;  %v5939_v45 = vpop.f32.mrf.mxu1 }
 0x1a4   : > { %6480 = vst [vmem:[#allocation27_spill] sm:$0xff] %v5939_v45  ;;  %v5941_v21 = vpop.f32.mrf.mxu0 }
 0x1a5   : > { %6481 = vst [vmem:[#allocation29_spill] sm:$0xff] %v5941_v21  ;;  %v5943_v63 = vpop.f32.mrf.mxu1 }
 0x1a6   : > { %6482 = vst [vmem:[#allocation6_spill] sm:$0xff] %v5943_v63  ;;  %v5945_v29 = vpop.f32.mrf.mxu0 }
 0x1a7   : > { %6483 = vst [vmem:[#allocation31_spill] sm:$0xff] %v5945_v29  ;;  %v5947_v19 = vpop.f32.mrf.mxu1 }
 0x1a8   : > { %6484 = vst [vmem:[#allocation8_spill] sm:$0xff] %v5947_v19  ;;  %v5949_v44 = vpop.f32.mrf.mxu0 }
 0x1a9   : > { %6485 = vst [vmem:[#allocation18_spill] sm:$0xff] %v5949_v44  ;;  %v5951_v5 = vpop.f32.mrf.mxu1  ;;  %v2130_v44 = vadd.f32 %v5867_v41, %v5772_v10 }
 0x1aa   : > { %v5953_v2 = vpop.f32.mrf.mxu0 }
 0x1ab   : > { %6486 = vst [vmem:[#allocation33_spill] sm:$0xff] %v5953_v2  ;;  %v5955_v58 = vpop.f32.mrf.mxu1 }
 0x1ac   : > { %6487 = vst [vmem:[#allocation14_spill] sm:$0xff] %v5955_v58  ;;  %v2368_v60 = vpop.f32.mrf.mxu0 }
 0x1ad   : > { %v2100_v37 = vpop.f32.mrf.mxu1 }
 0x1ae   : > { %v2155_v45 = vadd.f32 %v2100_v37, %v5853_v15  ;;  %v4219_v14 = vpop.f32.mrf.mxu0  ;;  %v2129_v15 = vadd.f32 %v5873_v31, %v5775_v59  ;;  %v2132_v37 = vadd.f32 %v4130_v57, %v5778_v54  ;;  %v2398_v59 = vadd.f32 %v5865_v1, %v2130_v44 }
 0x1af   : > { %v4169_v21 = vpop.f32.mrf.mxu1  ;;  %v2137_v54 = vadd.f32 %v2010_v27, %v5799_v32  ;;  %v2139_v32 = vadd.f32 %v5895_v42, %v5805_v23  ;;  %v6489_v42 = vld [vmem:[#allocation30_spill] sm:$0xff] }
 0x1b0   : > { %v5958_v3 = vadd.f32 %v2368_v60, %v2155_v45  ;;  %v2158_v29 = vadd.f32 %v4169_v21, %v5856_v35  ;;  %v5961_v63 = vpop.f32.mrf.mxu0  ;;  %v2131_v45 = vadd.f32 %v1980_v46, %v5781_v7  ;;  %v2134_v21 = vadd.f32 %v4133_v43, %v5784_v56 }
 0x1b1   : > { %v5963_v19 = vpop.f32.mrf.mxu1  ;;  %v2133_v60 = vadd.f32 %v1990_v62, %v5787_v18  ;;  %v2140_v7 = vadd.f32 %v4142_v33, %v5802_v40  ;;  %v2397_v31 = vadd.f32 %v5871_v28, %v2129_v15  ;;  %v2400_v18 = vadd.f32 %v5875_v39, %v2132_v37 }
 0x1b2   : > { %6488 = vst [vmem:[#allocation10_spill] sm:$0xff] %v5958_v3  ;;  %v5967_v2 = vadd.f32 %v4219_v14, %v2158_v29  ;;  %v5969_v58 = vpop.f32.mrf.mxu0  ;;  %v2136_v3 = vadd.f32 %v4136_v20, %v5790_v53  ;;  %v2135_v14 = vadd.f32 %v2000_v0, %v5793_v4  ;;  %v2138_v29 = vadd.f32 %v4139_v26, %v5796_v48 }
 0x1b3   : > { %v5976_v35 = vpop.f32.mrf.mxu1  ;;  %v2399_v53 = vadd.f32 %v5877_v30, %v2131_v45  ;;  %v2402_v57 = vadd.f32 %v5879_v55, %v2134_v21  ;;  %v2401_v48 = vadd.f32 %v5881_v24, %v2133_v60  ;;  %v2142_v39 = vadd.f32 %v5899_v17, %v5808_v50  ;;  %v6012_v55 = vld [vmem:[%s6242_s2] ss:$0 sm:$0xff]  ;;  %v6494_v45 = vld [vmem:[#allocation32_spill] sm:$0xff] }
 0x1b4   : > { %v5980_v10 = vpop.f32.mrf.mxu0  ;;  %v5995_v46 = vadd.f32 %v5883_v38, %v2136_v3  ;;  %v6000_v1 = vadd.f32 %v5885_v34, %v2135_v14  ;;  %v6003_v28 = vadd.f32 %v5887_v49, %v2138_v29  ;;  %v2141_v30 = vadd.f32 %v5903_v22, %v5811_v52  ;;  %v6490_v17 = vld [vmem:[#allocation38_spill] sm:$0xff]  ;;  %v6492_v3 = vld [vmem:[#allocation39_spill] sm:$0xff] }
 0x1b5   : > { %v5984_v41 = vpop.f32.mrf.mxu1  ;;  %v6015_v43 = vadd.f32 %v5889_v47, %v2137_v54  ;;  %v6018_v24 = vadd.f32 %v5891_v9, %v2140_v7  ;;  %v2144_v50 = vadd.f32 %v5907_v8, %v5814_v6  ;;  %v2143_v52 = vadd.f32 %v5911_v61, %v5817_v16  ;;  %v6496_v14 = vld [vmem:[#allocation3_spill] sm:$0xff] }
 0x1b6   : > { %v4277_v56 = vpop.f32.mrf.mxu0  ;;  %v2146_v34 = vadd.f32 %v5915_v51, %v5820_v25  ;;  %v2145_v0 = vadd.f32 %v5919_v13, %v5823_v11  ;;  %v6029_v26 = vadd.f32 %v5893_v12, %v2139_v32  ;;  %v6033_v6 = vadd.f32 %v5897_v36, %v2142_v39  ;;  %v6491_v25 = vld [vmem:[#allocation9_spill] sm:$0xff]  ;;  %v6495_v36 = vld [vmem:[#allocation2_spill] sm:$0xff]  ;;  %v6498_v32 = vld [vmem:[#allocation7_spill] sm:$0xff] }
 0x1b7   : > { %v4227_v4 = vpop.f32.mrf.mxu1  ;;  %v6036_v16 = vadd.f32 %v6489_v42, %v2141_v30  ;;  %v2148_v51 = vadd.f32 %v6491_v25, %v6490_v17  ;;  %v6493_v11 = vld [vmem:[#allocation13_spill] sm:$0xff]  ;;  %v6044_v21 = vadd.f32 %v6494_v45, %v2144_v50  ;;  %v6047_v60 = vadd.f32 %v6495_v36, %v2143_v52  ;;  %v6500_v30 = vld [vmem:[#allocation40_spill] sm:$0xff] }
 0x1b8   : > { %v2670_v44 = vadd.f32 %v4227_v4, %v2398_v59  ;;  %v2781_v40 = vpop.f32.mrf.mxu0  ;;  %v2147_v13 = vadd.f32 %v6493_v11, %v6492_v3  ;;  %v6050_v29 = vadd.f32 %v6496_v14, %v2146_v34  ;;  %v6497_v59 = vld [vmem:[#allocation5_spill] sm:$0xff] }
 0x1b9   : > { %v2510_v23 = vpop.f32.mrf.mxu1  ;;  %v6053_v54 = vadd.f32 %v6497_v59, %v2145_v0 }
 0x1ba   : > { %v2941_v62 = vadd.f32 %v4277_v56, %v2670_v44  ;;  %v2669_v38 = vadd.f32 %v2510_v23, %v2397_v31  ;;  %v4280_v20 = vpop.f32.mrf.mxu0  ;;  %v6057_v44 = vadd.f32 %v6498_v32, %v2148_v51  ;;  %v6501_v23 = vld [vmem:[#allocation17_spill] sm:$0xff] }
 0x1bb   : > { %v4230_v49 = vpop.f32.mrf.mxu1 }
 0x1bc   : > { %v2980_v47 = vadd.f32 %v6012_v55, %v2941_v62  ;;  %v2940_v27 = vadd.f32 %v2781_v40, %v2669_v38  ;;  %v2672_v9 = vadd.f32 %v4230_v49, %v2400_v18  ;;  %v2791_v33 = vpop.f32.mrf.mxu0  ;;  %v6499_v40 = vld [vmem:[#allocation11_spill] sm:$0xff]  ;;  %v2150_v62 = vadd.f32 %v6501_v23, %v6500_v30  ;;  %v6502_v49 = vld [vmem:[#allocation41_spill] sm:$0xff] }
 0x1bd   : > { %v2520_v22 = vpop.f32.mrf.mxu1  ;;  %v6060_v39 = vadd.f32 %v6499_v40, %v2147_v13 }
 0x1be   : > { %v3012_v12 = vsub.f32 0.0, %v2980_v47  ;;  %v2979_v8 = vadd.f32 %v6012_v55, %v2940_v27  ;;  %v2943_v61 = vadd.f32 %v4280_v20, %v2672_v9  ;;  %v2671_v15 = vadd.f32 %v2520_v22, %v2399_v53  ;;  %v4283_v37 = vpop.f32.mrf.mxu0  ;;  %v6503_v47 = vld [vmem:[#allocation22_spill] sm:$0xff]  ;;  %v6506_v22 = vld [vmem:[#allocation15_spill] sm:$0xff] }
 0x1bf   : > { %v4233_v7 = vpop.f32.mrf.mxu1  ;;  %v2149_v27 = vadd.f32 %v6503_v47, %v6502_v49  ;;  %v6504_v9 = vld [vmem:[#allocation42_spill] sm:$0xff] }
 0x1c0   : > { %v3045_v56 = vmul.f32 1.442695, %v3012_v12  ;;  %v3011_v31 = vsub.f32 0.0, %v2979_v8  ;;  %v2982_v18 = vadd.f32 %v6012_v55, %v2943_v61  ;;  %v2942_v4 = vadd.f32 %v2791_v33, %v2671_v15  ;;  %v2801_v53 = vpop.f32.mrf.mxu0  ;;  %v6505_v33 = vld [vmem:[#allocation27_spill] sm:$0xff]  ;;  %v6508_v61 = vld [vmem:[#allocation6_spill] sm:$0xff] }
 0x1c1   : > { %v2674_v38 = vadd.f32 %v4233_v7, %v2402_v57  ;;  %v2530_v20 = vpop.f32.mrf.mxu1  ;;  %v2152_v42 = vadd.f32 %v6505_v33, %v6504_v9  ;;  %v6071_v12 = vadd.f32 %v6506_v22, %v2150_v62  ;;  %v6507_v8 = vld [vmem:[#allocation43_spill] sm:$0xff] }
 0x1c2   : > { %4334 = vpow2.f32 %v3045_v56  ;;  %v3043_v50 = vmul.f32 1.442695, %v3011_v31  ;;  %v3014_v52 = vsub.f32 0.0, %v2982_v18  ;;  %v2981_v34 = vadd.f32 %v6012_v55, %v2942_v4  ;;  %v4286_v0 = vpop.f32.mrf.mxu0  ;;  %v6509_v56 = vld [vmem:[#allocation20_spill] sm:$0xff] }
 0x1c3   : > { %v2945_v17 = vadd.f32 %v4283_v37, %v2674_v38  ;;  %v2673_v25 = vadd.f32 %v2530_v20, %v2401_v48  ;;  %v4236_v51 = vpop.f32.mrf.mxu1  ;;  %v2151_v15 = vadd.f32 %v6508_v61, %v6507_v8  ;;  %v6078_v31 = vadd.f32 %v6509_v56, %v2149_v27  ;;  %v6511_v38 = vld [vmem:[#allocation29_spill] sm:$0xff]  ;;  %v6512_v20 = vld [vmem:[#allocation44_spill] sm:$0xff] }
 0x1c4   : > { %4336 = vpow2.f32 %v3043_v50  ;;  %v3049_v3 = vmul.f32 1.442695, %v3014_v52  ;;  %v3013_v11 = vsub.f32 0.0, %v2981_v34  ;;  %v2676_v57 = vadd.f32 %v4236_v51, %v5995_v46  ;;  %v2811_v13 = vpop.f32.mrf.mxu0  ;;  %v6510_v46 = vld [vmem:[#allocation25_spill] sm:$0xff]  ;;  %v6513_v50 = vld [vmem:[#allocation8_spill] sm:$0xff]  ;;  %v6516_v51 = vld [vmem:[#allocation14_spill] sm:$0xff] }
 0x1c5   : > { %v2984_v45 = vadd.f32 %v6012_v55, %v2945_v17  ;;  %v2944_v36 = vadd.f32 %v2801_v53, %v2673_v25  ;;  %v2540_v14 = vpop.f32.mrf.mxu1  ;;  %v6081_v18 = vadd.f32 %v6510_v46, %v2152_v42  ;;  %v2154_v52 = vadd.f32 %v6513_v50, %v6512_v20  ;;  %v6514_v17 = vld [vmem:[#allocation16_spill] sm:$0xff]  ;;  %v6515_v25 = vld [vmem:[#allocation21_spill] sm:$0xff] }
 0x1c6   : > { %4338 = vpow2.f32 %v3049_v3  ;;  %v3047_v37 = vmul.f32 1.442695, %v3013_v11  ;;  %v2947_v48 = vadd.f32 %v4286_v0, %v2676_v57  ;;  %v2675_v59 = vadd.f32 %v2540_v14, %v6000_v1  ;;  %v4289_v7 = vpop.f32.mrf.mxu0 }
 0x1c7   : > { %v3016_v4 = vsub.f32 0.0, %v2984_v45  ;;  %v2983_v32 = vadd.f32 %v6012_v55, %v2944_v36  ;;  %v4239_v40 = vpop.f32.mrf.mxu1  ;;  %v6087_v1 = vadd.f32 %v6511_v38, %v2151_v15  ;;  %v2156_v3 = vadd.f32 %v6516_v51, %v6515_v25  ;;  %v6517_v45 = vld [vmem:[#allocation31_spill] sm:$0xff] }
 0x1c8   : > { %4340 = vpow2.f32 %v3047_v37  ;;  %v2986_v53 = vadd.f32 %v6012_v55, %v2947_v48  ;;  %v2946_v30 = vadd.f32 %v2811_v13, %v2675_v59  ;;  %v2678_v23 = vadd.f32 %v4239_v40, %v6003_v28  ;;  %v2821_v62 = vpop.f32.mrf.mxu0  ;;  %v6520_v40 = vld [vmem:[#allocation33_spill] sm:$0xff] }
 0x1c9   : > { %v3053_v34 = vmul.f32 1.442695, %v3016_v4  ;;  %v3015_v0 = vsub.f32 0.0, %v2983_v32  ;;  %v2550_v49 = vpop.f32.mrf.mxu1  ;;  %v2153_v28 = vadd.f32 %v5951_v5, %v6514_v17  ;;  %v6099_v36 = vadd.f32 %v6517_v45, %v2154_v52  ;;  %v6519_v4 = vld [vmem:[#allocation18_spill] sm:$0xff] }
 0x1ca   : > { %v3018_v47 = vsub.f32 0.0, %v2986_v53  ;;  %v2985_v27 = vadd.f32 %v6012_v55, %v2946_v30  ;;  %v2949_v9 = vadd.f32 %v4289_v7, %v2678_v23  ;;  %v2677_v33 = vadd.f32 %v2550_v49, %v6015_v43  ;;  %v4292_v42 = vpop.f32.mrf.mxu0  ;;  %v6518_v43 = vld [vmem:[#allocation24_spill] sm:$0xff] }
 0x1cb   : > { %4342 = vpow2.f32 %v3053_v34  ;;  %v3051_v11 = vmul.f32 1.442695, %v3015_v0  ;;  %v4242_v57 = vpop.f32.mrf.mxu1  ;;  %v2157_v14 = vadd.f32 %v5963_v19, %v6518_v43  ;;  %v6106_v32 = vadd.f32 %v6519_v4, %v2153_v28 }
 0x1cc   : > { %v3057_v13 = vmul.f32 1.442695, %v3018_v47  ;;  %v3017_v22 = vsub.f32 0.0, %v2985_v27  ;;  %v2988_v8 = vadd.f32 %v6012_v55, %v2949_v9  ;;  %v2948_v61 = vadd.f32 %v2821_v62, %v2677_v33  ;;  %v2831_v15 = vpop.f32.mrf.mxu0 }
 0x1cd   : > { %4344 = vpow2.f32 %v3051_v11  ;;  %v2680_v5 = vadd.f32 %v4242_v57, %v6018_v24  ;;  %v2560_v37 = vpop.f32.mrf.mxu1  ;;  %v6109_v53 = vadd.f32 %v6520_v40, %v2156_v3  ;;  %v6113_v52 = vadd.f32 %v5961_v63, %v2157_v14 }
 0x1ce   : > { %4346 = vpow2.f32 %v3057_v13  ;;  %v3055_v48 = vmul.f32 1.442695, %v3017_v22  ;;  %v3020_v59 = vsub.f32 0.0, %v2988_v8  ;;  %v2987_v7 = vadd.f32 %v6012_v55, %v2948_v61  ;;  %v4295_v56 = vpop.f32.mrf.mxu0 }
 0x1cf   : > { %v4335_v46 = vpop.eup %4334  ;;  %v2951_v30 = vadd.f32 %v4292_v42, %v2680_v5  ;;  %v2679_v19 = vadd.f32 %v2560_v37, %v6029_v26  ;;  %v4245_v23 = vpop.f32.mrf.mxu1 }
 0x1d0   : > { %v3108_v62 = vadd.f32 1.0, %v4335_v46  ;;  %4348 = vpow2.f32 %v3055_v48  ;;  %v3061_v24 = vmul.f32 1.442695, %v3020_v59  ;;  %v3019_v38 = vsub.f32 0.0, %v2987_v7  ;;  %v2841_v20 = vpop.f32.mrf.mxu0 }
 0x1d1   : > { %v4337_v50 = vpop.eup %4336  ;;  %v2990_v34 = vadd.f32 %v6012_v55, %v2951_v30  ;;  %v2950_v0 = vadd.f32 %v2831_v15, %v2679_v19  ;;  %v2682_v49 = vadd.f32 %v4245_v23, %v6033_v6  ;;  %v2570_v47 = vpop.f32.mrf.mxu1 }
 0x1d2   : > { %4350 = vrcp.f32 %v3108_v62  ;;  %v3107_v27 = vadd.f32 1.0, %v4337_v50  ;;  %v3059_v9 = vmul.f32 1.442695, %v3019_v38  ;;  %v2681_v26 = vadd.f32 %v2570_v47, %v6036_v16  ;;  %v4298_v33 = vpop.f32.mrf.mxu0  ;;  %v6521_v62 = vld [vmem:[#allocation26_spill] sm:$0xff] }
 0x1d3   : > { %v4339_v42 = vpop.eup %4338  ;;  %4352 = vpow2.f32 %v3061_v24  ;;  %v3022_v17 = vsub.f32 0.0, %v2990_v34  ;;  %v2989_v28 = vadd.f32 %v6012_v55, %v2950_v0  ;;  %v2953_v25 = vadd.f32 %v4295_v56, %v2682_v49  ;;  %v4248_v63 = vpop.f32.mrf.mxu1 }
 0x1d4   : > { %4354 = vrcp.f32 %v3107_v27  ;;  %v3110_v51 = vadd.f32 1.0, %v4339_v42  ;;  %v2952_v3 = vadd.f32 %v2841_v20, %v2681_v26  ;;  %v2684_v11 = vadd.f32 %v4248_v63, %v6044_v21  ;;  %v2851_v6 = vpop.f32.mrf.mxu0 }
 0x1d5   : > { %v4341_v57 = vpop.eup %4340  ;;  %4356 = vpow2.f32 %v3059_v9  ;;  %v3065_v13 = vmul.f32 1.442695, %v3022_v17  ;;  %v3021_v22 = vsub.f32 0.0, %v2989_v28  ;;  %v2992_v16 = vadd.f32 %v6012_v55, %v2953_v25  ;;  %v2580_v8 = vpop.f32.mrf.mxu1 }
 0x1d6   : > { %4358 = vrcp.f32 %v3110_v51  ;;  %v3109_v61 = vadd.f32 1.0, %v4341_v57  ;;  %v2991_v15 = vadd.f32 %v6012_v55, %v2952_v3  ;;  %v2955_v45 = vadd.f32 %v4298_v33, %v2684_v11  ;;  %v4301_v43 = vpop.f32.mrf.mxu0 }
 0x1d7   : > { %4360 = vpow2.f32 %v3065_v13  ;;  %v3063_v14 = vmul.f32 1.442695, %v3021_v22  ;;  %v3024_v5 = vsub.f32 0.0, %v2992_v16  ;;  %v2683_v21 = vadd.f32 %v2580_v8, %v6047_v60  ;;  %v4251_v37 = vpop.f32.mrf.mxu1 }
 0x1d8   : > { %v4343_v48 = vpop.eup %4342  ;;  %4362 = vrcp.f32 %v3109_v61  ;;  %v3023_v59 = vsub.f32 0.0, %v2991_v15  ;;  %v2994_v7 = vadd.f32 %v6012_v55, %v2955_v45  ;;  %v2686_v56 = vadd.f32 %v4251_v37, %v6050_v29  ;;  %v2861_v46 = vpop.f32.mrf.mxu0 }
 0x1d9   : > { %v3112_v4 = vadd.f32 1.0, %v4343_v48  ;;  %4364 = vpow2.f32 %v3063_v14  ;;  %v3069_v40 = vmul.f32 1.442695, %v3024_v5  ;;  %v2954_v30 = vadd.f32 %v2851_v6, %v2683_v21  ;;  %v2590_v19 = vpop.f32.mrf.mxu1 }
 0x1da   : > { %v4345_v23 = vpop.eup %4344  ;;  %v6127_v24 = vadd.f32 %v5976_v35, %v6521_v62  ;;  %v3026_v60 = vsub.f32 0.0, %v2994_v7  ;;  %v2957_v38 = vadd.f32 %v4301_v43, %v2686_v56  ;;  %v2685_v20 = vadd.f32 %v2590_v19, %v6053_v54  ;;  %v4304_v50 = vpop.f32.mrf.mxu0 }
 0x1db   : > { %v4347_v34 = vpop.eup %4346  ;;  %4366 = vrcp.f32 %v3112_v4  ;;  %v3111_v29 = vadd.f32 1.0, %v4345_v23  ;;  %v3067_v0 = vmul.f32 1.442695, %v3023_v59  ;;  %v2993_v49 = vadd.f32 %v6012_v55, %v2954_v30  ;;  %v4254_v47 = vpop.f32.mrf.mxu1 }
 0x1dc   : > { %v3114_v27 = vadd.f32 1.0, %v4347_v34  ;;  %4368 = vpow2.f32 %v3069_v40  ;;  %v3073_v9 = vmul.f32 1.442695, %v3026_v60  ;;  %v2996_v26 = vadd.f32 %v6012_v55, %v2957_v38  ;;  %v2871_v35 = vpop.f32.mrf.mxu0 }
 0x1dd   : > { %v4349_v33 = vpop.eup %4348  ;;  %4370 = vrcp.f32 %v3111_v29  ;;  %v3025_v54 = vsub.f32 0.0, %v2993_v49  ;;  %v2956_v42 = vadd.f32 %v2861_v46, %v2685_v20  ;;  %v2688_v17 = vadd.f32 %v4254_v47, %v6057_v44  ;;  %v2600_v28 = vpop.f32.mrf.mxu1 }
 0x1de   : > { %4372 = vrcp.f32 %v3114_v27  ;;  %v3113_v25 = vadd.f32 1.0, %v4349_v33  ;;  %v3028_v63 = vsub.f32 0.0, %v2996_v26  ;;  %v2687_v51 = vadd.f32 %v2600_v28, %v6060_v39  ;;  %v4307_v3 = vpop.f32.mrf.mxu0 }
 0x1df   : > { %v4351_v11 = vpop.eup %4350  ;;  %4374 = vpow2.f32 %v3067_v0  ;;  %v3071_v6 = vmul.f32 1.442695, %v3025_v54  ;;  %v2995_v57 = vadd.f32 %v6012_v55, %v2956_v42  ;;  %v2959_v13 = vadd.f32 %v4304_v50, %v2688_v17  ;;  %v4257_v22 = vpop.f32.mrf.mxu1 }
 0x1e0   : > { %v4353_v16 = vpop.eup %4352  ;;  %3173 = vst.msk [vmem:[%s6136_s15 + $0x8] sm:$0xff] %vm3171_vm4, %v4351_v11  ;;  %4376 = vrcp.f32 %v3113_v25  ;;  %v3077_v44 = vmul.f32 1.442695, %v3028_v63  ;;  %v2958_v8 = vadd.f32 %v2871_v35, %v2687_v51  ;;  %v2690_v61 = vadd.f32 %v4257_v22, %v6071_v12  ;;  %v2881_v15 = vpop.f32.mrf.mxu0  ;;  %v6522_v63 = vld [vmem:[#allocation28_spill] sm:$0xff] }
 0x1e1   : > { %v4355_v45 = vpop.eup %4354  ;;  %v3116_v39 = vadd.f32 1.0, %v4353_v16  ;;  %4378 = vpow2.f32 %v3073_v9  ;;  %v3027_v43 = vsub.f32 0.0, %v2995_v57  ;;  %v2998_v14 = vadd.f32 %v6012_v55, %v2959_v13  ;;  %v2610_v5 = vpop.f32.mrf.mxu1 }
 0x1e2   : > { %v4357_v21 = vpop.eup %4356  ;;  %3172 = vst.msk [vmem:[%s6136_s15] sm:$0xff] %vm3171_vm4, %v4355_v45  ;;  %4380 = vpow2.f32 %v3071_v6  ;;  %v2997_v37 = vadd.f32 %v6012_v55, %v2958_v8  ;;  %v2961_v48 = vadd.f32 %v4307_v3, %v2690_v61  ;;  %v2689_v59 = vadd.f32 %v2610_v5, %v6078_v31  ;;  %v4310_v7 = vpop.f32.mrf.mxu0 }
 0x1e3   : > { %v4359_v12 = vpop.eup %4358  ;;  %4382 = vrcp.f32 %v3116_v39  ;;  %v3115_v56 = vadd.f32 1.0, %v4357_v21  ;;  %v3075_v46 = vmul.f32 1.442695, %v3027_v43  ;;  %v3030_v4 = vsub.f32 0.0, %v2998_v14  ;;  %v4260_v40 = vpop.f32.mrf.mxu1 }
 0x1e4   : > { %v4361_v30 = vpop.eup %4360  ;;  %3175 = vst.msk [vmem:[%s6136_s15 + $0x18] sm:$0xff] %vm3171_vm4, %v4359_v12  ;;  %4384 = vpow2.f32 %v3077_v44  ;;  %v3029_v19 = vsub.f32 0.0, %v2997_v37  ;;  %v3000_v23 = vadd.f32 %v6012_v55, %v2961_v48  ;;  %v2960_v62 = vadd.f32 %v2881_v15, %v2689_v59  ;;  %v2891_v60 = vpop.f32.mrf.mxu0  ;;  %v6523_v12 = vld [vmem:[#allocation10_spill] sm:$0xff] }
 0x1e5   : > { %v4363_v38 = vpop.eup %4362  ;;  %4386 = vrcp.f32 %v3115_v56  ;;  %v3118_v31 = vadd.f32 1.0, %v4361_v30  ;;  %v3081_v20 = vmul.f32 1.442695, %v3030_v4  ;;  %v2692_v50 = vadd.f32 %v4260_v40, %v6081_v18  ;;  %v2620_v34 = vpop.f32.mrf.mxu1 }
 0x1e6   : > { %v4365_v29 = vpop.eup %4364  ;;  %3174 = vst.msk [vmem:[%s6136_s15 + $0x10] sm:$0xff] %vm3171_vm4, %v4363_v38  ;;  %4388 = vpow2.f32 %v3075_v46  ;;  %v3079_v0 = vmul.f32 1.442695, %v3029_v19  ;;  %v3032_v49 = vsub.f32 0.0, %v3000_v23  ;;  %v2999_v47 = vadd.f32 %v6012_v55, %v2960_v62  ;;  %v4313_v27 = vpop.f32.mrf.mxu0 }
 0x1e7   : > { %4390 = vrcp.f32 %v3118_v31  ;;  %v3117_v9 = vadd.f32 1.0, %v4365_v29  ;;  %v2963_v26 = vadd.f32 %v4310_v7, %v2692_v50  ;;  %v2691_v35 = vadd.f32 %v2620_v34, %v6087_v1  ;;  %v4263_v33 = vpop.f32.mrf.mxu1 }
 0x1e8   : > { %v4367_v54 = vpop.eup %4366  ;;  %4392 = vpow2.f32 %v3081_v20  ;;  %v3085_v18 = vmul.f32 1.442695, %v3032_v49  ;;  %v3031_v42 = vsub.f32 0.0, %v2999_v47  ;;  %v2694_v17 = vadd.f32 %v4263_v33, %v6099_v36  ;;  %v2901_v28 = vpop.f32.mrf.mxu0 }
 0x1e9   : > { %v4369_v25 = vpop.eup %4368  ;;  %v2159_v51 = vadd.f32 %v5984_v41, %v6522_v63  ;;  %3177 = vst.msk [vmem:[%s6136_s15 + $0x28] sm:$0xff] %vm3171_vm4, %v4367_v54  ;;  %4394 = vrcp.f32 %v3117_v9  ;;  %v3002_v3 = vadd.f32 %v6012_v55, %v2963_v26  ;;  %v2962_v11 = vadd.f32 %v2891_v60, %v2691_v35  ;;  %v2630_v1 = vpop.f32.mrf.mxu1 }
 0x1ea   : > { %v4371_v6 = vpop.eup %4370  ;;  %v3120_v57 = vadd.f32 1.0, %v4369_v25  ;;  %4396 = vpow2.f32 %v3079_v0  ;;  %v3083_v13 = vmul.f32 1.442695, %v3031_v42  ;;  %v2965_v22 = vadd.f32 %v4313_v27, %v2694_v17  ;;  %v4316_v36 = vpop.f32.mrf.mxu0 }
 0x1eb   : > { %v4373_v16 = vpop.eup %4372  ;;  %3176 = vst.msk [vmem:[%s6136_s15 + $0x20] sm:$0xff] %vm3171_vm4, %v4371_v6  ;;  %4398 = vpow2.f32 %v3085_v18  ;;  %v3034_v44 = vsub.f32 0.0, %v3002_v3  ;;  %v3001_v41 = vadd.f32 %v6012_v55, %v2962_v11  ;;  %v2693_v8 = vadd.f32 %v2630_v1, %v6106_v32  ;;  %v4266_v61 = vpop.f32.mrf.mxu1 }
 0x1ec   : > { %v4375_v15 = vpop.eup %4374  ;;  %v6169_v45 = vadd.f32 %v5969_v58, %v6127_v24  ;;  %3179 = vst.msk [vmem:[%s6136_s15 + $0x38] sm:$0xff] %vm3171_vm4, %v4373_v16  ;;  %4400 = vrcp.f32 %v3120_v57  ;;  %v3004_v39 = vadd.f32 %v6012_v55, %v2965_v22  ;;  %v2696_v43 = vadd.f32 %v4266_v61, %v6109_v53  ;;  %v2911_v14 = vpop.f32.mrf.mxu0 }
 0x1ed   : > { %v4377_v5 = vpop.eup %4376  ;;  %v3119_v21 = vadd.f32 1.0, %v4375_v15  ;;  %4402 = vpow2.f32 %v3083_v13  ;;  %v3089_v37 = vmul.f32 1.442695, %v3034_v44  ;;  %v3033_v32 = vsub.f32 0.0, %v3001_v41  ;;  %v2640_v48 = vpop.f32.mrf.mxu1 }
 0x1ee   : > { %v4379_v59 = vpop.eup %4378  ;;  %3178 = vst.msk [vmem:[%s6136_s15 + $0x30] sm:$0xff] %vm3171_vm4, %v4377_v5  ;;  %v3036_v7 = vsub.f32 0.0, %v3004_v39  ;;  %v2964_v58 = vadd.f32 %v2901_v28, %v2693_v8  ;;  %v2967_v24 = vadd.f32 %v4316_v36, %v2696_v43  ;;  %v2695_v56 = vadd.f32 %v2640_v48, %v6523_v12  ;;  %v4319_v46 = vpop.f32.mrf.mxu0 }
 0x1ef   : > { %v4381_v4 = vpop.eup %4380  ;;  %v2427_v53 = vadd.f32 %v5980_v10, %v2159_v51  ;;  %4404 = vrcp.f32 %v3119_v21  ;;  %v3122_v40 = vadd.f32 1.0, %v4379_v59  ;;  %v3087_v30 = vmul.f32 1.442695, %v3033_v32  ;;  %v4269_v19 = vpop.f32.mrf.mxu1 }
 0x1f0   : > { %v4383_v23 = vpop.eup %4382  ;;  %v3121_v62 = vadd.f32 1.0, %v4381_v4  ;;  %4406 = vpow2.f32 %v3089_v37  ;;  %v3093_v60 = vmul.f32 1.442695, %v3036_v7  ;;  %v3003_v38 = vadd.f32 %v6012_v55, %v2964_v58  ;;  %v2921_v31 = vpop.f32.mrf.mxu0 }
 0x1f1   : > { %v4385_v20 = vpop.eup %4384  ;;  %3181 = vst.msk [vmem:[%s6136_s15 + $0x48] sm:$0xff] %vm3171_vm4, %v4383_v23  ;;  %4408 = vrcp.f32 %v3122_v40  ;;  %v3006_v50 = vadd.f32 %v6012_v55, %v2967_v24  ;;  %v2966_v34 = vadd.f32 %v2911_v14, %v2695_v56  ;;  %v2698_v10 = vadd.f32 %v4269_v19, %v5967_v2  ;;  %v2650_v29 = vpop.f32.mrf.mxu1 }
 0x1f2   : > { %v4387_v0 = vpop.eup %4386  ;;  %4410 = vrcp.f32 %v3121_v62  ;;  %v3124_v49 = vadd.f32 1.0, %v4385_v20  ;;  %v3035_v47 = vsub.f32 0.0, %v3003_v38  ;;  %v2697_v27 = vadd.f32 %v2650_v29, %v6113_v52  ;;  %v4322_v28 = vpop.f32.mrf.mxu0 }
 0x1f3   : > { %v4389_v9 = vpop.eup %4388  ;;  %3180 = vst.msk [vmem:[%s6136_s15 + $0x40] sm:$0xff] %vm3171_vm4, %v4387_v0  ;;  %4412 = vpow2.f32 %v3087_v30  ;;  %v3038_v26 = vsub.f32 0.0, %v3006_v50  ;;  %v3005_v35 = vadd.f32 %v6012_v55, %v2966_v34  ;;  %v2969_v33 = vadd.f32 %v4319_v46, %v2698_v10  ;;  %v4272_v54 = vpop.f32.mrf.mxu1 }
 0x1f4   : > { %v4391_v18 = vpop.eup %4390  ;;  %4414 = vrcp.f32 %v3124_v49  ;;  %v3123_v2 = vadd.f32 1.0, %v4389_v9  ;;  %v3091_v42 = vmul.f32 1.442695, %v3035_v47  ;;  %v2968_v17 = vadd.f32 %v2921_v31, %v2697_v27  ;;  %v2931_v15 = vpop.f32.mrf.mxu0 }
 0x1f5   : > { %v4393_v25 = vpop.eup %4392  ;;  %3183 = vst.msk [vmem:[%s6136_s15 + $0x58] sm:$0xff] %vm3171_vm4, %v4391_v18  ;;  %4416 = vpow2.f32 %v3093_v60  ;;  %v3097_v52 = vmul.f32 1.442695, %v3038_v26  ;;  %v3037_v63 = vsub.f32 0.0, %v3005_v35  ;;  %v3008_v51 = vadd.f32 %v6012_v55, %v2969_v33  ;;  %v2660_v3 = vpop.f32.mrf.mxu1 }
 0x1f6   : > { %v4395_v11 = vpop.eup %4394  ;;  %4418 = vrcp.f32 %v3123_v2  ;;  %v3126_v1 = vadd.f32 1.0, %v4393_v25  ;;  %v3007_v6 = vadd.f32 %v6012_v55, %v2968_v17  ;;  %v2700_v57 = vadd.f32 %v4272_v54, %v6169_v45 }
 0x1f7   : > { %v4397_v13 = vpop.eup %4396  ;;  %3182 = vst.msk [vmem:[%s6136_s15 + $0x50] sm:$0xff] %vm3171_vm4, %v4395_v11  ;;  %4420 = vpow2.f32 %v3091_v42  ;;  %v3095_v22 = vmul.f32 1.442695, %v3037_v63  ;;  %v3040_v36 = vsub.f32 0.0, %v3008_v51  ;;  %v2699_v16 = vadd.f32 %v2660_v3, %v2427_v53 }
 0x1f8   : > { %v4399_v44 = vpop.eup %4398  ;;  %4422 = vrcp.f32 %v3126_v1  ;;  %v3125_v41 = vadd.f32 1.0, %v4397_v13  ;;  %v3039_v8 = vsub.f32 0.0, %v3007_v6  ;;  %v2971_v61 = vadd.f32 %v4322_v28, %v2700_v57 }
 0x1f9   : > { %v4401_v39 = vpop.eup %4400  ;;  %v3128_v43 = vadd.f32 1.0, %v4399_v44  ;;  %4424 = vpow2.f32 %v3097_v52  ;;  %v2970_v14 = vadd.f32 %v2931_v15, %v2699_v16  ;;  %v3101_v5 = vmul.f32 1.442695, %v3040_v36 }
 0x1fa   : > { %v4403_v45 = vpop.eup %4402  ;;  %3185 = vst.msk [vmem:[%s6136_s15 + $0x68] sm:$0xff] %vm3171_vm4, %v4401_v39  ;;  %4426 = vrcp.f32 %v3125_v41  ;;  %v3010_v21 = vadd.f32 %v6012_v55, %v2971_v61  ;;  %v3099_v32 = vmul.f32 1.442695, %v3039_v8 }
 0x1fb   : > { %4428 = vrcp.f32 %v3128_v43  ;;  %v3127_v37 = vadd.f32 1.0, %v4403_v45  ;;  %v3009_v48 = vadd.f32 %v6012_v55, %v2970_v14 }
 0x1fc   : > { %v4405_v59 = vpop.eup %4404  ;;  %4430 = vpow2.f32 %v3095_v22  ;;  %v3042_v7 = vsub.f32 0.0, %v3010_v21 }
 0x1fd   : > { %v4407_v58 = vpop.eup %4406  ;;  %3184 = vst.msk [vmem:[%s6136_s15 + $0x60] sm:$0xff] %vm3171_vm4, %v4405_v59  ;;  %4432 = vrcp.f32 %v3127_v37  ;;  %v3041_v24 = vsub.f32 0.0, %v3009_v48 }
 0x1fe   : > { %v4409_v12 = vpop.eup %4408  ;;  %v3130_v56 = vadd.f32 1.0, %v4407_v58  ;;  %4434 = vpow2.f32 %v3101_v5  ;;  %v3105_v46 = vmul.f32 1.442695, %v3042_v7 }
 0x1ff   : > { %v4411_v4 = vpop.eup %4410  ;;  %3187 = vst.msk [vmem:[%s6136_s15 + $0x78] sm:$0xff] %vm3171_vm4, %v4409_v12  ;;  %4436 = vpow2.f32 %v3099_v32  ;;  %v3103_v55 = vmul.f32 1.442695, %v3041_v24 }
 0x200   : > { %v4413_v53 = vpop.eup %4412  ;;  %3186 = vst.msk [vmem:[%s6136_s15 + $0x70] sm:$0xff] %vm3171_vm4, %v4411_v4  ;;  %4438 = vrcp.f32 %v3130_v56 }
 0x201   : > { %v4415_v40 = vpop.eup %4414  ;;  %v3129_v30 = vadd.f32 1.0, %v4413_v53  ;;  %4440 = vpow2.f32 %v3105_v46 }
 0x202   : > { %v4417_v19 = vpop.eup %4416  ;;  %3189 = vst.msk [vmem:[%s6136_s15 + $0x88] sm:$0xff] %vm3171_vm4, %v4415_v40  ;;  %4442 = vpow2.f32 %v3103_v55 }
 0x203   : > { %v4419_v23 = vpop.eup %4418  ;;  %4444 = vrcp.f32 %v3129_v30  ;;  %v3132_v62 = vadd.f32 1.0, %v4417_v19 }
 0x204   : > { %v4421_v60 = vpop.eup %4420  ;;  %3188 = vst.msk [vmem:[%s6136_s15 + $0x80] sm:$0xff] %vm3171_vm4, %v4419_v23 }
 0x205   : > { %v4423_v38 = vpop.eup %4422  ;;  %4446 = vrcp.f32 %v3132_v62  ;;  %v3131_v31 = vadd.f32 1.0, %v4421_v60 }
 0x206   : > { %v4425_v20 = vpop.eup %4424  ;;  %3191 = vst.msk [vmem:[%s6136_s15 + $0x98] sm:$0xff] %vm3171_vm4, %v4423_v38 }
 0x207   : > { %v4427_v50 = vpop.eup %4426  ;;  %4448 = vrcp.f32 %v3131_v31  ;;  %v3134_v34 = vadd.f32 1.0, %v4425_v20 }
 0x208   : > { %v4429_v10 = vpop.eup %4428  ;;  %3190 = vst.msk [vmem:[%s6136_s15 + $0x90] sm:$0xff] %vm3171_vm4, %v4427_v50 }
 0x209   : > { %v4431_v29 = vpop.eup %4430  ;;  %3193 = vst.msk [vmem:[%s6136_s15 + $0xa8] sm:$0xff] %vm3171_vm4, %v4429_v10  ;;  %4450 = vrcp.f32 %v3134_v34 }
 0x20a   : > { %v4433_v0 = vpop.eup %4432  ;;  %v3133_v49 = vadd.f32 1.0, %v4431_v29 }
 0x20b   : > { %v4435_v47 = vpop.eup %4434  ;;  %3192 = vst.msk [vmem:[%s6136_s15 + $0xa0] sm:$0xff] %vm3171_vm4, %v4433_v0 }
 0x20c   : > { %v4437_v27 = vpop.eup %4436  ;;  %4452 = vrcp.f32 %v3133_v49  ;;  %v3136_v9 = vadd.f32 1.0, %v4435_v47 }
 0x20d   : > { %v4439_v26 = vpop.eup %4438  ;;  %v3135_v35 = vadd.f32 1.0, %v4437_v27 }
 0x20e   : > { %v4441_v33 = vpop.eup %4440  ;;  %3195 = vst.msk [vmem:[%s6136_s15 + $0xb8] sm:$0xff] %vm3171_vm4, %v4439_v26  ;;  %4454 = vrcp.f32 %v3136_v9 }
 0x20f   : > { %v4443_v54 = vpop.eup %4442  ;;  %4456 = vrcp.f32 %v3135_v35  ;;  %v3138_v18 = vadd.f32 1.0, %v4441_v33 }
 0x210   : > { %v4445_v2 = vpop.eup %4444  ;;  %v3137_v42 = vadd.f32 1.0, %v4443_v54 }
 0x211   : > { %3194 = vst.msk [vmem:[%s6136_s15 + $0xb0] sm:$0xff] %vm3171_vm4, %v4445_v2  ;;  %4458 = vrcp.f32 %v3138_v18 }
 0x212   : > { %v4447_v17 = vpop.eup %4446  ;;  %4460 = vrcp.f32 %v3137_v42 }
 0x213   : > { %3197 = vst.msk [vmem:[%s6136_s15 + $0xc8] sm:$0xff] %vm3171_vm4, %v4447_v17 }
 0x214   : > { %v4449_v28 = vpop.eup %4448 }
 0x215   : > { %3196 = vst.msk [vmem:[%s6136_s15 + $0xc0] sm:$0xff] %vm3171_vm4, %v4449_v28 }
 0x216   : > { %v4451_v25 = vpop.eup %4450 }
 0x217   : > { %3199 = vst.msk [vmem:[%s6136_s15 + $0xd8] sm:$0xff] %vm3171_vm4, %v4451_v25 }
 0x219   : > { %v4453_v52 = vpop.eup %4452 }
 0x21a   : > { %3198 = vst.msk [vmem:[%s6136_s15 + $0xd0] sm:$0xff] %vm3171_vm4, %v4453_v52 }
 0x21b   : > { %v4455_v63 = vpop.eup %4454 }
 0x21c   : > { %v4457_v51 = vpop.eup %4456  ;;  %3201 = vst.msk [vmem:[%s6136_s15 + $0xe8] sm:$0xff] %vm3171_vm4, %v4455_v63 }
 0x21d   : > { %3200 = vst.msk [vmem:[%s6136_s15 + $0xe0] sm:$0xff] %vm3171_vm4, %v4457_v51 }
 0x21e   : > { %v4459_v3 = vpop.eup %4458 }
 0x21f   : > { %v4461_v11 = vpop.eup %4460  ;;  %3203 = vst.msk [vmem:[%s6136_s15 + $0xf8] sm:$0xff] %vm3171_vm4, %v4459_v3 }
 0x220   : > { %3202 = vst.msk [vmem:[%s6136_s15 + $0xf0] sm:$0xff] %vm3171_vm4, %v4461_v11 }
 0x221 PF: > { %s13_s12 = sadd.s32 1, %s4468_s12  }
 0x222   : > { %p10_p4 = scmp.ge.s32.totalorder %s13_s12, 4  }
 0x224   :  { %12 = sbr.rel (!%p10_p4) target bundleno = 1 (0x1), region = 70 }

// kernel: inception3b_forward.6
= control target key start
LH: loop header
LB: loop body
LE: loop exit
PB: predicated region body
PF: predicated region fallthrough
CT: control target
= control target key end

     0   :  { %s11031_s12 = smov 0   ;;  %s15264_s0 = inlined_call_operand.vmem [shape: f32[2,20,20,4], index: 0, kind: input, shape index: {}]   ;;  %s15265_s1 = inlined_call_operand.vmem [shape: f32[25,4,8], index: 1, kind: input, shape index: {}]   ;;  %s15266_s2 = inlined_call_operand.vmem [shape: f32[1,8], index: 2, kind: input, shape index: {}]   ;;  %s15267_s3 = inlined_call_operand.vmem [shape: f32[2,16,16,8], index: 3, kind: output, shape index: {}]  }
   0x1 LB: > { %s7868_s13 = sadd.s32 4294967295, %s11009_s12   ;;  %p7872_p0 = scmp.ge.s32.totalorder %s11009_s12, 1  ;;  %s11009_s12 = sphi %s11031_s12, %s13_s12  }
   0x2   : > { %p137_p1 = scmp.lt.s32.totalorder %s11009_s12, 3 }
   0x4   : > { %p138_p2 = pnand %p7872_p0, %p137_p1 }
   0x6   : > { %141 = sbr.rel (%p138_p2) target bundleno = 1057 (0x421), region = 32 }
   0xb   : > { %v7876_v0 = vld [vmem:[%s15265_s1 + $0x4] sm:$0xf]  ;;  %vm428_vm0 = vcmask 1043456   ;;  %p161_p3 = scmp.lt.s32.totalorder %s7868_s13, 1  ;;  %v231_v1 = vld [vmem:[%s15265_s1] sm:$0xf] }
   0xc   : > { %10804 = vmatprep.subr.msk.mxu1 %vm428_vm0, %v7876_v0  ;;  %9554 = vmatprep.subr.msk.mxu0 %vm428_vm0, %v7876_v0  ;;  %v7943_v2 = vld [vmem:[%s15265_s1 + $0x8] sm:$0xf]  ;;  %vm280_vm1 = vcmask 1046528   ;;  %vm363_vm2 = vcmask 31744   ;;  %v11107_v23 = vld [vmem:[%s15265_s1 + $0xc] sm:$0xf] }
   0xd   : > { %10805 = vmatpush3.msk.msra.mxu1 %vm428_vm0, %v7876_v0  ;;  %9555 = vmatpush3.msk.msra.mxu0 %vm428_vm0, %v7876_v0  ;;  %s16324_s13 = smov (!%p161_p3, %s7868_s13), 1  ;;  %v11125_v30 = vld [vmem:[%s15265_s1 + $0x10] sm:$0xf]  ;;  %vm949_vm3 = vcmask 1045504   ;;  %vm1356_vm4 = vcmask 1044480   ;;  %vm7780_vm5 = vcmask 64512  }
   0xe   : > { %9604 = vmatprep.subr.msk.mxu1 %vm428_vm0, %v231_v1  ;;  %9654 = vmatprep.subr.msk.mxu0 %vm428_vm0, %v7943_v2  ;;  %s10806_s20 = smul.u32 480, %s16324_s13 }
  0x10   : > { %s11060_s23 = scalar_lea.vmem %s15264_s0, %s10806_s20  ;;  %s8728_s20 = sshll.u32 %s16324_s13, 8 }
  0x11   : > { %v11063_v3 = vld [vmem:[%s11060_s23] sm:$0xff]  ;;  %v11066_v4 = vld [vmem:[%s11060_s23 + $0x8] sm:$0xff]  ;;  %v11078_v10 = vld [vmem:[%s11060_s23 + $0x10] sm:$0xf]  ;;  %s15160_s22 = scalar_lea.vmem %s15267_s3, %s8728_s20 }
  0x12   : > { %v11069_v5 = vld [vmem:[%s11060_s23 + $0xc0] sm:$0xff]  ;;  %v281_v6 = vrot.slane %v11063_v3, 1  ;;  %v282_v7 = vrot.slane %v11066_v4, 1  ;;  %v11074_v8 = vld [vmem:[%s11060_s23 + $0xc8] sm:$0xff]  ;;  %v284_v12 = vrot.slane %v11078_v10, 1  ;;  %v11086_v14 = vld [vmem:[%s11060_s23 + $0x18] sm:$0xff] }
  0x13   : > { %v321_v9 = vrot.slane %v11069_v5, 1  ;;  %v322_v11 = vrot.slane %v11074_v8, 1  ;;  %v11083_v13 = vld [vmem:[%s11060_s23 + $0xd0] sm:$0xf]  ;;  %v11089_v15 = vld [vmem:[%s11060_s23 + $0x20] sm:$0xff]  ;;  %v286_v18 = vrot.slane %v11086_v14, 1 }
  0x14   : > { %v283_v16 = vsel %vm280_vm1, %v281_v6, %v282_v7  ;;  %v324_v17 = vrot.slane %v11083_v13, 1  ;;  %v287_v19 = vrot.slane %v11089_v15, 1  ;;  %v11096_v20 = vld [vmem:[%s11060_s23 + $0xd8] sm:$0xff]  ;;  %v11099_v21 = vld [vmem:[%s11060_s23 + $0xe0] sm:$0xff]  ;;  %v11102_v22 = vld [vmem:[%s11060_s23 + $0x30] sm:$0xff]  ;;  %v285_v25 = vsel %vm280_vm1, %v282_v7, %v284_v12 }
  0x15   : > { %9556 = vmatprep.mubr.msk.f32.mxu0 %vm363_vm2, %v283_v16  ;;  %v11111_v24 = vsel %vm280_vm1, %v321_v9, %v322_v11  ;;  %v326_v26 = vrot.slane %v11096_v20, 1  ;;  %v327_v27 = vrot.slane %v11099_v21, 1  ;;  %v11117_v28 = vld [vmem:[%s11060_s23 + $0x28] sm:$0xf]  ;;  %v11139_v35 = vld [vmem:[%s11060_s23 + $0x38] sm:$0xff]  ;;  %v11142_v36 = vld [vmem:[%s11060_s23 + $0xf0] sm:$0xff] }
  0x16   : > { %15599 = vst [vmem:[#allocation2_spill] sm:$0xff] %v11111_v24  ;;  %v11120_v29 = vld [vmem:[%s11060_s23 + $0xe8] sm:$0xf]  ;;  %9580 = vmatprep.mubr.msk.f32.mxu1 %vm363_vm2, %v11111_v24  ;;  %9557 = vmatmul.mubr.msk.f32.vlgmr.msra.gmra.mxu0 %vm363_vm2, %v285_v25  ;;  %v11131_v31 = vsel %vm280_vm1, %v322_v11, %v324_v17  ;;  %v11134_v32 = vsel %vm280_vm1, %v286_v18, %v287_v19  ;;  %v289_v33 = vrot.slane %v11117_v28, 1  ;;  %v11145_v37 = vld [vmem:[%s11060_s23 + $0xf8] sm:$0xff]  ;;  %v291_v39 = vrot.slane %v11102_v22, 1 }
  0x17   : > { %15600 = vst [vmem:[#allocation3_spill] sm:$0xff] %v11131_v31  ;;  %15601 = vst [vmem:[#allocation4_spill] sm:$0xff] %v11134_v32  ;;  %v329_v34 = vrot.slane %v11120_v29, 1  ;;  %9581 = vmatmul.mubr.msk.f32.vlgmr.msra.gmra.mxu1 %vm363_vm2, %v11131_v31  ;;  %9655 = vmatpush3.msk.msra.mxu0 %vm428_vm0, %v7943_v2  ;;  %v11151_v38 = vsel %vm280_vm1, %v326_v26, %v327_v27  ;;  %v292_v40 = vrot.slane %v11139_v35, 1  ;;  %v331_v41 = vrot.slane %v11142_v36, 1  ;;  %v11160_v43 = vld [vmem:[%s11060_s23 + $0x48] sm:$0xff] }
  0x18   : > { %15602 = vst [vmem:[#allocation5_spill] sm:$0xff] %v11151_v38  ;;  %v11157_v42 = vld [vmem:[%s11060_s23 + $0x40] sm:$0xf]  ;;  %9605 = vmatpush3.msk.msra.mxu1 %vm428_vm0, %v231_v1  ;;  %9559 = vmatprep.mubr.msk.f32.mxu0 %vm363_vm2, %v11134_v32  ;;  %v11166_v44 = vsel %vm280_vm1, %v287_v19, %v289_v33  ;;  %v332_v46 = vrot.slane %v11145_v37, 1  ;;  %v11177_v49 = vld [vmem:[%s11060_s23 + $0x50] sm:$0xff]  ;;  %v11180_v50 = vld [vmem:[%s11060_s23 + $0x108] sm:$0xff] }
  0x19   : > { %15603 = vst [vmem:[#allocation6_spill] sm:$0xff] %v11166_v44  ;;  %v11169_v45 = vsel %vm280_vm1, %v327_v27, %v329_v34  ;;  %v294_v47 = vrot.slane %v11157_v42, 1  ;;  %v11174_v48 = vld [vmem:[%s11060_s23 + $0x100] sm:$0xf]  ;;  %9583 = vmatprep.mubr.msk.f32.mxu1 %vm363_vm2, %v11151_v38  ;;  %v11185_v51 = vsel %vm280_vm1, %v291_v39, %v292_v40  ;;  %v296_v53 = vrot.slane %v11160_v43, 1  ;;  %v11191_v55 = vld [vmem:[%s11060_s23 + $0x110] sm:$0xff]  ;;  %9704 = vmatprep.subr.msk.mxu1 %vm428_vm0, %v11107_v23 }
  0x1a   : > { %15604 = vst [vmem:[#allocation7_spill] sm:$0xff] %v11169_v45  ;;  %15605 = vst [vmem:[#allocation8_spill] sm:$0xff] %v11185_v51  ;;  %v334_v52 = vrot.slane %v11174_v48, 1  ;;  %v297_v54 = vrot.slane %v11177_v49, 1  ;;  %v11194_v56 = vld [vmem:[%s11060_s23 + $0x58] sm:$0xf]  ;;  %9560 = vmatmul.mubr.msk.f32.gmra.mxu0 %vm363_vm2, %v11166_v44  ;;  %v11201_v57 = vsel %vm280_vm1, %v331_v41, %v332_v46  ;;  %9754 = vmatprep.subr.msk.mxu0 %vm428_vm0, %v11125_v30 }
  0x1b   : > { %15606 = vst [vmem:[#allocation9_spill] sm:$0xff] %v11201_v57  ;;  %v336_v58 = vrot.slane %v11180_v50, 1  ;;  %v337_v59 = vrot.slane %v11191_v55, 1  ;;  %v11206_v60 = vld [vmem:[%s11060_s23 + $0x118] sm:$0xf]  ;;  %v11209_v61 = vld [vmem:[%s11060_s23 + $0x60] sm:$0xff]  ;;  %9584 = vmatmul.mubr.msk.f32.gmra.mxu1 %vm363_vm2, %v11169_v45  ;;  %9562 = vmatprep.mubr.msk.f32.mxu0 %vm363_vm2, %v11185_v51  ;;  %v11221_v63 = vsel %vm280_vm1, %v292_v40, %v294_v47 }
  0x1c   : > { %v11212_v62 = vld [vmem:[%s11060_s23 + $0x68] sm:$0xff]  ;;  %15607 = vst [vmem:[#allocation10_spill] sm:$0xff] %v11221_v63  ;;  %v299_v0 = vrot.slane %v11194_v56, 1  ;;  %v339_v1 = vrot.slane %v11206_v60, 1  ;;  %v11226_v2 = vld [vmem:[%s11060_s23 + $0x120] sm:$0xff]  ;;  %9586 = vmatprep.mubr.msk.f32.mxu1 %vm363_vm2, %v11201_v57  ;;  %v11234_v7 = vsel %vm280_vm1, %v332_v46, %v334_v52  ;;  %v11237_v9 = vsel %vm280_vm1, %v296_v53, %v297_v54  ;;  %v11253_v26 = vld [vmem:[%s11060_s23 + $0x78] sm:$0xff] }
  0x1d   : > { %v11229_v6 = vld [vmem:[%s11060_s23 + $0x128] sm:$0xff]  ;;  %15608 = vst [vmem:[#allocation11_spill] sm:$0xff] %v11234_v7  ;;  %15609 = vst [vmem:[#allocation12_spill] sm:$0xff] %v11237_v9  ;;  %v301_v11 = vrot.slane %v11209_v61, 1  ;;  %v302_v12 = vrot.slane %v11212_v62, 1  ;;  %v11248_v18 = vsel %vm280_vm1, %v336_v58, %v337_v59  ;;  %v341_v19 = vrot.slane %v11226_v2, 1 }
  0x1e   : > { %v11242_v16 = vld [vmem:[%s11060_s23 + $0x70] sm:$0xf]  ;;  %15610 = vst [vmem:[#allocation13_spill] sm:$0xff] %v11248_v18  ;;  %v342_v25 = vrot.slane %v11229_v6, 1  ;;  %v11256_v27 = vld [vmem:[%s11060_s23 + $0x80] sm:$0xff]  ;;  %9563 = vmatmul.mubr.msk.f32.gmra.mxu0 %vm363_vm2, %v11221_v63  ;;  %v11261_v33 = vld [vmem:[%s11060_s23 + $0x138] sm:$0xff]  ;;  %v11271_v39 = vsel %vm280_vm1, %v297_v54, %v299_v0  ;;  %v11278_v46 = vsel %vm280_vm1, %v337_v59, %v339_v1 }
  0x1f   : > { %v11245_v17 = vld [vmem:[%s11060_s23 + $0x130] sm:$0xf]  ;;  %v11264_v34 = vld [vmem:[%s11060_s23 + $0x140] sm:$0xff]  ;;  %9587 = vmatmul.mubr.msk.f32.gmra.mxu1 %vm363_vm2, %v11234_v7  ;;  %9565 = vmatprep.mubr.msk.f32.mxu0 %vm363_vm2, %v11237_v9  ;;  %15611 = vst [vmem:[#allocation14_spill] sm:$0xff] %v11271_v39  ;;  %v304_v40 = vrot.slane %v11242_v16, 1  ;;  %15612 = vst [vmem:[#allocation15_spill] sm:$0xff] %v11278_v46  ;;  %v11281_v47 = vsel %vm280_vm1, %v301_v11, %v302_v12 }
  0x20   : > { %v344_v41 = vrot.slane %v11245_v17, 1  ;;  %9589 = vmatprep.mubr.msk.f32.mxu1 %vm363_vm2, %v11248_v18  ;;  %15613 = vst [vmem:[#allocation16_spill] sm:$0xff] %v11281_v47  ;;  %v306_v52 = vrot.slane %v11253_v26, 1  ;;  %v307_v53 = vrot.slane %v11256_v27, 1  ;;  %v11286_v54 = vld [vmem:[%s11060_s23 + $0x88] sm:$0xf]  ;;  %v11292_v0 = vsel %vm280_vm1, %v341_v19, %v342_v25 }
  0x21   : > { %v11289_v58 = vld [vmem:[%s11060_s23 + $0x148] sm:$0xf]  ;;  %15614 = vst [vmem:[#allocation17_spill] sm:$0xff] %v11292_v0  ;;  %v346_v7 = vrot.slane %v11261_v33, 1  ;;  %v347_v18 = vrot.slane %v11264_v34, 1  ;;  %v11297_v59 = vld [vmem:[%s11060_s23 + $0x90] sm:$0xff]  ;;  %v11315_v19 = vsel %vm280_vm1, %v302_v12, %v304_v40 }
  0x22   : > { %v11300_v1 = vld [vmem:[%s11060_s23 + $0x98] sm:$0xff]  ;;  %9566 = vmatmul.mubr.msk.f32.gmra.mxu0 %vm363_vm2, %v11271_v39  ;;  %v11305_v11 = vld [vmem:[%s11060_s23 + $0x150] sm:$0xff]  ;;  %15616 = vst [vmem:[#allocation19_spill] sm:$0xff] %v11315_v19  ;;  %v309_v45 = vrot.slane %v11286_v54, 1  ;;  %v349_v38 = vrot.slane %v11289_v58, 1  ;;  %v11322_v31 = vsel %vm280_vm1, %v342_v25, %v344_v41  ;;  %v311_v24 = vrot.slane %v11297_v59, 1 }
  0x23   : > { %v11308_v57 = vld [vmem:[%s11060_s23 + $0x158] sm:$0xff]  ;;  %9590 = vmatmul.mubr.msk.f32.gmra.mxu1 %vm363_vm2, %v11278_v46  ;;  %9568 = vmatprep.mubr.msk.f32.mxu0 %vm363_vm2, %v11281_v47  ;;  %15617 = vst [vmem:[#allocation20_spill] sm:$0xff] %v11322_v31  ;;  %v11325_v46 = vsel %vm280_vm1, %v306_v52, %v307_v53  ;;  %v312_v12 = vrot.slane %v11300_v1, 1  ;;  %v11330_v40 = vld [vmem:[%s11060_s23 + $0xa0] sm:$0xf]  ;;  %v11336_v39 = vsel %vm280_vm1, %v346_v7, %v347_v18  ;;  %v351_v9 = vrot.slane %v11305_v11, 1 }
  0x24   : > { %15615 = vst [vmem:[#allocation18_spill] sm:$0xff] %v11308_v57  ;;  %9592 = vmatprep.mubr.msk.f32.mxu1 %vm363_vm2, %v11292_v0  ;;  %15618 = vst [vmem:[#allocation21_spill] sm:$0xff] %v11325_v46  ;;  %v11333_v47 = vld [vmem:[%s11060_s23 + $0x160] sm:$0xf]  ;;  %v352_v0 = vrot.slane %v11308_v57, 1  ;;  %v11341_v25 = vld [vmem:[%s11060_s23 + $0xa8] sm:$0xff]  ;;  %v11359_v7 = vsel %vm280_vm1, %v307_v53, %v309_v45 }
  0x25   : > { %15619 = vst [vmem:[#allocation22_spill] sm:$0xff] %v11333_v47  ;;  %15620 = vst [vmem:[#allocation23_spill] sm:$0xff] %v11336_v39  ;;  %v11344_v41 = vld [vmem:[%s11060_s23 + $0xb0] sm:$0xff]  ;;  %v11349_v52 = vld [vmem:[%s11060_s23 + $0x168] sm:$0xff]  ;;  %v314_v51 = vrot.slane %v11330_v40, 1  ;;  %v354_v44 = vrot.slane %v11333_v47, 1  ;;  %v11369_v32 = vsel %vm280_vm1, %v311_v24, %v312_v12 }
  0x26   : > { %9569 = vmatmul.mubr.msk.f32.gmra.mxu0 %vm363_vm2, %v11315_v19  ;;  %v11352_v63 = vld [vmem:[%s11060_s23 + $0x170] sm:$0xff]  ;;  %15621 = vst [vmem:[#allocation24_spill] sm:$0xff] %v11359_v7  ;;  %v11366_v19 = vsel %vm280_vm1, %v347_v18, %v349_v38  ;;  %15623 = vst [vmem:[#allocation26_spill] sm:$0xff] %v11369_v32  ;;  %v11374_v57 = vld [vmem:[%s11060_s23 + $0xb8] sm:$0xf]  ;;  %v11377_v45 = vsel %vm280_vm1, %v351_v9, %v352_v0  ;;  %v356_v53 = vrot.slane %v11349_v52, 1 }
  0x27   : > { %9593 = vmatmul.mubr.msk.f32.gmra.mxu1 %vm363_vm2, %v11322_v31  ;;  %9571 = vmatprep.mubr.msk.f32.mxu0 %vm363_vm2, %v11325_v46  ;;  %15622 = vst [vmem:[#allocation25_spill] sm:$0xff] %v11366_v19  ;;  %v316_v31 = vrot.slane %v11341_v25, 1  ;;  %v317_v46 = vrot.slane %v11344_v41, 1  ;;  %15624 = vst [vmem:[#allocation27_spill] sm:$0xff] %v11377_v45  ;;  %v357_v47 = vrot.slane %v11352_v63, 1  ;;  %v11391_v24 = vsel %vm280_vm1, %v312_v12, %v314_v51 }
  0x28   : > { %9595 = vmatprep.mubr.msk.f32.mxu1 %vm363_vm2, %v11336_v39  ;;  %v11382_v39 = vld [vmem:[%s11060_s23 + $0x178] sm:$0xf]  ;;  %15625 = vst [vmem:[#allocation28_spill] sm:$0xff] %v11391_v24  ;;  %v11394_v38 = vsel %vm280_vm1, %v352_v0, %v354_v44  ;;  %v319_v9 = vrot.slane %v11374_v57, 1  ;;  %v953_v44 = vrot.slane %v11078_v10, 2 }
  0x29   : > { %15626 = vst [vmem:[#allocation29_spill] sm:$0xff] %v11394_v38  ;;  %v11400_v18 = vsel %vm280_vm1, %v316_v31, %v317_v46  ;;  %v11406_v51 = vsel %vm280_vm1, %v356_v53, %v357_v47  ;;  %v955_v53 = vrot.slane %v11086_v14, 2 }
  0x2a   : > { %9572 = vmatmul.mubr.msk.f32.gmra.mxu0 %vm363_vm2, %v11359_v7  ;;  %15627 = vst [vmem:[#allocation30_spill] sm:$0xff] %v11400_v18  ;;  %v359_v7 = vrot.slane %v11382_v39, 1  ;;  %15628 = vst [vmem:[#allocation31_spill] sm:$0xff] %v11406_v51  ;;  %v11415_v31 = vsel %vm280_vm1, %v317_v46, %v319_v9  ;;  %v958_v9 = vrot.slane %v11117_v28, 2 }
  0x2b   : > { %9596 = vmatmul.mubr.msk.f32.gmra.mxu1 %vm363_vm2, %v11366_v19  ;;  %9574 = vmatprep.mubr.msk.f32.mxu0 %vm363_vm2, %v11369_v32  ;;  %v950_v19 = vrot.slane %v11063_v3, 2  ;;  %v951_v32 = vrot.slane %v11066_v4, 2  ;;  %15629 = vst [vmem:[#allocation32_spill] sm:$0xff] %v11415_v31 }
  0x2c   : > { %9598 = vmatprep.mubr.msk.f32.mxu1 %vm363_vm2, %v11377_v45  ;;  %v11421_v0 = vsel %vm280_vm1, %v357_v47, %v359_v7  ;;  %v960_v47 = vrot.slane %v11102_v22, 2  ;;  %v1360_v45 = vrot.slane %v11078_v10, 3 }
  0x2d   : > { %15630 = vst [vmem:[#allocation33_spill] sm:$0xff] %v11421_v0  ;;  %v952_v12 = vsel %vm949_vm3, %v950_v19, %v951_v32  ;;  %v954_v46 = vsel %vm949_vm3, %v951_v32, %v953_v44  ;;  %v961_v19 = vrot.slane %v11139_v35, 2  ;;  %v963_v44 = vrot.slane %v11157_v42, 2 }
  0x2e   : > { %9575 = vmatmul.mubr.msk.f32.gmra.mxu0 %vm363_vm2, %v11391_v24 }
  0x2f   : > { %9599 = vmatmul.mubr.msk.f32.gmra.mxu1 %vm363_vm2, %v11394_v38  ;;  %9577 = vmatprep.mubr.msk.f32.mxu0 %vm363_vm2, %v11400_v18  ;;  %v956_v38 = vrot.slane %v11089_v15, 2 }
  0x30   : > { %9601 = vmatprep.mubr.msk.f32.mxu1 %vm363_vm2, %v11406_v51  ;;  %v1764_v51 = vrot.slane %v11066_v4, 4 }
  0x31   : > { %v11439_v7 = vsel %vm949_vm3, %v955_v53, %v956_v38  ;;  %v11451_v32 = vsel %vm949_vm3, %v956_v38, %v958_v9  ;;  %v11457_v53 = vld [vmem:[%s15265_s1 + $0x18] sm:$0xf]  ;;  %v966_v38 = vrot.slane %v11177_v49, 2  ;;  %v1357_v9 = vrot.slane %v11063_v3, 3 }
  0x32   : > { %9578 = vmatmul.mubr.msk.f32.gmra.mxu0 %vm363_vm2, %v11415_v31  ;;  %15631 = vst [vmem:[#allocation34_spill] sm:$0xff] %v11439_v7  ;;  %15632 = vst [vmem:[#allocation35_spill] sm:$0xff] %v11451_v32  ;;  %v971_v31 = vrot.slane %v11212_v62, 2 }
  0x33   : > { %9602 = vmatmul.mubr.msk.f32.gmra.mxu1 %vm363_vm2, %v11421_v0  ;;  %9656 = vmatprep.mubr.msk.f32.mxu0 %vm363_vm2, %v952_v12  ;;  %v11444_v12 = vld [vmem:[%s15265_s1 + $0x14] sm:$0xf]  ;;  %v1763_v0 = vrot.slane %v11063_v3, 4 }
  0x34   : > { %9606 = vmatprep.mubr.msk.f32.mxu1 %vm363_vm2, %v11063_v3 }
  0x36   : > { %9657 = vmatmul.mubr.msk.f32.vlgmr.msra.gmra.mxu0 %vm363_vm2, %v954_v46  ;;  %v11464_v46 = vsel %vm949_vm3, %v960_v47, %v961_v19  ;;  %v1358_v47 = vrot.slane %v11066_v4, 3 }
  0x37   : > { %9607 = vmatmul.mubr.msk.f32.vlgmr.msra.gmra.mxu1 %vm363_vm2, %v11066_v4  ;;  %9755 = vmatpush3.msk.msra.mxu0 %vm428_vm0, %v11125_v30  ;;  %15633 = vst [vmem:[#allocation36_spill] sm:$0xff] %v11464_v46  ;;  %v965_v30 = vrot.slane %v11160_v43, 2 }
  0x38   : > { %9705 = vmatpush3.msk.msra.mxu1 %vm428_vm0, %v11107_v23  ;;  %9609 = vmatprep.mubr.msk.f32.mxu1 %vm363_vm2, %v11086_v14  ;;  %v968_v23 = vrot.slane %v11194_v56, 2  ;;  %v11497_v18 = vsel %vm1356_vm4, %v1357_v9, %v1358_v47  ;;  %v11504_v4 = vsel %vm1356_vm4, %v1358_v47, %v1360_v45  ;;  %v978_v9 = vrot.slane %v11286_v54, 2 }
  0x39   : > { %9659 = vmatprep.mubr.msk.f32.mxu0 %vm363_vm2, %v11439_v7  ;;  %9804 = vmatprep.subr.msk.mxu1 %vm428_vm0, %v11444_v12  ;;  %v11485_v7 = vsel %vm949_vm3, %v961_v19, %v963_v44  ;;  %v11493_v3 = vsel %vm949_vm3, %v965_v30, %v966_v38  ;;  %v1766_v19 = vrot.slane %v11078_v10, 4  ;;  %v11501_v44 = vsel %vm428_vm0, %v1763_v0, %v1764_v51 }
  0x3a   : > { %9660 = vmatmul.mubr.msk.f32.gmra.mxu0 %vm363_vm2, %v11451_v32  ;;  %9854 = vmatprep.subr.msk.mxu0 %vm428_vm0, %v11457_v53  ;;  %15634 = vst [vmem:[#allocation37_spill] sm:$0xff] %v11485_v7  ;;  %v970_v32 = vrot.slane %v11209_v61, 2  ;;  %15635 = vst [vmem:[#allocation38_spill] sm:$0xff] %v11493_v3  ;;  %v11516_v10 = vsel %vm949_vm3, %v966_v38, %v968_v23  ;;  %v973_v0 = vrot.slane %v11242_v16, 2  ;;  %v976_v30 = vrot.slane %v11256_v27, 2 }
  0x3b   : > { %9610 = vmatmul.mubr.msk.f32.gmra.mxu1 %vm363_vm2, %v11089_v15  ;;  %9662 = vmatprep.mubr.msk.f32.mxu0 %vm363_vm2, %v11464_v46  ;;  %v11509_v46 = vsel %vm428_vm0, %v1764_v51, %v1766_v19  ;;  %15636 = vst [vmem:[#allocation39_spill] sm:$0xff] %v11516_v10  ;;  %v975_v51 = vrot.slane %v11253_v26, 2  ;;  %v980_v23 = vrot.slane %v11297_v59, 2  ;;  %v981_v47 = vrot.slane %v11300_v1, 2 }
  0x3c   : > { %9612 = vmatprep.mubr.msk.f32.mxu1 %vm363_vm2, %v11102_v22  ;;  %v11522_v45 = vsel %vm949_vm3, %v970_v32, %v971_v31  ;;  %v11533_v38 = vsel %vm949_vm3, %v971_v31, %v973_v0  ;;  %v11550_v31 = vsel %vm949_vm3, %v976_v30, %v978_v9  ;;  %v983_v19 = vrot.slane %v11330_v40, 2 }
  0x3d   : > { %15637 = vst [vmem:[#allocation40_spill] sm:$0xff] %v11522_v45  ;;  %15638 = vst [vmem:[#allocation41_spill] sm:$0xff] %v11533_v38  ;;  %v11539_v32 = vsel %vm949_vm3, %v975_v51, %v976_v30  ;;  %v11556_v0 = vsel %vm949_vm3, %v980_v23, %v981_v47  ;;  %v985_v51 = vrot.slane %v11341_v25, 2  ;;  %v988_v9 = vrot.slane %v11374_v57, 2 }
  0x3e   : > { %9663 = vmatmul.mubr.msk.f32.gmra.mxu0 %vm363_vm2, %v11485_v7  ;;  %15639 = vst [vmem:[#allocation42_spill] sm:$0xff] %v11539_v32  ;;  %15640 = vst [vmem:[#allocation43_spill] sm:$0xff] %v11550_v31  ;;  %v11567_v30 = vsel %vm949_vm3, %v981_v47, %v983_v19  ;;  %v993_v19 = vrot.slane %v11083_v13, 2 }
  0x3f   : > { %9613 = vmatmul.mubr.msk.f32.gmra.mxu1 %vm363_vm2, %v11139_v35  ;;  %9665 = vmatprep.mubr.msk.f32.mxu0 %vm363_vm2, %v11493_v3  ;;  %15641 = vst [vmem:[#allocation44_spill] sm:$0xff] %v11556_v0  ;;  %15642 = vst [vmem:[#allocation45_spill] sm:$0xff] %v11567_v30 }
  0x40   : > { %9615 = vmatprep.mubr.msk.f32.mxu1 %vm363_vm2, %v11160_v43 }
  0x42   : > { %9666 = vmatmul.mubr.msk.f32.gmra.mxu0 %vm363_vm2, %v11516_v10  ;;  %v1025_v10 = vrot.slane %v11349_v52, 2 }
  0x43   : > { %9616 = vmatmul.mubr.msk.f32.gmra.mxu1 %vm363_vm2, %v11177_v49  ;;  %9668 = vmatprep.mubr.msk.f32.mxu0 %vm363_vm2, %v11522_v45 }
  0x44   : > { %9618 = vmatprep.mubr.msk.f32.mxu1 %vm363_vm2, %v11209_v61 }
  0x46   : > { %9669 = vmatmul.mubr.msk.f32.gmra.mxu0 %vm363_vm2, %v11533_v38  ;;  %v986_v38 = vrot.slane %v11344_v41, 2 }
  0x47   : > { %9619 = vmatmul.mubr.msk.f32.gmra.mxu1 %vm363_vm2, %v11212_v62  ;;  %9671 = vmatprep.mubr.msk.f32.mxu0 %vm363_vm2, %v11539_v32  ;;  %v990_v32 = vrot.slane %v11069_v5, 2 }
  0x48   : > { %9621 = vmatprep.mubr.msk.f32.mxu1 %vm363_vm2, %v11253_v26  ;;  %v11573_v23 = vsel %vm949_vm3, %v985_v51, %v986_v38  ;;  %v11584_v47 = vsel %vm949_vm3, %v986_v38, %v988_v9  ;;  %v998_v9 = vrot.slane %v11120_v29, 2 }
  0x49   : > { %15643 = vst [vmem:[#allocation46_spill] sm:$0xff] %v11573_v23  ;;  %15644 = vst [vmem:[#allocation47_spill] sm:$0xff] %v11584_v47 }
  0x4a   : > { %9672 = vmatmul.mubr.msk.f32.gmra.mxu0 %vm363_vm2, %v11550_v31  ;;  %v991_v31 = vrot.slane %v11074_v8, 2 }
  0x4b   : > { %9622 = vmatmul.mubr.msk.f32.gmra.mxu1 %vm363_vm2, %v11256_v27  ;;  %9674 = vmatprep.mubr.msk.f32.mxu0 %vm363_vm2, %v11556_v0  ;;  %v995_v0 = vrot.slane %v11096_v20, 2 }
  0x4c   : > { %9624 = vmatprep.mubr.msk.f32.mxu1 %vm363_vm2, %v11297_v59  ;;  %v11590_v51 = vsel %vm949_vm3, %v990_v32, %v991_v31  ;;  %v11601_v38 = vsel %vm949_vm3, %v991_v31, %v993_v19  ;;  %v1003_v19 = vrot.slane %v11174_v48, 2 }
  0x4d   : > { %15645 = vst [vmem:[#allocation48_spill] sm:$0xff] %v11590_v51  ;;  %15646 = vst [vmem:[#allocation49_spill] sm:$0xff] %v11601_v38 }
  0x4e   : > { %9675 = vmatmul.mubr.msk.f32.gmra.mxu0 %vm363_vm2, %v11567_v30  ;;  %v996_v30 = vrot.slane %v11099_v21, 2 }
  0x4f   : > { %9625 = vmatmul.mubr.msk.f32.gmra.mxu1 %vm363_vm2, %v11300_v1  ;;  %9677 = vmatprep.mubr.msk.f32.mxu0 %vm363_vm2, %v11573_v23  ;;  %v1000_v23 = vrot.slane %v11142_v36, 2 }
  0x50   : > { %9627 = vmatprep.mubr.msk.f32.mxu1 %vm363_vm2, %v11341_v25  ;;  %v11607_v32 = vsel %vm949_vm3, %v995_v0, %v996_v30  ;;  %v11618_v31 = vsel %vm949_vm3, %v996_v30, %v998_v9  ;;  %v1008_v9 = vrot.slane %v11206_v60, 2 }
  0x51   : > { %15647 = vst [vmem:[#allocation50_spill] sm:$0xff] %v11607_v32  ;;  %15648 = vst [vmem:[#allocation51_spill] sm:$0xff] %v11618_v31 }
  0x52   : > { %9678 = vmatmul.mubr.msk.f32.gmra.mxu0 %vm363_vm2, %v11584_v47  ;;  %v1001_v47 = vrot.slane %v11145_v37, 2 }
  0x53   : > { %9628 = vmatmul.mubr.msk.f32.gmra.mxu1 %vm363_vm2, %v11344_v41  ;;  %9680 = vmatprep.mubr.msk.f32.mxu0 %vm363_vm2, %v11590_v51  ;;  %v1005_v51 = vrot.slane %v11180_v50, 2 }
  0x54   : > { %9630 = vmatprep.mubr.msk.f32.mxu1 %vm363_vm2, %v11069_v5  ;;  %v11624_v0 = vsel %vm949_vm3, %v1000_v23, %v1001_v47  ;;  %v11635_v30 = vsel %vm949_vm3, %v1001_v47, %v1003_v19  ;;  %v1013_v19 = vrot.slane %v11245_v17, 2 }
  0x55   : > { %15649 = vst [vmem:[#allocation52_spill] sm:$0xff] %v11624_v0  ;;  %15650 = vst [vmem:[#allocation53_spill] sm:$0xff] %v11635_v30 }
  0x56   : > { %9681 = vmatmul.mubr.msk.f32.gmra.mxu0 %vm363_vm2, %v11601_v38  ;;  %v1006_v38 = vrot.slane %v11191_v55, 2 }
  0x57   : > { %9631 = vmatmul.mubr.msk.f32.gmra.mxu1 %vm363_vm2, %v11074_v8  ;;  %9683 = vmatprep.mubr.msk.f32.mxu0 %vm363_vm2, %v11607_v32  ;;  %v1010_v32 = vrot.slane %v11226_v2, 2 }
  0x58   : > { %9633 = vmatprep.mubr.msk.f32.mxu1 %vm363_vm2, %v11096_v20  ;;  %v11641_v23 = vsel %vm949_vm3, %v1005_v51, %v1006_v38  ;;  %v11652_v47 = vsel %vm949_vm3, %v1006_v38, %v1008_v9  ;;  %v1018_v9 = vrot.slane %v11289_v58, 2 }
  0x59   : > { %15651 = vst [vmem:[#allocation54_spill] sm:$0xff] %v11641_v23  ;;  %15652 = vst [vmem:[#allocation55_spill] sm:$0xff] %v11652_v47 }
  0x5a   : > { %9684 = vmatmul.mubr.msk.f32.gmra.mxu0 %vm363_vm2, %v11618_v31  ;;  %v1011_v31 = vrot.slane %v11229_v6, 2 }
  0x5b   : > { %9634 = vmatmul.mubr.msk.f32.gmra.mxu1 %vm363_vm2, %v11099_v21  ;;  %9686 = vmatprep.mubr.msk.f32.mxu0 %vm363_vm2, %v11624_v0  ;;  %v1015_v0 = vrot.slane %v11261_v33, 2 }
  0x5c   : > { %9636 = vmatprep.mubr.msk.f32.mxu1 %vm363_vm2, %v11142_v36  ;;  %v11658_v51 = vsel %vm949_vm3, %v1010_v32, %v1011_v31  ;;  %v11669_v38 = vsel %vm949_vm3, %v1011_v31, %v1013_v19  ;;  %v15658_v19 = vld [vmem:[#allocation22_spill] sm:$0xff] }
  0x5d   : > { %15653 = vst [vmem:[#allocation56_spill] sm:$0xff] %v11658_v51  ;;  %15654 = vst [vmem:[#allocation57_spill] sm:$0xff] %v11669_v38 }
  0x5e   : > { %9687 = vmatmul.mubr.msk.f32.gmra.mxu0 %vm363_vm2, %v11635_v30  ;;  %v1016_v30 = vrot.slane %v11264_v34, 2 }
  0x5f   : > { %9637 = vmatmul.mubr.msk.f32.gmra.mxu1 %vm363_vm2, %v11145_v37  ;;  %9689 = vmatprep.mubr.msk.f32.mxu0 %vm363_vm2, %v11641_v23  ;;  %v1020_v23 = vrot.slane %v11305_v11, 2 }
  0x60   : > { %9639 = vmatprep.mubr.msk.f32.mxu1 %vm363_vm2, %v11180_v50  ;;  %v11675_v32 = vsel %vm949_vm3, %v1015_v0, %v1016_v30  ;;  %v11686_v31 = vsel %vm949_vm3, %v1016_v30, %v1018_v9  ;;  %v1028_v9 = vrot.slane %v11382_v39, 2 }
  0x61   : > { %15655 = vst [vmem:[#allocation58_spill] sm:$0xff] %v11675_v32 }
  0x62   : > { %9690 = vmatmul.mubr.msk.f32.gmra.mxu0 %vm363_vm2, %v11652_v47  ;;  %v15656_v47 = vld [vmem:[#allocation18_spill] sm:$0xff] }
  0x63   : > { %9640 = vmatmul.mubr.msk.f32.gmra.mxu1 %vm363_vm2, %v11191_v55  ;;  %9692 = vmatprep.mubr.msk.f32.mxu0 %vm363_vm2, %v11658_v51  ;;  %v1021_v45 = vrot.slane %v15656_v47, 2  ;;  %15657 = vst [vmem:[#allocation18_spill] sm:$0xff] %v11686_v31  ;;  %v1023_v51 = vrot.slane %v15658_v19, 2 }
  0x64   : > { %9642 = vmatprep.mubr.msk.f32.mxu1 %vm363_vm2, %v11226_v2 }
  0x65   : > { %v11692_v0 = vsel %vm949_vm3, %v1020_v23, %v1021_v45  ;;  %v11703_v30 = vsel %vm949_vm3, %v1021_v45, %v1023_v51  ;;  %v1362_v51 = vrot.slane %v11086_v14, 3 }
  0x66   : > { %9693 = vmatmul.mubr.msk.f32.gmra.mxu0 %vm363_vm2, %v11669_v38  ;;  %15659 = vst [vmem:[#allocation22_spill] sm:$0xff] %v11692_v0  ;;  %v1026_v38 = vrot.slane %v11352_v63, 2  ;;  %15660 = vst [vmem:[#allocation59_spill] sm:$0xff] %v11703_v30 }
  0x67   : > { %9643 = vmatmul.mubr.msk.f32.gmra.mxu1 %vm363_vm2, %v11229_v6  ;;  %9695 = vmatprep.mubr.msk.f32.mxu0 %vm363_vm2, %v11675_v32  ;;  %v1803_v32 = vrot.slane %v11069_v5, 4 }
  0x68   : > { %9645 = vmatprep.mubr.msk.f32.mxu1 %vm363_vm2, %v11261_v33  ;;  %v11709_v23 = vsel %vm949_vm3, %v1025_v10, %v1026_v38  ;;  %v11718_v45 = vsel %vm949_vm3, %v1026_v38, %v1028_v9  ;;  %v1363_v10 = vrot.slane %v11089_v15, 3  ;;  %v1365_v38 = vrot.slane %v11117_v28, 3 }
  0x69   : > { %15661 = vst [vmem:[#allocation60_spill] sm:$0xff] %v11709_v23  ;;  %15662 = vst [vmem:[#allocation61_spill] sm:$0xff] %v11718_v45  ;;  %v1771_v9 = vrot.slane %v11117_v28, 4  ;;  %v11751_v28 = vld [vmem:[%s15265_s1 + $0x1c] sm:$0xf] }
  0x6a   : > { %9696 = vmatmul.mubr.msk.f32.gmra.mxu0 %vm363_vm2, %v11686_v31  ;;  %v1368_v31 = vrot.slane %v11139_v35, 3 }
  0x6b   : > { %9646 = vmatmul.mubr.msk.f32.gmra.mxu1 %vm363_vm2, %v11264_v34  ;;  %9698 = vmatprep.mubr.msk.f32.mxu0 %vm363_vm2, %v11692_v0  ;;  %v1769_v0 = vrot.slane %v11089_v15, 4  ;;  %v1367_v15 = vrot.slane %v11102_v22, 3 }
  0x6c   : > { %9648 = vmatprep.mubr.msk.f32.mxu1 %vm363_vm2, %v11305_v11 }
  0x6e   : > { %9699 = vmatmul.mubr.msk.f32.gmra.mxu0 %vm363_vm2, %v11703_v30  ;;  %v1768_v30 = vrot.slane %v11086_v14, 4  ;;  %v11739_v14 = vsel %vm1356_vm4, %v1362_v51, %v1363_v10  ;;  %v11782_v51 = vsel %vm1356_vm4, %v1367_v15, %v1368_v31  ;;  %v1784_v15 = vrot.slane %v11212_v62, 4 }
  0x6f   : > { %9649 = vmatmul.mubr.msk.f32.gmra.mxu1 %vm363_vm2, %v15656_v47  ;;  %9701 = vmatprep.mubr.msk.f32.mxu0 %vm363_vm2, %v11709_v23  ;;  %v1773_v23 = vrot.slane %v11102_v22, 4  ;;  %v11758_v22 = vsel %vm1356_vm4, %v1363_v10, %v1365_v38  ;;  %15666 = vst [vmem:[#allocation65_spill] sm:$0xff] %v11782_v51  ;;  %v1373_v10 = vrot.slane %v11177_v49, 3 }
  0x70   : > { %9651 = vmatprep.mubr.msk.f32.mxu1 %vm363_vm2, %v11349_v52 }
  0x72   : > { %9702 = vmatmul.mubr.msk.f32.gmra.mxu0 %vm363_vm2, %v11718_v45  ;;  %v1774_v45 = vrot.slane %v11139_v35, 4  ;;  %v11761_v35 = vsel %vm428_vm0, %v1769_v0, %v1771_v9  ;;  %v1783_v9 = vrot.slane %v11209_v61, 4 }
  0x73   : > { %9652 = vmatmul.mubr.msk.f32.gmra.mxu1 %vm363_vm2, %v11352_v63  ;;  %9756 = vmatprep.mubr.msk.f32.mxu0 %vm363_vm2, %v11501_v44  ;;  %v11746_v44 = vsel %vm428_vm0, %v1768_v30, %v1769_v0  ;;  %15664 = vst [vmem:[#allocation63_spill] sm:$0xff] %v11761_v35  ;;  %v1778_v0 = vrot.slane %v11160_v43, 4  ;;  %v1779_v30 = vrot.slane %v11177_v49, 4  ;;  %v1781_v49 = vrot.slane %v11194_v56, 4 }
  0x74   : > { %9706 = vmatprep.mubr.msk.f32.mxu1 %vm363_vm2, %v11497_v18  ;;  %15663 = vst [vmem:[#allocation62_spill] sm:$0xff] %v11746_v44  ;;  %v1776_v18 = vrot.slane %v11157_v42, 4 }
  0x75   : > { %v11807_v38 = vsel %vm428_vm0, %v1778_v0, %v1779_v30  ;;  %v1786_v0 = vrot.slane %v11242_v16, 4 }
  0x76   : > { %9757 = vmatmul.mubr.msk.f32.vlgmr.msra.gmra.mxu0 %vm363_vm2, %v11509_v46  ;;  %v11767_v46 = vld [vmem:[%s15265_s1 + $0x20] sm:$0xf]  ;;  %15669 = vst [vmem:[#allocation68_spill] sm:$0xff] %v11807_v38 }
  0x77   : > { %9707 = vmatmul.mubr.msk.f32.vlgmr.msra.gmra.mxu1 %vm363_vm2, %v11504_v4  ;;  %9855 = vmatpush3.msk.msra.mxu0 %vm428_vm0, %v11457_v53  ;;  %v11774_v53 = vsel %vm428_vm0, %v1773_v23, %v1774_v45  ;;  %v1370_v4 = vrot.slane %v11157_v42, 3  ;;  %v11797_v42 = vsel %vm428_vm0, %v1774_v45, %v1776_v18  ;;  %v1377_v18 = vrot.slane %v11209_v61, 3 }
  0x78   : > { %9805 = vmatpush3.msk.msra.mxu1 %vm428_vm0, %v11444_v12  ;;  %9709 = vmatprep.mubr.msk.f32.mxu1 %vm363_vm2, %v11739_v14  ;;  %15665 = vst [vmem:[#allocation64_spill] sm:$0xff] %v11774_v53  ;;  %v1372_v12 = vrot.slane %v11160_v43, 3  ;;  %15667 = vst [vmem:[#allocation66_spill] sm:$0xff] %v11797_v42  ;;  %v1375_v43 = vrot.slane %v11194_v56, 3  ;;  %v1378_v56 = vrot.slane %v11212_v62, 3 }
  0x79   : > { %9759 = vmatprep.mubr.msk.f32.mxu0 %vm363_vm2, %v11746_v44  ;;  %9904 = vmatprep.subr.msk.mxu1 %vm428_vm0, %v11751_v28  ;;  %v11804_v23 = vsel %vm1356_vm4, %v1368_v31, %v1370_v4  ;;  %v11826_v4 = vsel %vm428_vm0, %v1779_v30, %v1781_v49  ;;  %v1382_v30 = vrot.slane %v11253_v26, 3  ;;  %v1385_v49 = vrot.slane %v11286_v54, 3 }
  0x7a   : > { %9760 = vmatmul.mubr.msk.f32.gmra.mxu0 %vm363_vm2, %v11761_v35  ;;  %9954 = vmatprep.subr.msk.mxu0 %vm428_vm0, %v11767_v46  ;;  %15668 = vst [vmem:[#allocation67_spill] sm:$0xff] %v11804_v23  ;;  %v11812_v45 = vsel %vm1356_vm4, %v1372_v12, %v1373_v10  ;;  %v11823_v31 = vsel %vm1356_vm4, %v1373_v10, %v1375_v43  ;;  %15672 = vst [vmem:[#allocation71_spill] sm:$0xff] %v11826_v4  ;;  %v1383_v43 = vrot.slane %v11256_v27, 3 }
  0x7b   : > { %9710 = vmatmul.mubr.msk.f32.gmra.mxu1 %vm363_vm2, %v11758_v22  ;;  %9762 = vmatprep.mubr.msk.f32.mxu0 %vm363_vm2, %v11774_v53  ;;  %15670 = vst [vmem:[#allocation69_spill] sm:$0xff] %v11812_v45  ;;  %15671 = vst [vmem:[#allocation70_spill] sm:$0xff] %v11823_v31  ;;  %v11832_v12 = vsel %vm428_vm0, %v1783_v9, %v1784_v15  ;;  %v1788_v53 = vrot.slane %v11253_v26, 4  ;;  %v11838_v10 = vsel %vm1356_vm4, %v1377_v18, %v1378_v56 }
  0x7c   : > { %9712 = vmatprep.mubr.msk.f32.mxu1 %vm363_vm2, %v11782_v51  ;;  %15673 = vst [vmem:[#allocation72_spill] sm:$0xff] %v11832_v12  ;;  %15674 = vst [vmem:[#allocation73_spill] sm:$0xff] %v11838_v10  ;;  %v1791_v9 = vrot.slane %v11286_v54, 4  ;;  %v1793_v35 = vrot.slane %v11297_v59, 4  ;;  %v1388_v54 = vrot.slane %v11300_v1, 3  ;;  %v1798_v44 = vrot.slane %v11341_v25, 4 }
  0x7e   : > { %9763 = vmatmul.mubr.msk.f32.gmra.mxu0 %vm363_vm2, %v11797_v42  ;;  %v1380_v42 = vrot.slane %v11242_v16, 3  ;;  %v11849_v16 = vsel %vm428_vm0, %v1784_v15, %v1786_v0  ;;  %v11864_v15 = vsel %vm1356_vm4, %v1382_v30, %v1383_v43  ;;  %v1387_v0 = vrot.slane %v11297_v59, 3 }
  0x7f   : > { %9713 = vmatmul.mubr.msk.f32.gmra.mxu1 %vm363_vm2, %v11804_v23  ;;  %9765 = vmatprep.mubr.msk.f32.mxu0 %vm363_vm2, %v11807_v38  ;;  %v1789_v38 = vrot.slane %v11256_v27, 4  ;;  %15675 = vst [vmem:[#allocation74_spill] sm:$0xff] %v11849_v16  ;;  %15678 = vst [vmem:[#allocation77_spill] sm:$0xff] %v11864_v15 }
  0x80   : > { %9715 = vmatprep.mubr.msk.f32.mxu1 %vm363_vm2, %v11812_v45  ;;  %v11856_v18 = vsel %vm1356_vm4, %v1378_v56, %v1380_v42  ;;  %v1796_v56 = vrot.slane %v11330_v40, 4 }
  0x81   : > { %15676 = vst [vmem:[#allocation75_spill] sm:$0xff] %v11856_v18  ;;  %v11878_v42 = vsel %vm428_vm0, %v1789_v38, %v1791_v9  ;;  %v1801_v9 = vrot.slane %v11374_v57, 4 }
  0x82   : > { %9766 = vmatmul.mubr.msk.f32.gmra.mxu0 %vm363_vm2, %v11826_v4  ;;  %v11859_v4 = vsel %vm428_vm0, %v1788_v53, %v1789_v38  ;;  %v11875_v53 = vsel %vm1356_vm4, %v1383_v43, %v1385_v49  ;;  %15680 = vst [vmem:[#allocation79_spill] sm:$0xff] %v11878_v42  ;;  %v11890_v43 = vsel %vm1356_vm4, %v1387_v0, %v1388_v54  ;;  %v1392_v38 = vrot.slane %v11341_v25, 3 }
  0x83   : > { %9716 = vmatmul.mubr.msk.f32.gmra.mxu1 %vm363_vm2, %v11823_v31  ;;  %9768 = vmatprep.mubr.msk.f32.mxu0 %vm363_vm2, %v11832_v12  ;;  %15677 = vst [vmem:[#allocation76_spill] sm:$0xff] %v11859_v4  ;;  %v1794_v12 = vrot.slane %v11300_v1, 4  ;;  %15679 = vst [vmem:[#allocation78_spill] sm:$0xff] %v11875_v53  ;;  %v1393_v49 = vrot.slane %v11344_v41, 3 }
  0x84   : > { %9718 = vmatprep.mubr.msk.f32.mxu1 %vm363_vm2, %v11838_v10  ;;  %15682 = vst [vmem:[#allocation81_spill] sm:$0xff] %v11890_v43 }
  0x85   : > { %v11884_v30 = vsel %vm428_vm0, %v1793_v35, %v1794_v12  ;;  %v1395_v35 = vrot.slane %v11374_v57, 3  ;;  %v1398_v57 = vrot.slane %v11074_v8, 3 }
  0x86   : > { %9769 = vmatmul.mubr.msk.f32.gmra.mxu0 %vm363_vm2, %v11849_v16  ;;  %15681 = vst [vmem:[#allocation80_spill] sm:$0xff] %v11884_v30  ;;  %v1390_v16 = vrot.slane %v11330_v40, 3  ;;  %v11901_v40 = vsel %vm428_vm0, %v1794_v12, %v1796_v56  ;;  %v11916_v12 = vsel %vm1356_vm4, %v1392_v38, %v1393_v49  ;;  %v1397_v56 = vrot.slane %v11069_v5, 3 }
  0x87   : > { %9719 = vmatmul.mubr.msk.f32.gmra.mxu1 %vm363_vm2, %v11856_v18  ;;  %9771 = vmatprep.mubr.msk.f32.mxu0 %vm363_vm2, %v11859_v4  ;;  %v1799_v4 = vrot.slane %v11344_v41, 4  ;;  %15683 = vst [vmem:[#allocation82_spill] sm:$0xff] %v11901_v40  ;;  %15686 = vst [vmem:[#allocation85_spill] sm:$0xff] %v11916_v12  ;;  %v1808_v38 = vrot.slane %v11096_v20, 4 }
  0x88   : > { %9721 = vmatprep.mubr.msk.f32.mxu1 %vm363_vm2, %v11864_v15  ;;  %v11908_v0 = vsel %vm1356_vm4, %v1388_v54, %v1390_v16  ;;  %v1806_v54 = vrot.slane %v11083_v13, 4 }
  0x89   : > { %15684 = vst [vmem:[#allocation83_spill] sm:$0xff] %v11908_v0  ;;  %v11930_v16 = vsel %vm428_vm0, %v1799_v4, %v1801_v9  ;;  %v1811_v9 = vrot.slane %v11120_v29, 4 }
  0x8a   : > { %9772 = vmatmul.mubr.msk.f32.gmra.mxu0 %vm363_vm2, %v11878_v42  ;;  %v11911_v42 = vsel %vm428_vm0, %v1798_v44, %v1799_v4  ;;  %v11927_v44 = vsel %vm1356_vm4, %v1393_v49, %v1395_v35  ;;  %15688 = vst [vmem:[#allocation87_spill] sm:$0xff] %v11930_v16  ;;  %v11942_v49 = vsel %vm1356_vm4, %v1397_v56, %v1398_v57  ;;  %v1402_v4 = vrot.slane %v11096_v20, 3 }
  0x8b   : > { %9722 = vmatmul.mubr.msk.f32.gmra.mxu1 %vm363_vm2, %v11875_v53  ;;  %9774 = vmatprep.mubr.msk.f32.mxu0 %vm363_vm2, %v11884_v30  ;;  %15685 = vst [vmem:[#allocation84_spill] sm:$0xff] %v11911_v42  ;;  %v1804_v30 = vrot.slane %v11074_v8, 4  ;;  %15687 = vst [vmem:[#allocation86_spill] sm:$0xff] %v11927_v44  ;;  %v1400_v8 = vrot.slane %v11083_v13, 3  ;;  %v1403_v35 = vrot.slane %v11099_v21, 3  ;;  %v1813_v56 = vrot.slane %v11142_v36, 4 }
  0x8c   : > { %9724 = vmatprep.mubr.msk.f32.mxu1 %vm363_vm2, %v11890_v43  ;;  %15690 = vst [vmem:[#allocation89_spill] sm:$0xff] %v11942_v49 }
  0x8d   : > { %v11936_v5 = vsel %vm428_vm0, %v1803_v32, %v1804_v30  ;;  %v11953_v13 = vsel %vm428_vm0, %v1804_v30, %v1806_v54  ;;  %v1405_v32 = vrot.slane %v11120_v29, 3  ;;  %v11960_v20 = vsel %vm1356_vm4, %v1398_v57, %v1400_v8 }
  0x8e   : > { %9775 = vmatmul.mubr.msk.f32.gmra.mxu0 %vm363_vm2, %v11901_v40  ;;  %15689 = vst [vmem:[#allocation88_spill] sm:$0xff] %v11936_v5  ;;  %15691 = vst [vmem:[#allocation90_spill] sm:$0xff] %v11953_v13  ;;  %v11968_v30 = vsel %vm1356_vm4, %v1402_v4, %v1403_v35  ;;  %v1407_v54 = vrot.slane %v11142_v36, 3  ;;  %v1408_v29 = vrot.slane %v11145_v37, 3  ;;  %v1818_v4 = vrot.slane %v11180_v50, 4  ;;  %v12359_v40 = vld [vmem:[%s11060_s23 + $0x150] sm:$0xff] }
  0x8f   : > { %9725 = vmatmul.mubr.msk.f32.gmra.mxu1 %vm363_vm2, %v11908_v0  ;;  %9777 = vmatprep.mubr.msk.f32.mxu0 %vm363_vm2, %v11911_v42  ;;  %v1809_v42 = vrot.slane %v11099_v21, 4  ;;  %15692 = vst [vmem:[#allocation91_spill] sm:$0xff] %v11960_v20  ;;  %15694 = vst [vmem:[#allocation93_spill] sm:$0xff] %v11968_v30  ;;  %v11979_v57 = vsel %vm1356_vm4, %v1403_v35, %v1405_v32  ;;  %v1413_v32 = vrot.slane %v11191_v55, 3 }
  0x90   : > { %9727 = vmatprep.mubr.msk.f32.mxu1 %vm363_vm2, %v11916_v12  ;;  %15695 = vst [vmem:[#allocation94_spill] sm:$0xff] %v11979_v57  ;;  %v11994_v35 = vsel %vm1356_vm4, %v1407_v54, %v1408_v29  ;;  %v1823_v54 = vrot.slane %v11226_v2, 4  ;;  %15765 = vst [vmem:[#allocation136_spill] sm:$0xff] %v12359_v40 }
  0x91   : > { %v11963_v21 = vsel %vm428_vm0, %v1808_v38, %v1809_v42  ;;  %v11982_v8 = vsel %vm428_vm0, %v1809_v42, %v1811_v9  ;;  %v1816_v38 = vrot.slane %v11174_v48, 4  ;;  %15698 = vst [vmem:[#allocation97_spill] sm:$0xff] %v11994_v35  ;;  %v1412_v42 = vrot.slane %v11180_v50, 3 }
  0x92   : > { %9778 = vmatmul.mubr.msk.f32.gmra.mxu0 %vm363_vm2, %v11930_v16  ;;  %15693 = vst [vmem:[#allocation92_spill] sm:$0xff] %v11963_v21  ;;  %15696 = vst [vmem:[#allocation95_spill] sm:$0xff] %v11982_v8  ;;  %v1415_v9 = vrot.slane %v11206_v60, 3 }
  0x93   : > { %9728 = vmatmul.mubr.msk.f32.gmra.mxu1 %vm363_vm2, %v11927_v44  ;;  %9780 = vmatprep.mubr.msk.f32.mxu0 %vm363_vm2, %v11936_v5  ;;  %v1814_v5 = vrot.slane %v11145_v37, 4  ;;  %v1410_v37 = vrot.slane %v11174_v48, 3 }
  0x94   : > { %9730 = vmatprep.mubr.msk.f32.mxu1 %vm363_vm2, %v11942_v49 }
  0x95   : > { %v11988_v36 = vsel %vm428_vm0, %v1813_v56, %v1814_v5  ;;  %v12005_v48 = vsel %vm428_vm0, %v1814_v5, %v1816_v38  ;;  %v1821_v56 = vrot.slane %v11206_v60, 4  ;;  %v12012_v50 = vsel %vm1356_vm4, %v1408_v29, %v1410_v37 }
  0x96   : > { %9781 = vmatmul.mubr.msk.f32.gmra.mxu0 %vm363_vm2, %v11953_v13  ;;  %15697 = vst [vmem:[#allocation96_spill] sm:$0xff] %v11988_v36  ;;  %15699 = vst [vmem:[#allocation98_spill] sm:$0xff] %v12005_v48  ;;  %v12020_v5 = vsel %vm1356_vm4, %v1412_v42, %v1413_v32  ;;  %v1417_v38 = vrot.slane %v11226_v2, 3  ;;  %v1418_v60 = vrot.slane %v11229_v6, 3  ;;  %v12031_v29 = vsel %vm1356_vm4, %v1413_v32, %v1415_v9  ;;  %v12331_v13 = vld [vmem:[%s11060_s23 + $0x138] sm:$0xff] }
  0x97   : > { %9731 = vmatmul.mubr.msk.f32.gmra.mxu1 %vm363_vm2, %v11960_v20  ;;  %9783 = vmatprep.mubr.msk.f32.mxu0 %vm363_vm2, %v11963_v21  ;;  %v1819_v21 = vrot.slane %v11191_v55, 4  ;;  %15700 = vst [vmem:[#allocation99_spill] sm:$0xff] %v12012_v50  ;;  %15702 = vst [vmem:[#allocation101_spill] sm:$0xff] %v12020_v5  ;;  %v1828_v42 = vrot.slane %v11261_v33, 4  ;;  %v1423_v9 = vrot.slane %v11264_v34, 3 }
  0x98   : > { %9733 = vmatprep.mubr.msk.f32.mxu1 %vm363_vm2, %v11968_v30  ;;  %15703 = vst [vmem:[#allocation102_spill] sm:$0xff] %v12031_v29  ;;  %v12046_v32 = vsel %vm1356_vm4, %v1417_v38, %v1418_v60  ;;  %v1833_v38 = vrot.slane %v11305_v11, 4  ;;  %15759 = vst [vmem:[#allocation132_spill] sm:$0xff] %v12331_v13 }
  0x99   : > { %v12015_v55 = vsel %vm428_vm0, %v1818_v4, %v1819_v21  ;;  %v12034_v37 = vsel %vm428_vm0, %v1819_v21, %v1821_v56  ;;  %v1826_v4 = vrot.slane %v11245_v17, 4  ;;  %15706 = vst [vmem:[#allocation105_spill] sm:$0xff] %v12046_v32  ;;  %v1422_v21 = vrot.slane %v11261_v33, 3 }
  0x9a   : > { %9784 = vmatmul.mubr.msk.f32.gmra.mxu0 %vm363_vm2, %v11982_v8  ;;  %15701 = vst [vmem:[#allocation100_spill] sm:$0xff] %v12015_v55  ;;  %15704 = vst [vmem:[#allocation103_spill] sm:$0xff] %v12034_v37  ;;  %v1425_v56 = vrot.slane %v11289_v58, 3 }
  0x9b   : > { %9734 = vmatmul.mubr.msk.f32.gmra.mxu1 %vm363_vm2, %v11979_v57  ;;  %9786 = vmatprep.mubr.msk.f32.mxu0 %vm363_vm2, %v11988_v36  ;;  %v1824_v36 = vrot.slane %v11229_v6, 4  ;;  %v1420_v6 = vrot.slane %v11245_v17, 3 }
  0x9c   : > { %9736 = vmatprep.mubr.msk.f32.mxu1 %vm363_vm2, %v11994_v35 }
  0x9d   : > { %v12040_v2 = vsel %vm428_vm0, %v1823_v54, %v1824_v36  ;;  %v12057_v17 = vsel %vm428_vm0, %v1824_v36, %v1826_v4  ;;  %v1831_v54 = vrot.slane %v11289_v58, 4  ;;  %v12064_v33 = vsel %vm1356_vm4, %v1418_v60, %v1420_v6 }
  0x9e   : > { %9787 = vmatmul.mubr.msk.f32.gmra.mxu0 %vm363_vm2, %v12005_v48  ;;  %15705 = vst [vmem:[#allocation104_spill] sm:$0xff] %v12040_v2  ;;  %15707 = vst [vmem:[#allocation106_spill] sm:$0xff] %v12057_v17  ;;  %v12072_v36 = vsel %vm1356_vm4, %v1422_v21, %v1423_v9  ;;  %v1427_v4 = vrot.slane %v11305_v11, 3  ;;  %v1428_v58 = vrot.slane %v15656_v47, 3  ;;  %v12083_v60 = vsel %vm1356_vm4, %v1423_v9, %v1425_v56 }
  0x9f   : > { %9737 = vmatmul.mubr.msk.f32.gmra.mxu1 %vm363_vm2, %v12012_v50  ;;  %9789 = vmatprep.mubr.msk.f32.mxu0 %vm363_vm2, %v12015_v55  ;;  %v1829_v55 = vrot.slane %v11264_v34, 4  ;;  %15708 = vst [vmem:[#allocation107_spill] sm:$0xff] %v12064_v33  ;;  %15710 = vst [vmem:[#allocation109_spill] sm:$0xff] %v12072_v36  ;;  %v1838_v21 = vrot.slane %v11349_v52, 4  ;;  %v1433_v56 = vrot.slane %v11352_v63, 3 }
  0xa0   : > { %9739 = vmatprep.mubr.msk.f32.mxu1 %vm363_vm2, %v12020_v5  ;;  %15711 = vst [vmem:[#allocation110_spill] sm:$0xff] %v12083_v60  ;;  %v12098_v9 = vsel %vm1356_vm4, %v1427_v4, %v1428_v58  ;;  %v1435_v4 = vrot.slane %v11382_v39, 3 }
  0xa1   : > { %v12067_v34 = vsel %vm428_vm0, %v1828_v42, %v1829_v55  ;;  %v12086_v6 = vsel %vm428_vm0, %v1829_v55, %v1831_v54  ;;  %v1836_v42 = vrot.slane %v15658_v19, 4  ;;  %15714 = vst [vmem:[#allocation113_spill] sm:$0xff] %v12098_v9  ;;  %v1432_v55 = vrot.slane %v11349_v52, 3 }
  0xa2   : > { %9790 = vmatmul.mubr.msk.f32.gmra.mxu0 %vm363_vm2, %v12034_v37  ;;  %15709 = vst [vmem:[#allocation108_spill] sm:$0xff] %v12067_v34  ;;  %15712 = vst [vmem:[#allocation111_spill] sm:$0xff] %v12086_v6  ;;  %v1841_v54 = vrot.slane %v11382_v39, 4  ;;  %v12136_v39 = vsel %vm1356_vm4, %v1433_v56, %v1435_v4  ;;  %v12178_v4 = vld [vmem:[%s11060_s23 + $0x38] sm:$0xff]  ;;  %v12300_v37 = vld [vmem:[%s11060_s23 + $0x110] sm:$0xff] }
  0xa3   : > { %9740 = vmatmul.mubr.msk.f32.gmra.mxu1 %vm363_vm2, %v12031_v29  ;;  %9792 = vmatprep.mubr.msk.f32.mxu0 %vm363_vm2, %v12040_v2  ;;  %v1834_v2 = vrot.slane %v15656_v47, 4  ;;  %v1430_v47 = vrot.slane %v15658_v19, 3  ;;  %15720 = vst [vmem:[#allocation119_spill] sm:$0xff] %v12136_v39  ;;  %15753 = vst [vmem:[#allocation129_spill] sm:$0xff] %v12300_v37 }
  0xa4   : > { %9742 = vmatprep.mubr.msk.f32.mxu1 %vm363_vm2, %v12046_v32 }
  0xa5   : > { %v12092_v11 = vsel %vm428_vm0, %v1833_v38, %v1834_v2  ;;  %v12109_v19 = vsel %vm428_vm0, %v1834_v2, %v1836_v42  ;;  %v10943_v42 = vld [vmem:[%s11060_s23 + $0x18] sm:$0xff] }
  0xa6   : > { %9793 = vmatmul.mubr.msk.f32.gmra.mxu0 %vm363_vm2, %v12057_v17  ;;  %15713 = vst [vmem:[#allocation112_spill] sm:$0xff] %v12092_v11  ;;  %15715 = vst [vmem:[#allocation114_spill] sm:$0xff] %v12109_v19 }
  0xa7   : > { %9743 = vmatmul.mubr.msk.f32.gmra.mxu1 %vm363_vm2, %v12064_v33  ;;  %9795 = vmatprep.mubr.msk.f32.mxu0 %vm363_vm2, %v12067_v34  ;;  %v1839_v34 = vrot.slane %v11352_v63, 4  ;;  %v12115_v63 = vsel %vm1356_vm4, %v1428_v58, %v1430_v47  ;;  %v15721_v58 = vld [vmem:[#allocation4_spill] sm:$0xff]  ;;  %v12151_v47 = vld [vmem:[%s15265_s1 + $0x24] sm:$0xf] }
  0xa8   : > { %9745 = vmatprep.mubr.msk.f32.mxu1 %vm363_vm2, %v12072_v36  ;;  %15716 = vst [vmem:[#allocation115_spill] sm:$0xff] %v12115_v63 }
  0xa9   : > { %v12118_v38 = vsel %vm428_vm0, %v1838_v21, %v1839_v34  ;;  %v12131_v2 = vsel %vm428_vm0, %v1839_v34, %v1841_v54  ;;  %v15722_v34 = vld [vmem:[#allocation6_spill] sm:$0xff]  ;;  %v15724_v54 = vld [vmem:[#allocation8_spill] sm:$0xff] }
  0xaa   : > { %9796 = vmatmul.mubr.msk.f32.gmra.mxu0 %vm363_vm2, %v12086_v6  ;;  %15717 = vst [vmem:[#allocation116_spill] sm:$0xff] %v12118_v38  ;;  %15719 = vst [vmem:[#allocation118_spill] sm:$0xff] %v12131_v2  ;;  %v10944_v21 = vld [vmem:[%s11060_s23 + $0x20] sm:$0xff]  ;;  %v15752_v6 = vld [vmem:[#allocation15_spill] sm:$0xff] }
  0xab   : > { %9746 = vmatmul.mubr.msk.f32.gmra.mxu1 %vm363_vm2, %v12083_v60  ;;  %9798 = vmatprep.mubr.msk.f32.mxu0 %vm363_vm2, %v12092_v11  ;;  %v12122_v11 = vsel %vm1356_vm4, %v1432_v55, %v1433_v56  ;;  %v12160_v55 = vld [vmem:[%s15265_s1 + $0x28] sm:$0xf]  ;;  %v12165_v56 = vld [vmem:[%s11060_s23 + $0x30] sm:$0xff]  ;;  %15726 = vst [vmem:[#allocation6_spill] sm:$0xff] %v12178_v4 }
  0xac   : > { %9748 = vmatprep.mubr.msk.f32.mxu1 %vm363_vm2, %v12098_v9  ;;  %15718 = vst [vmem:[#allocation117_spill] sm:$0xff] %v12122_v11  ;;  %15723 = vst [vmem:[#allocation4_spill] sm:$0xff] %v12165_v56 }
  0xae   : > { %9799 = vmatmul.mubr.msk.f32.gmra.mxu0 %vm363_vm2, %v12109_v19 }
  0xaf   : > { %9749 = vmatmul.mubr.msk.f32.gmra.mxu1 %vm363_vm2, %v12115_v63  ;;  %9801 = vmatprep.mubr.msk.f32.mxu0 %vm363_vm2, %v12118_v38  ;;  %v12287_v38 = vld [vmem:[%s11060_s23 + $0x108] sm:$0xff] }
  0xb0   : > { %9751 = vmatprep.mubr.msk.f32.mxu1 %vm363_vm2, %v12122_v11  ;;  %15751 = vst [vmem:[#allocation128_spill] sm:$0xff] %v12287_v38 }
  0xb2   : > { %9802 = vmatmul.mubr.msk.f32.gmra.mxu0 %vm363_vm2, %v12131_v2 }
  0xb3   : > { %9752 = vmatmul.mubr.msk.f32.gmra.mxu1 %vm363_vm2, %v12136_v39  ;;  %9856 = vmatprep.mubr.msk.f32.mxu0 %vm363_vm2, %v15721_v58  ;;  %v12185_v58 = vld [vmem:[%s11060_s23 + $0x48] sm:$0xff]  ;;  %v12377_v39 = vld [vmem:[%s11060_s23 + $0x158] sm:$0xff] }
  0xb4   : > { %9806 = vmatprep.mubr.msk.f32.mxu1 %vm363_vm2, %v10943_v42  ;;  %15728 = vst [vmem:[#allocation120_spill] sm:$0xff] %v12185_v58  ;;  %v15729_v42 = vld [vmem:[#allocation14_spill] sm:$0xff]  ;;  %15770 = vst [vmem:[#allocation140_spill] sm:$0xff] %v12377_v39 }
  0xb6   : > { %9857 = vmatmul.mubr.msk.f32.vlgmr.msra.gmra.mxu0 %vm363_vm2, %v15722_v34  ;;  %v12192_v34 = vld [vmem:[%s11060_s23 + $0x50] sm:$0xff] }
  0xb7   : > { %9807 = vmatmul.mubr.msk.f32.vlgmr.msra.gmra.mxu1 %vm363_vm2, %v10944_v21  ;;  %9955 = vmatpush3.msk.msra.mxu0 %vm428_vm0, %v11767_v46  ;;  %v15725_v46 = vld [vmem:[#allocation10_spill] sm:$0xff]  ;;  %15730 = vst [vmem:[#allocation121_spill] sm:$0xff] %v12192_v34  ;;  %v15731_v21 = vld [vmem:[#allocation16_spill] sm:$0xff] }
  0xb8   : > { %9905 = vmatpush3.msk.msra.mxu1 %vm428_vm0, %v11751_v28  ;;  %9809 = vmatprep.mubr.msk.f32.mxu1 %vm363_vm2, %v12165_v56  ;;  %v15727_v28 = vld [vmem:[#allocation12_spill] sm:$0xff]  ;;  %v15768_v56 = vld [vmem:[#allocation29_spill] sm:$0xff] }
  0xb9   : > { %9859 = vmatprep.mubr.msk.f32.mxu0 %vm363_vm2, %v15724_v54  ;;  %10004 = vmatprep.subr.msk.mxu1 %vm428_vm0, %v12151_v47  ;;  %v12278_v54 = vld [vmem:[%s11060_s23 + $0xf8] sm:$0xff] }
  0xba   : > { %9860 = vmatmul.mubr.msk.f32.gmra.mxu0 %vm363_vm2, %v15725_v46  ;;  %10054 = vmatprep.subr.msk.mxu0 %vm428_vm0, %v12160_v55  ;;  %v15733_v46 = vld [vmem:[#allocation21_spill] sm:$0xff]  ;;  %15749 = vst [vmem:[#allocation127_spill] sm:$0xff] %v12278_v54 }
  0xbb   : > { %9810 = vmatmul.mubr.msk.f32.gmra.mxu1 %vm363_vm2, %v12178_v4  ;;  %9862 = vmatprep.mubr.msk.f32.mxu0 %vm363_vm2, %v15727_v28  ;;  %v15732_v28 = vld [vmem:[#allocation19_spill] sm:$0xff] }
  0xbc   : > { %9812 = vmatprep.mubr.msk.f32.mxu1 %vm363_vm2, %v12185_v58  ;;  %v12366_v58 = vld [vmem:[%s11060_s23 + $0x190] sm:$0xf] }
  0xbd   : > { %15766 = vst [vmem:[#allocation137_spill] sm:$0xff] %v12366_v58  ;;  %v2441_v11 = vrot.slane %v12366_v58, 1 }
  0xbe   : > { %9863 = vmatmul.mubr.msk.f32.gmra.mxu0 %vm363_vm2, %v15729_v42  ;;  %v15734_v42 = vld [vmem:[#allocation24_spill] sm:$0xff] }
  0xbf   : > { %9813 = vmatmul.mubr.msk.f32.gmra.mxu1 %vm363_vm2, %v12192_v34  ;;  %9865 = vmatprep.mubr.msk.f32.mxu0 %vm363_vm2, %v15731_v21 }
  0xc0   : > { %9815 = vmatprep.mubr.msk.f32.mxu1 %vm363_vm2, %v11209_v61  ;;  %v15735_v61 = vld [vmem:[#allocation26_spill] sm:$0xff] }
  0xc2   : > { %9866 = vmatmul.mubr.msk.f32.gmra.mxu0 %vm363_vm2, %v15732_v28  ;;  %v15748_v28 = vld [vmem:[#allocation11_spill] sm:$0xff] }
  0xc3   : > { %9816 = vmatmul.mubr.msk.f32.gmra.mxu1 %vm363_vm2, %v11212_v62  ;;  %9868 = vmatprep.mubr.msk.f32.mxu0 %vm363_vm2, %v15733_v46  ;;  %v15736_v62 = vld [vmem:[#allocation30_spill] sm:$0xff] }
  0xc4   : > { %9818 = vmatprep.mubr.msk.f32.mxu1 %vm363_vm2, %v11253_v26  ;;  %v15737_v26 = vld [vmem:[#allocation32_spill] sm:$0xff] }
  0xc6   : > { %9869 = vmatmul.mubr.msk.f32.gmra.mxu0 %vm363_vm2, %v15734_v42  ;;  %v12265_v42 = vld [vmem:[%s11060_s23 + $0xf0] sm:$0xff] }
  0xc7   : > { %9819 = vmatmul.mubr.msk.f32.gmra.mxu1 %vm363_vm2, %v11256_v27  ;;  %9871 = vmatprep.mubr.msk.f32.mxu0 %vm363_vm2, %v15735_v61  ;;  %v15738_v27 = vld [vmem:[#allocation2_spill] sm:$0xff]  ;;  %15747 = vst [vmem:[#allocation126_spill] sm:$0xff] %v12265_v42 }
  0xc8   : > { %9821 = vmatprep.mubr.msk.f32.mxu1 %vm363_vm2, %v11297_v59  ;;  %v12231_v59 = vld [vmem:[%s11060_s23 + $0xc0] sm:$0xff] }
  0xc9   : > { %15739 = vst [vmem:[#allocation122_spill] sm:$0xff] %v12231_v59 }
  0xca   : > { %9872 = vmatmul.mubr.msk.f32.gmra.mxu0 %vm363_vm2, %v11391_v24  ;;  %v12256_v24 = vld [vmem:[%s11060_s23 + $0xe0] sm:$0xff] }
  0xcb   : > { %9822 = vmatmul.mubr.msk.f32.gmra.mxu1 %vm363_vm2, %v11300_v1  ;;  %9874 = vmatprep.mubr.msk.f32.mxu0 %vm363_vm2, %v15736_v62  ;;  %v15740_v1 = vld [vmem:[#allocation3_spill] sm:$0xff]  ;;  %15745 = vst [vmem:[#allocation125_spill] sm:$0xff] %v12256_v24 }
  0xcc   : > { %9824 = vmatprep.mubr.msk.f32.mxu1 %vm363_vm2, %v11341_v25  ;;  %v12238_v62 = vld [vmem:[%s11060_s23 + $0xc8] sm:$0xff]  ;;  %v15742_v25 = vld [vmem:[#allocation5_spill] sm:$0xff] }
  0xcd   : > { %15741 = vst [vmem:[#allocation123_spill] sm:$0xff] %v12238_v62 }
  0xce   : > { %9875 = vmatmul.mubr.msk.f32.gmra.mxu0 %vm363_vm2, %v15737_v26  ;;  %v15744_v26 = vld [vmem:[#allocation7_spill] sm:$0xff] }
  0xcf   : > { %9825 = vmatmul.mubr.msk.f32.gmra.mxu1 %vm363_vm2, %v11344_v41  ;;  %9877 = vmatprep.mubr.msk.f32.mxu0 %vm363_vm2, %v15738_v27  ;;  %v12245_v41 = vld [vmem:[%s11060_s23 + $0xd8] sm:$0xff] }
  0xd0   : > { %9827 = vmatprep.mubr.msk.f32.mxu1 %vm363_vm2, %v12231_v59  ;;  %15743 = vst [vmem:[#allocation124_spill] sm:$0xff] %v12245_v41 }
  0xd2   : > { %9878 = vmatmul.mubr.msk.f32.gmra.mxu0 %vm363_vm2, %v15740_v1 }
  0xd3   : > { %9828 = vmatmul.mubr.msk.f32.gmra.mxu1 %vm363_vm2, %v12238_v62  ;;  %9880 = vmatprep.mubr.msk.f32.mxu0 %vm363_vm2, %v15742_v25  ;;  %v15746_v25 = vld [vmem:[#allocation9_spill] sm:$0xff]  ;;  %v12350_v62 = vld [vmem:[%s11060_s23 + $0x140] sm:$0xff] }
  0xd4   : > { %9830 = vmatprep.mubr.msk.f32.mxu1 %vm363_vm2, %v12245_v41  ;;  %v12341_v41 = vld [vmem:[%s11060_s23 + $0x188] sm:$0xff]  ;;  %15763 = vst [vmem:[#allocation135_spill] sm:$0xff] %v12350_v62 }
  0xd5   : > { %15760 = vst [vmem:[#allocation133_spill] sm:$0xff] %v12341_v41 }
  0xd6   : > { %v12249_v27 = vpop.f32.mrf.mxu0  ;;  %9881 = vmatmul.mubr.msk.f32.gmra.mxu0 %vm363_vm2, %v15744_v26 }
  0xd7   : > { %v12253_v1 = vpop.f32.mrf.mxu1  ;;  %9831 = vmatmul.mubr.msk.f32.gmra.mxu1 %vm363_vm2, %v12256_v24  ;;  %9883 = vmatprep.mubr.msk.f32.mxu0 %vm363_vm2, %v15746_v25  ;;  %v15750_v25 = vld [vmem:[#allocation13_spill] sm:$0xff]  ;;  %v12338_v24 = vld [vmem:[%s11060_s23 + $0x180] sm:$0xff] }
  0xd8   : > { %v12262_v61 = vpop.f32.mrf.mxu0  ;;  %9833 = vmatprep.mubr.msk.f32.mxu1 %vm363_vm2, %v12265_v42  ;;  %v12322_v42 = vld [vmem:[%s11060_s23 + $0x128] sm:$0xff]  ;;  %v2438_v34 = vrot.slane %v12338_v24, 1 }
  0xd9   : > { %v12269_v26 = vpop.f32.mrf.mxu1  ;;  %15757 = vst [vmem:[#allocation131_spill] sm:$0xff] %v12322_v42 }
  0xda   : > { %v12271_v46 = vpop.f32.mrf.mxu0  ;;  %9884 = vmatmul.mubr.msk.f32.gmra.mxu0 %vm363_vm2, %v15748_v28 }
  0xdb   : > { %v12275_v21 = vpop.f32.mrf.mxu1  ;;  %9834 = vmatmul.mubr.msk.f32.gmra.mxu1 %vm363_vm2, %v12278_v54  ;;  %9886 = vmatprep.mubr.msk.f32.mxu0 %vm363_vm2, %v15750_v25  ;;  %v15754_v25 = vld [vmem:[#allocation17_spill] sm:$0xff]  ;;  %v15756_v54 = vld [vmem:[#allocation20_spill] sm:$0xff] }
  0xdc   : > { %v12284_v2 = vpop.f32.mrf.mxu0  ;;  %9836 = vmatprep.mubr.msk.f32.mxu1 %vm363_vm2, %v12287_v38  ;;  %v12309_v38 = vld [vmem:[%s11060_s23 + $0x120] sm:$0xff] }
  0xdd   : > { %v12291_v28 = vpop.f32.mrf.mxu1  ;;  %15755 = vst [vmem:[#allocation130_spill] sm:$0xff] %v12309_v38 }
  0xde   : > { %v12293_v19 = vpop.f32.mrf.mxu0  ;;  %9887 = vmatmul.mubr.msk.f32.gmra.mxu0 %vm363_vm2, %v15752_v6 }
  0xdf   : > { %v12297_v17 = vpop.f32.mrf.mxu1  ;;  %9837 = vmatmul.mubr.msk.f32.gmra.mxu1 %vm363_vm2, %v12300_v37  ;;  %9889 = vmatprep.mubr.msk.f32.mxu0 %vm363_vm2, %v15754_v25  ;;  %v15758_v25 = vld [vmem:[#allocation23_spill] sm:$0xff] }
  0xe0   : > { %v12306_v48 = vpop.f32.mrf.mxu0  ;;  %9839 = vmatprep.mubr.msk.f32.mxu1 %vm363_vm2, %v12309_v38 }
  0xe1   : > { %v12313_v6 = vpop.f32.mrf.mxu1 }
  0xe2   : > { %v12315_v8 = vpop.f32.mrf.mxu0  ;;  %9890 = vmatmul.mubr.msk.f32.gmra.mxu0 %vm363_vm2, %v15756_v54 }
  0xe3   : > { %v12319_v37 = vpop.f32.mrf.mxu1  ;;  %9840 = vmatmul.mubr.msk.f32.gmra.mxu1 %vm363_vm2, %v12322_v42  ;;  %9892 = vmatprep.mubr.msk.f32.mxu0 %vm363_vm2, %v15758_v25  ;;  %v15761_v42 = vld [vmem:[#allocation25_spill] sm:$0xff] }
  0xe4   : > { %v12328_v38 = vpop.f32.mrf.mxu0  ;;  %9842 = vmatprep.mubr.msk.f32.mxu1 %vm363_vm2, %v12331_v13  ;;  %v15764_v13 = vld [vmem:[#allocation27_spill] sm:$0xff] }
  0xe5   : > { %v12335_v54 = vpop.f32.mrf.mxu1 }
  0xe6   : > { %v12343_v16 = vpop.f32.mrf.mxu0  ;;  %9893 = vmatmul.mubr.msk.f32.gmra.mxu0 %vm363_vm2, %v15761_v42  ;;  %v2439_v42 = vrot.slane %v12341_v41, 1 }
  0xe7   : > { %v12347_v25 = vpop.f32.mrf.mxu1  ;;  %9843 = vmatmul.mubr.msk.f32.gmra.mxu1 %vm363_vm2, %v12350_v62  ;;  %9895 = vmatprep.mubr.msk.f32.mxu0 %vm363_vm2, %v15764_v13 }
  0xe8   : > { %15762 = vst [vmem:[#allocation134_spill] sm:$0xff] %v12347_v25  ;;  %v12356_v59 = vpop.f32.mrf.mxu0  ;;  %9845 = vmatprep.mubr.msk.f32.mxu1 %vm363_vm2, %v12359_v40  ;;  %v15771_v40 = vld [vmem:[#allocation31_spill] sm:$0xff]  ;;  %v15774_v25 = vld [vmem:[#allocation33_spill] sm:$0xff] }
  0xe9   : > { %v12368_v4 = vpop.f32.mrf.mxu1 }
  0xea   : > { %15767 = vst [vmem:[#allocation138_spill] sm:$0xff] %v12368_v4  ;;  %v12370_v62 = vpop.f32.mrf.mxu0  ;;  %9896 = vmatmul.mubr.msk.f32.gmra.mxu0 %vm363_vm2, %v15768_v56  ;;  %v12389_v4 = vsel %vm280_vm1, %v2438_v34, %v2439_v42 }
  0xeb   : > { %v12374_v13 = vpop.f32.mrf.mxu1  ;;  %9846 = vmatmul.mubr.msk.f32.gmra.mxu1 %vm363_vm2, %v12377_v39  ;;  %9898 = vmatprep.mubr.msk.f32.mxu0 %vm363_vm2, %v15771_v40  ;;  %15772 = vst [vmem:[#allocation141_spill] sm:$0xff] %v12389_v4  ;;  %v12400_v40 = vld [vmem:[%s11060_s23 + $0x170] sm:$0xff] }
  0xec   : > { %15769 = vst [vmem:[#allocation139_spill] sm:$0xff] %v12374_v13  ;;  %v12384_v63 = vpop.f32.mrf.mxu0  ;;  %9848 = vmatprep.mubr.msk.f32.mxu1 %vm363_vm2, %v11349_v52  ;;  %15776 = vst [vmem:[#allocation144_spill] sm:$0xff] %v12400_v40  ;;  %v12407_v52 = vsel %vm280_vm1, %v2439_v42, %v2441_v11  ;;  %v15780_v42 = vld [vmem:[#allocation34_spill] sm:$0xff] }
  0xed   : > { %v12391_v56 = vpop.f32.mrf.mxu1  ;;  %15777 = vst [vmem:[#allocation145_spill] sm:$0xff] %v12407_v52 }
  0xee   : > { %15773 = vst [vmem:[#allocation142_spill] sm:$0xff] %v12391_v56  ;;  %v12393_v13 = vpop.f32.mrf.mxu0  ;;  %9899 = vmatmul.mubr.msk.f32.gmra.mxu0 %vm363_vm2, %v15774_v25 }
  0xef   : > { %v12397_v39 = vpop.f32.mrf.mxu1  ;;  %9849 = vmatmul.mubr.msk.f32.gmra.mxu1 %vm363_vm2, %v12400_v40  ;;  %9901 = vmatprep.mubr.msk.f32.mxu0 %vm363_vm2, %v12389_v4 }
  0xf0   : > { %15775 = vst [vmem:[#allocation143_spill] sm:$0xff] %v12397_v39  ;;  %v12409_v34 = vpop.f32.mrf.mxu0  ;;  %9851 = vmatprep.mubr.msk.f32.mxu1 %vm363_vm2, %v12338_v24 }
  0xf1   : > { %v12413_v56 = vpop.f32.mrf.mxu1 }
  0xf2   : > { %15778 = vst [vmem:[#allocation146_spill] sm:$0xff] %v12413_v56  ;;  %v12415_v25 = vpop.f32.mrf.mxu0  ;;  %9902 = vmatmul.mubr.msk.f32.gmra.mxu0 %vm363_vm2, %v12407_v52  ;;  %v12436_v52 = vld [vmem:[%s15265_s1 + $0x2c] sm:$0xf] }
  0xf3   : > { %v12419_v39 = vpop.f32.mrf.mxu1  ;;  %9852 = vmatmul.mubr.msk.f32.gmra.mxu1 %vm363_vm2, %v12341_v41  ;;  %9956 = vmatprep.mubr.msk.f32.mxu0 %vm363_vm2, %v11739_v14  ;;  %v15782_v56 = vld [vmem:[#allocation35_spill] sm:$0xff]  ;;  %v12445_v14 = vld [vmem:[%s15265_s1 + $0x30] sm:$0xf] }
  0xf4   : > { %15779 = vst [vmem:[#allocation147_spill] sm:$0xff] %v12419_v39  ;;  %v12425_v11 = vpop.f32.mrf.mxu0  ;;  %9906 = vmatprep.mubr.msk.f32.mxu1 %vm363_vm2, %v15780_v42 }
  0xf5   : > { %v12429_v4 = vpop.f32.mrf.mxu1 }
  0xf6   : > { %15781 = vst [vmem:[#allocation34_spill] sm:$0xff] %v12429_v4  ;;  %v9658_v40 = vpop.f32.mrf.mxu0  ;;  %9957 = vmatmul.mubr.msk.f32.vlgmr.msra.gmra.mxu0 %vm363_vm2, %v11758_v22  ;;  %v15783_v4 = vld [vmem:[#allocation36_spill] sm:$0xff] }
  0xf7   : > { %v9608_v39 = vpop.f32.mrf.mxu1  ;;  %9907 = vmatmul.mubr.msk.f32.vlgmr.msra.gmra.mxu1 %vm363_vm2, %v15782_v56  ;;  %10055 = vmatpush3.msk.msra.mxu0 %vm428_vm0, %v12160_v55 }
  0xf8   : > { %v796_v42 = vadd.f32 %v9608_v39, %v12249_v27  ;;  %10005 = vmatpush3.msk.msra.mxu1 %vm428_vm0, %v12151_v47  ;;  %v1165_v22 = vpop.f32.mrf.mxu0  ;;  %9909 = vmatprep.mubr.msk.f32.mxu1 %vm363_vm2, %v15783_v4 }
  0xf9   : > { %v790_v58 = vpop.f32.mrf.mxu1  ;;  %9959 = vmatprep.mubr.msk.f32.mxu0 %vm363_vm2, %v11782_v51  ;;  %10104 = vmatprep.subr.msk.mxu1 %vm428_vm0, %v12436_v52 }
  0xfa   : > { %v12456_v55 = vadd.f32 %v9658_v40, %v796_v42  ;;  %v791_v56 = vadd.f32 %v790_v58, %v12262_v61  ;;  %v9661_v41 = vpop.f32.mrf.mxu0  ;;  %9960 = vmatmul.mubr.msk.f32.gmra.mxu0 %vm363_vm2, %v11804_v23  ;;  %10154 = vmatprep.subr.msk.mxu0 %vm428_vm0, %v12445_v14 }
  0xfb   : > { %v9611_v39 = vpop.f32.mrf.mxu1  ;;  %9910 = vmatmul.mubr.msk.f32.gmra.mxu1 %vm363_vm2, %v11485_v7  ;;  %9962 = vmatprep.mubr.msk.f32.mxu0 %vm363_vm2, %v11812_v45  ;;  %v15784_v7 = vld [vmem:[#allocation39_spill] sm:$0xff]  ;;  %v15786_v45 = vld [vmem:[#allocation41_spill] sm:$0xff] }
  0xfc   : > { %v12467_v47 = vadd.f32 %v1165_v22, %v791_v56  ;;  %v806_v40 = vadd.f32 %v9611_v39, %v12271_v46  ;;  %v1175_v27 = vpop.f32.mrf.mxu0  ;;  %9912 = vmatprep.mubr.msk.f32.mxu1 %vm363_vm2, %v11493_v3 }
  0xfd   : > { %v800_v58 = vpop.f32.mrf.mxu1 }
  0xfe   : > { %v12472_v61 = vadd.f32 %v9661_v41, %v806_v40  ;;  %v801_v42 = vadd.f32 %v800_v58, %v12284_v2  ;;  %v9664_v23 = vpop.f32.mrf.mxu0  ;;  %9963 = vmatmul.mubr.msk.f32.gmra.mxu0 %vm363_vm2, %v11823_v31  ;;  %v15785_v41 = vld [vmem:[#allocation40_spill] sm:$0xff] }
  0xff   : > { %v9614_v51 = vpop.f32.mrf.mxu1  ;;  %9913 = vmatmul.mubr.msk.f32.gmra.mxu1 %vm363_vm2, %v15784_v7  ;;  %9965 = vmatprep.mubr.msk.f32.mxu0 %vm363_vm2, %v11838_v10  ;;  %v15788_v10 = vld [vmem:[#allocation43_spill] sm:$0xff] }
 0x100   : > { %v12481_v46 = vadd.f32 %v1175_v27, %v801_v42  ;;  %v816_v22 = vadd.f32 %v9614_v51, %v12293_v19  ;;  %v1185_v56 = vpop.f32.mrf.mxu0  ;;  %9915 = vmatprep.mubr.msk.f32.mxu1 %vm363_vm2, %v15785_v41 }
 0x101   : > { %v810_v2 = vpop.f32.mrf.mxu1 }
 0x102   : > { %v12486_v39 = vadd.f32 %v9664_v23, %v816_v22  ;;  %v811_v40 = vadd.f32 %v810_v2, %v12306_v48  ;;  %v9667_v58 = vpop.f32.mrf.mxu0  ;;  %9966 = vmatmul.mubr.msk.f32.gmra.mxu0 %vm363_vm2, %v11856_v18  ;;  %v15787_v23 = vld [vmem:[#allocation42_spill] sm:$0xff] }
 0x103   : > { %v9617_v31 = vpop.f32.mrf.mxu1  ;;  %9916 = vmatmul.mubr.msk.f32.gmra.mxu1 %vm363_vm2, %v15786_v45  ;;  %9968 = vmatprep.mubr.msk.f32.mxu0 %vm363_vm2, %v11864_v15  ;;  %v15790_v15 = vld [vmem:[#allocation45_spill] sm:$0xff] }
 0x104   : > { %v12495_v51 = vadd.f32 %v1185_v56, %v811_v40  ;;  %v826_v19 = vadd.f32 %v9617_v31, %v12315_v8  ;;  %v1195_v27 = vpop.f32.mrf.mxu0  ;;  %9918 = vmatprep.mubr.msk.f32.mxu1 %vm363_vm2, %v15787_v23  ;;  %v15789_v40 = vld [vmem:[#allocation44_spill] sm:$0xff] }
 0x105   : > { %v820_v48 = vpop.f32.mrf.mxu1 }
 0x106   : > { %v12500_v42 = vadd.f32 %v9667_v58, %v826_v19  ;;  %v821_v22 = vadd.f32 %v820_v48, %v12328_v38  ;;  %v9670_v2 = vpop.f32.mrf.mxu0  ;;  %9969 = vmatmul.mubr.msk.f32.gmra.mxu0 %vm363_vm2, %v11875_v53 }
 0x107   : > { %v9620_v18 = vpop.f32.mrf.mxu1  ;;  %9919 = vmatmul.mubr.msk.f32.gmra.mxu1 %vm363_vm2, %v15788_v10  ;;  %9971 = vmatprep.mubr.msk.f32.mxu0 %vm363_vm2, %v11890_v43  ;;  %v15792_v43 = vld [vmem:[#allocation47_spill] sm:$0xff] }
 0x108   : > { %v12509_v31 = vadd.f32 %v1195_v27, %v821_v22  ;;  %v836_v8 = vadd.f32 %v9620_v18, %v12343_v16  ;;  %v1205_v56 = vpop.f32.mrf.mxu0  ;;  %9921 = vmatprep.mubr.msk.f32.mxu1 %vm363_vm2, %v15789_v40  ;;  %v15791_v22 = vld [vmem:[#allocation46_spill] sm:$0xff] }
 0x109   : > { %v830_v38 = vpop.f32.mrf.mxu1 }
 0x10a   : > { %v12514_v58 = vadd.f32 %v9670_v2, %v836_v8  ;;  %v831_v19 = vadd.f32 %v830_v38, %v12356_v59  ;;  %v9673_v48 = vpop.f32.mrf.mxu0  ;;  %9972 = vmatmul.mubr.msk.f32.gmra.mxu0 %vm363_vm2, %v11908_v0 }
 0x10b   : > { %v9623_v53 = vpop.f32.mrf.mxu1  ;;  %9922 = vmatmul.mubr.msk.f32.gmra.mxu1 %vm363_vm2, %v15790_v15  ;;  %9974 = vmatprep.mubr.msk.f32.mxu0 %vm363_vm2, %v11916_v12  ;;  %v15794_v12 = vld [vmem:[#allocation49_spill] sm:$0xff] }
 0x10c   : > { %v12523_v18 = vadd.f32 %v1205_v56, %v831_v19  ;;  %v846_v16 = vadd.f32 %v9623_v53, %v12370_v62  ;;  %v1215_v27 = vpop.f32.mrf.mxu0  ;;  %9924 = vmatprep.mubr.msk.f32.mxu1 %vm363_vm2, %v15791_v22  ;;  %v15793_v19 = vld [vmem:[#allocation48_spill] sm:$0xff] }
 0x10d   : > { %v840_v59 = vpop.f32.mrf.mxu1 }
 0x10e   : > { %v12528_v2 = vadd.f32 %v9673_v48, %v846_v16  ;;  %v841_v8 = vadd.f32 %v840_v59, %v12384_v63  ;;  %v9676_v38 = vpop.f32.mrf.mxu0  ;;  %9975 = vmatmul.mubr.msk.f32.gmra.mxu0 %vm363_vm2, %v11927_v44 }
 0x10f   : > { %v9626_v0 = vpop.f32.mrf.mxu1  ;;  %9925 = vmatmul.mubr.msk.f32.gmra.mxu1 %vm363_vm2, %v15792_v43  ;;  %9977 = vmatprep.mubr.msk.f32.mxu0 %vm363_vm2, %v11942_v49  ;;  %v15796_v49 = vld [vmem:[#allocation51_spill] sm:$0xff] }
 0x110   : > { %v12537_v53 = vadd.f32 %v1215_v27, %v841_v8  ;;  %v856_v62 = vadd.f32 %v9626_v0, %v12393_v13  ;;  %v1225_v56 = vpop.f32.mrf.mxu0  ;;  %9927 = vmatprep.mubr.msk.f32.mxu1 %vm363_vm2, %v15793_v19  ;;  %v15795_v8 = vld [vmem:[#allocation50_spill] sm:$0xff] }
 0x111   : > { %v850_v63 = vpop.f32.mrf.mxu1 }
 0x112   : > { %v12542_v48 = vadd.f32 %v9676_v38, %v856_v62  ;;  %v851_v16 = vadd.f32 %v850_v63, %v12409_v34  ;;  %v9679_v59 = vpop.f32.mrf.mxu0  ;;  %9978 = vmatmul.mubr.msk.f32.gmra.mxu0 %vm363_vm2, %v11960_v20 }
 0x113   : > { %v9629_v44 = vpop.f32.mrf.mxu1  ;;  %9928 = vmatmul.mubr.msk.f32.gmra.mxu1 %vm363_vm2, %v15794_v12  ;;  %9980 = vmatprep.mubr.msk.f32.mxu0 %vm363_vm2, %v11968_v30  ;;  %v15798_v30 = vld [vmem:[#allocation53_spill] sm:$0xff] }
 0x114   : > { %v12551_v0 = vadd.f32 %v1225_v56, %v851_v16  ;;  %v866_v13 = vadd.f32 %v9629_v44, %v12415_v25  ;;  %v1235_v27 = vpop.f32.mrf.mxu0  ;;  %9930 = vmatprep.mubr.msk.f32.mxu1 %vm363_vm2, %v15795_v8  ;;  %v15797_v16 = vld [vmem:[#allocation52_spill] sm:$0xff]  ;;  %v15818_v8 = vld [vmem:[#allocation119_spill] sm:$0xff] }
 0x115   : > { %v860_v34 = vpop.f32.mrf.mxu1 }
 0x116   : > { %v12556_v38 = vadd.f32 %v9679_v59, %v866_v13  ;;  %v861_v62 = vadd.f32 %v860_v34, %v12425_v11  ;;  %v9682_v63 = vpop.f32.mrf.mxu0  ;;  %9981 = vmatmul.mubr.msk.f32.gmra.mxu0 %vm363_vm2, %v11979_v57 }
 0x117   : > { %v9632_v20 = vpop.f32.mrf.mxu1  ;;  %9931 = vmatmul.mubr.msk.f32.gmra.mxu1 %vm363_vm2, %v15796_v49  ;;  %9983 = vmatprep.mubr.msk.f32.mxu0 %vm363_vm2, %v11994_v35  ;;  %v15800_v35 = vld [vmem:[#allocation55_spill] sm:$0xff]  ;;  %v15817_v49 = vld [vmem:[#allocation142_spill] sm:$0xff] }
 0x118   : > { %v12565_v44 = vadd.f32 %v1235_v27, %v861_v62  ;;  %v876_v25 = vadd.f32 %v9632_v20, %v12253_v1  ;;  %v1245_v56 = vpop.f32.mrf.mxu0  ;;  %9933 = vmatprep.mubr.msk.f32.mxu1 %vm363_vm2, %v15797_v16  ;;  %v15799_v62 = vld [vmem:[#allocation54_spill] sm:$0xff]  ;;  %v15814_v16 = vld [vmem:[#allocation60_spill] sm:$0xff] }
 0x119   : > { %v870_v11 = vpop.f32.mrf.mxu1 }
 0x11a   : > { %v12570_v59 = vadd.f32 %v9682_v63, %v876_v25  ;;  %v871_v13 = vadd.f32 %v870_v11, %v12269_v26  ;;  %v9685_v34 = vpop.f32.mrf.mxu0  ;;  %9984 = vmatmul.mubr.msk.f32.gmra.mxu0 %vm363_vm2, %v12012_v50 }
 0x11b   : > { %v9635_v57 = vpop.f32.mrf.mxu1  ;;  %9934 = vmatmul.mubr.msk.f32.gmra.mxu1 %vm363_vm2, %v15798_v30  ;;  %9986 = vmatprep.mubr.msk.f32.mxu0 %vm363_vm2, %v12020_v5  ;;  %v15802_v5 = vld [vmem:[#allocation57_spill] sm:$0xff]  ;;  %v15813_v30 = vld [vmem:[#allocation139_spill] sm:$0xff] }
 0x11c   : > { %v12579_v20 = vadd.f32 %v1245_v56, %v871_v13  ;;  %v886_v1 = vadd.f32 %v9635_v57, %v12275_v21  ;;  %v1255_v27 = vpop.f32.mrf.mxu0  ;;  %9936 = vmatprep.mubr.msk.f32.mxu1 %vm363_vm2, %v15799_v62  ;;  %v15801_v13 = vld [vmem:[#allocation56_spill] sm:$0xff] }
 0x11d   : > { %v880_v26 = vpop.f32.mrf.mxu1 }
 0x11e   : > { %v12584_v63 = vadd.f32 %v9685_v34, %v886_v1  ;;  %v881_v25 = vadd.f32 %v880_v26, %v12291_v28  ;;  %v9688_v11 = vpop.f32.mrf.mxu0  ;;  %9987 = vmatmul.mubr.msk.f32.gmra.mxu0 %vm363_vm2, %v12031_v29 }
 0x11f   : > { %v9638_v50 = vpop.f32.mrf.mxu1  ;;  %9937 = vmatmul.mubr.msk.f32.gmra.mxu1 %vm363_vm2, %v15800_v35  ;;  %9989 = vmatprep.mubr.msk.f32.mxu0 %vm363_vm2, %v12046_v32  ;;  %v15804_v32 = vld [vmem:[#allocation18_spill] sm:$0xff] }
 0x120   : > { %v12593_v57 = vadd.f32 %v1255_v27, %v881_v25  ;;  %v896_v21 = vadd.f32 %v9638_v50, %v12297_v17  ;;  %v1265_v56 = vpop.f32.mrf.mxu0  ;;  %9939 = vmatprep.mubr.msk.f32.mxu1 %vm363_vm2, %v15801_v13  ;;  %v15803_v25 = vld [vmem:[#allocation58_spill] sm:$0xff]  ;;  %v15812_v13 = vld [vmem:[#allocation137_spill] sm:$0xff] }
 0x121   : > { %v890_v28 = vpop.f32.mrf.mxu1  ;;  %v2983_v35 = vrot.slane %v15812_v13, 3 }
 0x122   : > { %v12598_v34 = vadd.f32 %v9688_v11, %v896_v21  ;;  %v891_v1 = vadd.f32 %v890_v28, %v12313_v6  ;;  %v9691_v26 = vpop.f32.mrf.mxu0  ;;  %9990 = vmatmul.mubr.msk.f32.gmra.mxu0 %vm363_vm2, %v12064_v33 }
 0x123   : > { %v9641_v29 = vpop.f32.mrf.mxu1  ;;  %9940 = vmatmul.mubr.msk.f32.gmra.mxu1 %vm363_vm2, %v15802_v5  ;;  %9992 = vmatprep.mubr.msk.f32.mxu0 %vm363_vm2, %v12072_v36  ;;  %v2709_v36 = vrot.slane %v12338_v24, 2  ;;  %v15809_v5 = vld [vmem:[#allocation115_spill] sm:$0xff] }
 0x124   : > { %v12607_v50 = vadd.f32 %v1265_v56, %v891_v1  ;;  %v906_v17 = vadd.f32 %v9641_v29, %v12319_v37  ;;  %v1275_v27 = vpop.f32.mrf.mxu0  ;;  %9942 = vmatprep.mubr.msk.f32.mxu1 %vm363_vm2, %v15803_v25  ;;  %v15805_v37 = vld [vmem:[#allocation134_spill] sm:$0xff] }
 0x125   : > { %v900_v6 = vpop.f32.mrf.mxu1 }
 0x126   : > { %v12612_v11 = vadd.f32 %v9691_v26, %v906_v17  ;;  %v901_v21 = vadd.f32 %v900_v6, %v12335_v54  ;;  %v9694_v28 = vpop.f32.mrf.mxu0  ;;  %9993 = vmatmul.mubr.msk.f32.gmra.mxu0 %vm363_vm2, %v12083_v60  ;;  %v15806_v26 = vld [vmem:[#allocation22_spill] sm:$0xff]  ;;  %v2980_v54 = vrot.slane %v12338_v24, 3  ;;  %v15807_v17 = vld [vmem:[#allocation133_spill] sm:$0xff] }
 0x127   : > { %v9644_v33 = vpop.f32.mrf.mxu1  ;;  %9943 = vmatmul.mubr.msk.f32.gmra.mxu1 %vm363_vm2, %v15804_v32  ;;  %9995 = vmatprep.mubr.msk.f32.mxu0 %vm363_vm2, %v12098_v9  ;;  %v2981_v6 = vrot.slane %v15807_v17, 3  ;;  %v2710_v32 = vrot.slane %v15807_v17, 2  ;;  %v15808_v9 = vld [vmem:[#allocation138_spill] sm:$0xff] }
 0x128   : > { %v12621_v29 = vadd.f32 %v1275_v27, %v901_v21  ;;  %v916_v56 = vadd.f32 %v9644_v33, %v15805_v37  ;;  %v1285_v1 = vpop.f32.mrf.mxu0  ;;  %9945 = vmatprep.mubr.msk.f32.mxu1 %vm363_vm2, %v15806_v26  ;;  %v15810_v37 = vld [vmem:[#allocation59_spill] sm:$0xff]  ;;  %v15811_v26 = vld [vmem:[#allocation117_spill] sm:$0xff] }
 0x129   : > { %v910_v60 = vpop.f32.mrf.mxu1 }
 0x12a   : > { %v12630_v25 = vadd.f32 %v9694_v28, %v916_v56  ;;  %v911_v27 = vadd.f32 %v910_v60, %v15808_v9  ;;  %v9697_v21 = vpop.f32.mrf.mxu0  ;;  %9996 = vmatmul.mubr.msk.f32.gmra.mxu0 %vm363_vm2, %v15809_v5  ;;  %v12646_v60 = vsel %vm1356_vm4, %v2980_v54, %v2981_v6  ;;  %v2712_v9 = vrot.slane %v15812_v13, 2 }
 0x12b   : > { %v9647_v33 = vpop.f32.mrf.mxu1  ;;  %9946 = vmatmul.mubr.msk.f32.gmra.mxu1 %vm363_vm2, %v15810_v37  ;;  %9998 = vmatprep.mubr.msk.f32.mxu0 %vm363_vm2, %v15811_v26  ;;  %15815 = vst [vmem:[#allocation35_spill] sm:$0xff] %v12646_v60  ;;  %v12650_v37 = vsel %vm949_vm3, %v2709_v36, %v2710_v32  ;;  %v12662_v54 = vsel %vm1356_vm4, %v2981_v6, %v2983_v35  ;;  %v15824_v6 = vld [vmem:[#allocation4_spill] sm:$0xff] }
 0x12c   : > { %v12640_v62 = vadd.f32 %v1285_v1, %v911_v27  ;;  %v926_v28 = vadd.f32 %v9647_v33, %v15813_v30  ;;  %v1295_v56 = vpop.f32.mrf.mxu0  ;;  %9948 = vmatprep.mubr.msk.f32.mxu1 %vm363_vm2, %v15814_v16  ;;  %15816 = vst [vmem:[#allocation36_spill] sm:$0xff] %v12650_v37  ;;  %v15819_v33 = vld [vmem:[#allocation61_spill] sm:$0xff]  ;;  %15820 = vst [vmem:[#allocation134_spill] sm:$0xff] %v12662_v54 }
 0x12d   : > { %v920_v5 = vpop.f32.mrf.mxu1 }
 0x12e   : > { %v12652_v26 = vadd.f32 %v9697_v21, %v926_v28  ;;  %v921_v1 = vadd.f32 %v920_v5, %v15817_v49  ;;  %v9700_v27 = vpop.f32.mrf.mxu0  ;;  %9999 = vmatmul.mubr.msk.f32.gmra.mxu0 %vm363_vm2, %v15818_v8  ;;  %v15821_v21 = vld [vmem:[#allocation143_spill] sm:$0xff]  ;;  %v12670_v49 = vsel %vm949_vm3, %v2710_v32, %v2712_v9 }
 0x12f   : > { %v9650_v30 = vpop.f32.mrf.mxu1  ;;  %9949 = vmatmul.mubr.msk.f32.gmra.mxu1 %vm363_vm2, %v15819_v33  ;;  %10001 = vmatprep.mubr.msk.f32.mxu0 %vm363_vm2, %v12646_v60  ;;  %15822 = vst [vmem:[#allocation133_spill] sm:$0xff] %v12670_v49  ;;  %v15823_v33 = vld [vmem:[#allocation146_spill] sm:$0xff]  ;;  %v15825_v32 = vld [vmem:[#allocation147_spill] sm:$0xff] }
 0x130   : > { %v12664_v36 = vadd.f32 %v1295_v56, %v921_v1  ;;  %v936_v28 = vadd.f32 %v9650_v30, %v15821_v21  ;;  %v1305_v16 = vpop.f32.mrf.mxu0  ;;  %9951 = vmatprep.mubr.msk.f32.mxu1 %vm363_vm2, %v12650_v37  ;;  %v15827_v21 = vld [vmem:[#allocation34_spill] sm:$0xff] }
 0x131   : > { %v930_v5 = vpop.f32.mrf.mxu1  ;;  %v15841_v37 = vld [vmem:[#allocation82_spill] sm:$0xff] }
 0x132   : > { %v12672_v8 = vadd.f32 %v9700_v27, %v936_v28  ;;  %v931_v12 = vadd.f32 %v930_v5, %v15823_v33  ;;  %v9703_v60 = vpop.f32.mrf.mxu0  ;;  %10002 = vmatmul.mubr.msk.f32.gmra.mxu0 %vm363_vm2, %v12662_v54  ;;  %v15826_v27 = vld [vmem:[#allocation62_spill] sm:$0xff] }
 0x133   : > { %v9653_v35 = vpop.f32.mrf.mxu1  ;;  %9952 = vmatmul.mubr.msk.f32.gmra.mxu1 %vm363_vm2, %v12670_v49  ;;  %10056 = vmatprep.mubr.msk.f32.mxu0 %vm363_vm2, %v15824_v6  ;;  %v15828_v54 = vld [vmem:[#allocation6_spill] sm:$0xff]  ;;  %v10965_v49 = vld [vmem:[%s11060_s23 + $0x68] sm:$0xff] }
 0x134   : > { %v12681_v56 = vadd.f32 %v1305_v16, %v931_v12  ;;  %v946_v9 = vadd.f32 %v9653_v35, %v15825_v32  ;;  %v1315_v1 = vpop.f32.mrf.mxu0  ;;  %10006 = vmatprep.mubr.msk.f32.mxu1 %vm363_vm2, %v15826_v27  ;;  %v12694_v12 = vld [vmem:[%s15265_s1 + $0x34] sm:$0xf]  ;;  %v15829_v35 = vld [vmem:[#allocation63_spill] sm:$0xff] }
 0x135   : > { %v940_v30 = vpop.f32.mrf.mxu1 }
 0x136   : > { %v12686_v33 = vadd.f32 %v9703_v60, %v946_v9  ;;  %v941_v28 = vadd.f32 %v940_v30, %v15827_v21  ;;  %v9758_v5 = vpop.f32.mrf.mxu0  ;;  %10057 = vmatmul.mubr.msk.f32.vlgmr.msra.gmra.mxu0 %vm363_vm2, %v15828_v54  ;;  %v12703_v60 = vld [vmem:[%s15265_s1 + $0x38] sm:$0xf]  ;;  %v15830_v9 = vld [vmem:[#allocation64_spill] sm:$0xff] }
 0x137   : > { %v9708_v16 = vpop.f32.mrf.mxu1  ;;  %10007 = vmatmul.mubr.msk.f32.vlgmr.msra.gmra.mxu1 %vm363_vm2, %v15829_v35  ;;  %10155 = vmatpush3.msk.msra.mxu0 %vm428_vm0, %v12445_v14  ;;  %v15831_v30 = vld [vmem:[#allocation120_spill] sm:$0xff]  ;;  %v15832_v21 = vld [vmem:[#allocation121_spill] sm:$0xff] }
 0x138   : > { %v12705_v6 = vadd.f32 %v1315_v1, %v941_v28  ;;  %v1732_v54 = vadd.f32 %v9708_v16, %v12456_v55  ;;  %10105 = vmatpush3.msk.msra.mxu1 %vm428_vm0, %v12436_v52  ;;  %v1978_v32 = vpop.f32.mrf.mxu0  ;;  %10009 = vmatprep.mubr.msk.f32.mxu1 %vm363_vm2, %v15830_v9  ;;  %v15833_v28 = vld [vmem:[#allocation66_spill] sm:$0xff] }
 0x139   : > { %v1572_v27 = vpop.f32.mrf.mxu1  ;;  %10059 = vmatprep.mubr.msk.f32.mxu0 %vm363_vm2, %v15831_v30  ;;  %10204 = vmatprep.subr.msk.mxu1 %vm428_vm0, %v12694_v12  ;;  %v10964_v16 = vld [vmem:[%s11060_s23 + $0x60] sm:$0xff] }
 0x13a   : > { %v12716_v14 = vadd.f32 %v9758_v5, %v1732_v54  ;;  %v1731_v1 = vadd.f32 %v1572_v27, %v12467_v47  ;;  %v9761_v55 = vpop.f32.mrf.mxu0  ;;  %10060 = vmatmul.mubr.msk.f32.gmra.mxu0 %vm363_vm2, %v15832_v21  ;;  %10254 = vmatprep.subr.msk.mxu0 %vm428_vm0, %v12703_v60  ;;  %v15834_v54 = vld [vmem:[#allocation68_spill] sm:$0xff] }
 0x13b   : > { %v9711_v52 = vpop.f32.mrf.mxu1  ;;  %10010 = vmatmul.mubr.msk.f32.gmra.mxu1 %vm363_vm2, %v15833_v28  ;;  %10062 = vmatprep.mubr.msk.f32.mxu0 %vm363_vm2, %v10964_v16  ;;  %v15835_v16 = vld [vmem:[#allocation71_spill] sm:$0xff] }
 0x13c   : > { %v12727_v5 = vadd.f32 %v1978_v32, %v1731_v1  ;;  %v1734_v47 = vadd.f32 %v9711_v52, %v12472_v61  ;;  %v1988_v35 = vpop.f32.mrf.mxu0  ;;  %10012 = vmatprep.mubr.msk.f32.mxu1 %vm363_vm2, %v15834_v54  ;;  %v10966_v61 = vld [vmem:[%s11060_s23 + $0x78] sm:$0xff]  ;;  %v15836_v52 = vld [vmem:[#allocation72_spill] sm:$0xff]  ;;  %v10967_v54 = vld [vmem:[%s11060_s23 + $0x80] sm:$0xff] }
 0x13d   : > { %v1582_v27 = vpop.f32.mrf.mxu1 }
 0x13e   : > { %v12732_v30 = vadd.f32 %v9761_v55, %v1734_v47  ;;  %v1733_v21 = vadd.f32 %v1582_v27, %v12481_v46  ;;  %v9764_v9 = vpop.f32.mrf.mxu0  ;;  %10063 = vmatmul.mubr.msk.f32.gmra.mxu0 %vm363_vm2, %v10965_v49 }
 0x13f   : > { %v9714_v28 = vpop.f32.mrf.mxu1  ;;  %10013 = vmatmul.mubr.msk.f32.gmra.mxu1 %vm363_vm2, %v15835_v16  ;;  %10065 = vmatprep.mubr.msk.f32.mxu0 %vm363_vm2, %v10966_v61  ;;  %v15837_v61 = vld [vmem:[#allocation74_spill] sm:$0xff] }
 0x140   : > { %v12741_v32 = vadd.f32 %v1988_v35, %v1733_v21  ;;  %v1736_v1 = vadd.f32 %v9714_v28, %v12486_v39  ;;  %v1998_v55 = vpop.f32.mrf.mxu0  ;;  %10015 = vmatprep.mubr.msk.f32.mxu1 %vm363_vm2, %v15836_v52  ;;  %v10968_v39 = vld [vmem:[%s11060_s23 + $0x90] sm:$0xff]  ;;  %v10969_v52 = vld [vmem:[%s11060_s23 + $0x98] sm:$0xff] }
 0x141   : > { %v1592_v46 = vpop.f32.mrf.mxu1  ;;  %v15838_v21 = vld [vmem:[#allocation76_spill] sm:$0xff] }
 0x142   : > { %v12746_v47 = vadd.f32 %v9764_v9, %v1736_v1  ;;  %v1735_v49 = vadd.f32 %v1592_v46, %v12495_v51  ;;  %v9767_v27 = vpop.f32.mrf.mxu0  ;;  %10066 = vmatmul.mubr.msk.f32.gmra.mxu0 %vm363_vm2, %v10967_v54 }
 0x143   : > { %v9717_v16 = vpop.f32.mrf.mxu1  ;;  %10016 = vmatmul.mubr.msk.f32.gmra.mxu1 %vm363_vm2, %v15837_v61  ;;  %10068 = vmatprep.mubr.msk.f32.mxu0 %vm363_vm2, %v10968_v39  ;;  %v15839_v39 = vld [vmem:[#allocation79_spill] sm:$0xff] }
 0x144   : > { %v12755_v28 = vadd.f32 %v1998_v55, %v1735_v49  ;;  %v1738_v9 = vadd.f32 %v9717_v16, %v12500_v42  ;;  %v2008_v35 = vpop.f32.mrf.mxu0  ;;  %10018 = vmatprep.mubr.msk.f32.mxu1 %vm363_vm2, %v15838_v21  ;;  %v10970_v55 = vld [vmem:[%s11060_s23 + $0xa8] sm:$0xff]  ;;  %v10971_v21 = vld [vmem:[%s11060_s23 + $0xb0] sm:$0xff] }
 0x145   : > { %v1602_v51 = vpop.f32.mrf.mxu1 }
 0x146   : > { %v12760_v1 = vadd.f32 %v9767_v27, %v1738_v9  ;;  %v1737_v54 = vadd.f32 %v1602_v51, %v12509_v31  ;;  %v9770_v46 = vpop.f32.mrf.mxu0  ;;  %10069 = vmatmul.mubr.msk.f32.gmra.mxu0 %vm363_vm2, %v10969_v52  ;;  %v15840_v27 = vld [vmem:[#allocation80_spill] sm:$0xff] }
 0x147   : > { %v9720_v61 = vpop.f32.mrf.mxu1  ;;  %10019 = vmatmul.mubr.msk.f32.gmra.mxu1 %vm363_vm2, %v15839_v39  ;;  %10071 = vmatprep.mubr.msk.f32.mxu0 %vm363_vm2, %v10970_v55 }
 0x148   : > { %v12769_v42 = vadd.f32 %v2008_v35, %v1737_v54  ;;  %v1740_v16 = vadd.f32 %v9720_v61, %v12514_v58  ;;  %v2018_v49 = vpop.f32.mrf.mxu0  ;;  %10021 = vmatprep.mubr.msk.f32.mxu1 %vm363_vm2, %v15840_v27  ;;  %v15842_v35 = vld [vmem:[#allocation122_spill] sm:$0xff]  ;;  %v15845_v27 = vld [vmem:[#allocation87_spill] sm:$0xff] }
 0x149   : > { %v1612_v31 = vpop.f32.mrf.mxu1 }
 0x14a   : > { %v12774_v9 = vadd.f32 %v9770_v46, %v1740_v16  ;;  %v1739_v52 = vadd.f32 %v1612_v31, %v12523_v18  ;;  %v9773_v51 = vpop.f32.mrf.mxu0  ;;  %10072 = vmatmul.mubr.msk.f32.gmra.mxu0 %vm363_vm2, %v10971_v21  ;;  %v15843_v46 = vld [vmem:[#allocation84_spill] sm:$0xff]  ;;  %v15844_v31 = vld [vmem:[#allocation123_spill] sm:$0xff] }
 0x14b   : > { %v9723_v39 = vpop.f32.mrf.mxu1  ;;  %10022 = vmatmul.mubr.msk.f32.gmra.mxu1 %vm363_vm2, %v15841_v37  ;;  %10074 = vmatprep.mubr.msk.f32.mxu0 %vm363_vm2, %v15842_v35 }
 0x14c   : > { %v12783_v58 = vadd.f32 %v2018_v49, %v1739_v52  ;;  %v1742_v61 = vadd.f32 %v9723_v39, %v12528_v2  ;;  %v2028_v54 = vpop.f32.mrf.mxu0  ;;  %10024 = vmatprep.mubr.msk.f32.mxu1 %vm363_vm2, %v15843_v46  ;;  %v15846_v49 = vld [vmem:[#allocation124_spill] sm:$0xff]  ;;  %v15849_v46 = vld [vmem:[#allocation90_spill] sm:$0xff] }
 0x14d   : > { %v1622_v18 = vpop.f32.mrf.mxu1 }
 0x14e   : > { %v12788_v55 = vadd.f32 %v9773_v51, %v1742_v61  ;;  %v1741_v21 = vadd.f32 %v1622_v18, %v12537_v53  ;;  %v9776_v16 = vpop.f32.mrf.mxu0  ;;  %10075 = vmatmul.mubr.msk.f32.gmra.mxu0 %vm363_vm2, %v15844_v31  ;;  %v15847_v51 = vld [vmem:[#allocation88_spill] sm:$0xff]  ;;  %v15848_v31 = vld [vmem:[#allocation125_spill] sm:$0xff] }
 0x14f   : > { %v9726_v37 = vpop.f32.mrf.mxu1  ;;  %10025 = vmatmul.mubr.msk.f32.gmra.mxu1 %vm363_vm2, %v15845_v27  ;;  %10077 = vmatprep.mubr.msk.f32.mxu0 %vm363_vm2, %v15846_v49 }
 0x150   : > { %v12797_v2 = vadd.f32 %v2028_v54, %v1741_v21  ;;  %v1744_v39 = vadd.f32 %v9726_v37, %v12542_v48  ;;  %v2038_v52 = vpop.f32.mrf.mxu0  ;;  %10027 = vmatprep.mubr.msk.f32.mxu1 %vm363_vm2, %v15847_v51  ;;  %v15850_v54 = vld [vmem:[#allocation126_spill] sm:$0xff]  ;;  %v15853_v51 = vld [vmem:[#allocation95_spill] sm:$0xff] }
 0x151   : > { %v1632_v53 = vpop.f32.mrf.mxu1 }
 0x152   : > { %v12802_v35 = vadd.f32 %v9776_v16, %v1744_v39  ;;  %v1743_v61 = vadd.f32 %v1632_v53, %v12551_v0  ;;  %v9779_v18 = vpop.f32.mrf.mxu0  ;;  %10078 = vmatmul.mubr.msk.f32.gmra.mxu0 %vm363_vm2, %v15848_v31  ;;  %v15851_v16 = vld [vmem:[#allocation92_spill] sm:$0xff]  ;;  %v15852_v31 = vld [vmem:[#allocation127_spill] sm:$0xff] }
 0x153   : > { %v9729_v27 = vpop.f32.mrf.mxu1  ;;  %10028 = vmatmul.mubr.msk.f32.gmra.mxu1 %vm363_vm2, %v15849_v46  ;;  %10080 = vmatprep.mubr.msk.f32.mxu0 %vm363_vm2, %v15850_v54 }
 0x154   : > { %v12811_v48 = vadd.f32 %v2038_v52, %v1743_v61  ;;  %v1746_v37 = vadd.f32 %v9729_v27, %v12556_v38  ;;  %v2048_v21 = vpop.f32.mrf.mxu0  ;;  %10030 = vmatprep.mubr.msk.f32.mxu1 %vm363_vm2, %v15851_v16  ;;  %v15854_v52 = vld [vmem:[#allocation128_spill] sm:$0xff]  ;;  %v15857_v16 = vld [vmem:[#allocation98_spill] sm:$0xff] }
 0x155   : > { %v1642_v0 = vpop.f32.mrf.mxu1 }
 0x156   : > { %v12816_v49 = vadd.f32 %v9779_v18, %v1746_v37  ;;  %v1745_v39 = vadd.f32 %v1642_v0, %v12565_v44  ;;  %v9782_v53 = vpop.f32.mrf.mxu0  ;;  %10081 = vmatmul.mubr.msk.f32.gmra.mxu0 %vm363_vm2, %v15852_v31  ;;  %v15855_v18 = vld [vmem:[#allocation96_spill] sm:$0xff]  ;;  %v15856_v31 = vld [vmem:[#allocation129_spill] sm:$0xff] }
 0x157   : > { %v9732_v46 = vpop.f32.mrf.mxu1  ;;  %10031 = vmatmul.mubr.msk.f32.gmra.mxu1 %vm363_vm2, %v15853_v51  ;;  %10083 = vmatprep.mubr.msk.f32.mxu0 %vm363_vm2, %v15854_v52 }
 0x158   : > { %v12825_v38 = vadd.f32 %v2048_v21, %v1745_v39  ;;  %v1748_v27 = vadd.f32 %v9732_v46, %v12570_v59  ;;  %v2058_v61 = vpop.f32.mrf.mxu0  ;;  %10033 = vmatprep.mubr.msk.f32.mxu1 %vm363_vm2, %v15855_v18  ;;  %v15858_v21 = vld [vmem:[#allocation130_spill] sm:$0xff]  ;;  %v15861_v18 = vld [vmem:[#allocation103_spill] sm:$0xff] }
 0x159   : > { %v1652_v44 = vpop.f32.mrf.mxu1 }
 0x15a   : > { %v12830_v54 = vadd.f32 %v9782_v53, %v1748_v27  ;;  %v1747_v37 = vadd.f32 %v1652_v44, %v12579_v20  ;;  %v9785_v0 = vpop.f32.mrf.mxu0  ;;  %10084 = vmatmul.mubr.msk.f32.gmra.mxu0 %vm363_vm2, %v15856_v31  ;;  %v15859_v53 = vld [vmem:[#allocation100_spill] sm:$0xff]  ;;  %v15860_v31 = vld [vmem:[#allocation131_spill] sm:$0xff] }
 0x15b   : > { %v9735_v51 = vpop.f32.mrf.mxu1  ;;  %10034 = vmatmul.mubr.msk.f32.gmra.mxu1 %vm363_vm2, %v15857_v16  ;;  %10086 = vmatprep.mubr.msk.f32.mxu0 %vm363_vm2, %v15858_v21 }
 0x15c   : > { %v12839_v59 = vadd.f32 %v2058_v61, %v1747_v37  ;;  %v1750_v46 = vadd.f32 %v9735_v51, %v12584_v63  ;;  %v2068_v39 = vpop.f32.mrf.mxu0  ;;  %10036 = vmatprep.mubr.msk.f32.mxu1 %vm363_vm2, %v15859_v53  ;;  %v15862_v61 = vld [vmem:[#allocation132_spill] sm:$0xff]  ;;  %v15869_v53 = vld [vmem:[#allocation111_spill] sm:$0xff] }
 0x15d   : > { %v1662_v20 = vpop.f32.mrf.mxu1 }
 0x15e   : > { %v12844_v52 = vadd.f32 %v9785_v0, %v1750_v46  ;;  %v1749_v27 = vadd.f32 %v1662_v20, %v12593_v57  ;;  %v9788_v44 = vpop.f32.mrf.mxu0  ;;  %10087 = vmatmul.mubr.msk.f32.gmra.mxu0 %vm363_vm2, %v15860_v31  ;;  %v15863_v0 = vld [vmem:[#allocation104_spill] sm:$0xff]  ;;  %v15864_v31 = vld [vmem:[#allocation135_spill] sm:$0xff] }
 0x15f   : > { %v9738_v16 = vpop.f32.mrf.mxu1  ;;  %10037 = vmatmul.mubr.msk.f32.gmra.mxu1 %vm363_vm2, %v15861_v18  ;;  %10089 = vmatprep.mubr.msk.f32.mxu0 %vm363_vm2, %v15862_v61  ;;  %v15865_v61 = vld [vmem:[#allocation106_spill] sm:$0xff] }
 0x160   : > { %v12853_v63 = vadd.f32 %v2068_v39, %v1749_v27  ;;  %v1752_v51 = vadd.f32 %v9738_v16, %v12598_v34  ;;  %v2078_v37 = vpop.f32.mrf.mxu0  ;;  %10039 = vmatprep.mubr.msk.f32.mxu1 %vm363_vm2, %v15863_v0  ;;  %v15866_v39 = vld [vmem:[#allocation136_spill] sm:$0xff] }
 0x161   : > { %v1672_v57 = vpop.f32.mrf.mxu1  ;;  %v15868_v0 = vld [vmem:[#allocation140_spill] sm:$0xff] }
 0x162   : > { %v12858_v21 = vadd.f32 %v9788_v44, %v1752_v51  ;;  %v1751_v46 = vadd.f32 %v1672_v57, %v12607_v50  ;;  %v9791_v20 = vpop.f32.mrf.mxu0  ;;  %10090 = vmatmul.mubr.msk.f32.gmra.mxu0 %vm363_vm2, %v15864_v31  ;;  %v15867_v44 = vld [vmem:[#allocation108_spill] sm:$0xff] }
 0x163   : > { %v9741_v18 = vpop.f32.mrf.mxu1  ;;  %10040 = vmatmul.mubr.msk.f32.gmra.mxu1 %vm363_vm2, %v15865_v61  ;;  %10092 = vmatprep.mubr.msk.f32.mxu0 %vm363_vm2, %v15866_v39  ;;  %v3251_v39 = vrot.slane %v12338_v24, 4 }
 0x164   : > { %v12867_v34 = vadd.f32 %v2078_v37, %v1751_v46  ;;  %v1754_v16 = vadd.f32 %v9741_v18, %v12612_v11  ;;  %v2088_v27 = vpop.f32.mrf.mxu0  ;;  %10042 = vmatprep.mubr.msk.f32.mxu1 %vm363_vm2, %v15867_v44  ;;  %v10972_v37 = vld [vmem:[%s11060_s23 + $0x168] sm:$0xff] }
 0x165   : > { %v1682_v50 = vpop.f32.mrf.mxu1 }
 0x166   : > { %v12872_v51 = vadd.f32 %v9791_v20, %v1754_v16  ;;  %v1753_v57 = vadd.f32 %v1682_v50, %v12621_v29  ;;  %v9794_v31 = vpop.f32.mrf.mxu0  ;;  %10093 = vmatmul.mubr.msk.f32.gmra.mxu0 %vm363_vm2, %v15868_v0  ;;  %v15870_v20 = vld [vmem:[#allocation112_spill] sm:$0xff]  ;;  %v3252_v0 = vrot.slane %v15807_v17, 4 }
 0x167   : > { %v9744_v61 = vpop.f32.mrf.mxu1  ;;  %10043 = vmatmul.mubr.msk.f32.gmra.mxu1 %vm363_vm2, %v15869_v53  ;;  %10095 = vmatprep.mubr.msk.f32.mxu0 %vm363_vm2, %v10972_v37  ;;  %v15871_v37 = vld [vmem:[#allocation144_spill] sm:$0xff] }
 0x168   : > { %v12881_v11 = vadd.f32 %v2088_v27, %v1753_v57  ;;  %v1756_v18 = vadd.f32 %v9744_v61, %v12630_v25  ;;  %v2098_v46 = vpop.f32.mrf.mxu0  ;;  %10045 = vmatprep.mubr.msk.f32.mxu1 %vm363_vm2, %v15870_v20  ;;  %v15872_v25 = vld [vmem:[#allocation114_spill] sm:$0xff]  ;;  %v12907_v20 = vsel %vm428_vm0, %v3251_v39, %v3252_v0 }
 0x169   : > { %v1692_v29 = vpop.f32.mrf.mxu1  ;;  %15874 = vst [vmem:[#allocation138_spill] sm:$0xff] %v12907_v20 }
 0x16a   : > { %v12888_v16 = vadd.f32 %v9794_v31, %v1756_v18  ;;  %v1755_v50 = vadd.f32 %v1692_v29, %v12640_v62  ;;  %v9797_v53 = vpop.f32.mrf.mxu0  ;;  %10096 = vmatmul.mubr.msk.f32.gmra.mxu0 %vm363_vm2, %v15871_v37  ;;  %v15873_v18 = vld [vmem:[#allocation116_spill] sm:$0xff]  ;;  %v12903_v62 = vld [vmem:[%s11060_s23 + $0x198] sm:$0xff]  ;;  %v3254_v29 = vrot.slane %v15812_v13, 4  ;;  %v12919_v13 = vld [vmem:[%s11060_s23 + $0x1a0] sm:$0xff] }
 0x16b   : > { %v9747_v27 = vpop.f32.mrf.mxu1  ;;  %10046 = vmatmul.mubr.msk.f32.gmra.mxu1 %vm363_vm2, %v15872_v25  ;;  %10098 = vmatprep.mubr.msk.f32.mxu0 %vm363_vm2, %v12338_v24 }
 0x16c   : > { %v12897_v61 = vadd.f32 %v2098_v46, %v1755_v50  ;;  %v1758_v57 = vadd.f32 %v9747_v27, %v12652_v26  ;;  %v2108_v31 = vpop.f32.mrf.mxu0  ;;  %10048 = vmatprep.mubr.msk.f32.mxu1 %vm363_vm2, %v15873_v18  ;;  %v15875_v50 = vld [vmem:[#allocation118_spill] sm:$0xff] }
 0x16d   : > { %v1702_v37 = vpop.f32.mrf.mxu1 }
 0x16e   : > { %v12909_v25 = vadd.f32 %v9797_v53, %v1758_v57  ;;  %v1757_v24 = vadd.f32 %v1702_v37, %v12664_v36  ;;  %v9800_v46 = vpop.f32.mrf.mxu0  ;;  %10099 = vmatmul.mubr.msk.f32.gmra.mxu0 %vm363_vm2, %v15807_v17  ;;  %v12927_v36 = vsel %vm428_vm0, %v3252_v0, %v3254_v29 }
 0x16f   : > { %v9750_v26 = vpop.f32.mrf.mxu1  ;;  %10049 = vmatmul.mubr.msk.f32.gmra.mxu1 %vm363_vm2, %v15875_v50  ;;  %10101 = vmatprep.mubr.msk.f32.mxu0 %vm363_vm2, %v12903_v62  ;;  %15876 = vst [vmem:[#allocation137_spill] sm:$0xff] %v12927_v36 }
 0x170   : > { %v12921_v27 = vadd.f32 %v2108_v31, %v1757_v24  ;;  %v1760_v53 = vadd.f32 %v9750_v26, %v12672_v8  ;;  %v2118_v39 = vpop.f32.mrf.mxu0  ;;  %10051 = vmatprep.mubr.msk.f32.mxu1 %vm363_vm2, %v12907_v20  ;;  %v15877_v24 = vld [vmem:[#allocation8_spill] sm:$0xff] }
 0x171   : > { %v1712_v17 = vpop.f32.mrf.mxu1 }
 0x172   : > { %v12929_v57 = vadd.f32 %v9800_v46, %v1760_v53  ;;  %v1759_v37 = vadd.f32 %v1712_v17, %v12681_v56  ;;  %v9803_v50 = vpop.f32.mrf.mxu0  ;;  %10102 = vmatmul.mubr.msk.f32.gmra.mxu0 %vm363_vm2, %v12919_v13  ;;  %v15878_v17 = vld [vmem:[#allocation37_spill] sm:$0xff] }
 0x173   : > { %v9753_v31 = vpop.f32.mrf.mxu1  ;;  %10052 = vmatmul.mubr.msk.f32.gmra.mxu1 %vm363_vm2, %v12927_v36  ;;  %10156 = vmatprep.mubr.msk.f32.mxu0 %vm363_vm2, %v15783_v4  ;;  %v12951_v4 = vld [vmem:[%s15265_s1 + $0x3c] sm:$0xf] }
 0x174   : > { %v12938_v8 = vadd.f32 %v2118_v39, %v1759_v37  ;;  %v1762_v0 = vadd.f32 %v9753_v31, %v12686_v33  ;;  %v2128_v29 = vpop.f32.mrf.mxu0  ;;  %10106 = vmatprep.mubr.msk.f32.mxu1 %vm363_vm2, %v15877_v24  ;;  %v15879_v33 = vld [vmem:[#allocation10_spill] sm:$0xff] }
 0x175   : > { %v1722_v56 = vpop.f32.mrf.mxu1 }
 0x176   : > { %v12943_v46 = vadd.f32 %v9803_v50, %v1762_v0  ;;  %v1761_v26 = vadd.f32 %v1722_v56, %v12705_v6  ;;  %v9858_v53 = vpop.f32.mrf.mxu0  ;;  %10157 = vmatmul.mubr.msk.f32.vlgmr.msra.gmra.mxu0 %vm363_vm2, %v15878_v17  ;;  %v12960_v6 = vld [vmem:[%s15265_s1 + $0x40] sm:$0xf]  ;;  %v15880_v0 = vld [vmem:[#allocation12_spill] sm:$0xff] }
 0x177   : > { %v9808_v39 = vpop.f32.mrf.mxu1  ;;  %10107 = vmatmul.mubr.msk.f32.vlgmr.msra.gmra.mxu1 %vm363_vm2, %v15879_v33  ;;  %10255 = vmatpush3.msk.msra.mxu0 %vm428_vm0, %v12703_v60 }
 0x178   : > { %v12962_v50 = vadd.f32 %v2128_v29, %v1761_v26  ;;  %v2406_v37 = vadd.f32 %v9808_v39, %v12716_v14  ;;  %10205 = vmatpush3.msk.msra.mxu1 %vm428_vm0, %v12694_v12  ;;  %v2518_v31 = vpop.f32.mrf.mxu0  ;;  %10109 = vmatprep.mubr.msk.f32.mxu1 %vm363_vm2, %v15880_v0  ;;  %v15881_v14 = vld [vmem:[#allocation14_spill] sm:$0xff] }
 0x179   : > { %v2246_v24 = vpop.f32.mrf.mxu1  ;;  %10159 = vmatprep.mubr.msk.f32.mxu0 %vm363_vm2, %v11493_v3  ;;  %10304 = vmatprep.subr.msk.mxu1 %vm428_vm0, %v12951_v4  ;;  %v15883_v3 = vld [vmem:[#allocation19_spill] sm:$0xff] }
 0x17a   : > { %v12973_v60 = vadd.f32 %v9858_v53, %v2406_v37  ;;  %v2405_v29 = vadd.f32 %v2246_v24, %v12727_v5  ;;  %v9861_v56 = vpop.f32.mrf.mxu0  ;;  %10160 = vmatmul.mubr.msk.f32.gmra.mxu0 %vm363_vm2, %v15784_v7  ;;  %10354 = vmatprep.subr.msk.mxu0 %vm428_vm0, %v12960_v6  ;;  %v15882_v5 = vld [vmem:[#allocation16_spill] sm:$0xff] }
 0x17b   : > { %v9811_v12 = vpop.f32.mrf.mxu1  ;;  %10110 = vmatmul.mubr.msk.f32.gmra.mxu1 %vm363_vm2, %v15881_v14  ;;  %10162 = vmatprep.mubr.msk.f32.mxu0 %vm363_vm2, %v15785_v41  ;;  %v15885_v41 = vld [vmem:[#allocation24_spill] sm:$0xff] }
 0x17c   : > { %v12984_v26 = vadd.f32 %v2518_v31, %v2405_v29  ;;  %v2408_v53 = vadd.f32 %v9811_v12, %v12732_v30  ;;  %v2528_v17 = vpop.f32.mrf.mxu0  ;;  %10112 = vmatprep.mubr.msk.f32.mxu1 %vm363_vm2, %v15882_v5 }
 0x17d   : > { %v2256_v39 = vpop.f32.mrf.mxu1 }
 0x17e   : > { %v12989_v33 = vadd.f32 %v9861_v56, %v2408_v53  ;;  %v2407_v37 = vadd.f32 %v2256_v39, %v12741_v32  ;;  %v9864_v24 = vpop.f32.mrf.mxu0  ;;  %10163 = vmatmul.mubr.msk.f32.gmra.mxu0 %vm363_vm2, %v15786_v45  ;;  %v15884_v56 = vld [vmem:[#allocation21_spill] sm:$0xff] }
 0x17f   : > { %v9814_v7 = vpop.f32.mrf.mxu1  ;;  %10113 = vmatmul.mubr.msk.f32.gmra.mxu1 %vm363_vm2, %v15883_v3  ;;  %10165 = vmatprep.mubr.msk.f32.mxu0 %vm363_vm2, %v15787_v23  ;;  %v15887_v23 = vld [vmem:[#allocation28_spill] sm:$0xff] }
 0x180   : > { %v12998_v30 = vadd.f32 %v2528_v17, %v2407_v37  ;;  %v2410_v31 = vadd.f32 %v9814_v7, %v12746_v47  ;;  %v2538_v29 = vpop.f32.mrf.mxu0  ;;  %10115 = vmatprep.mubr.msk.f32.mxu1 %vm363_vm2, %v15884_v56  ;;  %v15886_v37 = vld [vmem:[#allocation26_spill] sm:$0xff] }
 0x181   : > { %v2266_v32 = vpop.f32.mrf.mxu1 }
 0x182   : > { %v13003_v12 = vadd.f32 %v9864_v24, %v2410_v31  ;;  %v2409_v53 = vadd.f32 %v2266_v32, %v12755_v28  ;;  %v9867_v39 = vpop.f32.mrf.mxu0  ;;  %10166 = vmatmul.mubr.msk.f32.gmra.mxu0 %vm363_vm2, %v15788_v10 }
 0x183   : > { %v9817_v45 = vpop.f32.mrf.mxu1  ;;  %10116 = vmatmul.mubr.msk.f32.gmra.mxu1 %vm363_vm2, %v15885_v41  ;;  %10168 = vmatprep.mubr.msk.f32.mxu0 %vm363_vm2, %v15789_v40  ;;  %v15889_v40 = vld [vmem:[#allocation32_spill] sm:$0xff]  ;;  %v15925_v41 = vld [vmem:[#allocation133_spill] sm:$0xff] }
 0x184   : > { %v13012_v7 = vadd.f32 %v2538_v29, %v2409_v53  ;;  %v2412_v47 = vadd.f32 %v9817_v45, %v12760_v1  ;;  %v2548_v17 = vpop.f32.mrf.mxu0  ;;  %10118 = vmatprep.mubr.msk.f32.mxu1 %vm363_vm2, %v15886_v37  ;;  %v15888_v53 = vld [vmem:[#allocation30_spill] sm:$0xff]  ;;  %v15922_v37 = vld [vmem:[#allocation141_spill] sm:$0xff] }
 0x185   : > { %v2276_v28 = vpop.f32.mrf.mxu1 }
 0x186   : > { %v13017_v24 = vadd.f32 %v9867_v39, %v2412_v47  ;;  %v2411_v31 = vadd.f32 %v2276_v28, %v12769_v42  ;;  %v9870_v32 = vpop.f32.mrf.mxu0  ;;  %10169 = vmatmul.mubr.msk.f32.gmra.mxu0 %vm363_vm2, %v15790_v15 }
 0x187   : > { %v9820_v10 = vpop.f32.mrf.mxu1  ;;  %10119 = vmatmul.mubr.msk.f32.gmra.mxu1 %vm363_vm2, %v15887_v23  ;;  %10171 = vmatprep.mubr.msk.f32.mxu0 %vm363_vm2, %v15791_v22 }
 0x188   : > { %v13026_v45 = vadd.f32 %v2548_v17, %v2411_v31  ;;  %v2414_v1 = vadd.f32 %v9820_v10, %v12774_v9  ;;  %v2558_v29 = vpop.f32.mrf.mxu0  ;;  %10121 = vmatprep.mubr.msk.f32.mxu1 %vm363_vm2, %v15888_v53  ;;  %v15890_v31 = vld [vmem:[#allocation2_spill] sm:$0xff] }
 0x189   : > { %v2286_v42 = vpop.f32.mrf.mxu1 }
 0x18a   : > { %v13031_v39 = vadd.f32 %v9870_v32, %v2414_v1  ;;  %v2413_v47 = vadd.f32 %v2286_v42, %v12783_v58  ;;  %v9873_v28 = vpop.f32.mrf.mxu0  ;;  %10172 = vmatmul.mubr.msk.f32.gmra.mxu0 %vm363_vm2, %v15792_v43  ;;  %v15891_v43 = vld [vmem:[#allocation49_spill] sm:$0xff] }
 0x18b   : > { %v9823_v15 = vpop.f32.mrf.mxu1  ;;  %10122 = vmatmul.mubr.msk.f32.gmra.mxu1 %vm363_vm2, %v15889_v40  ;;  %10174 = vmatprep.mubr.msk.f32.mxu0 %vm363_vm2, %v15793_v19  ;;  %v15892_v40 = vld [vmem:[#allocation3_spill] sm:$0xff] }
 0x18c   : > { %v13040_v10 = vadd.f32 %v2558_v29, %v2413_v47  ;;  %v2416_v9 = vadd.f32 %v9823_v15, %v12788_v55  ;;  %v2568_v17 = vpop.f32.mrf.mxu0  ;;  %10124 = vmatprep.mubr.msk.f32.mxu1 %vm363_vm2, %v15890_v31  ;;  %v15893_v29 = vld [vmem:[#allocation50_spill] sm:$0xff]  ;;  %v15895_v19 = vld [vmem:[#allocation51_spill] sm:$0xff] }
 0x18d   : > { %v2296_v58 = vpop.f32.mrf.mxu1  ;;  %v15896_v31 = vld [vmem:[#allocation7_spill] sm:$0xff] }
 0x18e   : > { %v13045_v32 = vadd.f32 %v9873_v28, %v2416_v9  ;;  %v2415_v1 = vadd.f32 %v2296_v58, %v12797_v2  ;;  %v9876_v42 = vpop.f32.mrf.mxu0  ;;  %10175 = vmatmul.mubr.msk.f32.gmra.mxu0 %vm363_vm2, %v15891_v43  ;;  %v15894_v28 = vld [vmem:[#allocation5_spill] sm:$0xff] }
 0x18f   : > { %v9826_v22 = vpop.f32.mrf.mxu1  ;;  %10125 = vmatmul.mubr.msk.f32.gmra.mxu1 %vm363_vm2, %v15892_v40  ;;  %10177 = vmatprep.mubr.msk.f32.mxu0 %vm363_vm2, %v15893_v29  ;;  %v15899_v29 = vld [vmem:[#allocation53_spill] sm:$0xff] }
 0x190   : > { %v13054_v15 = vadd.f32 %v2568_v17, %v2415_v1  ;;  %v2418_v55 = vadd.f32 %v9826_v22, %v12802_v35  ;;  %v2578_v47 = vpop.f32.mrf.mxu0  ;;  %10127 = vmatprep.mubr.msk.f32.mxu1 %vm363_vm2, %v15894_v28  ;;  %v15897_v17 = vld [vmem:[#allocation52_spill] sm:$0xff]  ;;  %v15900_v28 = vld [vmem:[#allocation11_spill] sm:$0xff] }
 0x191   : > { %v2306_v2 = vpop.f32.mrf.mxu1 }
 0x192   : > { %v13059_v9 = vadd.f32 %v9876_v42, %v2418_v55  ;;  %v2417_v58 = vadd.f32 %v2306_v2, %v12811_v48  ;;  %v9879_v43 = vpop.f32.mrf.mxu0  ;;  %10178 = vmatmul.mubr.msk.f32.gmra.mxu0 %vm363_vm2, %v15895_v19  ;;  %v15898_v42 = vld [vmem:[#allocation9_spill] sm:$0xff] }
 0x193   : > { %v9829_v40 = vpop.f32.mrf.mxu1  ;;  %10128 = vmatmul.mubr.msk.f32.gmra.mxu1 %vm363_vm2, %v15896_v31  ;;  %10180 = vmatprep.mubr.msk.f32.mxu0 %vm363_vm2, %v15897_v17  ;;  %v15903_v17 = vld [vmem:[#allocation55_spill] sm:$0xff] }
 0x194   : > { %v13068_v22 = vadd.f32 %v2578_v47, %v2417_v58  ;;  %v2420_v35 = vadd.f32 %v9829_v40, %v12816_v49  ;;  %v2588_v1 = vpop.f32.mrf.mxu0  ;;  %10130 = vmatprep.mubr.msk.f32.mxu1 %vm363_vm2, %v15898_v42  ;;  %v15901_v47 = vld [vmem:[#allocation54_spill] sm:$0xff]  ;;  %v15904_v42 = vld [vmem:[#allocation15_spill] sm:$0xff] }
 0x195   : > { %v2316_v48 = vpop.f32.mrf.mxu1 }
 0x196   : > { %v13073_v55 = vadd.f32 %v9879_v43, %v2420_v35  ;;  %v2419_v2 = vadd.f32 %v2316_v48, %v12825_v38  ;;  %v9882_v19 = vpop.f32.mrf.mxu0  ;;  %10181 = vmatmul.mubr.msk.f32.gmra.mxu0 %vm363_vm2, %v15899_v29  ;;  %v15902_v43 = vld [vmem:[#allocation13_spill] sm:$0xff] }
 0x197   : > { %v9832_v31 = vpop.f32.mrf.mxu1  ;;  %10131 = vmatmul.mubr.msk.f32.gmra.mxu1 %vm363_vm2, %v15900_v28  ;;  %10183 = vmatprep.mubr.msk.f32.mxu0 %vm363_vm2, %v15901_v47  ;;  %v15907_v47 = vld [vmem:[#allocation57_spill] sm:$0xff] }
 0x198   : > { %v13082_v40 = vadd.f32 %v2588_v1, %v2419_v2  ;;  %v2422_v49 = vadd.f32 %v9832_v31, %v12830_v54  ;;  %v2598_v58 = vpop.f32.mrf.mxu0  ;;  %10133 = vmatprep.mubr.msk.f32.mxu1 %vm363_vm2, %v15902_v43  ;;  %v15905_v1 = vld [vmem:[#allocation56_spill] sm:$0xff] }
 0x199   : > { %v2326_v38 = vpop.f32.mrf.mxu1  ;;  %v15908_v43 = vld [vmem:[#allocation20_spill] sm:$0xff] }
 0x19a   : > { %v13087_v35 = vadd.f32 %v9882_v19, %v2422_v49  ;;  %v2421_v48 = vadd.f32 %v2326_v38, %v12839_v59  ;;  %v9885_v29 = vpop.f32.mrf.mxu0  ;;  %10184 = vmatmul.mubr.msk.f32.gmra.mxu0 %vm363_vm2, %v15903_v17  ;;  %v15906_v19 = vld [vmem:[#allocation17_spill] sm:$0xff] }
 0x19b   : > { %v9835_v28 = vpop.f32.mrf.mxu1  ;;  %10134 = vmatmul.mubr.msk.f32.gmra.mxu1 %vm363_vm2, %v15904_v42  ;;  %10186 = vmatprep.mubr.msk.f32.mxu0 %vm363_vm2, %v15905_v1  ;;  %v15911_v1 = vld [vmem:[#allocation18_spill] sm:$0xff] }
 0x19c   : > { %v13096_v54 = vadd.f32 %v2598_v58, %v2421_v48  ;;  %v2424_v31 = vadd.f32 %v9835_v28, %v12844_v52  ;;  %v2608_v2 = vpop.f32.mrf.mxu0  ;;  %10136 = vmatprep.mubr.msk.f32.mxu1 %vm363_vm2, %v15906_v19  ;;  %v15909_v58 = vld [vmem:[#allocation58_spill] sm:$0xff]  ;;  %v15912_v19 = vld [vmem:[#allocation25_spill] sm:$0xff] }
 0x19d   : > { %v2336_v59 = vpop.f32.mrf.mxu1 }
 0x19e   : > { %v13101_v49 = vadd.f32 %v9885_v29, %v2424_v31  ;;  %v2423_v38 = vadd.f32 %v2336_v59, %v12853_v63  ;;  %v9888_v17 = vpop.f32.mrf.mxu0  ;;  %10187 = vmatmul.mubr.msk.f32.gmra.mxu0 %vm363_vm2, %v15907_v47  ;;  %v15910_v29 = vld [vmem:[#allocation23_spill] sm:$0xff] }
 0x19f   : > { %v9838_v42 = vpop.f32.mrf.mxu1  ;;  %10137 = vmatmul.mubr.msk.f32.gmra.mxu1 %vm363_vm2, %v15908_v43  ;;  %10189 = vmatprep.mubr.msk.f32.mxu0 %vm363_vm2, %v15909_v58  ;;  %v15915_v58 = vld [vmem:[#allocation59_spill] sm:$0xff] }
 0x1a0   : > { %v13110_v52 = vadd.f32 %v2608_v2, %v2423_v38  ;;  %v2426_v28 = vadd.f32 %v9838_v42, %v12858_v21  ;;  %v2618_v48 = vpop.f32.mrf.mxu0  ;;  %10139 = vmatprep.mubr.msk.f32.mxu1 %vm363_vm2, %v15910_v29  ;;  %v15913_v2 = vld [vmem:[#allocation22_spill] sm:$0xff]  ;;  %v15921_v29 = vld [vmem:[#allocation36_spill] sm:$0xff] }
 0x1a1   : > { %v2346_v63 = vpop.f32.mrf.mxu1 }
 0x1a2   : > { %v13115_v31 = vadd.f32 %v9888_v17, %v2426_v28  ;;  %v2425_v59 = vadd.f32 %v2346_v63, %v12867_v34  ;;  %v9891_v47 = vpop.f32.mrf.mxu0  ;;  %10190 = vmatmul.mubr.msk.f32.gmra.mxu0 %vm363_vm2, %v15911_v1  ;;  %v15914_v17 = vld [vmem:[#allocation27_spill] sm:$0xff] }
 0x1a3   : > { %v9841_v43 = vpop.f32.mrf.mxu1  ;;  %10140 = vmatmul.mubr.msk.f32.gmra.mxu1 %vm363_vm2, %v15912_v19  ;;  %10192 = vmatprep.mubr.msk.f32.mxu0 %vm363_vm2, %v15913_v2  ;;  %v15916_v2 = vld [vmem:[#allocation29_spill] sm:$0xff] }
 0x1a4   : > { %v13124_v21 = vadd.f32 %v2618_v48, %v2425_v59  ;;  %v2428_v42 = vadd.f32 %v9841_v43, %v12872_v51  ;;  %v2628_v38 = vpop.f32.mrf.mxu0  ;;  %10142 = vmatprep.mubr.msk.f32.mxu1 %vm363_vm2, %v15914_v17  ;;  %v15917_v48 = vld [vmem:[#allocation60_spill] sm:$0xff]  ;;  %v3792_v17 = vrot.slane %v12919_v13, 1 }
 0x1a5   : > { %v2356_v34 = vpop.f32.mrf.mxu1 }
 0x1a6   : > { %v13129_v28 = vadd.f32 %v9891_v47, %v2428_v42  ;;  %v2427_v63 = vadd.f32 %v2356_v34, %v12881_v11  ;;  %v9894_v1 = vpop.f32.mrf.mxu0  ;;  %10193 = vmatmul.mubr.msk.f32.gmra.mxu0 %vm363_vm2, %v15915_v58  ;;  %v15918_v47 = vld [vmem:[#allocation31_spill] sm:$0xff]  ;;  %v4062_v11 = vrot.slane %v12903_v62, 2  ;;  %v4063_v42 = vrot.slane %v12919_v13, 2 }
 0x1a7   : > { %v9844_v19 = vpop.f32.mrf.mxu1  ;;  %10143 = vmatmul.mubr.msk.f32.gmra.mxu1 %vm363_vm2, %v15916_v2  ;;  %10195 = vmatprep.mubr.msk.f32.mxu0 %vm363_vm2, %v15917_v48  ;;  %v13146_v34 = vld [vmem:[%s11060_s23 + $0x1a8] sm:$0xf]  ;;  %v3791_v2 = vrot.slane %v12903_v62, 1 }
 0x1a8   : > { %v13138_v51 = vadd.f32 %v2628_v38, %v2427_v63  ;;  %v2430_v43 = vadd.f32 %v9844_v19, %v12888_v16  ;;  %v2638_v59 = vpop.f32.mrf.mxu0  ;;  %10145 = vmatprep.mubr.msk.f32.mxu1 %vm363_vm2, %v15918_v47  ;;  %v15919_v19 = vld [vmem:[#allocation61_spill] sm:$0xff]  ;;  %v4065_v53 = vrot.slane %v13146_v34, 2 }
 0x1a9   : > { %v2366_v58 = vpop.f32.mrf.mxu1  ;;  %v15920_v47 = vld [vmem:[#allocation33_spill] sm:$0xff] }
 0x1aa   : > { %v13150_v48 = vadd.f32 %v9894_v1, %v2430_v43  ;;  %v2429_v38 = vadd.f32 %v2366_v58, %v12897_v61  ;;  %v9897_v16 = vpop.f32.mrf.mxu0  ;;  %10196 = vmatmul.mubr.msk.f32.gmra.mxu0 %vm363_vm2, %v15919_v19  ;;  %v13166_v61 = vsel %vm949_vm3, %v4062_v11, %v4063_v42  ;;  %v3794_v58 = vrot.slane %v13146_v34, 1 }
 0x1ab   : > { %v9847_v63 = vpop.f32.mrf.mxu1  ;;  %10146 = vmatmul.mubr.msk.f32.gmra.mxu1 %vm363_vm2, %v15920_v47  ;;  %10198 = vmatprep.mubr.msk.f32.mxu0 %vm363_vm2, %v15921_v29  ;;  %15923 = vst [vmem:[#allocation139_spill] sm:$0xff] %v13166_v61  ;;  %v13170_v47 = vsel %vm280_vm1, %v3791_v2, %v3792_v17  ;;  %v13182_v11 = vsel %vm949_vm3, %v4063_v42, %v4065_v53 }
 0x1ac   : > { %v13160_v23 = vadd.f32 %v2638_v59, %v2429_v38  ;;  %v2432_v1 = vadd.f32 %v9847_v63, %v12909_v25  ;;  %v2648_v43 = vpop.f32.mrf.mxu0  ;;  %10148 = vmatprep.mubr.msk.f32.mxu1 %vm363_vm2, %v15922_v37  ;;  %15924 = vst [vmem:[#allocation142_spill] sm:$0xff] %v13170_v47  ;;  %v15926_v63 = vld [vmem:[#allocation145_spill] sm:$0xff]  ;;  %15927 = vst [vmem:[#allocation143_spill] sm:$0xff] %v13182_v11 }
 0x1ad   : > { %v2376_v19 = vpop.f32.mrf.mxu1 }
 0x1ae   : > { %v13172_v29 = vadd.f32 %v9897_v16, %v2432_v1  ;;  %v2431_v59 = vadd.f32 %v2376_v19, %v12921_v27  ;;  %v9900_v38 = vpop.f32.mrf.mxu0  ;;  %10199 = vmatmul.mubr.msk.f32.gmra.mxu0 %vm363_vm2, %v15925_v41  ;;  %v13190_v27 = vsel %vm280_vm1, %v3792_v17, %v3794_v58  ;;  %v15930_v58 = vld [vmem:[#allocation65_spill] sm:$0xff] }
 0x1af   : > { %v9850_v25 = vpop.f32.mrf.mxu1  ;;  %10149 = vmatmul.mubr.msk.f32.gmra.mxu1 %vm363_vm2, %v15926_v63  ;;  %10201 = vmatprep.mubr.msk.f32.mxu0 %vm363_vm2, %v13166_v61  ;;  %15928 = vst [vmem:[#allocation146_spill] sm:$0xff] %v13190_v27 }
 0x1b0   : > { %v13184_v2 = vadd.f32 %v2648_v43, %v2431_v59  ;;  %v2434_v16 = vadd.f32 %v9850_v25, %v12929_v57  ;;  %v2658_v1 = vpop.f32.mrf.mxu0  ;;  %10151 = vmatprep.mubr.msk.f32.mxu1 %vm363_vm2, %v13170_v47  ;;  %v15929_v57 = vld [vmem:[#allocation64_spill] sm:$0xff] }
 0x1b1   : > { %v2386_v19 = vpop.f32.mrf.mxu1 }
 0x1b2   : > { %v13192_v41 = vadd.f32 %v9900_v38, %v2434_v16  ;;  %v2433_v63 = vadd.f32 %v2386_v19, %v12938_v8  ;;  %v9903_v61 = vpop.f32.mrf.mxu0  ;;  %10202 = vmatmul.mubr.msk.f32.gmra.mxu0 %vm363_vm2, %v13182_v11  ;;  %v15931_v16 = vld [vmem:[#allocation66_spill] sm:$0xff] }
 0x1b3   : > { %v9853_v53 = vpop.f32.mrf.mxu1  ;;  %10152 = vmatmul.mubr.msk.f32.gmra.mxu1 %vm363_vm2, %v13190_v27  ;;  %10256 = vmatprep.mubr.msk.f32.mxu0 %vm363_vm2, %v15929_v57  ;;  %v15933_v57 = vld [vmem:[#allocation69_spill] sm:$0xff]  ;;  %v15939_v11 = vld [vmem:[#allocation74_spill] sm:$0xff] }
 0x1b4   : > { %v13201_v42 = vadd.f32 %v2658_v1, %v2433_v63  ;;  %v2436_v17 = vadd.f32 %v9853_v53, %v12943_v46  ;;  %v2668_v43 = vpop.f32.mrf.mxu0  ;;  %10206 = vmatprep.mubr.msk.f32.mxu1 %vm363_vm2, %v15930_v58  ;;  %v13214_v63 = vld [vmem:[%s15265_s1 + $0x44] sm:$0xf]  ;;  %v15932_v46 = vld [vmem:[#allocation67_spill] sm:$0xff]  ;;  %v15934_v58 = vld [vmem:[#allocation68_spill] sm:$0xff] }
 0x1b5   : > { %v2396_v8 = vpop.f32.mrf.mxu1 }
 0x1b6   : > { %v13206_v59 = vadd.f32 %v9903_v61, %v2436_v17  ;;  %v2435_v38 = vadd.f32 %v2396_v8, %v12962_v50  ;;  %v9958_v25 = vpop.f32.mrf.mxu0  ;;  %10257 = vmatmul.mubr.msk.f32.vlgmr.msra.gmra.mxu0 %vm363_vm2, %v15931_v16  ;;  %v13223_v50 = vld [vmem:[%s15265_s1 + $0x48] sm:$0xf]  ;;  %v15937_v16 = vld [vmem:[#allocation72_spill] sm:$0xff] }
 0x1b7   : > { %v9908_v1 = vpop.f32.mrf.mxu1  ;;  %10207 = vmatmul.mubr.msk.f32.vlgmr.msra.gmra.mxu1 %vm363_vm2, %v15932_v46  ;;  %10355 = vmatpush3.msk.msra.mxu0 %vm428_vm0, %v12960_v6 }
 0x1b8   : > { %v13225_v61 = vadd.f32 %v2668_v43, %v2435_v38  ;;  %v2949_v19 = vadd.f32 %v9908_v1, %v12973_v60  ;;  %10305 = vmatpush3.msk.msra.mxu1 %vm428_vm0, %v12951_v4  ;;  %v3060_v53 = vpop.f32.mrf.mxu0  ;;  %10209 = vmatprep.mubr.msk.f32.mxu1 %vm363_vm2, %v15933_v57  ;;  %v15935_v60 = vld [vmem:[#allocation71_spill] sm:$0xff]  ;;  %v15936_v38 = vld [vmem:[#allocation70_spill] sm:$0xff] }
 0x1b9   : > { %v2789_v17 = vpop.f32.mrf.mxu1  ;;  %10259 = vmatprep.mubr.msk.f32.mxu0 %vm363_vm2, %v15934_v58  ;;  %10404 = vmatprep.subr.msk.mxu1 %vm428_vm0, %v13214_v63  ;;  %v15940_v57 = vld [vmem:[#allocation75_spill] sm:$0xff] }
 0x1ba   : > { %v13236_v6 = vadd.f32 %v9958_v25, %v2949_v19  ;;  %v2948_v43 = vadd.f32 %v2789_v17, %v12984_v26  ;;  %v9961_v8 = vpop.f32.mrf.mxu0  ;;  %10260 = vmatmul.mubr.msk.f32.gmra.mxu0 %vm363_vm2, %v15935_v60  ;;  %10454 = vmatprep.subr.msk.mxu0 %vm428_vm0, %v13223_v50  ;;  %v15938_v26 = vld [vmem:[#allocation73_spill] sm:$0xff] }
 0x1bb   : > { %v9911_v4 = vpop.f32.mrf.mxu1  ;;  %10210 = vmatmul.mubr.msk.f32.gmra.mxu1 %vm363_vm2, %v15936_v38  ;;  %10262 = vmatprep.mubr.msk.f32.mxu0 %vm363_vm2, %v15937_v16  ;;  %v15943_v16 = vld [vmem:[#allocation79_spill] sm:$0xff] }
 0x1bc   : > { %v13247_v1 = vadd.f32 %v3060_v53, %v2948_v43  ;;  %v2951_v25 = vadd.f32 %v9911_v4, %v12989_v33  ;;  %v3070_v46 = vpop.f32.mrf.mxu0  ;;  %10212 = vmatprep.mubr.msk.f32.mxu1 %vm363_vm2, %v15938_v26  ;;  %v15941_v53 = vld [vmem:[#allocation76_spill] sm:$0xff]  ;;  %v15944_v26 = vld [vmem:[#allocation78_spill] sm:$0xff] }
 0x1bd   : > { %v2799_v19 = vpop.f32.mrf.mxu1 }
 0x1be   : > { %v13252_v17 = vadd.f32 %v9961_v8, %v2951_v25  ;;  %v2950_v60 = vadd.f32 %v2799_v19, %v12998_v30  ;;  %v9964_v58 = vpop.f32.mrf.mxu0  ;;  %10263 = vmatmul.mubr.msk.f32.gmra.mxu0 %vm363_vm2, %v15939_v11  ;;  %v15942_v8 = vld [vmem:[#allocation77_spill] sm:$0xff] }
 0x1bf   : > { %v9914_v38 = vpop.f32.mrf.mxu1  ;;  %10213 = vmatmul.mubr.msk.f32.gmra.mxu1 %vm363_vm2, %v15940_v57  ;;  %10265 = vmatprep.mubr.msk.f32.mxu0 %vm363_vm2, %v15941_v53  ;;  %v15947_v53 = vld [vmem:[#allocation82_spill] sm:$0xff] }
 0x1c0   : > { %v13261_v33 = vadd.f32 %v3070_v46, %v2950_v60  ;;  %v2953_v43 = vadd.f32 %v9914_v38, %v13003_v12  ;;  %v3080_v4 = vpop.f32.mrf.mxu0  ;;  %10215 = vmatprep.mubr.msk.f32.mxu1 %vm363_vm2, %v15942_v8  ;;  %v15945_v60 = vld [vmem:[#allocation80_spill] sm:$0xff]  ;;  %v15948_v8 = vld [vmem:[#allocation83_spill] sm:$0xff] }
 0x1c1   : > { %v2809_v30 = vpop.f32.mrf.mxu1 }
 0x1c2   : > { %v13266_v25 = vadd.f32 %v9964_v58, %v2953_v43  ;;  %v2952_v19 = vadd.f32 %v2809_v30, %v13012_v7  ;;  %v9967_v11 = vpop.f32.mrf.mxu0  ;;  %10266 = vmatmul.mubr.msk.f32.gmra.mxu0 %vm363_vm2, %v15943_v16  ;;  %v15946_v58 = vld [vmem:[#allocation81_spill] sm:$0xff] }
 0x1c3   : > { %v9917_v57 = vpop.f32.mrf.mxu1  ;;  %10216 = vmatmul.mubr.msk.f32.gmra.mxu1 %vm363_vm2, %v15944_v26  ;;  %10268 = vmatprep.mubr.msk.f32.mxu0 %vm363_vm2, %v15945_v60  ;;  %v15951_v60 = vld [vmem:[#allocation87_spill] sm:$0xff] }
 0x1c4   : > { %v13275_v12 = vadd.f32 %v3080_v4, %v2952_v19  ;;  %v2955_v38 = vadd.f32 %v9917_v57, %v13017_v24  ;;  %v3090_v46 = vpop.f32.mrf.mxu0  ;;  %10218 = vmatprep.mubr.msk.f32.mxu1 %vm363_vm2, %v15946_v58  ;;  %v15949_v4 = vld [vmem:[#allocation84_spill] sm:$0xff]  ;;  %v15952_v58 = vld [vmem:[#allocation86_spill] sm:$0xff] }
 0x1c5   : > { %v2819_v7 = vpop.f32.mrf.mxu1 }
 0x1c6   : > { %v13280_v43 = vadd.f32 %v9967_v11, %v2955_v38  ;;  %v2954_v30 = vadd.f32 %v2819_v7, %v13026_v45  ;;  %v9970_v16 = vpop.f32.mrf.mxu0  ;;  %10269 = vmatmul.mubr.msk.f32.gmra.mxu0 %vm363_vm2, %v15947_v53  ;;  %v15950_v11 = vld [vmem:[#allocation85_spill] sm:$0xff] }
 0x1c7   : > { %v9920_v26 = vpop.f32.mrf.mxu1  ;;  %10219 = vmatmul.mubr.msk.f32.gmra.mxu1 %vm363_vm2, %v15948_v8  ;;  %10271 = vmatprep.mubr.msk.f32.mxu0 %vm363_vm2, %v15949_v4  ;;  %v15955_v4 = vld [vmem:[#allocation90_spill] sm:$0xff] }
 0x1c8   : > { %v13289_v24 = vadd.f32 %v3090_v46, %v2954_v30  ;;  %v2957_v57 = vadd.f32 %v9920_v26, %v13031_v39  ;;  %v3100_v19 = vpop.f32.mrf.mxu0  ;;  %10221 = vmatprep.mubr.msk.f32.mxu1 %vm363_vm2, %v15950_v11  ;;  %v15953_v46 = vld [vmem:[#allocation88_spill] sm:$0xff]  ;;  %v15956_v11 = vld [vmem:[#allocation91_spill] sm:$0xff] }
 0x1c9   : > { %v2829_v45 = vpop.f32.mrf.mxu1 }
 0x1ca   : > { %v13294_v38 = vadd.f32 %v9970_v16, %v2957_v57  ;;  %v2956_v7 = vadd.f32 %v2829_v45, %v13040_v10  ;;  %v9973_v53 = vpop.f32.mrf.mxu0  ;;  %10272 = vmatmul.mubr.msk.f32.gmra.mxu0 %vm363_vm2, %v15951_v60  ;;  %v15954_v16 = vld [vmem:[#allocation89_spill] sm:$0xff] }
 0x1cb   : > { %v9923_v8 = vpop.f32.mrf.mxu1  ;;  %10222 = vmatmul.mubr.msk.f32.gmra.mxu1 %vm363_vm2, %v15952_v58  ;;  %10274 = vmatprep.mubr.msk.f32.mxu0 %vm363_vm2, %v15953_v46  ;;  %v15959_v46 = vld [vmem:[#allocation95_spill] sm:$0xff] }
 0x1cc   : > { %v13303_v39 = vadd.f32 %v3100_v19, %v2956_v7  ;;  %v2959_v26 = vadd.f32 %v9923_v8, %v13045_v32  ;;  %v3110_v30 = vpop.f32.mrf.mxu0  ;;  %10224 = vmatprep.mubr.msk.f32.mxu1 %vm363_vm2, %v15954_v16  ;;  %v15957_v19 = vld [vmem:[#allocation92_spill] sm:$0xff]  ;;  %v15960_v16 = vld [vmem:[#allocation94_spill] sm:$0xff] }
 0x1cd   : > { %v2839_v10 = vpop.f32.mrf.mxu1 }
 0x1ce   : > { %v13308_v57 = vadd.f32 %v9973_v53, %v2959_v26  ;;  %v2958_v45 = vadd.f32 %v2839_v10, %v13054_v15  ;;  %v9976_v60 = vpop.f32.mrf.mxu0  ;;  %10275 = vmatmul.mubr.msk.f32.gmra.mxu0 %vm363_vm2, %v15955_v4  ;;  %v15958_v53 = vld [vmem:[#allocation93_spill] sm:$0xff] }
 0x1cf   : > { %v9926_v58 = vpop.f32.mrf.mxu1  ;;  %10225 = vmatmul.mubr.msk.f32.gmra.mxu1 %vm363_vm2, %v15956_v11  ;;  %10277 = vmatprep.mubr.msk.f32.mxu0 %vm363_vm2, %v15957_v19  ;;  %v15963_v19 = vld [vmem:[#allocation98_spill] sm:$0xff] }
 0x1d0   : > { %v13317_v32 = vadd.f32 %v3110_v30, %v2958_v45  ;;  %v2961_v8 = vadd.f32 %v9926_v58, %v13059_v9  ;;  %v3120_v7 = vpop.f32.mrf.mxu0  ;;  %10227 = vmatprep.mubr.msk.f32.mxu1 %vm363_vm2, %v15958_v53  ;;  %v15961_v30 = vld [vmem:[#allocation96_spill] sm:$0xff]  ;;  %v15964_v53 = vld [vmem:[#allocation99_spill] sm:$0xff] }
 0x1d1   : > { %v2849_v15 = vpop.f32.mrf.mxu1 }
 0x1d2   : > { %v13322_v26 = vadd.f32 %v9976_v60, %v2961_v8  ;;  %v2960_v10 = vadd.f32 %v2849_v15, %v13068_v22  ;;  %v9979_v4 = vpop.f32.mrf.mxu0  ;;  %10278 = vmatmul.mubr.msk.f32.gmra.mxu0 %vm363_vm2, %v15959_v46  ;;  %v15962_v60 = vld [vmem:[#allocation97_spill] sm:$0xff] }
 0x1d3   : > { %v9929_v11 = vpop.f32.mrf.mxu1  ;;  %10228 = vmatmul.mubr.msk.f32.gmra.mxu1 %vm363_vm2, %v15960_v16  ;;  %10280 = vmatprep.mubr.msk.f32.mxu0 %vm363_vm2, %v15961_v30  ;;  %v15967_v30 = vld [vmem:[#allocation103_spill] sm:$0xff] }
 0x1d4   : > { %v13331_v9 = vadd.f32 %v3120_v7, %v2960_v10  ;;  %v2963_v58 = vadd.f32 %v9929_v11, %v13073_v55  ;;  %v3130_v45 = vpop.f32.mrf.mxu0  ;;  %10230 = vmatprep.mubr.msk.f32.mxu1 %vm363_vm2, %v15962_v60  ;;  %v15965_v7 = vld [vmem:[#allocation100_spill] sm:$0xff]  ;;  %v15968_v60 = vld [vmem:[#allocation102_spill] sm:$0xff] }
 0x1d5   : > { %v2859_v22 = vpop.f32.mrf.mxu1 }
 0x1d6   : > { %v13336_v8 = vadd.f32 %v9979_v4, %v2963_v58  ;;  %v2962_v15 = vadd.f32 %v2859_v22, %v13082_v40  ;;  %v9982_v46 = vpop.f32.mrf.mxu0  ;;  %10281 = vmatmul.mubr.msk.f32.gmra.mxu0 %vm363_vm2, %v15963_v19  ;;  %v15966_v4 = vld [vmem:[#allocation101_spill] sm:$0xff] }
 0x1d7   : > { %v9932_v16 = vpop.f32.mrf.mxu1  ;;  %10231 = vmatmul.mubr.msk.f32.gmra.mxu1 %vm363_vm2, %v15964_v53  ;;  %10283 = vmatprep.mubr.msk.f32.mxu0 %vm363_vm2, %v15965_v7  ;;  %v15971_v7 = vld [vmem:[#allocation106_spill] sm:$0xff] }
 0x1d8   : > { %v13345_v55 = vadd.f32 %v3130_v45, %v2962_v15  ;;  %v2965_v11 = vadd.f32 %v9932_v16, %v13087_v35  ;;  %v3140_v10 = vpop.f32.mrf.mxu0  ;;  %10233 = vmatprep.mubr.msk.f32.mxu1 %vm363_vm2, %v15966_v4  ;;  %v15969_v45 = vld [vmem:[#allocation104_spill] sm:$0xff]  ;;  %v15972_v4 = vld [vmem:[#allocation107_spill] sm:$0xff] }
 0x1d9   : > { %v2869_v40 = vpop.f32.mrf.mxu1 }
 0x1da   : > { %v13350_v58 = vadd.f32 %v9982_v46, %v2965_v11  ;;  %v2964_v22 = vadd.f32 %v2869_v40, %v13096_v54  ;;  %v9985_v19 = vpop.f32.mrf.mxu0  ;;  %10284 = vmatmul.mubr.msk.f32.gmra.mxu0 %vm363_vm2, %v15967_v30  ;;  %v15970_v46 = vld [vmem:[#allocation105_spill] sm:$0xff] }
 0x1db   : > { %v9935_v53 = vpop.f32.mrf.mxu1  ;;  %10234 = vmatmul.mubr.msk.f32.gmra.mxu1 %vm363_vm2, %v15968_v60  ;;  %10286 = vmatprep.mubr.msk.f32.mxu0 %vm363_vm2, %v15969_v45 }
 0x1dc   : > { %v13359_v35 = vadd.f32 %v3140_v10, %v2964_v22  ;;  %v2967_v16 = vadd.f32 %v9935_v53, %v13101_v49  ;;  %v3150_v15 = vpop.f32.mrf.mxu0  ;;  %10236 = vmatprep.mubr.msk.f32.mxu1 %vm363_vm2, %v15970_v46 }
 0x1dd   : > { %v2879_v54 = vpop.f32.mrf.mxu1 }
 0x1de   : > { %v13364_v11 = vadd.f32 %v9985_v19, %v2967_v16  ;;  %v2966_v40 = vadd.f32 %v2879_v54, %v13110_v52  ;;  %v9988_v30 = vpop.f32.mrf.mxu0  ;;  %10287 = vmatmul.mubr.msk.f32.gmra.mxu0 %vm363_vm2, %v15971_v7  ;;  %v15973_v19 = vld [vmem:[#allocation109_spill] sm:$0xff]  ;;  %v15974_v7 = vld [vmem:[#allocation111_spill] sm:$0xff] }
 0x1df   : > { %v9938_v60 = vpop.f32.mrf.mxu1  ;;  %10237 = vmatmul.mubr.msk.f32.gmra.mxu1 %vm363_vm2, %v15972_v4  ;;  %10289 = vmatprep.mubr.msk.f32.mxu0 %vm363_vm2, %v15867_v44  ;;  %v15975_v4 = vld [vmem:[#allocation110_spill] sm:$0xff] }
 0x1e0   : > { %v13373_v49 = vadd.f32 %v3150_v15, %v2966_v40  ;;  %v2969_v53 = vadd.f32 %v9938_v60, %v13115_v31  ;;  %v3160_v10 = vpop.f32.mrf.mxu0  ;;  %10239 = vmatprep.mubr.msk.f32.mxu1 %vm363_vm2, %v15973_v19  ;;  %v15976_v15 = vld [vmem:[#allocation112_spill] sm:$0xff]  ;;  %v15978_v44 = vld [vmem:[#allocation114_spill] sm:$0xff]  ;;  %v15979_v19 = vld [vmem:[#allocation115_spill] sm:$0xff] }
 0x1e1   : > { %v2889_v52 = vpop.f32.mrf.mxu1 }
 0x1e2   : > { %v13378_v22 = vadd.f32 %v9988_v30, %v2969_v53  ;;  %v2968_v16 = vadd.f32 %v2889_v52, %v13124_v21  ;;  %v9991_v54 = vpop.f32.mrf.mxu0  ;;  %10290 = vmatmul.mubr.msk.f32.gmra.mxu0 %vm363_vm2, %v15974_v7  ;;  %v15977_v30 = vld [vmem:[#allocation113_spill] sm:$0xff] }
 0x1e3   : > { %v9941_v45 = vpop.f32.mrf.mxu1  ;;  %10240 = vmatmul.mubr.msk.f32.gmra.mxu1 %vm363_vm2, %v15975_v4  ;;  %10292 = vmatprep.mubr.msk.f32.mxu0 %vm363_vm2, %v15976_v15 }
 0x1e4   : > { %v13387_v31 = vadd.f32 %v3160_v10, %v2968_v16  ;;  %v2971_v60 = vadd.f32 %v9941_v45, %v13129_v28  ;;  %v3170_v40 = vpop.f32.mrf.mxu0  ;;  %10242 = vmatprep.mubr.msk.f32.mxu1 %vm363_vm2, %v15977_v30  ;;  %v15980_v16 = vld [vmem:[#allocation117_spill] sm:$0xff] }
 0x1e5   : > { %v2899_v21 = vpop.f32.mrf.mxu1 }
 0x1e6   : > { %v13392_v53 = vadd.f32 %v9991_v54, %v2971_v60  ;;  %v2970_v52 = vadd.f32 %v2899_v21, %v13138_v51  ;;  %v9994_v7 = vpop.f32.mrf.mxu0  ;;  %10293 = vmatmul.mubr.msk.f32.gmra.mxu0 %vm363_vm2, %v15978_v44  ;;  %v4604_v51 = vrot.slane %v12903_v62, 4  ;;  %v4605_v54 = vrot.slane %v12919_v13, 4 }
 0x1e7   : > { %v9944_v4 = vpop.f32.mrf.mxu1  ;;  %10243 = vmatmul.mubr.msk.f32.gmra.mxu1 %vm363_vm2, %v15979_v19  ;;  %10295 = vmatprep.mubr.msk.f32.mxu0 %vm363_vm2, %v15873_v18  ;;  %v4333_v21 = vrot.slane %v12903_v62, 3  ;;  %v4334_v44 = vrot.slane %v12919_v13, 3  ;;  %v15981_v18 = vld [vmem:[#allocation118_spill] sm:$0xff] }
 0x1e8   : > { %v13401_v28 = vadd.f32 %v3170_v40, %v2970_v52  ;;  %v2973_v45 = vadd.f32 %v9944_v4, %v13150_v48  ;;  %v3180_v10 = vpop.f32.mrf.mxu0  ;;  %10245 = vmatprep.mubr.msk.f32.mxu1 %vm363_vm2, %v15980_v16  ;;  %v15982_v4 = vld [vmem:[#allocation119_spill] sm:$0xff]  ;;  %v4607_v16 = vrot.slane %v13146_v34, 4 }
 0x1e9   : > { %v2909_v60 = vpop.f32.mrf.mxu1 }
 0x1ea   : > { %v13410_v15 = vadd.f32 %v9994_v7, %v2973_v45  ;;  %v2972_v40 = vadd.f32 %v2909_v60, %v13160_v23  ;;  %v9997_v52 = vpop.f32.mrf.mxu0  ;;  %10296 = vmatmul.mubr.msk.f32.gmra.mxu0 %vm363_vm2, %v15981_v18  ;;  %v15983_v45 = vld [vmem:[#allocation35_spill] sm:$0xff]  ;;  %v13426_v23 = vsel %vm428_vm0, %v4604_v51, %v4605_v54  ;;  %v4336_v60 = vrot.slane %v13146_v34, 3 }
 0x1eb   : > { %v9947_v48 = vpop.f32.mrf.mxu1  ;;  %10246 = vmatmul.mubr.msk.f32.gmra.mxu1 %vm363_vm2, %v15982_v4  ;;  %10298 = vmatprep.mubr.msk.f32.mxu0 %vm363_vm2, %v12907_v20  ;;  %15984 = vst [vmem:[#allocation4_spill] sm:$0xff] %v13426_v23  ;;  %v13430_v4 = vsel %vm1356_vm4, %v4333_v21, %v4334_v44  ;;  %v13442_v34 = vsel %vm428_vm0, %v4605_v54, %v4607_v16 }
 0x1ec   : > { %v13420_v62 = vadd.f32 %v3180_v10, %v2972_v40  ;;  %v2975_v13 = vadd.f32 %v9947_v48, %v13172_v29  ;;  %v3190_v7 = vpop.f32.mrf.mxu0  ;;  %10248 = vmatprep.mubr.msk.f32.mxu1 %vm363_vm2, %v15983_v45  ;;  %15985 = vst [vmem:[#allocation147_spill] sm:$0xff] %v13430_v4  ;;  %v15986_v48 = vld [vmem:[#allocation134_spill] sm:$0xff]  ;;  %15987 = vst [vmem:[#allocation62_spill] sm:$0xff] %v13442_v34 }
 0x1ed   : > { %v2919_v18 = vpop.f32.mrf.mxu1 }
 0x1ee   : > { %v13432_v20 = vadd.f32 %v9997_v52, %v2975_v13  ;;  %v2974_v10 = vadd.f32 %v2919_v18, %v13184_v2  ;;  %v10000_v40 = vpop.f32.mrf.mxu0  ;;  %10299 = vmatmul.mubr.msk.f32.gmra.mxu0 %vm363_vm2, %v12927_v36  ;;  %v13450_v2 = vsel %vm1356_vm4, %v4334_v44, %v4336_v60 }
 0x1ef   : > { %v9950_v29 = vpop.f32.mrf.mxu1  ;;  %10249 = vmatmul.mubr.msk.f32.gmra.mxu1 %vm363_vm2, %v15986_v48  ;;  %10301 = vmatprep.mubr.msk.f32.mxu0 %vm363_vm2, %v13426_v23  ;;  %15988 = vst [vmem:[#allocation34_spill] sm:$0xff] %v13450_v2 }
 0x1f0   : > { %v13444_v51 = vadd.f32 %v3190_v7, %v2974_v10  ;;  %v2977_v21 = vadd.f32 %v9950_v29, %v13192_v41  ;;  %v3200_v18 = vpop.f32.mrf.mxu0  ;;  %10251 = vmatprep.mubr.msk.f32.mxu1 %vm363_vm2, %v13430_v4  ;;  %v10973_v7 = vld [vmem:[%s11060_s23 + $0x48] sm:$0xff] }
 0x1f1   : > { %v2929_v52 = vpop.f32.mrf.mxu1 }
 0x1f2   : > { %v13452_v13 = vadd.f32 %v10000_v40, %v2977_v21  ;;  %v2976_v23 = vadd.f32 %v2929_v52, %v13201_v42  ;;  %v10003_v36 = vpop.f32.mrf.mxu0  ;;  %10302 = vmatmul.mubr.msk.f32.gmra.mxu0 %vm363_vm2, %v13442_v34  ;;  %v13491_v21 = vld [vmem:[%s11060_s23 + $0x60] sm:$0xff] }
 0x1f3   : > { %v9953_v16 = vpop.f32.mrf.mxu1  ;;  %10252 = vmatmul.mubr.msk.f32.gmra.mxu1 %vm363_vm2, %v13450_v2  ;;  %10356 = vmatprep.mubr.msk.f32.mxu0 %vm363_vm2, %v15880_v0  ;;  %v13474_v0 = vld [vmem:[%s15265_s1 + $0x4c] sm:$0xf] }
 0x1f4   : > { %v13461_v41 = vadd.f32 %v3200_v18, %v2976_v23  ;;  %v2979_v44 = vadd.f32 %v9953_v16, %v13206_v59  ;;  %v3210_v54 = vpop.f32.mrf.mxu0  ;;  %10306 = vmatprep.mubr.msk.f32.mxu1 %vm363_vm2, %v10973_v7  ;;  %v10974_v23 = vld [vmem:[%s11060_s23 + $0x50] sm:$0xff]  ;;  %v13507_v16 = vld [vmem:[%s11060_s23 + $0x68] sm:$0xff]  ;;  %v13517_v7 = vld [vmem:[%s11060_s23 + $0x78] sm:$0xff] }
 0x1f5   : > { %v2939_v42 = vpop.f32.mrf.mxu1 }
 0x1f6   : > { %v13466_v60 = vadd.f32 %v10003_v36, %v2979_v44  ;;  %v2978_v10 = vadd.f32 %v2939_v42, %v13225_v61  ;;  %v10058_v40 = vpop.f32.mrf.mxu0  ;;  %10357 = vmatmul.mubr.msk.f32.vlgmr.msra.gmra.mxu0 %vm363_vm2, %v15881_v14  ;;  %v13483_v36 = vld [vmem:[%s15265_s1 + $0x50] sm:$0xf] }
 0x1f7   : > { %v10008_v59 = vpop.f32.mrf.mxu1  ;;  %10307 = vmatmul.mubr.msk.f32.vlgmr.msra.gmra.mxu1 %vm363_vm2, %v10974_v23  ;;  %10455 = vmatpush3.msk.msra.mxu0 %vm428_vm0, %v13223_v50  ;;  %v15989_v23 = vld [vmem:[#allocation24_spill] sm:$0xff] }
 0x1f8   : > { %v13485_v61 = vadd.f32 %v3210_v54, %v2978_v10  ;;  %v3491_v14 = vadd.f32 %v10008_v59, %v13236_v6  ;;  %10405 = vmatpush3.msk.msra.mxu1 %vm428_vm0, %v13214_v63  ;;  %v3599_v29 = vpop.f32.mrf.mxu0  ;;  %10309 = vmatprep.mubr.msk.f32.mxu1 %vm363_vm2, %v13491_v21 }
 0x1f9   : > { %v3331_v50 = vpop.f32.mrf.mxu1  ;;  %10359 = vmatprep.mubr.msk.f32.mxu0 %vm363_vm2, %v15882_v5  ;;  %10504 = vmatprep.subr.msk.mxu1 %vm428_vm0, %v13474_v0  ;;  %v15996_v5 = vld [vmem:[#allocation32_spill] sm:$0xff] }
 0x1fa   : > { %v13499_v18 = vadd.f32 %v10058_v40, %v3491_v14  ;;  %v3490_v6 = vadd.f32 %v3331_v50, %v13247_v1  ;;  %v10061_v52 = vpop.f32.mrf.mxu0  ;;  %10360 = vmatmul.mubr.msk.f32.gmra.mxu0 %vm363_vm2, %v15883_v3  ;;  %10554 = vmatprep.subr.msk.mxu0 %vm428_vm0, %v13483_v36 }
 0x1fb   : > { %v10011_v63 = vpop.f32.mrf.mxu1  ;;  %10310 = vmatmul.mubr.msk.f32.gmra.mxu1 %vm363_vm2, %v13507_v16  ;;  %10362 = vmatprep.mubr.msk.f32.mxu0 %vm363_vm2, %v15884_v56  ;;  %v15992_v56 = vld [vmem:[#allocation28_spill] sm:$0xff] }
 0x1fc   : > { %v13513_v44 = vadd.f32 %v3599_v29, %v3490_v6  ;;  %v3493_v1 = vadd.f32 %v10011_v63, %v13252_v17  ;;  %v3609_v54 = vpop.f32.mrf.mxu0  ;;  %10312 = vmatprep.mubr.msk.f32.mxu1 %vm363_vm2, %v13517_v7  ;;  %v13527_v29 = vld [vmem:[%s11060_s23 + $0x80] sm:$0xff] }
 0x1fd   : > { %v3341_v42 = vpop.f32.mrf.mxu1  ;;  %v15990_v17 = vld [vmem:[#allocation26_spill] sm:$0xff] }
 0x1fe   : > { %v13521_v10 = vadd.f32 %v10061_v52, %v3493_v1  ;;  %v3492_v40 = vadd.f32 %v3341_v42, %v13261_v33  ;;  %v10064_v59 = vpop.f32.mrf.mxu0  ;;  %10363 = vmatmul.mubr.msk.f32.gmra.mxu0 %vm363_vm2, %v15989_v23  ;;  %v13537_v52 = vld [vmem:[%s11060_s23 + $0x90] sm:$0xff] }
 0x1ff   : > { %v10014_v14 = vpop.f32.mrf.mxu1  ;;  %10313 = vmatmul.mubr.msk.f32.gmra.mxu1 %vm363_vm2, %v13527_v29  ;;  %10365 = vmatprep.mubr.msk.f32.mxu0 %vm363_vm2, %v15990_v17  ;;  %15991 = vst [vmem:[#allocation6_spill] sm:$0xff] %v13537_v52 }
 0x200   : > { %v13533_v50 = vadd.f32 %v3609_v54, %v3492_v40  ;;  %v3495_v6 = vadd.f32 %v10014_v14, %v13266_v25  ;;  %v3619_v33 = vpop.f32.mrf.mxu0  ;;  %10315 = vmatprep.mubr.msk.f32.mxu1 %vm363_vm2, %v13537_v52  ;;  %v13547_v40 = vld [vmem:[%s11060_s23 + $0x98] sm:$0xff]  ;;  %v15994_v25 = vld [vmem:[#allocation30_spill] sm:$0xff] }
 0x201   : > { %v3351_v63 = vpop.f32.mrf.mxu1  ;;  %15993 = vst [vmem:[#allocation63_spill] sm:$0xff] %v13547_v40 }
 0x202   : > { %v13541_v1 = vadd.f32 %v10064_v59, %v3495_v6  ;;  %v3494_v42 = vadd.f32 %v3351_v63, %v13275_v12  ;;  %v10067_v23 = vpop.f32.mrf.mxu0  ;;  %10366 = vmatmul.mubr.msk.f32.gmra.mxu0 %vm363_vm2, %v15992_v56  ;;  %v13557_v6 = vld [vmem:[%s11060_s23 + $0xa8] sm:$0xff] }
 0x203   : > { %v10017_v54 = vpop.f32.mrf.mxu1  ;;  %10316 = vmatmul.mubr.msk.f32.gmra.mxu1 %vm363_vm2, %v13547_v40  ;;  %10368 = vmatprep.mubr.msk.f32.mxu0 %vm363_vm2, %v15994_v25  ;;  %15995 = vst [vmem:[#allocation120_spill] sm:$0xff] %v13557_v6 }
 0x204   : > { %v13553_v14 = vadd.f32 %v3619_v33, %v3494_v42  ;;  %v3497_v59 = vadd.f32 %v10017_v54, %v13280_v43  ;;  %v3629_v12 = vpop.f32.mrf.mxu0  ;;  %10318 = vmatprep.mubr.msk.f32.mxu1 %vm363_vm2, %v13557_v6  ;;  %v13567_v42 = vld [vmem:[%s11060_s23 + $0xb0] sm:$0xff]  ;;  %v15998_v43 = vld [vmem:[#allocation2_spill] sm:$0xff] }
 0x205   : > { %v3361_v63 = vpop.f32.mrf.mxu1  ;;  %15997 = vst [vmem:[#allocation121_spill] sm:$0xff] %v13567_v42 }
 0x206   : > { %v13561_v56 = vadd.f32 %v10067_v23, %v3497_v59  ;;  %v3496_v17 = vadd.f32 %v3361_v63, %v13289_v24  ;;  %v10070_v3 = vpop.f32.mrf.mxu0  ;;  %10369 = vmatmul.mubr.msk.f32.gmra.mxu0 %vm363_vm2, %v15996_v5  ;;  %v13577_v59 = vld [vmem:[%s11060_s23 + $0xc0] sm:$0xff] }
 0x207   : > { %v10020_v33 = vpop.f32.mrf.mxu1  ;;  %10319 = vmatmul.mubr.msk.f32.gmra.mxu1 %vm363_vm2, %v13567_v42  ;;  %10371 = vmatprep.mubr.msk.f32.mxu0 %vm363_vm2, %v15998_v43  ;;  %15999 = vst [vmem:[#allocation122_spill] sm:$0xff] %v13577_v59  ;;  %v16000_v42 = vld [vmem:[#allocation3_spill] sm:$0xff] }
 0x208   : > { %v13573_v54 = vadd.f32 %v3629_v12, %v3496_v17  ;;  %v3499_v23 = vadd.f32 %v10020_v33, %v13294_v38  ;;  %v3639_v24 = vpop.f32.mrf.mxu0  ;;  %10321 = vmatprep.mubr.msk.f32.mxu1 %vm363_vm2, %v13577_v59  ;;  %v13587_v12 = vld [vmem:[%s11060_s23 + $0xc8] sm:$0xff]  ;;  %v16002_v38 = vld [vmem:[#allocation5_spill] sm:$0xff] }
 0x209   : > { %v3371_v63 = vpop.f32.mrf.mxu1  ;;  %16001 = vst [vmem:[#allocation123_spill] sm:$0xff] %v13587_v12  ;;  %v16004_v59 = vld [vmem:[#allocation7_spill] sm:$0xff] }
 0x20a   : > { %v13581_v5 = vadd.f32 %v10070_v3, %v3499_v23  ;;  %v3498_v25 = vadd.f32 %v3371_v63, %v13303_v39  ;;  %v10073_v34 = vpop.f32.mrf.mxu0  ;;  %10372 = vmatmul.mubr.msk.f32.gmra.mxu0 %vm363_vm2, %v16000_v42  ;;  %v13597_v23 = vld [vmem:[%s11060_s23 + $0xd8] sm:$0xff] }
 0x20b   : > { %v10023_v17 = vpop.f32.mrf.mxu1  ;;  %10322 = vmatmul.mubr.msk.f32.gmra.mxu1 %vm363_vm2, %v13587_v12  ;;  %10374 = vmatprep.mubr.msk.f32.mxu0 %vm363_vm2, %v16002_v38  ;;  %16003 = vst [vmem:[#allocation124_spill] sm:$0xff] %v13597_v23 }
 0x20c   : > { %v13593_v33 = vadd.f32 %v3639_v24, %v3498_v25  ;;  %v3501_v3 = vadd.f32 %v10023_v17, %v13308_v57  ;;  %v3649_v39 = vpop.f32.mrf.mxu0  ;;  %10324 = vmatprep.mubr.msk.f32.mxu1 %vm363_vm2, %v13597_v23  ;;  %v13607_v24 = vld [vmem:[%s11060_s23 + $0xe0] sm:$0xff]  ;;  %v16006_v57 = vld [vmem:[#allocation9_spill] sm:$0xff]  ;;  %v16008_v23 = vld [vmem:[#allocation11_spill] sm:$0xff] }
 0x20d   : > { %v3381_v63 = vpop.f32.mrf.mxu1  ;;  %16005 = vst [vmem:[#allocation125_spill] sm:$0xff] %v13607_v24 }
 0x20e   : > { %v13601_v42 = vadd.f32 %v10073_v34, %v3501_v3  ;;  %v3500_v43 = vadd.f32 %v3381_v63, %v13317_v32  ;;  %v10076_v12 = vpop.f32.mrf.mxu0  ;;  %10375 = vmatmul.mubr.msk.f32.gmra.mxu0 %vm363_vm2, %v16004_v59  ;;  %v13617_v3 = vld [vmem:[%s11060_s23 + $0xf0] sm:$0xff] }
 0x20f   : > { %v10026_v25 = vpop.f32.mrf.mxu1  ;;  %10325 = vmatmul.mubr.msk.f32.gmra.mxu1 %vm363_vm2, %v13607_v24  ;;  %10377 = vmatprep.mubr.msk.f32.mxu0 %vm363_vm2, %v16006_v57  ;;  %16007 = vst [vmem:[#allocation126_spill] sm:$0xff] %v13617_v3 }
 0x210   : > { %v13613_v17 = vadd.f32 %v3649_v39, %v3500_v43  ;;  %v3503_v34 = vadd.f32 %v10026_v25, %v13322_v26  ;;  %v3659_v32 = vpop.f32.mrf.mxu0  ;;  %10327 = vmatprep.mubr.msk.f32.mxu1 %vm363_vm2, %v13617_v3  ;;  %v13627_v39 = vld [vmem:[%s11060_s23 + $0xf8] sm:$0xff]  ;;  %v16012_v3 = vld [vmem:[#allocation15_spill] sm:$0xff] }
 0x211   : > { %v3391_v63 = vpop.f32.mrf.mxu1  ;;  %16009 = vst [vmem:[#allocation127_spill] sm:$0xff] %v13627_v39  ;;  %v16010_v26 = vld [vmem:[#allocation13_spill] sm:$0xff] }
 0x212   : > { %v13621_v59 = vadd.f32 %v10076_v12, %v3503_v34  ;;  %v3502_v38 = vadd.f32 %v3391_v63, %v13331_v9  ;;  %v10079_v24 = vpop.f32.mrf.mxu0  ;;  %10378 = vmatmul.mubr.msk.f32.gmra.mxu0 %vm363_vm2, %v16008_v23  ;;  %v13637_v34 = vld [vmem:[%s11060_s23 + $0x108] sm:$0xff] }
 0x213   : > { %v10029_v43 = vpop.f32.mrf.mxu1  ;;  %10328 = vmatmul.mubr.msk.f32.gmra.mxu1 %vm363_vm2, %v13627_v39  ;;  %10380 = vmatprep.mubr.msk.f32.mxu0 %vm363_vm2, %v16010_v26  ;;  %16011 = vst [vmem:[#allocation128_spill] sm:$0xff] %v13637_v34 }
 0x214   : > { %v13633_v25 = vadd.f32 %v3659_v32, %v3502_v38  ;;  %v3505_v12 = vadd.f32 %v10029_v43, %v13336_v8  ;;  %v3669_v9 = vpop.f32.mrf.mxu0  ;;  %10330 = vmatprep.mubr.msk.f32.mxu1 %vm363_vm2, %v13637_v34  ;;  %v13647_v32 = vld [vmem:[%s11060_s23 + $0x110] sm:$0xff]  ;;  %v16014_v8 = vld [vmem:[#allocation17_spill] sm:$0xff] }
 0x215   : > { %v3401_v63 = vpop.f32.mrf.mxu1  ;;  %16013 = vst [vmem:[#allocation129_spill] sm:$0xff] %v13647_v32  ;;  %v16016_v34 = vld [vmem:[#allocation20_spill] sm:$0xff] }
 0x216   : > { %v13641_v23 = vadd.f32 %v10079_v24, %v3505_v12  ;;  %v3504_v57 = vadd.f32 %v3401_v63, %v13345_v55  ;;  %v10082_v39 = vpop.f32.mrf.mxu0  ;;  %10381 = vmatmul.mubr.msk.f32.gmra.mxu0 %vm363_vm2, %v16012_v3  ;;  %v13657_v12 = vld [vmem:[%s11060_s23 + $0x120] sm:$0xff] }
 0x217   : > { %v10032_v38 = vpop.f32.mrf.mxu1  ;;  %10331 = vmatmul.mubr.msk.f32.gmra.mxu1 %vm363_vm2, %v13647_v32  ;;  %10383 = vmatprep.mubr.msk.f32.mxu0 %vm363_vm2, %v16014_v8  ;;  %16015 = vst [vmem:[#allocation130_spill] sm:$0xff] %v13657_v12 }
 0x218   : > { %v13653_v43 = vadd.f32 %v3669_v9, %v3504_v57  ;;  %v3507_v24 = vadd.f32 %v10032_v38, %v13350_v58  ;;  %v3679_v55 = vpop.f32.mrf.mxu0  ;;  %10333 = vmatprep.mubr.msk.f32.mxu1 %vm363_vm2, %v13657_v12  ;;  %v13667_v9 = vld [vmem:[%s11060_s23 + $0x128] sm:$0xff]  ;;  %v16020_v12 = vld [vmem:[#allocation25_spill] sm:$0xff] }
 0x219   : > { %v3411_v63 = vpop.f32.mrf.mxu1  ;;  %16017 = vst [vmem:[#allocation131_spill] sm:$0xff] %v13667_v9  ;;  %v16018_v58 = vld [vmem:[#allocation23_spill] sm:$0xff] }
 0x21a   : > { %v13661_v3 = vadd.f32 %v10082_v39, %v3507_v24  ;;  %v3506_v26 = vadd.f32 %v3411_v63, %v13359_v35  ;;  %v10085_v32 = vpop.f32.mrf.mxu0  ;;  %10384 = vmatmul.mubr.msk.f32.gmra.mxu0 %vm363_vm2, %v16016_v34  ;;  %v13677_v24 = vld [vmem:[%s11060_s23 + $0x138] sm:$0xff] }
 0x21b   : > { %v10035_v57 = vpop.f32.mrf.mxu1  ;;  %10334 = vmatmul.mubr.msk.f32.gmra.mxu1 %vm363_vm2, %v13667_v9  ;;  %10386 = vmatprep.mubr.msk.f32.mxu0 %vm363_vm2, %v16018_v58  ;;  %16019 = vst [vmem:[#allocation132_spill] sm:$0xff] %v13677_v24 }
 0x21c   : > { %v13673_v38 = vadd.f32 %v3679_v55, %v3506_v26  ;;  %v3509_v39 = vadd.f32 %v10035_v57, %v13364_v11  ;;  %v3689_v35 = vpop.f32.mrf.mxu0  ;;  %10336 = vmatprep.mubr.msk.f32.mxu1 %vm363_vm2, %v13677_v24  ;;  %v13687_v55 = vld [vmem:[%s11060_s23 + $0x140] sm:$0xff]  ;;  %v16022_v11 = vld [vmem:[#allocation27_spill] sm:$0xff] }
 0x21d   : > { %v3421_v63 = vpop.f32.mrf.mxu1  ;;  %16021 = vst [vmem:[#allocation135_spill] sm:$0xff] %v13687_v55 }
 0x21e   : > { %v13681_v34 = vadd.f32 %v10085_v32, %v3509_v39  ;;  %v3508_v8 = vadd.f32 %v3421_v63, %v13373_v49  ;;  %v10088_v9 = vpop.f32.mrf.mxu0  ;;  %10387 = vmatmul.mubr.msk.f32.gmra.mxu0 %vm363_vm2, %v16020_v12  ;;  %v13697_v39 = vld [vmem:[%s11060_s23 + $0x150] sm:$0xff] }
 0x21f   : > { %v10038_v26 = vpop.f32.mrf.mxu1  ;;  %10337 = vmatmul.mubr.msk.f32.gmra.mxu1 %vm363_vm2, %v13687_v55  ;;  %10389 = vmatprep.mubr.msk.f32.mxu0 %vm363_vm2, %v16022_v11  ;;  %16023 = vst [vmem:[#allocation136_spill] sm:$0xff] %v13697_v39  ;;  %v16024_v11 = vld [vmem:[#allocation29_spill] sm:$0xff] }
 0x220   : > { %v13693_v57 = vadd.f32 %v3689_v35, %v3508_v8  ;;  %v3511_v32 = vadd.f32 %v10038_v26, %v13378_v22  ;;  %v3699_v49 = vpop.f32.mrf.mxu0  ;;  %10339 = vmatprep.mubr.msk.f32.mxu1 %vm363_vm2, %v13697_v39  ;;  %v13707_v22 = vld [vmem:[%s11060_s23 + $0x158] sm:$0xff]  ;;  %v16026_v35 = vld [vmem:[#allocation31_spill] sm:$0xff] }
 0x221   : > { %v3431_v63 = vpop.f32.mrf.mxu1  ;;  %16025 = vst [vmem:[#allocation140_spill] sm:$0xff] %v13707_v22  ;;  %v13725_v39 = vld [vmem:[%s11060_s23 + $0x1b8] sm:$0xff] }
 0x222   : > { %v13701_v12 = vadd.f32 %v10088_v9, %v3511_v32  ;;  %v3510_v58 = vadd.f32 %v3431_v63, %v13387_v31  ;;  %v10091_v55 = vpop.f32.mrf.mxu0  ;;  %10390 = vmatmul.mubr.msk.f32.gmra.mxu0 %vm363_vm2, %v16024_v11  ;;  %v13717_v31 = vld [vmem:[%s11060_s23 + $0x168] sm:$0xff]  ;;  %v13722_v11 = vld [vmem:[%s11060_s23 + $0x1b0] sm:$0xff] }
 0x223   : > { %v10041_v8 = vpop.f32.mrf.mxu1  ;;  %10340 = vmatmul.mubr.msk.f32.gmra.mxu1 %vm363_vm2, %v13707_v22  ;;  %10392 = vmatprep.mubr.msk.f32.mxu0 %vm363_vm2, %v16026_v35  ;;  %16027 = vst [vmem:[#allocation144_spill] sm:$0xff] %v13717_v31  ;;  %v16028_v35 = vld [vmem:[#allocation33_spill] sm:$0xff] }
 0x224   : > { %v13713_v26 = vadd.f32 %v3699_v49, %v3510_v58  ;;  %v3513_v9 = vadd.f32 %v10041_v8, %v13392_v53  ;;  %v3709_v32 = vpop.f32.mrf.mxu0  ;;  %10342 = vmatprep.mubr.msk.f32.mxu1 %vm363_vm2, %v13717_v31  ;;  %v13733_v8 = vld [vmem:[%s11060_s23 + $0x170] sm:$0xff] }
 0x225   : > { %v3441_v63 = vpop.f32.mrf.mxu1  ;;  %16029 = vst [vmem:[#allocation8_spill] sm:$0xff] %v13733_v8 }
 0x226   : > { %v13727_v22 = vadd.f32 %v10091_v55, %v3513_v9  ;;  %v3512_v58 = vadd.f32 %v3441_v63, %v13401_v28  ;;  %v10094_v49 = vpop.f32.mrf.mxu0  ;;  %10393 = vmatmul.mubr.msk.f32.gmra.mxu0 %vm363_vm2, %v16028_v35  ;;  %v13743_v28 = vld [vmem:[%s11060_s23 + $0x180] sm:$0xff]  ;;  %v5144_v63 = vrot.slane %v13722_v11, 1  ;;  %v5145_v35 = vrot.slane %v13725_v39, 1 }
 0x227   : > { %v10044_v53 = vpop.f32.mrf.mxu1  ;;  %10343 = vmatmul.mubr.msk.f32.gmra.mxu1 %vm363_vm2, %v13733_v8  ;;  %10395 = vmatprep.mubr.msk.f32.mxu0 %vm363_vm2, %v15922_v37  ;;  %16030 = vst [vmem:[#allocation37_spill] sm:$0xff] %v13743_v28  ;;  %v13750_v8 = vld [vmem:[%s11060_s23 + $0x1c0] sm:$0xf]  ;;  %v13758_v37 = vld [vmem:[%s11060_s23 + $0x188] sm:$0xff] }
 0x228   : > { %v13739_v31 = vadd.f32 %v3709_v32, %v3512_v58  ;;  %v3515_v55 = vadd.f32 %v10044_v53, %v13410_v15  ;;  %v3719_v9 = vpop.f32.mrf.mxu0  ;;  %10345 = vmatprep.mubr.msk.f32.mxu1 %vm363_vm2, %v13743_v28  ;;  %v16031_v15 = vld [vmem:[#allocation145_spill] sm:$0xff]  ;;  %16032 = vst [vmem:[#allocation10_spill] sm:$0xff] %v13758_v37  ;;  %v5147_v28 = vrot.slane %v13750_v8, 1 }
 0x229   : > { %v3451_v24 = vpop.f32.mrf.mxu1 }
 0x22a   : > { %v13752_v6 = vadd.f32 %v10094_v49, %v3515_v55  ;;  %v3514_v32 = vadd.f32 %v3451_v24, %v13420_v62  ;;  %v10097_v58 = vpop.f32.mrf.mxu0  ;;  %10396 = vmatmul.mubr.msk.f32.gmra.mxu0 %vm363_vm2, %v16031_v15  ;;  %v13769_v55 = vld [vmem:[%s11060_s23 + $0x198] sm:$0xff]  ;;  %v13774_v15 = vsel %vm280_vm1, %v5144_v63, %v5145_v35  ;;  %v13789_v63 = vsel %vm280_vm1, %v5145_v35, %v5147_v28 }
 0x22b   : > { %v10047_v53 = vpop.f32.mrf.mxu1  ;;  %10346 = vmatmul.mubr.msk.f32.gmra.mxu1 %vm363_vm2, %v13758_v37  ;;  %10398 = vmatprep.mubr.msk.f32.mxu0 %vm363_vm2, %v13170_v47  ;;  %16033 = vst [vmem:[#allocation12_spill] sm:$0xff] %v13774_v15  ;;  %16035 = vst [vmem:[#allocation64_spill] sm:$0xff] %v13789_v63 }
 0x22c   : > { %v13765_v49 = vadd.f32 %v3719_v9, %v3514_v32  ;;  %v3517_v62 = vadd.f32 %v10047_v53, %v13432_v20  ;;  %v3729_v24 = vpop.f32.mrf.mxu0  ;;  %10348 = vmatprep.mubr.msk.f32.mxu1 %vm363_vm2, %v13769_v55  ;;  %v13782_v20 = vld [vmem:[%s11060_s23 + $0x1a0] sm:$0xff] }
 0x22d   : > { %v3461_v40 = vpop.f32.mrf.mxu1  ;;  %16034 = vst [vmem:[#allocation14_spill] sm:$0xff] %v13782_v20 }
 0x22e   : > { %v13776_v37 = vadd.f32 %v10097_v58, %v3517_v62  ;;  %v3516_v47 = vadd.f32 %v3461_v40, %v13444_v51  ;;  %v10100_v52 = vpop.f32.mrf.mxu0  ;;  %10399 = vmatmul.mubr.msk.f32.gmra.mxu0 %vm363_vm2, %v13190_v27 }
 0x22f   : > { %v10050_v9 = vpop.f32.mrf.mxu1  ;;  %10349 = vmatmul.mubr.msk.f32.gmra.mxu1 %vm363_vm2, %v13782_v20  ;;  %10401 = vmatprep.mubr.msk.f32.mxu0 %vm363_vm2, %v13774_v15  ;;  %v16047_v20 = vld [vmem:[#allocation43_spill] sm:$0xff] }
 0x230   : > { %v13791_v32 = vadd.f32 %v3729_v24, %v3516_v47  ;;  %v3519_v51 = vadd.f32 %v10050_v9, %v13452_v13  ;;  %v3739_v40 = vpop.f32.mrf.mxu0  ;;  %10351 = vmatprep.mubr.msk.f32.mxu1 %vm363_vm2, %v13722_v11  ;;  %v16036_v47 = vld [vmem:[#allocation69_spill] sm:$0xff] }
 0x231   : > { %v3471_v58 = vpop.f32.mrf.mxu1 }
 0x232   : > { %v13796_v53 = vadd.f32 %v10100_v52, %v3519_v51  ;;  %v3518_v62 = vadd.f32 %v3471_v58, %v13461_v41  ;;  %v10103_v27 = vpop.f32.mrf.mxu0  ;;  %10402 = vmatmul.mubr.msk.f32.gmra.mxu0 %vm363_vm2, %v13789_v63  ;;  %v16037_v52 = vld [vmem:[#allocation38_spill] sm:$0xff] }
 0x233   : > { %v10053_v15 = vpop.f32.mrf.mxu1  ;;  %10352 = vmatmul.mubr.msk.f32.gmra.mxu1 %vm363_vm2, %v13725_v39  ;;  %10456 = vmatprep.mubr.msk.f32.mxu0 %vm363_vm2, %v16036_v47  ;;  %v16038_v58 = vld [vmem:[#allocation70_spill] sm:$0xff] }
 0x234   : > { %v13805_v13 = vadd.f32 %v3739_v40, %v3518_v62  ;;  %v3521_v35 = vadd.f32 %v10053_v15, %v13466_v60  ;;  %v3749_v28 = vpop.f32.mrf.mxu0  ;;  %10406 = vmatprep.mubr.msk.f32.mxu1 %vm363_vm2, %v16037_v52  ;;  %v13818_v40 = vld [vmem:[%s15265_s1 + $0x54] sm:$0xf]  ;;  %v16039_v60 = vld [vmem:[#allocation39_spill] sm:$0xff] }
 0x235   : > { %v3481_v41 = vpop.f32.mrf.mxu1 }
 0x236   : > { %v13810_v24 = vadd.f32 %v10103_v27, %v3521_v35  ;;  %v3520_v9 = vadd.f32 %v3481_v41, %v13485_v61  ;;  %v10158_v51 = vpop.f32.mrf.mxu0  ;;  %10457 = vmatmul.mubr.msk.f32.vlgmr.msra.gmra.mxu0 %vm363_vm2, %v16038_v58  ;;  %v13827_v27 = vld [vmem:[%s15265_s1 + $0x58] sm:$0xf]  ;;  %v16040_v35 = vld [vmem:[#allocation40_spill] sm:$0xff] }
 0x237   : > { %v10108_v62 = vpop.f32.mrf.mxu1  ;;  %10407 = vmatmul.mubr.msk.f32.vlgmr.msra.gmra.mxu1 %vm363_vm2, %v16039_v60  ;;  %10555 = vmatpush3.msk.msra.mxu0 %vm428_vm0, %v13483_v36  ;;  %v16041_v41 = vld [vmem:[#allocation73_spill] sm:$0xff] }
 0x238   : > { %v13829_v61 = vadd.f32 %v3749_v28, %v3520_v9  ;;  %v4031_v15 = vadd.f32 %v10108_v62, %v13499_v18  ;;  %10505 = vmatpush3.msk.msra.mxu1 %vm428_vm0, %v13474_v0  ;;  %v4142_v47 = vpop.f32.mrf.mxu0  ;;  %10409 = vmatprep.mubr.msk.f32.mxu1 %vm363_vm2, %v16040_v35  ;;  %v16042_v18 = vld [vmem:[#allocation75_spill] sm:$0xff]  ;;  %v16043_v58 = vld [vmem:[#allocation41_spill] sm:$0xff]  ;;  %v16046_v35 = vld [vmem:[#allocation78_spill] sm:$0xff] }
 0x239   : > { %v3871_v52 = vpop.f32.mrf.mxu1  ;;  %10459 = vmatprep.mubr.msk.f32.mxu0 %vm363_vm2, %v16041_v41  ;;  %10604 = vmatprep.subr.msk.mxu1 %vm428_vm0, %v13818_v40  ;;  %v16044_v62 = vld [vmem:[#allocation77_spill] sm:$0xff] }
 0x23a   : > { %v13840_v36 = vadd.f32 %v10158_v51, %v4031_v15  ;;  %v4030_v28 = vadd.f32 %v3871_v52, %v13513_v44  ;;  %v10161_v9 = vpop.f32.mrf.mxu0  ;;  %10460 = vmatmul.mubr.msk.f32.gmra.mxu0 %vm363_vm2, %v16042_v18  ;;  %10654 = vmatprep.subr.msk.mxu0 %vm428_vm0, %v13827_v27  ;;  %v16045_v44 = vld [vmem:[#allocation42_spill] sm:$0xff] }
 0x23b   : > { %v10111_v0 = vpop.f32.mrf.mxu1  ;;  %10410 = vmatmul.mubr.msk.f32.gmra.mxu1 %vm363_vm2, %v16043_v58  ;;  %10462 = vmatprep.mubr.msk.f32.mxu0 %vm363_vm2, %v16044_v62  ;;  %v16050_v62 = vld [vmem:[#allocation83_spill] sm:$0xff] }
 0x23c   : > { %v13851_v60 = vadd.f32 %v4142_v47, %v4030_v28  ;;  %v4033_v51 = vadd.f32 %v10111_v0, %v13521_v10  ;;  %v4152_v15 = vpop.f32.mrf.mxu0  ;;  %10412 = vmatprep.mubr.msk.f32.mxu1 %vm363_vm2, %v16045_v44  ;;  %v16048_v47 = vld [vmem:[#allocation81_spill] sm:$0xff] }
 0x23d   : > { %v3881_v52 = vpop.f32.mrf.mxu1  ;;  %v16051_v44 = vld [vmem:[#allocation45_spill] sm:$0xff] }
 0x23e   : > { %v13856_v18 = vadd.f32 %v10161_v9, %v4033_v51  ;;  %v4032_v41 = vadd.f32 %v3881_v52, %v13533_v50  ;;  %v10164_v63 = vpop.f32.mrf.mxu0  ;;  %10463 = vmatmul.mubr.msk.f32.gmra.mxu0 %vm363_vm2, %v16046_v35  ;;  %v16049_v9 = vld [vmem:[#allocation44_spill] sm:$0xff] }
 0x23f   : > { %v10114_v58 = vpop.f32.mrf.mxu1  ;;  %10413 = vmatmul.mubr.msk.f32.gmra.mxu1 %vm363_vm2, %v16047_v20  ;;  %10465 = vmatprep.mubr.msk.f32.mxu0 %vm363_vm2, %v16048_v47  ;;  %v16054_v47 = vld [vmem:[#allocation86_spill] sm:$0xff] }
 0x240   : > { %v13865_v10 = vadd.f32 %v4152_v15, %v4032_v41  ;;  %v4035_v28 = vadd.f32 %v10114_v58, %v13541_v1  ;;  %v4162_v0 = vpop.f32.mrf.mxu0  ;;  %10415 = vmatprep.mubr.msk.f32.mxu1 %vm363_vm2, %v16049_v9  ;;  %v16052_v41 = vld [vmem:[#allocation85_spill] sm:$0xff]  ;;  %v16055_v9 = vld [vmem:[#allocation47_spill] sm:$0xff] }
 0x241   : > { %v3891_v50 = vpop.f32.mrf.mxu1 }
 0x242   : > { %v13870_v51 = vadd.f32 %v10164_v63, %v4035_v28  ;;  %v4034_v52 = vadd.f32 %v3891_v50, %v13553_v14  ;;  %v10167_v35 = vpop.f32.mrf.mxu0  ;;  %10466 = vmatmul.mubr.msk.f32.gmra.mxu0 %vm363_vm2, %v16050_v62  ;;  %v16053_v63 = vld [vmem:[#allocation46_spill] sm:$0xff] }
 0x243   : > { %v10117_v20 = vpop.f32.mrf.mxu1  ;;  %10416 = vmatmul.mubr.msk.f32.gmra.mxu1 %vm363_vm2, %v16051_v44  ;;  %10468 = vmatprep.mubr.msk.f32.mxu0 %vm363_vm2, %v16052_v41  ;;  %v16058_v41 = vld [vmem:[#allocation91_spill] sm:$0xff] }
 0x244   : > { %v13879_v1 = vadd.f32 %v4162_v0, %v4034_v52  ;;  %v4037_v58 = vadd.f32 %v10117_v20, %v13561_v56  ;;  %v4172_v15 = vpop.f32.mrf.mxu0  ;;  %10418 = vmatprep.mubr.msk.f32.mxu1 %vm363_vm2, %v16053_v63  ;;  %v16056_v0 = vld [vmem:[#allocation89_spill] sm:$0xff] }
 0x245   : > { %v3901_v14 = vpop.f32.mrf.mxu1  ;;  %v16059_v63 = vld [vmem:[#allocation49_spill] sm:$0xff] }
 0x246   : > { %v13884_v28 = vadd.f32 %v10167_v35, %v4037_v58  ;;  %v4036_v50 = vadd.f32 %v3901_v14, %v13573_v54  ;;  %v10170_v62 = vpop.f32.mrf.mxu0  ;;  %10469 = vmatmul.mubr.msk.f32.gmra.mxu0 %vm363_vm2, %v16054_v47  ;;  %v16057_v35 = vld [vmem:[#allocation48_spill] sm:$0xff] }
 0x247   : > { %v10120_v44 = vpop.f32.mrf.mxu1  ;;  %10419 = vmatmul.mubr.msk.f32.gmra.mxu1 %vm363_vm2, %v16055_v9  ;;  %10471 = vmatprep.mubr.msk.f32.mxu0 %vm363_vm2, %v16056_v0  ;;  %v16062_v0 = vld [vmem:[#allocation94_spill] sm:$0xff] }
 0x248   : > { %v13893_v56 = vadd.f32 %v4172_v15, %v4036_v50  ;;  %v4039_v20 = vadd.f32 %v10120_v44, %v13581_v5  ;;  %v4182_v52 = vpop.f32.mrf.mxu0  ;;  %10421 = vmatprep.mubr.msk.f32.mxu1 %vm363_vm2, %v16057_v35  ;;  %v16060_v15 = vld [vmem:[#allocation93_spill] sm:$0xff]  ;;  %v16063_v35 = vld [vmem:[#allocation51_spill] sm:$0xff] }
 0x249   : > { %v3911_v54 = vpop.f32.mrf.mxu1 }
 0x24a   : > { %v13898_v58 = vadd.f32 %v10170_v62, %v4039_v20  ;;  %v4038_v14 = vadd.f32 %v3911_v54, %v13593_v33  ;;  %v10173_v47 = vpop.f32.mrf.mxu0  ;;  %10472 = vmatmul.mubr.msk.f32.gmra.mxu0 %vm363_vm2, %v16058_v41  ;;  %v16061_v62 = vld [vmem:[#allocation50_spill] sm:$0xff] }
 0x24b   : > { %v10123_v9 = vpop.f32.mrf.mxu1  ;;  %10422 = vmatmul.mubr.msk.f32.gmra.mxu1 %vm363_vm2, %v16059_v63  ;;  %10474 = vmatprep.mubr.msk.f32.mxu0 %vm363_vm2, %v16060_v15  ;;  %v16066_v15 = vld [vmem:[#allocation99_spill] sm:$0xff] }
 0x24c   : > { %v13907_v5 = vadd.f32 %v4182_v52, %v4038_v14  ;;  %v4041_v44 = vadd.f32 %v10123_v9, %v13601_v42  ;;  %v4192_v50 = vpop.f32.mrf.mxu0  ;;  %10424 = vmatprep.mubr.msk.f32.mxu1 %vm363_vm2, %v16061_v62  ;;  %v16064_v52 = vld [vmem:[#allocation97_spill] sm:$0xff] }
 0x24d   : > { %v3921_v33 = vpop.f32.mrf.mxu1  ;;  %v16067_v62 = vld [vmem:[#allocation53_spill] sm:$0xff] }
 0x24e   : > { %v13912_v20 = vadd.f32 %v10173_v47, %v4041_v44  ;;  %v4040_v54 = vadd.f32 %v3921_v33, %v13613_v17  ;;  %v10176_v41 = vpop.f32.mrf.mxu0  ;;  %10475 = vmatmul.mubr.msk.f32.gmra.mxu0 %vm363_vm2, %v16062_v0  ;;  %v16065_v47 = vld [vmem:[#allocation52_spill] sm:$0xff] }
 0x24f   : > { %v10126_v63 = vpop.f32.mrf.mxu1  ;;  %10425 = vmatmul.mubr.msk.f32.gmra.mxu1 %vm363_vm2, %v16063_v35  ;;  %10477 = vmatprep.mubr.msk.f32.mxu0 %vm363_vm2, %v16064_v52  ;;  %v16070_v52 = vld [vmem:[#allocation102_spill] sm:$0xff] }
 0x250   : > { %v13921_v42 = vadd.f32 %v4192_v50, %v4040_v54  ;;  %v4043_v9 = vadd.f32 %v10126_v63, %v13621_v59  ;;  %v4202_v14 = vpop.f32.mrf.mxu0  ;;  %10427 = vmatprep.mubr.msk.f32.mxu1 %vm363_vm2, %v16065_v47  ;;  %v16068_v50 = vld [vmem:[#allocation101_spill] sm:$0xff]  ;;  %v16071_v47 = vld [vmem:[#allocation55_spill] sm:$0xff] }
 0x251   : > { %v3931_v17 = vpop.f32.mrf.mxu1 }
 0x252   : > { %v13926_v44 = vadd.f32 %v10176_v41, %v4043_v9  ;;  %v4042_v33 = vadd.f32 %v3931_v17, %v13633_v25  ;;  %v10179_v0 = vpop.f32.mrf.mxu0  ;;  %10478 = vmatmul.mubr.msk.f32.gmra.mxu0 %vm363_vm2, %v16066_v15  ;;  %v16069_v41 = vld [vmem:[#allocation54_spill] sm:$0xff] }
 0x253   : > { %v10129_v35 = vpop.f32.mrf.mxu1  ;;  %10428 = vmatmul.mubr.msk.f32.gmra.mxu1 %vm363_vm2, %v16067_v62  ;;  %10480 = vmatprep.mubr.msk.f32.mxu0 %vm363_vm2, %v16068_v50 }
 0x254   : > { %v13935_v59 = vadd.f32 %v4202_v14, %v4042_v33  ;;  %v4045_v63 = vadd.f32 %v10129_v35, %v13641_v23  ;;  %v4212_v54 = vpop.f32.mrf.mxu0  ;;  %10430 = vmatprep.mubr.msk.f32.mxu1 %vm363_vm2, %v16069_v41 }
 0x255   : > { %v3941_v25 = vpop.f32.mrf.mxu1 }
 0x256   : > { %v13940_v9 = vadd.f32 %v10179_v0, %v4045_v63  ;;  %v4044_v17 = vadd.f32 %v3941_v25, %v13653_v43  ;;  %v10182_v15 = vpop.f32.mrf.mxu0  ;;  %10481 = vmatmul.mubr.msk.f32.gmra.mxu0 %vm363_vm2, %v16070_v52  ;;  %v16072_v0 = vld [vmem:[#allocation56_spill] sm:$0xff]  ;;  %v16073_v52 = vld [vmem:[#allocation107_spill] sm:$0xff] }
 0x257   : > { %v10132_v62 = vpop.f32.mrf.mxu1  ;;  %10431 = vmatmul.mubr.msk.f32.gmra.mxu1 %vm363_vm2, %v16071_v47  ;;  %10483 = vmatprep.mubr.msk.f32.mxu0 %vm363_vm2, %v15970_v46  ;;  %v16074_v47 = vld [vmem:[#allocation57_spill] sm:$0xff]  ;;  %v16077_v46 = vld [vmem:[#allocation110_spill] sm:$0xff] }
 0x258   : > { %v13949_v23 = vadd.f32 %v4212_v54, %v4044_v17  ;;  %v4047_v35 = vadd.f32 %v10132_v62, %v13661_v3  ;;  %v4222_v14 = vpop.f32.mrf.mxu0  ;;  %10433 = vmatprep.mubr.msk.f32.mxu1 %vm363_vm2, %v16072_v0  ;;  %v16075_v54 = vld [vmem:[#allocation109_spill] sm:$0xff]  ;;  %v16078_v0 = vld [vmem:[#allocation18_spill] sm:$0xff] }
 0x259   : > { %v3951_v43 = vpop.f32.mrf.mxu1 }
 0x25a   : > { %v13954_v33 = vadd.f32 %v10182_v15, %v4047_v35  ;;  %v4046_v63 = vadd.f32 %v3951_v43, %v13673_v38  ;;  %v10185_v25 = vpop.f32.mrf.mxu0  ;;  %10484 = vmatmul.mubr.msk.f32.gmra.mxu0 %vm363_vm2, %v16073_v52  ;;  %v16076_v15 = vld [vmem:[#allocation58_spill] sm:$0xff] }
 0x25b   : > { %v10135_v50 = vpop.f32.mrf.mxu1  ;;  %10434 = vmatmul.mubr.msk.f32.gmra.mxu1 %vm363_vm2, %v16074_v47  ;;  %10486 = vmatprep.mubr.msk.f32.mxu0 %vm363_vm2, %v16075_v54  ;;  %v16080_v54 = vld [vmem:[#allocation59_spill] sm:$0xff] }
 0x25c   : > { %v13963_v3 = vadd.f32 %v4222_v14, %v4046_v63  ;;  %v4049_v62 = vadd.f32 %v10135_v50, %v13681_v34  ;;  %v4232_v17 = vpop.f32.mrf.mxu0  ;;  %10436 = vmatprep.mubr.msk.f32.mxu1 %vm363_vm2, %v16076_v15  ;;  %v16079_v63 = vld [vmem:[#allocation22_spill] sm:$0xff] }
 0x25d   : > { %v3961_v38 = vpop.f32.mrf.mxu1 }
 0x25e   : > { %v13968_v35 = vadd.f32 %v10185_v25, %v4049_v62  ;;  %v4048_v43 = vadd.f32 %v3961_v38, %v13693_v57  ;;  %v10188_v52 = vpop.f32.mrf.mxu0  ;;  %10487 = vmatmul.mubr.msk.f32.gmra.mxu0 %vm363_vm2, %v16077_v46 }
 0x25f   : > { %v10138_v47 = vpop.f32.mrf.mxu1  ;;  %10437 = vmatmul.mubr.msk.f32.gmra.mxu1 %vm363_vm2, %v16078_v0  ;;  %10489 = vmatprep.mubr.msk.f32.mxu0 %vm363_vm2, %v15977_v30  ;;  %v16083_v30 = vld [vmem:[#allocation119_spill] sm:$0xff] }
 0x260   : > { %v13977_v34 = vadd.f32 %v4232_v17, %v4048_v43  ;;  %v4051_v50 = vadd.f32 %v10138_v47, %v13701_v12  ;;  %v4242_v14 = vpop.f32.mrf.mxu0  ;;  %10439 = vmatprep.mubr.msk.f32.mxu1 %vm363_vm2, %v16079_v63  ;;  %v16081_v17 = vld [vmem:[#allocation117_spill] sm:$0xff] }
 0x261   : > { %v3971_v57 = vpop.f32.mrf.mxu1  ;;  %v16084_v63 = vld [vmem:[#allocation61_spill] sm:$0xff] }
 0x262   : > { %v13982_v25 = vadd.f32 %v10188_v52, %v4051_v50  ;;  %v4050_v62 = vadd.f32 %v3971_v57, %v13713_v26  ;;  %v10191_v38 = vpop.f32.mrf.mxu0  ;;  %10490 = vmatmul.mubr.msk.f32.gmra.mxu0 %vm363_vm2, %v15979_v19  ;;  %v16082_v52 = vld [vmem:[#allocation60_spill] sm:$0xff] }
 0x263   : > { %v10141_v46 = vpop.f32.mrf.mxu1  ;;  %10440 = vmatmul.mubr.msk.f32.gmra.mxu1 %vm363_vm2, %v16080_v54  ;;  %10492 = vmatprep.mubr.msk.f32.mxu0 %vm363_vm2, %v16081_v17 }
 0x264   : > { %v13991_v12 = vadd.f32 %v4242_v14, %v4050_v62  ;;  %v4053_v47 = vadd.f32 %v10141_v46, %v13727_v22  ;;  %v4252_v43 = vpop.f32.mrf.mxu0  ;;  %10442 = vmatprep.mubr.msk.f32.mxu1 %vm363_vm2, %v16082_v52  ;;  %v16085_v62 = vld [vmem:[#allocation36_spill] sm:$0xff] }
 0x265   : > { %v3981_v26 = vpop.f32.mrf.mxu1 }
 0x266   : > { %v13996_v50 = vadd.f32 %v10191_v38, %v4053_v47  ;;  %v4052_v57 = vadd.f32 %v3981_v26, %v13739_v31  ;;  %v10194_v19 = vpop.f32.mrf.mxu0  ;;  %10493 = vmatmul.mubr.msk.f32.gmra.mxu0 %vm363_vm2, %v16083_v30  ;;  %v5686_v31 = vrot.slane %v13722_v11, 3  ;;  %v5687_v38 = vrot.slane %v13725_v39, 3 }
 0x267   : > { %v10144_v54 = vpop.f32.mrf.mxu1  ;;  %10443 = vmatmul.mubr.msk.f32.gmra.mxu1 %vm363_vm2, %v16084_v63  ;;  %10495 = vmatprep.mubr.msk.f32.mxu0 %vm363_vm2, %v15983_v45  ;;  %v5415_v26 = vrot.slane %v13722_v11, 2  ;;  %v5416_v30 = vrot.slane %v13725_v39, 2  ;;  %v5689_v45 = vrot.slane %v13750_v8, 3  ;;  %v16087_v63 = vld [vmem:[#allocation139_spill] sm:$0xff] }
 0x268   : > { %v14005_v46 = vadd.f32 %v4252_v43, %v4052_v57  ;;  %v4055_v22 = vadd.f32 %v10144_v54, %v13752_v6  ;;  %v4262_v14 = vpop.f32.mrf.mxu0  ;;  %10445 = vmatprep.mubr.msk.f32.mxu1 %vm363_vm2, %v16085_v62  ;;  %v16086_v54 = vld [vmem:[#allocation133_spill] sm:$0xff] }
 0x269   : > { %v3991_v47 = vpop.f32.mrf.mxu1 }
 0x26a   : > { %v14014_v17 = vadd.f32 %v10194_v19, %v4055_v22  ;;  %v4054_v43 = vadd.f32 %v3991_v47, %v13765_v49  ;;  %v10197_v57 = vpop.f32.mrf.mxu0  ;;  %10496 = vmatmul.mubr.msk.f32.gmra.mxu0 %vm363_vm2, %v15986_v48  ;;  %v14030_v49 = vsel %vm1356_vm4, %v5686_v31, %v5687_v38  ;;  %v5418_v47 = vrot.slane %v13750_v8, 2 }
 0x26b   : > { %v10147_v6 = vpop.f32.mrf.mxu1  ;;  %10446 = vmatmul.mubr.msk.f32.gmra.mxu1 %vm363_vm2, %v16086_v54  ;;  %10498 = vmatprep.mubr.msk.f32.mxu0 %vm363_vm2, %v13430_v4  ;;  %16088 = vst [vmem:[#allocation65_spill] sm:$0xff] %v14030_v49  ;;  %v14034_v54 = vsel %vm949_vm3, %v5415_v26, %v5416_v30  ;;  %v14046_v31 = vsel %vm1356_vm4, %v5687_v38, %v5689_v45 }
 0x26c   : > { %v14024_v62 = vadd.f32 %v4262_v14, %v4054_v43  ;;  %v4057_v19 = vadd.f32 %v10147_v6, %v13776_v37  ;;  %v4272_v22 = vpop.f32.mrf.mxu0  ;;  %10448 = vmatprep.mubr.msk.f32.mxu1 %vm363_vm2, %v16087_v63  ;;  %v16089_v6 = vld [vmem:[#allocation143_spill] sm:$0xff]  ;;  %16090 = vst [vmem:[#allocation66_spill] sm:$0xff] %v14046_v31 }
 0x26d   : > { %v4001_v48 = vpop.f32.mrf.mxu1 }
 0x26e   : > { %v14036_v4 = vadd.f32 %v10197_v57, %v4057_v19  ;;  %v4056_v14 = vadd.f32 %v4001_v48, %v13791_v32  ;;  %v10200_v43 = vpop.f32.mrf.mxu0  ;;  %10499 = vmatmul.mubr.msk.f32.gmra.mxu0 %vm363_vm2, %v13450_v2  ;;  %v14054_v48 = vsel %vm949_vm3, %v5416_v30, %v5418_v47 }
 0x26f   : > { %v10150_v37 = vpop.f32.mrf.mxu1  ;;  %10449 = vmatmul.mubr.msk.f32.gmra.mxu1 %vm363_vm2, %v16089_v6  ;;  %10501 = vmatprep.mubr.msk.f32.mxu0 %vm363_vm2, %v14030_v49 }
 0x270   : > { %v14048_v26 = vadd.f32 %v4272_v22, %v4056_v14  ;;  %v4059_v57 = vadd.f32 %v10150_v37, %v13796_v53  ;;  %v4282_v19 = vpop.f32.mrf.mxu0  ;;  %10451 = vmatprep.mubr.msk.f32.mxu1 %vm363_vm2, %v14034_v54  ;;  %v16091_v22 = vld [vmem:[#allocation68_spill] sm:$0xff] }
 0x271   : > { %v4011_v32 = vpop.f32.mrf.mxu1 }
 0x272   : > { %v14056_v2 = vadd.f32 %v10200_v43, %v4059_v57  ;;  %v4058_v6 = vadd.f32 %v4011_v32, %v13805_v13  ;;  %v10203_v49 = vpop.f32.mrf.mxu0  ;;  %10502 = vmatmul.mubr.msk.f32.gmra.mxu0 %vm363_vm2, %v14046_v31  ;;  %v16093_v57 = vld [vmem:[#allocation72_spill] sm:$0xff]  ;;  %v16102_v31 = vld [vmem:[#allocation82_spill] sm:$0xff] }
 0x273   : > { %v10153_v45 = vpop.f32.mrf.mxu1  ;;  %10452 = vmatmul.mubr.msk.f32.gmra.mxu1 %vm363_vm2, %v14054_v48  ;;  %10556 = vmatprep.mubr.msk.f32.mxu0 %vm363_vm2, %v13491_v21  ;;  %v14078_v21 = vld [vmem:[%s15265_s1 + $0x5c] sm:$0xf] }
 0x274   : > { %v14065_v53 = vadd.f32 %v4282_v19, %v4058_v6  ;;  %v4061_v30 = vadd.f32 %v10153_v45, %v13810_v24  ;;  %v4292_v38 = vpop.f32.mrf.mxu0  ;;  %10506 = vmatprep.mubr.msk.f32.mxu1 %vm363_vm2, %v16091_v22  ;;  %v16092_v24 = vld [vmem:[#allocation71_spill] sm:$0xff] }
 0x275   : > { %v4021_v13 = vpop.f32.mrf.mxu1 }
 0x276   : > { %v14070_v47 = vadd.f32 %v10203_v49, %v4061_v30  ;;  %v4060_v14 = vadd.f32 %v4021_v13, %v13829_v61  ;;  %v10258_v43 = vpop.f32.mrf.mxu0  ;;  %10557 = vmatmul.mubr.msk.f32.vlgmr.msra.gmra.mxu0 %vm363_vm2, %v13507_v16  ;;  %v14087_v61 = vld [vmem:[%s15265_s1 + $0x60] sm:$0xf] }
 0x277   : > { %v10208_v37 = vpop.f32.mrf.mxu1  ;;  %10507 = vmatmul.mubr.msk.f32.vlgmr.msra.gmra.mxu1 %vm363_vm2, %v16092_v24  ;;  %10655 = vmatpush3.msk.msra.mxu0 %vm428_vm0, %v13827_v27  ;;  %v16095_v30 = vld [vmem:[#allocation6_spill] sm:$0xff] }
 0x278   : > { %v14089_v49 = vadd.f32 %v4292_v38, %v4060_v14  ;;  %v4573_v16 = vadd.f32 %v10208_v37, %v13840_v36  ;;  %10605 = vmatpush3.msk.msra.mxu1 %vm428_vm0, %v13818_v40  ;;  %v4684_v6 = vpop.f32.mrf.mxu0  ;;  %10509 = vmatprep.mubr.msk.f32.mxu1 %vm363_vm2, %v16093_v57  ;;  %v16094_v36 = vld [vmem:[#allocation74_spill] sm:$0xff]  ;;  %v16097_v37 = vld [vmem:[#allocation63_spill] sm:$0xff] }
 0x279   : > { %v4413_v19 = vpop.f32.mrf.mxu1  ;;  %10559 = vmatprep.mubr.msk.f32.mxu0 %vm363_vm2, %v13517_v7  ;;  %10704 = vmatprep.subr.msk.mxu1 %vm428_vm0, %v14078_v21 }
 0x27a   : > { %v14100_v27 = vadd.f32 %v10258_v43, %v4573_v16  ;;  %v4572_v32 = vadd.f32 %v4413_v19, %v13851_v60  ;;  %v10261_v45 = vpop.f32.mrf.mxu0  ;;  %10560 = vmatmul.mubr.msk.f32.gmra.mxu0 %vm363_vm2, %v13527_v29  ;;  %10754 = vmatprep.subr.msk.mxu0 %vm428_vm0, %v14087_v61  ;;  %v16096_v60 = vld [vmem:[#allocation76_spill] sm:$0xff]  ;;  %v16098_v16 = vld [vmem:[#allocation79_spill] sm:$0xff] }
 0x27b   : > { %v10211_v40 = vpop.f32.mrf.mxu1  ;;  %10510 = vmatmul.mubr.msk.f32.gmra.mxu1 %vm363_vm2, %v16094_v36  ;;  %10562 = vmatprep.mubr.msk.f32.mxu0 %vm363_vm2, %v16095_v30 }
 0x27c   : > { %v14111_v7 = vadd.f32 %v4684_v6, %v4572_v32  ;;  %v4575_v38 = vadd.f32 %v10211_v40, %v13856_v18  ;;  %v4694_v22 = vpop.f32.mrf.mxu0  ;;  %10512 = vmatprep.mubr.msk.f32.mxu1 %vm363_vm2, %v16096_v60  ;;  %v16099_v6 = vld [vmem:[#allocation120_spill] sm:$0xff] }
 0x27d   : > { %v4423_v13 = vpop.f32.mrf.mxu1 }
 0x27e   : > { %v14116_v29 = vadd.f32 %v10261_v45, %v4575_v38  ;;  %v4574_v14 = vadd.f32 %v4423_v13, %v13865_v10  ;;  %v10264_v43 = vpop.f32.mrf.mxu0  ;;  %10563 = vmatmul.mubr.msk.f32.gmra.mxu0 %vm363_vm2, %v16097_v37  ;;  %v16100_v45 = vld [vmem:[#allocation80_spill] sm:$0xff]  ;;  %v16101_v13 = vld [vmem:[#allocation121_spill] sm:$0xff] }
 0x27f   : > { %v10214_v24 = vpop.f32.mrf.mxu1  ;;  %10513 = vmatmul.mubr.msk.f32.gmra.mxu1 %vm363_vm2, %v16098_v16  ;;  %10565 = vmatprep.mubr.msk.f32.mxu0 %vm363_vm2, %v16099_v6 }
 0x280   : > { %v14125_v18 = vadd.f32 %v4694_v22, %v4574_v14  ;;  %v4577_v19 = vadd.f32 %v10214_v24, %v13870_v51  ;;  %v4704_v32 = vpop.f32.mrf.mxu0  ;;  %10515 = vmatprep.mubr.msk.f32.mxu1 %vm363_vm2, %v16100_v45  ;;  %v16103_v22 = vld [vmem:[#allocation122_spill] sm:$0xff]  ;;  %v16106_v45 = vld [vmem:[#allocation87_spill] sm:$0xff] }
 0x281   : > { %v4433_v10 = vpop.f32.mrf.mxu1 }
 0x282   : > { %v14130_v40 = vadd.f32 %v10264_v43, %v4577_v19  ;;  %v4576_v30 = vadd.f32 %v4433_v10, %v13879_v1  ;;  %v10267_v38 = vpop.f32.mrf.mxu0  ;;  %10566 = vmatmul.mubr.msk.f32.gmra.mxu0 %vm363_vm2, %v16101_v13  ;;  %v16104_v43 = vld [vmem:[#allocation84_spill] sm:$0xff]  ;;  %v16105_v13 = vld [vmem:[#allocation123_spill] sm:$0xff] }
 0x283   : > { %v10217_v37 = vpop.f32.mrf.mxu1  ;;  %10516 = vmatmul.mubr.msk.f32.gmra.mxu1 %vm363_vm2, %v16102_v31  ;;  %10568 = vmatprep.mubr.msk.f32.mxu0 %vm363_vm2, %v16103_v22 }
 0x284   : > { %v14139_v51 = vadd.f32 %v4704_v32, %v4576_v30  ;;  %v4579_v14 = vadd.f32 %v10217_v37, %v13884_v28  ;;  %v4714_v24 = vpop.f32.mrf.mxu0  ;;  %10518 = vmatprep.mubr.msk.f32.mxu1 %vm363_vm2, %v16104_v43  ;;  %v16107_v32 = vld [vmem:[#allocation124_spill] sm:$0xff]  ;;  %v16110_v43 = vld [vmem:[#allocation90_spill] sm:$0xff] }
 0x285   : > { %v4443_v1 = vpop.f32.mrf.mxu1 }
 0x286   : > { %v14144_v6 = vadd.f32 %v10267_v38, %v4579_v14  ;;  %v4578_v19 = vadd.f32 %v4443_v1, %v13893_v56  ;;  %v10270_v10 = vpop.f32.mrf.mxu0  ;;  %10569 = vmatmul.mubr.msk.f32.gmra.mxu0 %vm363_vm2, %v16105_v13  ;;  %v16108_v38 = vld [vmem:[#allocation88_spill] sm:$0xff]  ;;  %v16109_v13 = vld [vmem:[#allocation125_spill] sm:$0xff] }
 0x287   : > { %v10220_v31 = vpop.f32.mrf.mxu1  ;;  %10519 = vmatmul.mubr.msk.f32.gmra.mxu1 %vm363_vm2, %v16106_v45  ;;  %10571 = vmatprep.mubr.msk.f32.mxu0 %vm363_vm2, %v16107_v32 }
 0x288   : > { %v14153_v28 = vadd.f32 %v4714_v24, %v4578_v19  ;;  %v4581_v30 = vadd.f32 %v10220_v31, %v13898_v58  ;;  %v4724_v37 = vpop.f32.mrf.mxu0  ;;  %10521 = vmatprep.mubr.msk.f32.mxu1 %vm363_vm2, %v16108_v38  ;;  %v16111_v24 = vld [vmem:[#allocation126_spill] sm:$0xff]  ;;  %v16114_v38 = vld [vmem:[#allocation95_spill] sm:$0xff] }
 0x289   : > { %v4453_v56 = vpop.f32.mrf.mxu1 }
 0x28a   : > { %v14158_v22 = vadd.f32 %v10270_v10, %v4581_v30  ;;  %v4580_v14 = vadd.f32 %v4453_v56, %v13907_v5  ;;  %v10273_v1 = vpop.f32.mrf.mxu0  ;;  %10572 = vmatmul.mubr.msk.f32.gmra.mxu0 %vm363_vm2, %v16109_v13  ;;  %v16112_v10 = vld [vmem:[#allocation92_spill] sm:$0xff]  ;;  %v16113_v13 = vld [vmem:[#allocation127_spill] sm:$0xff] }
 0x28b   : > { %v10223_v45 = vpop.f32.mrf.mxu1  ;;  %10522 = vmatmul.mubr.msk.f32.gmra.mxu1 %vm363_vm2, %v16110_v43  ;;  %10574 = vmatprep.mubr.msk.f32.mxu0 %vm363_vm2, %v16111_v24 }
 0x28c   : > { %v14167_v58 = vadd.f32 %v4724_v37, %v4580_v14  ;;  %v4583_v31 = vadd.f32 %v10223_v45, %v13912_v20  ;;  %v4734_v19 = vpop.f32.mrf.mxu0  ;;  %10524 = vmatprep.mubr.msk.f32.mxu1 %vm363_vm2, %v16112_v10  ;;  %v16115_v37 = vld [vmem:[#allocation128_spill] sm:$0xff]  ;;  %v16118_v10 = vld [vmem:[#allocation98_spill] sm:$0xff] }
 0x28d   : > { %v4463_v5 = vpop.f32.mrf.mxu1 }
 0x28e   : > { %v14172_v32 = vadd.f32 %v10273_v1, %v4583_v31  ;;  %v4582_v30 = vadd.f32 %v4463_v5, %v13921_v42  ;;  %v10276_v56 = vpop.f32.mrf.mxu0  ;;  %10575 = vmatmul.mubr.msk.f32.gmra.mxu0 %vm363_vm2, %v16113_v13  ;;  %v16116_v1 = vld [vmem:[#allocation96_spill] sm:$0xff]  ;;  %v16117_v13 = vld [vmem:[#allocation129_spill] sm:$0xff] }
 0x28f   : > { %v10226_v43 = vpop.f32.mrf.mxu1  ;;  %10525 = vmatmul.mubr.msk.f32.gmra.mxu1 %vm363_vm2, %v16114_v38  ;;  %10577 = vmatprep.mubr.msk.f32.mxu0 %vm363_vm2, %v16115_v37 }
 0x290   : > { %v14181_v20 = vadd.f32 %v4734_v19, %v4582_v30  ;;  %v4585_v45 = vadd.f32 %v10226_v43, %v13926_v44  ;;  %v4744_v14 = vpop.f32.mrf.mxu0  ;;  %10527 = vmatprep.mubr.msk.f32.mxu1 %vm363_vm2, %v16116_v1  ;;  %v16119_v19 = vld [vmem:[#allocation130_spill] sm:$0xff]  ;;  %v16122_v1 = vld [vmem:[#allocation103_spill] sm:$0xff] }
 0x291   : > { %v4473_v42 = vpop.f32.mrf.mxu1 }
 0x292   : > { %v14186_v24 = vadd.f32 %v10276_v56, %v4585_v45  ;;  %v4584_v31 = vadd.f32 %v4473_v42, %v13935_v59  ;;  %v10279_v5 = vpop.f32.mrf.mxu0  ;;  %10578 = vmatmul.mubr.msk.f32.gmra.mxu0 %vm363_vm2, %v16117_v13  ;;  %v16120_v56 = vld [vmem:[#allocation100_spill] sm:$0xff]  ;;  %v16121_v13 = vld [vmem:[#allocation131_spill] sm:$0xff] }
 0x293   : > { %v10229_v38 = vpop.f32.mrf.mxu1  ;;  %10528 = vmatmul.mubr.msk.f32.gmra.mxu1 %vm363_vm2, %v16118_v10  ;;  %10580 = vmatprep.mubr.msk.f32.mxu0 %vm363_vm2, %v16119_v19 }
 0x294   : > { %v14195_v44 = vadd.f32 %v4744_v14, %v4584_v31  ;;  %v4587_v43 = vadd.f32 %v10229_v38, %v13940_v9  ;;  %v4754_v30 = vpop.f32.mrf.mxu0  ;;  %10530 = vmatprep.mubr.msk.f32.mxu1 %vm363_vm2, %v16120_v56  ;;  %v16123_v14 = vld [vmem:[#allocation132_spill] sm:$0xff]  ;;  %v16126_v56 = vld [vmem:[#allocation106_spill] sm:$0xff] }
 0x295   : > { %v4483_v59 = vpop.f32.mrf.mxu1 }
 0x296   : > { %v14200_v37 = vadd.f32 %v10279_v5, %v4587_v43  ;;  %v4586_v45 = vadd.f32 %v4483_v59, %v13949_v23  ;;  %v10282_v42 = vpop.f32.mrf.mxu0  ;;  %10581 = vmatmul.mubr.msk.f32.gmra.mxu0 %vm363_vm2, %v16121_v13  ;;  %v16124_v5 = vld [vmem:[#allocation104_spill] sm:$0xff]  ;;  %v16125_v13 = vld [vmem:[#allocation135_spill] sm:$0xff] }
 0x297   : > { %v10232_v10 = vpop.f32.mrf.mxu1  ;;  %10531 = vmatmul.mubr.msk.f32.gmra.mxu1 %vm363_vm2, %v16122_v1  ;;  %10583 = vmatprep.mubr.msk.f32.mxu0 %vm363_vm2, %v16123_v14 }
 0x298   : > { %v14209_v9 = vadd.f32 %v4754_v30, %v4586_v45  ;;  %v4589_v38 = vadd.f32 %v10232_v10, %v13954_v33  ;;  %v4764_v31 = vpop.f32.mrf.mxu0  ;;  %10533 = vmatprep.mubr.msk.f32.mxu1 %vm363_vm2, %v16124_v5  ;;  %v16127_v30 = vld [vmem:[#allocation136_spill] sm:$0xff]  ;;  %v16130_v5 = vld [vmem:[#allocation111_spill] sm:$0xff] }
 0x299   : > { %v4493_v23 = vpop.f32.mrf.mxu1 }
 0x29a   : > { %v14214_v19 = vadd.f32 %v10282_v42, %v4589_v38  ;;  %v4588_v43 = vadd.f32 %v4493_v23, %v13963_v3  ;;  %v10285_v59 = vpop.f32.mrf.mxu0  ;;  %10584 = vmatmul.mubr.msk.f32.gmra.mxu0 %vm363_vm2, %v16125_v13  ;;  %v16128_v42 = vld [vmem:[#allocation108_spill] sm:$0xff] }
 0x29b   : > { %v10235_v1 = vpop.f32.mrf.mxu1  ;;  %10534 = vmatmul.mubr.msk.f32.gmra.mxu1 %vm363_vm2, %v16126_v56  ;;  %10586 = vmatprep.mubr.msk.f32.mxu0 %vm363_vm2, %v16127_v30  ;;  %v16129_v13 = vld [vmem:[#allocation140_spill] sm:$0xff] }
 0x29c   : > { %v14223_v33 = vadd.f32 %v4764_v31, %v4588_v43  ;;  %v4591_v10 = vadd.f32 %v10235_v1, %v13968_v35  ;;  %v4774_v45 = vpop.f32.mrf.mxu0  ;;  %10536 = vmatprep.mubr.msk.f32.mxu1 %vm363_vm2, %v16128_v42  ;;  %v16131_v31 = vld [vmem:[#allocation144_spill] sm:$0xff]  ;;  %v16134_v42 = vld [vmem:[#allocation114_spill] sm:$0xff] }
 0x29d   : > { %v4503_v3 = vpop.f32.mrf.mxu1 }
 0x29e   : > { %v14228_v14 = vadd.f32 %v10285_v59, %v4591_v10  ;;  %v4590_v38 = vadd.f32 %v4503_v3, %v13977_v34  ;;  %v10288_v23 = vpop.f32.mrf.mxu0  ;;  %10587 = vmatmul.mubr.msk.f32.gmra.mxu0 %vm363_vm2, %v16129_v13  ;;  %v16132_v59 = vld [vmem:[#allocation112_spill] sm:$0xff] }
 0x29f   : > { %v10238_v56 = vpop.f32.mrf.mxu1  ;;  %10537 = vmatmul.mubr.msk.f32.gmra.mxu1 %vm363_vm2, %v16130_v5  ;;  %10589 = vmatprep.mubr.msk.f32.mxu0 %vm363_vm2, %v16131_v31  ;;  %v16133_v13 = vld [vmem:[#allocation8_spill] sm:$0xff] }
 0x2a0   : > { %v14237_v35 = vadd.f32 %v4774_v45, %v4590_v38  ;;  %v4593_v1 = vadd.f32 %v10238_v56, %v13982_v25  ;;  %v4784_v43 = vpop.f32.mrf.mxu0  ;;  %10539 = vmatprep.mubr.msk.f32.mxu1 %vm363_vm2, %v16132_v59  ;;  %v16135_v45 = vld [vmem:[#allocation37_spill] sm:$0xff]  ;;  %v16138_v59 = vld [vmem:[#allocation118_spill] sm:$0xff] }
 0x2a1   : > { %v4513_v34 = vpop.f32.mrf.mxu1 }
 0x2a2   : > { %v14242_v30 = vadd.f32 %v10288_v23, %v4593_v1  ;;  %v4592_v10 = vadd.f32 %v4513_v34, %v13991_v12  ;;  %v10291_v3 = vpop.f32.mrf.mxu0  ;;  %10590 = vmatmul.mubr.msk.f32.gmra.mxu0 %vm363_vm2, %v16133_v13  ;;  %v16136_v23 = vld [vmem:[#allocation116_spill] sm:$0xff]  ;;  %v16137_v13 = vld [vmem:[#allocation10_spill] sm:$0xff] }
 0x2a3   : > { %v10241_v5 = vpop.f32.mrf.mxu1  ;;  %10540 = vmatmul.mubr.msk.f32.gmra.mxu1 %vm363_vm2, %v16134_v42  ;;  %10592 = vmatprep.mubr.msk.f32.mxu0 %vm363_vm2, %v16135_v45  ;;  %v5958_v45 = vrot.slane %v13725_v39, 4 }
 0x2a4   : > { %v14251_v25 = vadd.f32 %v4784_v43, %v4592_v10  ;;  %v4595_v56 = vadd.f32 %v10241_v5, %v13996_v50  ;;  %v4794_v38 = vpop.f32.mrf.mxu0  ;;  %10542 = vmatprep.mubr.msk.f32.mxu1 %vm363_vm2, %v16136_v23  ;;  %v16139_v10 = vld [vmem:[#allocation138_spill] sm:$0xff] }
 0x2a5   : > { %v4523_v12 = vpop.f32.mrf.mxu1 }
 0x2a6   : > { %v14256_v31 = vadd.f32 %v10291_v3, %v4595_v56  ;;  %v4594_v1 = vadd.f32 %v4523_v12, %v14005_v46  ;;  %v10294_v34 = vpop.f32.mrf.mxu0  ;;  %10593 = vmatmul.mubr.msk.f32.gmra.mxu0 %vm363_vm2, %v16137_v13  ;;  %v5957_v3 = vrot.slane %v13722_v11, 4 }
 0x2a7   : > { %v10244_v42 = vpop.f32.mrf.mxu1  ;;  %10543 = vmatmul.mubr.msk.f32.gmra.mxu1 %vm363_vm2, %v16138_v59  ;;  %10595 = vmatprep.mubr.msk.f32.mxu0 %vm363_vm2, %v13769_v55  ;;  %v16140_v55 = vld [vmem:[#allocation14_spill] sm:$0xff] }
 0x2a8   : > { %v14265_v50 = vadd.f32 %v4794_v38, %v4594_v1  ;;  %v4597_v5 = vadd.f32 %v10244_v42, %v14014_v17  ;;  %v4804_v43 = vpop.f32.mrf.mxu0  ;;  %10545 = vmatprep.mubr.msk.f32.mxu1 %vm363_vm2, %v16139_v10  ;;  %v16141_v17 = vld [vmem:[#allocation137_spill] sm:$0xff]  ;;  %v14291_v10 = vsel %vm428_vm0, %v5957_v3, %v5958_v45 }
 0x2a9   : > { %v4533_v46 = vpop.f32.mrf.mxu1  ;;  %16143 = vst [vmem:[#allocation67_spill] sm:$0xff] %v14291_v10 }
 0x2aa   : > { %v14272_v56 = vadd.f32 %v10294_v34, %v4597_v5  ;;  %v4596_v12 = vadd.f32 %v4533_v46, %v14024_v62  ;;  %v10297_v13 = vpop.f32.mrf.mxu0  ;;  %10596 = vmatmul.mubr.msk.f32.gmra.mxu0 %vm363_vm2, %v16140_v55  ;;  %v16142_v5 = vld [vmem:[#allocation4_spill] sm:$0xff]  ;;  %v14287_v62 = vld [vmem:[%s11060_s23 + $0x1c8] sm:$0xff]  ;;  %v5960_v46 = vrot.slane %v13750_v8, 4 }
 0x2ab   : > { %v10247_v38 = vpop.f32.mrf.mxu1  ;;  %10546 = vmatmul.mubr.msk.f32.gmra.mxu1 %vm363_vm2, %v16141_v17  ;;  %10598 = vmatprep.mubr.msk.f32.mxu0 %vm363_vm2, %v13722_v11  ;;  %v14303_v8 = vld [vmem:[%s11060_s23 + $0x1d0] sm:$0xff] }
 0x2ac   : > { %v14281_v42 = vadd.f32 %v4804_v43, %v4596_v12  ;;  %v4599_v1 = vadd.f32 %v10247_v38, %v14036_v4  ;;  %v4814_v34 = vpop.f32.mrf.mxu0  ;;  %10548 = vmatprep.mubr.msk.f32.mxu1 %vm363_vm2, %v16142_v5  ;;  %v16144_v12 = vld [vmem:[#allocation62_spill] sm:$0xff]  ;;  %v16149_v5 = vld [vmem:[#allocation19_spill] sm:$0xff] }
 0x2ad   : > { %v4543_v55 = vpop.f32.mrf.mxu1 }
 0x2ae   : > { %v14293_v17 = vadd.f32 %v10297_v13, %v4599_v1  ;;  %v4598_v11 = vadd.f32 %v4543_v55, %v14048_v26  ;;  %v10300_v43 = vpop.f32.mrf.mxu0  ;;  %10599 = vmatmul.mubr.msk.f32.gmra.mxu0 %vm363_vm2, %v13725_v39  ;;  %v14311_v26 = vsel %vm428_vm0, %v5958_v45, %v5960_v46 }
 0x2af   : > { %v10250_v4 = vpop.f32.mrf.mxu1  ;;  %10549 = vmatmul.mubr.msk.f32.gmra.mxu1 %vm363_vm2, %v16144_v12  ;;  %10601 = vmatprep.mubr.msk.f32.mxu0 %vm363_vm2, %v14287_v62  ;;  %16145 = vst [vmem:[#allocation69_spill] sm:$0xff] %v14311_v26 }
 0x2b0   : > { %v14305_v38 = vadd.f32 %v4814_v34, %v4598_v11  ;;  %v4601_v3 = vadd.f32 %v10250_v4, %v14056_v2  ;;  %v4824_v13 = vpop.f32.mrf.mxu0  ;;  %10551 = vmatprep.mubr.msk.f32.mxu1 %vm363_vm2, %v14291_v10  ;;  %v16146_v2 = vld [vmem:[#allocation40_spill] sm:$0xff]  ;;  %v16148_v10 = vld [vmem:[#allocation41_spill] sm:$0xff] }
 0x2b1   : > { %v4553_v39 = vpop.f32.mrf.mxu1 }
 0x2b2   : > { %v14313_v1 = vadd.f32 %v10300_v43, %v4601_v3  ;;  %v4600_v55 = vadd.f32 %v4553_v39, %v14065_v53  ;;  %v10303_v12 = vpop.f32.mrf.mxu0  ;;  %10602 = vmatmul.mubr.msk.f32.gmra.mxu0 %vm363_vm2, %v14303_v8  ;;  %v16147_v43 = vld [vmem:[#allocation16_spill] sm:$0xff] }
 0x2b3   : > { %v10253_v34 = vpop.f32.mrf.mxu1  ;;  %10552 = vmatmul.mubr.msk.f32.gmra.mxu1 %vm363_vm2, %v14311_v26  ;;  %10656 = vmatprep.mubr.msk.f32.mxu0 %vm363_vm2, %v16146_v2  ;;  %v16152_v2 = vld [vmem:[#allocation43_spill] sm:$0xff] }
 0x2b4   : > { %v14322_v11 = vadd.f32 %v4824_v13, %v4600_v55  ;;  %v4603_v45 = vadd.f32 %v10253_v34, %v14070_v47  ;;  %v4834_v46 = vpop.f32.mrf.mxu0  ;;  %10606 = vmatprep.mubr.msk.f32.mxu1 %vm363_vm2, %v16147_v43 }
 0x2b5   : > { %v4563_v53 = vpop.f32.mrf.mxu1 }
 0x2b6   : > { %v14327_v4 = vadd.f32 %v10303_v12, %v4603_v45  ;;  %v4602_v3 = vadd.f32 %v4563_v53, %v14089_v49  ;;  %v10358_v39 = vpop.f32.mrf.mxu0  ;;  %10657 = vmatmul.mubr.msk.f32.vlgmr.msra.gmra.mxu0 %vm363_vm2, %v16148_v10  ;;  %v16150_v49 = vld [vmem:[#allocation21_spill] sm:$0xff]  ;;  %v16151_v10 = vld [vmem:[#allocation42_spill] sm:$0xff] }
 0x2b7   : > { %v10308_v26 = vpop.f32.mrf.mxu1  ;;  %10607 = vmatmul.mubr.msk.f32.vlgmr.msra.gmra.mxu1 %vm363_vm2, %v16149_v5  ;;  %10755 = vmatpush3.msk.msra.mxu0 %vm428_vm0, %v14087_v61  ;;  %v16155_v53 = vld [vmem:[#allocation26_spill] sm:$0xff] }
 0x2b8   : > { %v14336_v47 = vadd.f32 %v4834_v46, %v4602_v3  ;;  %v5112_v13 = vadd.f32 %v10308_v26, %v14100_v27  ;;  %10705 = vmatpush3.msk.msra.mxu1 %vm428_vm0, %v14078_v21  ;;  %v5224_v12 = vpop.f32.mrf.mxu0  ;;  %10609 = vmatprep.mubr.msk.f32.mxu1 %vm363_vm2, %v16150_v49  ;;  %v16153_v26 = vld [vmem:[#allocation24_spill] sm:$0xff]  ;;  %v16156_v49 = vld [vmem:[#allocation45_spill] sm:$0xff] }
 0x2b9   : > { %v4952_v55 = vpop.f32.mrf.mxu1  ;;  %10659 = vmatprep.mubr.msk.f32.mxu0 %vm363_vm2, %v16151_v10  ;;  %v16154_v21 = vld [vmem:[#allocation44_spill] sm:$0xff] }
 0x2ba   : > { %v14345_v34 = vadd.f32 %v10358_v39, %v5112_v13  ;;  %v5111_v5 = vadd.f32 %v4952_v55, %v14111_v7  ;;  %v10361_v61 = vpop.f32.mrf.mxu0  ;;  %10660 = vmatmul.mubr.msk.f32.gmra.mxu0 %vm363_vm2, %v16152_v2  ;;  %v16157_v10 = vld [vmem:[#allocation28_spill] sm:$0xff] }
 0x2bb   : > { %v10311_v27 = vpop.f32.mrf.mxu1  ;;  %10610 = vmatmul.mubr.msk.f32.gmra.mxu1 %vm363_vm2, %v16153_v26  ;;  %10662 = vmatprep.mubr.msk.f32.mxu0 %vm363_vm2, %v16154_v21 }
 0x2bc   : > { %v14354_v45 = vadd.f32 %v5224_v12, %v5111_v5  ;;  %v5114_v46 = vadd.f32 %v10311_v27, %v14116_v29  ;;  %v5234_v43 = vpop.f32.mrf.mxu0  ;;  %10612 = vmatprep.mubr.msk.f32.mxu1 %vm363_vm2, %v16155_v53  ;;  %v16158_v12 = vld [vmem:[#allocation46_spill] sm:$0xff] }
 0x2bd   : > { %v4962_v7 = vpop.f32.mrf.mxu1 }
 0x2be   : > { %v14359_v3 = vadd.f32 %v10361_v61, %v5114_v46  ;;  %v5113_v39 = vadd.f32 %v4962_v7, %v14125_v18  ;;  %v10364_v13 = vpop.f32.mrf.mxu0  ;;  %10663 = vmatmul.mubr.msk.f32.gmra.mxu0 %vm363_vm2, %v16156_v49  ;;  %v16159_v61 = vld [vmem:[#allocation30_spill] sm:$0xff]  ;;  %v16160_v46 = vld [vmem:[#allocation47_spill] sm:$0xff]  ;;  %v16161_v7 = vld [vmem:[#allocation32_spill] sm:$0xff] }
 0x2bf   : > { %v10314_v55 = vpop.f32.mrf.mxu1  ;;  %10613 = vmatmul.mubr.msk.f32.gmra.mxu1 %vm363_vm2, %v16157_v10  ;;  %10665 = vmatprep.mubr.msk.f32.mxu0 %vm363_vm2, %v16158_v12 }
 0x2c0   : > { %v14368_v29 = vadd.f32 %v5234_v43, %v5113_v39  ;;  %v5116_v5 = vadd.f32 %v10314_v55, %v14130_v40  ;;  %v5244_v2 = vpop.f32.mrf.mxu0  ;;  %10615 = vmatprep.mubr.msk.f32.mxu1 %vm363_vm2, %v16159_v61  ;;  %v16162_v43 = vld [vmem:[#allocation48_spill] sm:$0xff] }
 0x2c1   : > { %v4972_v18 = vpop.f32.mrf.mxu1 }
 0x2c2   : > { %v14373_v27 = vadd.f32 %v10364_v13, %v5116_v5  ;;  %v5115_v26 = vadd.f32 %v4972_v18, %v14139_v51  ;;  %v10367_v21 = vpop.f32.mrf.mxu0  ;;  %10666 = vmatmul.mubr.msk.f32.gmra.mxu0 %vm363_vm2, %v16160_v46  ;;  %v16163_v13 = vld [vmem:[#allocation2_spill] sm:$0xff]  ;;  %v16164_v5 = vld [vmem:[#allocation49_spill] sm:$0xff]  ;;  %v16165_v18 = vld [vmem:[#allocation3_spill] sm:$0xff] }
 0x2c3   : > { %v10317_v53 = vpop.f32.mrf.mxu1  ;;  %10616 = vmatmul.mubr.msk.f32.gmra.mxu1 %vm363_vm2, %v16161_v7  ;;  %10668 = vmatprep.mubr.msk.f32.mxu0 %vm363_vm2, %v16162_v43 }
 0x2c4   : > { %v14382_v40 = vadd.f32 %v5244_v2, %v5115_v26  ;;  %v5118_v39 = vadd.f32 %v10317_v53, %v14144_v6  ;;  %v5254_v49 = vpop.f32.mrf.mxu0  ;;  %10618 = vmatprep.mubr.msk.f32.mxu1 %vm363_vm2, %v16163_v13  ;;  %v16166_v2 = vld [vmem:[#allocation50_spill] sm:$0xff] }
 0x2c5   : > { %v4982_v51 = vpop.f32.mrf.mxu1 }
 0x2c6   : > { %v14387_v55 = vadd.f32 %v10367_v21, %v5118_v39  ;;  %v5117_v10 = vadd.f32 %v4982_v51, %v14153_v28  ;;  %v10370_v12 = vpop.f32.mrf.mxu0  ;;  %10669 = vmatmul.mubr.msk.f32.gmra.mxu0 %vm363_vm2, %v16164_v5  ;;  %v16167_v21 = vld [vmem:[#allocation5_spill] sm:$0xff]  ;;  %v16168_v39 = vld [vmem:[#allocation51_spill] sm:$0xff] }
 0x2c7   : > { %v10320_v61 = vpop.f32.mrf.mxu1  ;;  %10619 = vmatmul.mubr.msk.f32.gmra.mxu1 %vm363_vm2, %v16165_v18  ;;  %10671 = vmatprep.mubr.msk.f32.mxu0 %vm363_vm2, %v16166_v2  ;;  %v16169_v51 = vld [vmem:[#allocation7_spill] sm:$0xff] }
 0x2c8   : > { %v14396_v6 = vadd.f32 %v5254_v49, %v5117_v10  ;;  %v5120_v26 = vadd.f32 %v10320_v61, %v14158_v22  ;;  %v5264_v46 = vpop.f32.mrf.mxu0  ;;  %10621 = vmatprep.mubr.msk.f32.mxu1 %vm363_vm2, %v16167_v21  ;;  %v16170_v49 = vld [vmem:[#allocation52_spill] sm:$0xff] }
 0x2c9   : > { %v4992_v28 = vpop.f32.mrf.mxu1 }
 0x2ca   : > { %v14401_v53 = vadd.f32 %v10370_v12, %v5120_v26  ;;  %v5119_v7 = vadd.f32 %v4992_v28, %v14167_v58  ;;  %v10373_v43 = vpop.f32.mrf.mxu0  ;;  %10672 = vmatmul.mubr.msk.f32.gmra.mxu0 %vm363_vm2, %v16168_v39  ;;  %v16171_v12 = vld [vmem:[#allocation9_spill] sm:$0xff]  ;;  %v16173_v28 = vld [vmem:[#allocation11_spill] sm:$0xff] }
 0x2cb   : > { %v10323_v13 = vpop.f32.mrf.mxu1  ;;  %10622 = vmatmul.mubr.msk.f32.gmra.mxu1 %vm363_vm2, %v16169_v51  ;;  %10674 = vmatprep.mubr.msk.f32.mxu0 %vm363_vm2, %v16170_v49  ;;  %v16172_v26 = vld [vmem:[#allocation53_spill] sm:$0xff]  ;;  %v16175_v49 = vld [vmem:[#allocation55_spill] sm:$0xff] }
 0x2cc   : > { %v14410_v22 = vadd.f32 %v5264_v46, %v5119_v7  ;;  %v5122_v10 = vadd.f32 %v10323_v13, %v14172_v32  ;;  %v5274_v5 = vpop.f32.mrf.mxu0  ;;  %10624 = vmatprep.mubr.msk.f32.mxu1 %vm363_vm2, %v16171_v12  ;;  %v16176_v12 = vld [vmem:[#allocation15_spill] sm:$0xff] }
 0x2cd   : > { %v5002_v58 = vpop.f32.mrf.mxu1 }
 0x2ce   : > { %v14415_v61 = vadd.f32 %v10373_v43, %v5122_v10  ;;  %v5121_v18 = vadd.f32 %v5002_v58, %v14181_v20  ;;  %v10376_v2 = vpop.f32.mrf.mxu0  ;;  %10675 = vmatmul.mubr.msk.f32.gmra.mxu0 %vm363_vm2, %v16172_v26  ;;  %v16174_v43 = vld [vmem:[#allocation13_spill] sm:$0xff] }
 0x2cf   : > { %v10326_v21 = vpop.f32.mrf.mxu1  ;;  %10625 = vmatmul.mubr.msk.f32.gmra.mxu1 %vm363_vm2, %v16173_v28  ;;  %10677 = vmatprep.mubr.msk.f32.mxu0 %vm363_vm2, %v16069_v41  ;;  %v16177_v41 = vld [vmem:[#allocation56_spill] sm:$0xff]  ;;  %v16179_v28 = vld [vmem:[#allocation57_spill] sm:$0xff] }
 0x2d0   : > { %v14424_v32 = vadd.f32 %v5274_v5, %v5121_v18  ;;  %v5124_v46 = vadd.f32 %v10326_v21, %v14186_v24  ;;  %v5284_v7 = vpop.f32.mrf.mxu0  ;;  %10627 = vmatprep.mubr.msk.f32.mxu1 %vm363_vm2, %v16174_v43  ;;  %v16178_v18 = vld [vmem:[#allocation17_spill] sm:$0xff]  ;;  %v16180_v43 = vld [vmem:[#allocation20_spill] sm:$0xff] }
 0x2d1   : > { %v5012_v20 = vpop.f32.mrf.mxu1 }
 0x2d2   : > { %v14429_v39 = vadd.f32 %v10376_v2, %v5124_v46  ;;  %v5123_v13 = vadd.f32 %v5012_v20, %v14195_v44  ;;  %v10379_v51 = vpop.f32.mrf.mxu0  ;;  %10678 = vmatmul.mubr.msk.f32.gmra.mxu0 %vm363_vm2, %v16175_v49 }
 0x2d3   : > { %v10329_v10 = vpop.f32.mrf.mxu1  ;;  %10628 = vmatmul.mubr.msk.f32.gmra.mxu1 %vm363_vm2, %v16176_v12  ;;  %10680 = vmatprep.mubr.msk.f32.mxu0 %vm363_vm2, %v16177_v41  ;;  %v16182_v41 = vld [vmem:[#allocation25_spill] sm:$0xff] }
 0x2d4   : > { %v14438_v24 = vadd.f32 %v5284_v7, %v5123_v13  ;;  %v5126_v5 = vadd.f32 %v10329_v10, %v14200_v37  ;;  %v5294_v58 = vpop.f32.mrf.mxu0  ;;  %10630 = vmatprep.mubr.msk.f32.mxu1 %vm363_vm2, %v16178_v18  ;;  %v16181_v13 = vld [vmem:[#allocation23_spill] sm:$0xff] }
 0x2d5   : > { %v5022_v44 = vpop.f32.mrf.mxu1  ;;  %v16184_v18 = vld [vmem:[#allocation27_spill] sm:$0xff] }
 0x2d6   : > { %v14443_v2 = vadd.f32 %v10379_v51, %v5126_v5  ;;  %v5125_v26 = vadd.f32 %v5022_v44, %v14209_v9  ;;  %v10382_v21 = vpop.f32.mrf.mxu0  ;;  %10681 = vmatmul.mubr.msk.f32.gmra.mxu0 %vm363_vm2, %v16179_v28 }
 0x2d7   : > { %v10332_v46 = vpop.f32.mrf.mxu1  ;;  %10631 = vmatmul.mubr.msk.f32.gmra.mxu1 %vm363_vm2, %v16180_v43  ;;  %10683 = vmatprep.mubr.msk.f32.mxu0 %vm363_vm2, %v16076_v15  ;;  %v16183_v15 = vld [vmem:[#allocation22_spill] sm:$0xff] }
 0x2d8   : > { %v14452_v37 = vadd.f32 %v5294_v58, %v5125_v26  ;;  %v5128_v7 = vadd.f32 %v10332_v46, %v14214_v19  ;;  %v5304_v20 = vpop.f32.mrf.mxu0  ;;  %10633 = vmatprep.mubr.msk.f32.mxu1 %vm363_vm2, %v16181_v13  ;;  %v16186_v46 = vld [vmem:[#allocation29_spill] sm:$0xff] }
 0x2d9   : > { %v5032_v9 = vpop.f32.mrf.mxu1 }
 0x2da   : > { %v14457_v51 = vadd.f32 %v10382_v21, %v5128_v7  ;;  %v5127_v49 = vadd.f32 %v5032_v9, %v14223_v33  ;;  %v10385_v10 = vpop.f32.mrf.mxu0  ;;  %10684 = vmatmul.mubr.msk.f32.gmra.mxu0 %vm363_vm2, %v16078_v0  ;;  %v16185_v21 = vld [vmem:[#allocation59_spill] sm:$0xff] }
 0x2db   : > { %v10335_v12 = vpop.f32.mrf.mxu1  ;;  %10634 = vmatmul.mubr.msk.f32.gmra.mxu1 %vm363_vm2, %v16182_v41  ;;  %10686 = vmatprep.mubr.msk.f32.mxu0 %vm363_vm2, %v16183_v15  ;;  %v16189_v41 = vld [vmem:[#allocation33_spill] sm:$0xff] }
 0x2dc   : > { %v14466_v19 = vadd.f32 %v5304_v20, %v5127_v49  ;;  %v5130_v5 = vadd.f32 %v10335_v12, %v14228_v14  ;;  %v5314_v58 = vpop.f32.mrf.mxu0  ;;  %10636 = vmatprep.mubr.msk.f32.mxu1 %vm363_vm2, %v16184_v18  ;;  %v16187_v20 = vld [vmem:[#allocation31_spill] sm:$0xff] }
 0x2dd   : > { %v5042_v33 = vpop.f32.mrf.mxu1 }
 0x2de   : > { %v14471_v44 = vadd.f32 %v10385_v10, %v5130_v5  ;;  %v5129_v0 = vadd.f32 %v5042_v33, %v14237_v35  ;;  %v10388_v26 = vpop.f32.mrf.mxu0  ;;  %10687 = vmatmul.mubr.msk.f32.gmra.mxu0 %vm363_vm2, %v16185_v21  ;;  %v16188_v10 = vld [vmem:[#allocation61_spill] sm:$0xff] }
 0x2df   : > { %v10338_v28 = vpop.f32.mrf.mxu1  ;;  %10637 = vmatmul.mubr.msk.f32.gmra.mxu1 %vm363_vm2, %v16186_v46  ;;  %10689 = vmatprep.mubr.msk.f32.mxu0 %vm363_vm2, %v16082_v52  ;;  %v16190_v52 = vld [vmem:[#allocation36_spill] sm:$0xff] }
 0x2e0   : > { %v14480_v14 = vadd.f32 %v5314_v58, %v5129_v0  ;;  %v5132_v43 = vadd.f32 %v10338_v28, %v14242_v30  ;;  %v5324_v7 = vpop.f32.mrf.mxu0  ;;  %10639 = vmatprep.mubr.msk.f32.mxu1 %vm363_vm2, %v16187_v20  ;;  %v16191_v58 = vld [vmem:[#allocation141_spill] sm:$0xff]  ;;  %v6769_v20 = vrot.slane %v14303_v8, 2 }
 0x2e1   : > { %v5052_v35 = vpop.f32.mrf.mxu1  ;;  %v16193_v28 = vld [vmem:[#allocation145_spill] sm:$0xff] }
 0x2e2   : > { %v14485_v13 = vadd.f32 %v10388_v26, %v5132_v43  ;;  %v5131_v9 = vadd.f32 %v5052_v35, %v14251_v25  ;;  %v10391_v49 = vpop.f32.mrf.mxu0  ;;  %10690 = vmatmul.mubr.msk.f32.gmra.mxu0 %vm363_vm2, %v16188_v10  ;;  %v16192_v26 = vld [vmem:[#allocation133_spill] sm:$0xff]  ;;  %v6498_v10 = vrot.slane %v14303_v8, 1 }
 0x2e3   : > { %v10341_v12 = vpop.f32.mrf.mxu1  ;;  %10640 = vmatmul.mubr.msk.f32.gmra.mxu1 %vm363_vm2, %v16189_v41  ;;  %10692 = vmatprep.mubr.msk.f32.mxu0 %vm363_vm2, %v16190_v52  ;;  %v14516_v35 = vld [vmem:[%s11060_s23 + $0x1d8] sm:$0xf]  ;;  %v16195_v41 = vld [vmem:[#allocation143_spill] sm:$0xff] }
 0x2e4   : > { %v14494_v30 = vadd.f32 %v5324_v7, %v5131_v9  ;;  %v5134_v15 = vadd.f32 %v10341_v12, %v14256_v31  ;;  %v5334_v5 = vpop.f32.mrf.mxu0  ;;  %10642 = vmatprep.mubr.msk.f32.mxu1 %vm363_vm2, %v16191_v58  ;;  %v16194_v7 = vld [vmem:[#allocation142_spill] sm:$0xff] }
 0x2e5   : > { %v5062_v25 = vpop.f32.mrf.mxu1 }
 0x2e6   : > { %v14499_v18 = vadd.f32 %v10391_v49, %v5134_v15  ;;  %v5133_v33 = vadd.f32 %v5062_v25, %v14265_v50  ;;  %v10394_v0 = vpop.f32.mrf.mxu0  ;;  %10693 = vmatmul.mubr.msk.f32.gmra.mxu0 %vm363_vm2, %v16192_v26  ;;  %v6768_v50 = vrot.slane %v14287_v62, 2  ;;  %v6497_v49 = vrot.slane %v14287_v62, 1  ;;  %v16196_v15 = vld [vmem:[#allocation146_spill] sm:$0xff] }
 0x2e7   : > { %v10344_v21 = vpop.f32.mrf.mxu1  ;;  %10643 = vmatmul.mubr.msk.f32.gmra.mxu1 %vm363_vm2, %v16193_v28  ;;  %10695 = vmatprep.mubr.msk.f32.mxu0 %vm363_vm2, %v16087_v63  ;;  %v6500_v26 = vrot.slane %v14516_v35, 1 }
 0x2e8   : > { %v14508_v31 = vadd.f32 %v5334_v5, %v5133_v33  ;;  %v5136_v46 = vadd.f32 %v10344_v21, %v14272_v56  ;;  %v5344_v43 = vpop.f32.mrf.mxu0  ;;  %10645 = vmatprep.mubr.msk.f32.mxu1 %vm363_vm2, %v16194_v7  ;;  %v6771_v5 = vrot.slane %v14516_v35, 2  ;;  %v6499_v28 = vsel %vm280_vm1, %v6497_v49, %v6498_v10 }
 0x2e9   : > { %v5072_v9 = vpop.f32.mrf.mxu1 }
 0x2ea   : > { %v14520_v63 = vadd.f32 %v10394_v0, %v5136_v46  ;;  %v5135_v12 = vadd.f32 %v5072_v9, %v14281_v42  ;;  %v10397_v56 = vpop.f32.mrf.mxu0  ;;  %10696 = vmatmul.mubr.msk.f32.gmra.mxu0 %vm363_vm2, %v16195_v41  ;;  %v16197_v0 = vld [vmem:[#allocation12_spill] sm:$0xff]  ;;  %v6770_v42 = vsel %vm949_vm3, %v6768_v50, %v6769_v20  ;;  %v6772_v50 = vsel %vm949_vm3, %v6769_v20, %v6771_v5 }
 0x2eb   : > { %v10347_v52 = vpop.f32.mrf.mxu1  ;;  %10646 = vmatmul.mubr.msk.f32.gmra.mxu1 %vm363_vm2, %v16196_v15  ;;  %10698 = vmatprep.mubr.msk.f32.mxu0 %vm363_vm2, %v14034_v54 }
 0x2ec   : > { %v14530_v58 = vadd.f32 %v5344_v43, %v5135_v12  ;;  %v5138_v25 = vadd.f32 %v10347_v52, %v14293_v17  ;;  %v5354_v33 = vpop.f32.mrf.mxu0  ;;  %10648 = vmatprep.mubr.msk.f32.mxu1 %vm363_vm2, %v16197_v0  ;;  %v16198_v43 = vld [vmem:[#allocation64_spill] sm:$0xff] }
 0x2ed   : > { %v5082_v21 = vpop.f32.mrf.mxu1 }
 0x2ee   : > { %v14538_v46 = vadd.f32 %v10397_v56, %v5138_v25  ;;  %v5137_v54 = vadd.f32 %v5082_v21, %v14305_v38  ;;  %v10400_v7 = vpop.f32.mrf.mxu0  ;;  %10699 = vmatmul.mubr.msk.f32.gmra.mxu0 %vm363_vm2, %v14054_v48  ;;  %v6501_v38 = vsel %vm280_vm1, %v6498_v10, %v6500_v26  ;;  %v16199_v10 = vld [vmem:[#allocation73_spill] sm:$0xff]  ;;  %v16200_v26 = vld [vmem:[#allocation75_spill] sm:$0xff] }
 0x2ef   : > { %v10350_v17 = vpop.f32.mrf.mxu1  ;;  %10649 = vmatmul.mubr.msk.f32.gmra.mxu1 %vm363_vm2, %v16198_v43  ;;  %10701 = vmatprep.mubr.msk.f32.mxu0 %vm363_vm2, %v6770_v42  ;;  %v16202_v43 = vld [vmem:[#allocation78_spill] sm:$0xff] }
 0x2f0   : > { %v14547_v9 = vadd.f32 %v5354_v33, %v5137_v54  ;;  %v5140_v49 = vadd.f32 %v10350_v17, %v14313_v1  ;;  %v5364_v12 = vpop.f32.mrf.mxu0  ;;  %10651 = vmatprep.mubr.msk.f32.mxu1 %vm363_vm2, %v6499_v28  ;;  %v16201_v28 = vld [vmem:[#allocation77_spill] sm:$0xff] }
 0x2f1   : > { %v5092_v56 = vpop.f32.mrf.mxu1 }
 0x2f2   : > { %v14552_v41 = vadd.f32 %v10400_v7, %v5140_v49  ;;  %v5139_v48 = vadd.f32 %v5092_v56, %v14322_v11  ;;  %v10403_v52 = vpop.f32.mrf.mxu0  ;;  %10702 = vmatmul.mubr.msk.f32.gmra.mxu0 %vm363_vm2, %v6772_v50 }
 0x2f3   : > { %v10353_v15 = vpop.f32.mrf.mxu1  ;;  %10652 = vmatmul.mubr.msk.f32.gmra.mxu1 %vm363_vm2, %v6501_v38  ;;  %10756 = vmatprep.mubr.msk.f32.mxu0 %vm363_vm2, %v16093_v57 }
 0x2f4   : > { %v14559_v1 = vadd.f32 %v5364_v12, %v5139_v48  ;;  %v5142_v20 = vadd.f32 %v10353_v15, %v14327_v4  ;;  %v5374_v5 = vpop.f32.mrf.mxu0  ;;  %10706 = vmatprep.mubr.msk.f32.mxu1 %vm363_vm2, %v16199_v10  ;;  %v16204_v12 = vld [vmem:[#allocation81_spill] sm:$0xff]  ;;  %v16205_v48 = vld [vmem:[#allocation82_spill] sm:$0xff]  ;;  %v16206_v15 = vld [vmem:[#allocation83_spill] sm:$0xff] }
 0x2f5   : > { %v5102_v25 = vpop.f32.mrf.mxu1 }
 0x2f6   : > { %v14564_v33 = vadd.f32 %v10403_v52, %v5142_v20  ;;  %v5141_v11 = vadd.f32 %v5102_v25, %v14336_v47  ;;  %v10458_v0 = vpop.f32.mrf.mxu0  ;;  %10757 = vmatmul.mubr.msk.f32.vlgmr.msra.gmra.mxu0 %vm363_vm2, %v16094_v36  ;;  %v16207_v20 = vld [vmem:[#allocation84_spill] sm:$0xff]  ;;  %v16208_v25 = vld [vmem:[#allocation85_spill] sm:$0xff] }
 0x2f7   : > { %v10408_v42 = vpop.f32.mrf.mxu1  ;;  %10707 = vmatmul.mubr.msk.f32.vlgmr.msra.gmra.mxu1 %vm363_vm2, %v16200_v26  ;;  %10759 = vmatprep.mubr.msk.f32.mxu0 %vm363_vm2, %v16096_v60  ;;  %v16203_v60 = vld [vmem:[#allocation80_spill] sm:$0xff]  ;;  %v16209_v26 = vld [vmem:[#allocation87_spill] sm:$0xff] }
 0x2f8   : > { %v14573_v57 = vadd.f32 %v5374_v5, %v5141_v11  ;;  %v5655_v4 = vadd.f32 %v10408_v42, %v14345_v34  ;;  %v5766_v21 = vpop.f32.mrf.mxu0  ;;  %10709 = vmatprep.mubr.msk.f32.mxu1 %vm363_vm2, %v16201_v28  ;;  %v16211_v28 = vld [vmem:[#allocation88_spill] sm:$0xff] }
 0x2f9   : > { %v5495_v47 = vpop.f32.mrf.mxu1 }
 0x2fa   : > { %v14578_v54 = vadd.f32 %v10458_v0, %v5655_v4  ;;  %v5654_v36 = vadd.f32 %v5495_v47, %v14354_v45  ;;  %v10461_v7 = vpop.f32.mrf.mxu0  ;;  %10760 = vmatmul.mubr.msk.f32.gmra.mxu0 %vm363_vm2, %v16098_v16 }
 0x2fb   : > { %v10411_v17 = vpop.f32.mrf.mxu1  ;;  %10710 = vmatmul.mubr.msk.f32.gmra.mxu1 %vm363_vm2, %v16202_v43  ;;  %10762 = vmatprep.mubr.msk.f32.mxu0 %vm363_vm2, %v16203_v60 }
 0x2fc   : > { %v14587_v34 = vadd.f32 %v5766_v21, %v5654_v36  ;;  %v5657_v50 = vadd.f32 %v10411_v17, %v14359_v3  ;;  %v5776_v49 = vpop.f32.mrf.mxu0  ;;  %10712 = vmatprep.mubr.msk.f32.mxu1 %vm363_vm2, %v16204_v12  ;;  %v16210_v21 = vld [vmem:[#allocation86_spill] sm:$0xff]  ;;  %v16214_v12 = vld [vmem:[#allocation91_spill] sm:$0xff] }
 0x2fd   : > { %v5505_v45 = vpop.f32.mrf.mxu1 }
 0x2fe   : > { %v14592_v38 = vadd.f32 %v10461_v7, %v5657_v50  ;;  %v5656_v16 = vadd.f32 %v5505_v45, %v14368_v29  ;;  %v10464_v56 = vpop.f32.mrf.mxu0  ;;  %10763 = vmatmul.mubr.msk.f32.gmra.mxu0 %vm363_vm2, %v16205_v48  ;;  %v16212_v7 = vld [vmem:[#allocation89_spill] sm:$0xff]  ;;  %v16213_v50 = vld [vmem:[#allocation90_spill] sm:$0xff]  ;;  %v16215_v45 = vld [vmem:[#allocation92_spill] sm:$0xff] }
 0x2ff   : > { %v10414_v52 = vpop.f32.mrf.mxu1  ;;  %10713 = vmatmul.mubr.msk.f32.gmra.mxu1 %vm363_vm2, %v16206_v15  ;;  %10765 = vmatprep.mubr.msk.f32.mxu0 %vm363_vm2, %v16207_v20  ;;  %v16216_v48 = vld [vmem:[#allocation93_spill] sm:$0xff] }
 0x300   : > { %v14601_v3 = vadd.f32 %v5776_v49, %v5656_v16  ;;  %v5659_v5 = vadd.f32 %v10414_v52, %v14373_v27  ;;  %v5786_v10 = vpop.f32.mrf.mxu0  ;;  %10715 = vmatprep.mubr.msk.f32.mxu1 %vm363_vm2, %v16208_v25  ;;  %v16218_v25 = vld [vmem:[#allocation94_spill] sm:$0xff] }
 0x301   : > { %v5515_v29 = vpop.f32.mrf.mxu1 }
 0x302   : > { %v14606_v11 = vadd.f32 %v10464_v56, %v5659_v5  ;;  %v5658_v0 = vadd.f32 %v5515_v29, %v14382_v40  ;;  %v10467_v42 = vpop.f32.mrf.mxu0  ;;  %10766 = vmatmul.mubr.msk.f32.gmra.mxu0 %vm363_vm2, %v16209_v26  ;;  %v16217_v5 = vld [vmem:[#allocation95_spill] sm:$0xff]  ;;  %v16219_v29 = vld [vmem:[#allocation96_spill] sm:$0xff]  ;;  %v16220_v26 = vld [vmem:[#allocation97_spill] sm:$0xff] }
 0x303   : > { %v10417_v4 = vpop.f32.mrf.mxu1  ;;  %10716 = vmatmul.mubr.msk.f32.gmra.mxu1 %vm363_vm2, %v16210_v21  ;;  %10768 = vmatprep.mubr.msk.f32.mxu0 %vm363_vm2, %v16211_v28 }
 0x304   : > { %v14615_v27 = vadd.f32 %v5786_v10, %v5658_v0  ;;  %v5661_v47 = vadd.f32 %v10417_v4, %v14387_v55  ;;  %v5796_v36 = vpop.f32.mrf.mxu0  ;;  %10718 = vmatprep.mubr.msk.f32.mxu1 %vm363_vm2, %v16212_v7  ;;  %v16222_v7 = vld [vmem:[#allocation99_spill] sm:$0xff] }
 0x305   : > { %v5525_v40 = vpop.f32.mrf.mxu1 }
 0x306   : > { %v14620_v17 = vadd.f32 %v10467_v42, %v5661_v47  ;;  %v5660_v43 = vadd.f32 %v5525_v40, %v14396_v6  ;;  %v10470_v60 = vpop.f32.mrf.mxu0  ;;  %10769 = vmatmul.mubr.msk.f32.gmra.mxu0 %vm363_vm2, %v16213_v50  ;;  %v16221_v47 = vld [vmem:[#allocation98_spill] sm:$0xff]  ;;  %v16223_v40 = vld [vmem:[#allocation100_spill] sm:$0xff]  ;;  %v16224_v50 = vld [vmem:[#allocation101_spill] sm:$0xff] }
 0x307   : > { %v10420_v49 = vpop.f32.mrf.mxu1  ;;  %10719 = vmatmul.mubr.msk.f32.gmra.mxu1 %vm363_vm2, %v16214_v12  ;;  %10771 = vmatprep.mubr.msk.f32.mxu0 %vm363_vm2, %v16215_v45 }
 0x308   : > { %v14629_v55 = vadd.f32 %v5796_v36, %v5660_v43  ;;  %v5663_v16 = vadd.f32 %v10420_v49, %v14401_v53  ;;  %v5806_v56 = vpop.f32.mrf.mxu0  ;;  %10721 = vmatprep.mubr.msk.f32.mxu1 %vm363_vm2, %v16216_v48  ;;  %v16226_v48 = vld [vmem:[#allocation102_spill] sm:$0xff] }
 0x309   : > { %v5535_v6 = vpop.f32.mrf.mxu1 }
 0x30a   : > { %v14634_v52 = vadd.f32 %v10470_v60, %v5663_v16  ;;  %v5662_v15 = vadd.f32 %v5535_v6, %v14410_v22  ;;  %v10473_v20 = vpop.f32.mrf.mxu0  ;;  %10772 = vmatmul.mubr.msk.f32.gmra.mxu0 %vm363_vm2, %v16217_v5  ;;  %v16225_v16 = vld [vmem:[#allocation103_spill] sm:$0xff]  ;;  %v16227_v6 = vld [vmem:[#allocation104_spill] sm:$0xff]  ;;  %v16228_v5 = vld [vmem:[#allocation105_spill] sm:$0xff] }
 0x30b   : > { %v10423_v10 = vpop.f32.mrf.mxu1  ;;  %10722 = vmatmul.mubr.msk.f32.gmra.mxu1 %vm363_vm2, %v16218_v25  ;;  %10774 = vmatprep.mubr.msk.f32.mxu0 %vm363_vm2, %v16219_v29 }
 0x30c   : > { %v14643_v53 = vadd.f32 %v5806_v56, %v5662_v15  ;;  %v5665_v0 = vadd.f32 %v10423_v10, %v14415_v61  ;;  %v5816_v42 = vpop.f32.mrf.mxu0  ;;  %10724 = vmatprep.mubr.msk.f32.mxu1 %vm363_vm2, %v16220_v26  ;;  %v16230_v26 = vld [vmem:[#allocation107_spill] sm:$0xff] }
 0x30d   : > { %v5545_v22 = vpop.f32.mrf.mxu1 }
 0x30e   : > { %v14648_v4 = vadd.f32 %v10473_v20, %v5665_v0  ;;  %v5664_v21 = vadd.f32 %v5545_v22, %v14424_v32  ;;  %v10476_v28 = vpop.f32.mrf.mxu0  ;;  %10775 = vmatmul.mubr.msk.f32.gmra.mxu0 %vm363_vm2, %v16221_v47  ;;  %v16229_v0 = vld [vmem:[#allocation106_spill] sm:$0xff]  ;;  %v16231_v22 = vld [vmem:[#allocation108_spill] sm:$0xff]  ;;  %v16232_v47 = vld [vmem:[#allocation109_spill] sm:$0xff] }
 0x30f   : > { %v10426_v36 = vpop.f32.mrf.mxu1  ;;  %10725 = vmatmul.mubr.msk.f32.gmra.mxu1 %vm363_vm2, %v16222_v7  ;;  %10777 = vmatprep.mubr.msk.f32.mxu0 %vm363_vm2, %v16223_v40 }
 0x310   : > { %v14657_v61 = vadd.f32 %v5816_v42, %v5664_v21  ;;  %v5667_v43 = vadd.f32 %v10426_v36, %v14429_v39  ;;  %v5826_v60 = vpop.f32.mrf.mxu0  ;;  %10727 = vmatprep.mubr.msk.f32.mxu1 %vm363_vm2, %v16224_v50  ;;  %v16234_v50 = vld [vmem:[#allocation110_spill] sm:$0xff] }
 0x311   : > { %v5555_v32 = vpop.f32.mrf.mxu1 }
 0x312   : > { %v14662_v49 = vadd.f32 %v10476_v28, %v5667_v43  ;;  %v5666_v12 = vadd.f32 %v5555_v32, %v14438_v24  ;;  %v10479_v45 = vpop.f32.mrf.mxu0  ;;  %10778 = vmatmul.mubr.msk.f32.gmra.mxu0 %vm363_vm2, %v16225_v16  ;;  %v16233_v43 = vld [vmem:[#allocation111_spill] sm:$0xff]  ;;  %v16235_v32 = vld [vmem:[#allocation112_spill] sm:$0xff]  ;;  %v16236_v16 = vld [vmem:[#allocation113_spill] sm:$0xff] }
 0x313   : > { %v10429_v56 = vpop.f32.mrf.mxu1  ;;  %10728 = vmatmul.mubr.msk.f32.gmra.mxu1 %vm363_vm2, %v16226_v48  ;;  %10780 = vmatprep.mubr.msk.f32.mxu0 %vm363_vm2, %v16227_v6 }
 0x314   : > { %v14671_v39 = vadd.f32 %v5826_v60, %v5666_v12  ;;  %v5669_v15 = vadd.f32 %v10429_v56, %v14443_v2  ;;  %v5836_v20 = vpop.f32.mrf.mxu0  ;;  %10730 = vmatprep.mubr.msk.f32.mxu1 %vm363_vm2, %v16228_v5  ;;  %v16238_v5 = vld [vmem:[#allocation115_spill] sm:$0xff] }
 0x315   : > { %v5565_v24 = vpop.f32.mrf.mxu1 }
 0x316   : > { %v14676_v10 = vadd.f32 %v10479_v45, %v5669_v15  ;;  %v5668_v25 = vadd.f32 %v5565_v24, %v14452_v37  ;;  %v10482_v29 = vpop.f32.mrf.mxu0  ;;  %10781 = vmatmul.mubr.msk.f32.gmra.mxu0 %vm363_vm2, %v16229_v0  ;;  %v16237_v15 = vld [vmem:[#allocation114_spill] sm:$0xff] }
 0x317   : > { %v10432_v42 = vpop.f32.mrf.mxu1  ;;  %10731 = vmatmul.mubr.msk.f32.gmra.mxu1 %vm363_vm2, %v16230_v26  ;;  %10783 = vmatprep.mubr.msk.f32.mxu0 %vm363_vm2, %v16231_v22 }
 0x318   : > { %v14685_v2 = vadd.f32 %v5836_v20, %v5668_v25  ;;  %v5671_v21 = vadd.f32 %v10432_v42, %v14457_v51  ;;  %v5846_v28 = vpop.f32.mrf.mxu0  ;;  %10733 = vmatprep.mubr.msk.f32.mxu1 %vm363_vm2, %v16232_v47 }
 0x319   : > { %v5575_v37 = vpop.f32.mrf.mxu1 }
 0x31a   : > { %v14690_v36 = vadd.f32 %v10482_v29, %v5671_v21  ;;  %v5670_v7 = vadd.f32 %v5575_v37, %v14466_v19  ;;  %v10485_v40 = vpop.f32.mrf.mxu0  ;;  %10784 = vmatmul.mubr.msk.f32.gmra.mxu0 %vm363_vm2, %v16233_v43  ;;  %v16239_v29 = vld [vmem:[#allocation117_spill] sm:$0xff]  ;;  %v16240_v21 = vld [vmem:[#allocation119_spill] sm:$0xff] }
 0x31b   : > { %v10435_v60 = vpop.f32.mrf.mxu1  ;;  %10734 = vmatmul.mubr.msk.f32.gmra.mxu1 %vm363_vm2, %v16234_v50  ;;  %10786 = vmatprep.mubr.msk.f32.mxu0 %vm363_vm2, %v16235_v32  ;;  %v16242_v37 = vld [vmem:[#allocation35_spill] sm:$0xff]  ;;  %v16243_v43 = vld [vmem:[#allocation137_spill] sm:$0xff]  ;;  %v16244_v50 = vld [vmem:[#allocation134_spill] sm:$0xff] }
 0x31c   : > { %v14699_v51 = vadd.f32 %v5846_v28, %v5670_v7  ;;  %v5673_v12 = vadd.f32 %v10435_v60, %v14471_v44  ;;  %v5856_v45 = vpop.f32.mrf.mxu0  ;;  %10736 = vmatprep.mubr.msk.f32.mxu1 %vm363_vm2, %v16236_v16  ;;  %v16245_v32 = vld [vmem:[#allocation4_spill] sm:$0xff]  ;;  %v16246_v16 = vld [vmem:[#allocation147_spill] sm:$0xff] }
 0x31d   : > { %v5585_v19 = vpop.f32.mrf.mxu1 }
 0x31e   : > { %v14704_v56 = vadd.f32 %v10485_v40, %v5673_v12  ;;  %v5672_v48 = vadd.f32 %v5585_v19, %v14480_v14  ;;  %v10488_v6 = vpop.f32.mrf.mxu0  ;;  %10787 = vmatmul.mubr.msk.f32.gmra.mxu0 %vm363_vm2, %v16237_v15  ;;  %v7311_v19 = vrot.slane %v14303_v8, 4  ;;  %v7040_v15 = vrot.slane %v14303_v8, 3 }
 0x31f   : > { %v10438_v20 = vpop.f32.mrf.mxu1  ;;  %10737 = vmatmul.mubr.msk.f32.gmra.mxu1 %vm363_vm2, %v16238_v5  ;;  %10789 = vmatprep.mubr.msk.f32.mxu0 %vm363_vm2, %v16136_v23  ;;  %v16241_v23 = vld [vmem:[#allocation138_spill] sm:$0xff] }
 0x320   : > { %v14713_v44 = vadd.f32 %v5856_v45, %v5672_v48  ;;  %v5675_v24 = vadd.f32 %v10438_v20, %v14485_v13  ;;  %v5866_v25 = vpop.f32.mrf.mxu0  ;;  %10739 = vmatprep.mubr.msk.f32.mxu1 %vm363_vm2, %v16239_v29  ;;  %v16248_v29 = vld [vmem:[#allocation34_spill] sm:$0xff] }
 0x321   : > { %v5595_v14 = vpop.f32.mrf.mxu1 }
 0x322   : > { %v14718_v0 = vadd.f32 %v10488_v6, %v5675_v24  ;;  %v5674_v42 = vadd.f32 %v5595_v14, %v14494_v30  ;;  %v10491_v26 = vpop.f32.mrf.mxu0  ;;  %10790 = vmatmul.mubr.msk.f32.gmra.mxu0 %vm363_vm2, %v16138_v59  ;;  %v7039_v6 = vrot.slane %v14287_v62, 3  ;;  %v16249_v14 = vld [vmem:[#allocation67_spill] sm:$0xff] }
 0x323   : > { %v10441_v22 = vpop.f32.mrf.mxu1  ;;  %10740 = vmatmul.mubr.msk.f32.gmra.mxu1 %vm363_vm2, %v16240_v21  ;;  %10792 = vmatprep.mubr.msk.f32.mxu0 %vm363_vm2, %v16241_v23  ;;  %v7042_v21 = vrot.slane %v14516_v35, 3 }
 0x324   : > { %v14727_v13 = vadd.f32 %v5866_v25, %v5674_v42  ;;  %v5677_v28 = vadd.f32 %v10441_v22, %v14499_v18  ;;  %v5876_v47 = vpop.f32.mrf.mxu0  ;;  %10742 = vmatprep.mubr.msk.f32.mxu1 %vm363_vm2, %v16242_v37  ;;  %v16247_v25 = vld [vmem:[#allocation62_spill] sm:$0xff]  ;;  %v7313_v42 = vrot.slane %v14516_v35, 4  ;;  %v16250_v22 = vld [vmem:[#allocation65_spill] sm:$0xff] }
 0x325   : > { %v5605_v30 = vpop.f32.mrf.mxu1 }
 0x326   : > { %v14732_v7 = vadd.f32 %v10491_v26, %v5677_v28  ;;  %v5676_v59 = vadd.f32 %v5605_v30, %v14508_v31  ;;  %v10494_v40 = vpop.f32.mrf.mxu0  ;;  %10793 = vmatmul.mubr.msk.f32.gmra.mxu0 %vm363_vm2, %v16243_v43  ;;  %v7310_v31 = vrot.slane %v14287_v62, 4  ;;  %v7041_v28 = vsel %vm1356_vm4, %v7039_v6, %v7040_v15 }
 0x327   : > { %v10444_v60 = vpop.f32.mrf.mxu1  ;;  %10743 = vmatmul.mubr.msk.f32.gmra.mxu1 %vm363_vm2, %v16244_v50  ;;  %10795 = vmatprep.mubr.msk.f32.mxu0 %vm363_vm2, %v16245_v32  ;;  %v7314_v43 = vsel %vm428_vm0, %v7311_v19, %v7313_v42 }
 0x328   : > { %v14741_v18 = vadd.f32 %v5876_v47, %v5676_v59  ;;  %v5679_v12 = vadd.f32 %v10444_v60, %v14520_v63  ;;  %v5886_v45 = vpop.f32.mrf.mxu0  ;;  %10745 = vmatprep.mubr.msk.f32.mxu1 %vm363_vm2, %v16246_v16  ;;  %v16251_v59 = vld [vmem:[#allocation69_spill] sm:$0xff] }
 0x329   : > { %v5615_v48 = vpop.f32.mrf.mxu1 }
 0x32a   : > { %v14750_v20 = vadd.f32 %v10494_v40, %v5679_v12  ;;  %v5678_v5 = vadd.f32 %v5615_v48, %v14530_v58  ;;  %v10497_v24 = vpop.f32.mrf.mxu0  ;;  %10796 = vmatmul.mubr.msk.f32.gmra.mxu0 %vm363_vm2, %v16247_v25  ;;  %v7312_v58 = vsel %vm428_vm0, %v7310_v31, %v7311_v19  ;;  %v16252_v40 = vld [vmem:[#allocation66_spill] sm:$0xff] }
 0x32b   : > { %v10447_v63 = vpop.f32.mrf.mxu1  ;;  %10746 = vmatmul.mubr.msk.f32.gmra.mxu1 %vm363_vm2, %v16248_v29  ;;  %10798 = vmatprep.mubr.msk.f32.mxu0 %vm363_vm2, %v16249_v14 }
 0x32c   : > { %v14760_v62 = vadd.f32 %v5886_v45, %v5678_v5  ;;  %v5681_v8 = vadd.f32 %v10447_v63, %v14538_v46  ;;  %v5896_v26 = vpop.f32.mrf.mxu0  ;;  %10748 = vmatprep.mubr.msk.f32.mxu1 %vm363_vm2, %v16250_v22 }
 0x32d   : > { %v5625_v23 = vpop.f32.mrf.mxu1 }
 0x32e   : > { %v14768_v47 = vadd.f32 %v10497_v24, %v5681_v8  ;;  %v5680_v37 = vadd.f32 %v5625_v23, %v14547_v9  ;;  %v10500_v30 = vpop.f32.mrf.mxu0  ;;  %10799 = vmatmul.mubr.msk.f32.gmra.mxu0 %vm363_vm2, %v16251_v59  ;;  %v7043_v9 = vsel %vm1356_vm4, %v7040_v15, %v7042_v21 }
 0x32f   : > { %v10450_v46 = vpop.f32.mrf.mxu1  ;;  %10749 = vmatmul.mubr.msk.f32.gmra.mxu1 %vm363_vm2, %v16252_v40  ;;  %10801 = vmatprep.mubr.msk.f32.mxu0 %vm363_vm2, %v7312_v58 }
 0x330   : > { %v14777_v35 = vadd.f32 %v5896_v26, %v5680_v37  ;;  %v5683_v60 = vadd.f32 %v10450_v46, %v14552_v41  ;;  %v5906_v50 = vpop.f32.mrf.mxu0  ;;  %10751 = vmatprep.mubr.msk.f32.mxu1 %vm363_vm2, %v7041_v28 }
 0x331   : > { %v5635_v32 = vpop.f32.mrf.mxu1 }
 0x332   : > { %v14782_v12 = vadd.f32 %v10500_v30, %v5683_v60  ;;  %v5682_v45 = vadd.f32 %v5635_v32, %v14559_v1  ;;  %v10503_v16 = vpop.f32.mrf.mxu0  ;;  %10802 = vmatmul.mubr.msk.f32.gmra.mxu0 %vm363_vm2, %v7314_v43 }
 0x333   : > { %v10453_v31 = vpop.f32.mrf.mxu1  ;;  %10752 = vmatmul.mubr.msk.f32.gmra.mxu1 %vm363_vm2, %v7043_v9 }
 0x334   : > { %v14787_v19 = vadd.f32 %v5906_v50, %v5682_v45  ;;  %v5685_v41 = vadd.f32 %v10453_v31, %v14564_v33  ;;  %v5916_v48 = vpop.f32.mrf.mxu0 }
 0x335   : > { %v5645_v6 = vpop.f32.mrf.mxu1 }
 0x336   : > { %v14790_v5 = vadd.f32 %v10503_v16, %v5685_v41  ;;  %v5684_v15 = vadd.f32 %v5645_v6, %v14573_v57  ;;  %v10558_v24 = vpop.f32.mrf.mxu0 }
 0x337   : > { %v10508_v25 = vpop.f32.mrf.mxu1 }
 0x338   : > { %v14793_v63 = vadd.f32 %v5916_v48, %v5684_v15  ;;  %v6197_v1 = vadd.f32 %v10508_v25, %v14578_v54  ;;  %v6305_v29 = vpop.f32.mrf.mxu0 }
 0x339   : > { %v6037_v14 = vpop.f32.mrf.mxu1 }
 0x33a   : > { %v14796_v42 = vadd.f32 %v10558_v24, %v6197_v1  ;;  %v6196_v8 = vadd.f32 %v6037_v14, %v14587_v34  ;;  %v10561_v26 = vpop.f32.mrf.mxu0 }
 0x33b   : > { %v10511_v33 = vpop.f32.mrf.mxu1 }
 0x33c   : > { %v14799_v22 = vadd.f32 %v6305_v29, %v6196_v8  ;;  %v6199_v58 = vadd.f32 %v10511_v33, %v14592_v38  ;;  %v6315_v21 = vpop.f32.mrf.mxu0 }
 0x33d   : > { %v6047_v57 = vpop.f32.mrf.mxu1 }
 0x33e   : > { %v14802_v23 = vadd.f32 %v10561_v26, %v6199_v58  ;;  %v6198_v28 = vadd.f32 %v6047_v57, %v14601_v3  ;;  %v10564_v37 = vpop.f32.mrf.mxu0 }
 0x33f   : > { %v10514_v54 = vpop.f32.mrf.mxu1 }
 0x340   : > { %v14805_v30 = vadd.f32 %v6315_v21, %v6198_v28  ;;  %v6201_v59 = vadd.f32 %v10514_v54, %v14606_v11  ;;  %v6325_v46 = vpop.f32.mrf.mxu0 }
 0x341   : > { %v6057_v34 = vpop.f32.mrf.mxu1 }
 0x342   : > { %v14808_v40 = vadd.f32 %v10564_v37, %v6201_v59  ;;  %v6200_v43 = vadd.f32 %v6057_v34, %v14615_v27  ;;  %v10567_v60 = vpop.f32.mrf.mxu0 }
 0x343   : > { %v10517_v38 = vpop.f32.mrf.mxu1 }
 0x344   : > { %v14811_v50 = vadd.f32 %v6325_v46, %v6200_v43  ;;  %v6203_v9 = vadd.f32 %v10517_v38, %v14620_v17  ;;  %v6335_v32 = vpop.f32.mrf.mxu0 }
 0x345   : > { %v6067_v3 = vpop.f32.mrf.mxu1 }
 0x346   : > { %v14814_v45 = vadd.f32 %v10567_v60, %v6203_v9  ;;  %v6202_v16 = vadd.f32 %v6067_v3, %v14629_v55  ;;  %v10570_v31 = vpop.f32.mrf.mxu0 }
 0x347   : > { %v10520_v11 = vpop.f32.mrf.mxu1 }
 0x348   : > { %v14817_v41 = vadd.f32 %v6335_v32, %v6202_v16  ;;  %v6205_v48 = vadd.f32 %v10520_v11, %v14634_v52  ;;  %v6345_v6 = vpop.f32.mrf.mxu0 }
 0x349   : > { %v6077_v27 = vpop.f32.mrf.mxu1 }
 0x34a   : > { %v14820_v15 = vadd.f32 %v10570_v31, %v6205_v48  ;;  %v6204_v24 = vadd.f32 %v6077_v27, %v14643_v53  ;;  %v10573_v25 = vpop.f32.mrf.mxu0 }
 0x34b   : > { %v10523_v17 = vpop.f32.mrf.mxu1 }
 0x34c   : > { %v14823_v1 = vadd.f32 %v6345_v6, %v6204_v24  ;;  %v6207_v29 = vadd.f32 %v10523_v17, %v14648_v4  ;;  %v6355_v14 = vpop.f32.mrf.mxu0 }
 0x34d   : > { %v6087_v55 = vpop.f32.mrf.mxu1 }
 0x34e   : > { %v14826_v8 = vadd.f32 %v10573_v25, %v6207_v29  ;;  %v6206_v26 = vadd.f32 %v6087_v55, %v14657_v61  ;;  %v10576_v33 = vpop.f32.mrf.mxu0 }
 0x34f   : > { %v10526_v52 = vpop.f32.mrf.mxu1 }
 0x350   : > { %v14829_v58 = vadd.f32 %v6355_v14, %v6206_v26  ;;  %v6209_v21 = vadd.f32 %v10526_v52, %v14662_v49  ;;  %v6365_v57 = vpop.f32.mrf.mxu0 }
 0x351   : > { %v6097_v53 = vpop.f32.mrf.mxu1 }
 0x352   : > { %v14832_v28 = vadd.f32 %v10576_v33, %v6209_v21  ;;  %v6208_v37 = vadd.f32 %v6097_v53, %v14671_v39  ;;  %v10579_v54 = vpop.f32.mrf.mxu0 }
 0x353   : > { %v10529_v4 = vpop.f32.mrf.mxu1 }
 0x354   : > { %v14835_v59 = vadd.f32 %v6365_v57, %v6208_v37  ;;  %v6211_v46 = vadd.f32 %v10529_v4, %v14676_v10  ;;  %v6375_v34 = vpop.f32.mrf.mxu0 }
 0x355   : > { %v6107_v61 = vpop.f32.mrf.mxu1 }
 0x356   : > { %v14838_v43 = vadd.f32 %v10579_v54, %v6211_v46  ;;  %v6210_v60 = vadd.f32 %v6107_v61, %v14685_v2  ;;  %v10582_v38 = vpop.f32.mrf.mxu0 }
 0x357   : > { %v10532_v49 = vpop.f32.mrf.mxu1 }
 0x358   : > { %v14841_v9 = vadd.f32 %v6375_v34, %v6210_v60  ;;  %v6213_v32 = vadd.f32 %v10532_v49, %v14690_v36  ;;  %v6385_v3 = vpop.f32.mrf.mxu0 }
 0x359   : > { %v6117_v39 = vpop.f32.mrf.mxu1 }
 0x35a   : > { %v14844_v16 = vadd.f32 %v10582_v38, %v6213_v32  ;;  %v6212_v31 = vadd.f32 %v6117_v39, %v14699_v51  ;;  %v10585_v11 = vpop.f32.mrf.mxu0 }
 0x35b   : > { %v10535_v10 = vpop.f32.mrf.mxu1 }
 0x35c   : > { %v14847_v48 = vadd.f32 %v6385_v3, %v6212_v31  ;;  %v6215_v6 = vadd.f32 %v10535_v10, %v14704_v56  ;;  %v6395_v27 = vpop.f32.mrf.mxu0 }
 0x35d   : > { %v6127_v2 = vpop.f32.mrf.mxu1 }
 0x35e   : > { %v14850_v24 = vadd.f32 %v10585_v11, %v6215_v6  ;;  %v6214_v25 = vadd.f32 %v6127_v2, %v14713_v44  ;;  %v10588_v17 = vpop.f32.mrf.mxu0 }
 0x35f   : > { %v10538_v36 = vpop.f32.mrf.mxu1 }
 0x360   : > { %16253 = vst [vmem:[#allocation38_spill] sm:$0xff] %v14850_v24  ;;  %v14853_v29 = vadd.f32 %v6395_v27, %v6214_v25  ;;  %v6217_v14 = vadd.f32 %v10538_v36, %v14718_v0  ;;  %v6405_v55 = vpop.f32.mrf.mxu0 }
 0x361   : > { %v6137_v51 = vpop.f32.mrf.mxu1 }
 0x362   : > { %16254 = vst [vmem:[#allocation70_spill] sm:$0xff] %v14853_v29  ;;  %v14856_v26 = vadd.f32 %v10588_v17, %v6217_v14  ;;  %v6216_v33 = vadd.f32 %v6137_v51, %v14727_v13  ;;  %v10591_v52 = vpop.f32.mrf.mxu0 }
 0x363   : > { %v10541_v56 = vpop.f32.mrf.mxu1 }
 0x364   : > { %16255 = vst [vmem:[#allocation39_spill] sm:$0xff] %v14856_v26  ;;  %v14859_v21 = vadd.f32 %v6405_v55, %v6216_v33  ;;  %v6219_v57 = vadd.f32 %v10541_v56, %v14732_v7  ;;  %v6415_v53 = vpop.f32.mrf.mxu0 }
 0x365   : > { %v6147_v44 = vpop.f32.mrf.mxu1 }
 0x366   : > { %16256 = vst [vmem:[#allocation54_spill] sm:$0xff] %v14859_v21  ;;  %v14862_v37 = vadd.f32 %v10591_v52, %v6219_v57  ;;  %v6218_v54 = vadd.f32 %v6147_v44, %v14741_v18  ;;  %v10594_v4 = vpop.f32.mrf.mxu0 }
 0x367   : > { %v10544_v0 = vpop.f32.mrf.mxu1 }
 0x368   : > { %16257 = vst [vmem:[#allocation58_spill] sm:$0xff] %v14862_v37  ;;  %v14865_v46 = vadd.f32 %v6415_v53, %v6218_v54  ;;  %v6221_v34 = vadd.f32 %v10544_v0, %v14750_v20  ;;  %v6425_v61 = vpop.f32.mrf.mxu0 }
 0x369   : > { %v6157_v13 = vpop.f32.mrf.mxu1 }
 0x36a   : > { %16258 = vst [vmem:[#allocation18_spill] sm:$0xff] %v14865_v46  ;;  %v14868_v60 = vadd.f32 %v10594_v4, %v6221_v34  ;;  %v6220_v38 = vadd.f32 %v6157_v13, %v14760_v62  ;;  %v10597_v49 = vpop.f32.mrf.mxu0 }
 0x36b   : > { %v10547_v7 = vpop.f32.mrf.mxu1 }
 0x36c   : > { %16259 = vst [vmem:[#allocation60_spill] sm:$0xff] %v14868_v60  ;;  %v14871_v32 = vadd.f32 %v6425_v61, %v6220_v38  ;;  %v6223_v3 = vadd.f32 %v10547_v7, %v14768_v47  ;;  %v6435_v39 = vpop.f32.mrf.mxu0 }
 0x36d   : > { %v6167_v18 = vpop.f32.mrf.mxu1 }
 0x36e   : > { %16260 = vst [vmem:[#allocation139_spill] sm:$0xff] %v14871_v32  ;;  %v14874_v31 = vadd.f32 %v10597_v49, %v6223_v3  ;;  %v6222_v11 = vadd.f32 %v6167_v18, %v14777_v35  ;;  %v10600_v10 = vpop.f32.mrf.mxu0 }
 0x36f   : > { %v10550_v20 = vpop.f32.mrf.mxu1 }
 0x370   : > { %16261 = vst [vmem:[#allocation68_spill] sm:$0xff] %v14874_v31  ;;  %v14877_v6 = vadd.f32 %v6435_v39, %v6222_v11  ;;  %v6225_v27 = vadd.f32 %v10550_v20, %v14782_v12  ;;  %v6445_v2 = vpop.f32.mrf.mxu0 }
 0x371   : > { %v6177_v62 = vpop.f32.mrf.mxu1 }
 0x372   : > { %v14880_v25 = vadd.f32 %v10600_v10, %v6225_v27  ;;  %v6224_v17 = vadd.f32 %v6177_v62, %v14787_v19  ;;  %v10603_v36 = vpop.f32.mrf.mxu0 }
 0x373   : > { %v10553_v47 = vpop.f32.mrf.mxu1 }
 0x374   : > { %v14883_v14 = vadd.f32 %v6445_v2, %v6224_v17  ;;  %v6227_v55 = vadd.f32 %v10553_v47, %v14790_v5  ;;  %v6455_v51 = vpop.f32.mrf.mxu0 }
 0x375   : > { %v6187_v35 = vpop.f32.mrf.mxu1 }
 0x376   : > { %16262 = vst [vmem:[#allocation71_spill] sm:$0xff] %v14883_v14  ;;  %v14886_v33 = vadd.f32 %v10603_v36, %v6227_v55  ;;  %v6226_v52 = vadd.f32 %v6187_v35, %v14793_v63  ;;  %v14889_v56 = vpop.f32.mrf.mxu0 }
 0x377   : > { %v14891_v12 = vpop.f32.mrf.mxu1 }
 0x378   : > { %16263 = vst [vmem:[#allocation72_spill] sm:$0xff] %v14886_v33  ;;  %v14893_v57 = vadd.f32 %v6455_v51, %v6226_v52  ;;  %v14895_v53 = vpop.f32.mrf.mxu0 }
 0x379   : > { %v14897_v19 = vpop.f32.mrf.mxu1 }
 0x37a   : > { %16264 = vst [vmem:[#allocation74_spill] sm:$0xff] %v14893_v57  ;;  %v14899_v44 = vpop.f32.mrf.mxu0 }
 0x37b   : > { %v10611_v54 = vpop.f32.mrf.mxu1 }
 0x37c   : > { %v14901_v5 = vpop.f32.mrf.mxu0 }
 0x37d   : > { %v6587_v4 = vpop.f32.mrf.mxu1 }
 0x37e   : > { %v14903_v0 = vpop.f32.mrf.mxu0 }
 0x37f   : > { %v10614_v34 = vpop.f32.mrf.mxu1 }
 0x380   : > { %v14905_v63 = vpop.f32.mrf.mxu0 }
 0x381   : > { %v6597_v61 = vpop.f32.mrf.mxu1 }
 0x382   : > { %v14907_v13 = vpop.f32.mrf.mxu0 }
 0x383   : > { %v10617_v38 = vpop.f32.mrf.mxu1 }
 0x384   : > { %v14909_v49 = vpop.f32.mrf.mxu0 }
 0x385   : > { %v6607_v7 = vpop.f32.mrf.mxu1 }
 0x386   : > { %v14911_v3 = vpop.f32.mrf.mxu0 }
 0x387   : > { %v10620_v39 = vpop.f32.mrf.mxu1 }
 0x388   : > { %v14913_v18 = vpop.f32.mrf.mxu0 }
 0x389   : > { %v6617_v11 = vpop.f32.mrf.mxu1 }
 0x38a   : > { %v14915_v10 = vpop.f32.mrf.mxu0 }
 0x38b   : > { %v10623_v20 = vpop.f32.mrf.mxu1 }
 0x38c   : > { %v14917_v27 = vpop.f32.mrf.mxu0 }
 0x38d   : > { %v14919_v2 = vpop.f32.mrf.mxu1 }
 0x38e   : > { %v14921_v62 = vpop.f32.mrf.mxu0 }
 0x38f   : > { %v14923_v17 = vpop.f32.mrf.mxu1 }
 0x390   : > { %v14925_v36 = vpop.f32.mrf.mxu0 }
 0x391   : > { %16265 = vst [vmem:[#allocation6_spill] sm:$0xff] %v14925_v36  ;;  %v14927_v47 = vpop.f32.mrf.mxu1 }
 0x392   : > { %v14929_v55 = vpop.f32.mrf.mxu0 }
 0x393   : > { %16266 = vst [vmem:[#allocation76_spill] sm:$0xff] %v14929_v55  ;;  %v14931_v51 = vpop.f32.mrf.mxu1 }
 0x394   : > { %v14933_v35 = vpop.f32.mrf.mxu0 }
 0x395   : > { %16267 = vst [vmem:[#allocation63_spill] sm:$0xff] %v14933_v35  ;;  %v14935_v52 = vpop.f32.mrf.mxu1 }
 0x396   : > { %v14937_v57 = vpop.f32.mrf.mxu0 }
 0x397   : > { %16268 = vst [vmem:[#allocation79_spill] sm:$0xff] %v14937_v57  ;;  %v14939_v33 = vpop.f32.mrf.mxu1 }
 0x398   : > { %v14941_v14 = vpop.f32.mrf.mxu0 }
 0x399   : > { %16269 = vst [vmem:[#allocation120_spill] sm:$0xff] %v14941_v14  ;;  %v14943_v31 = vpop.f32.mrf.mxu1 }
 0x39a   : > { %v14945_v32 = vpop.f32.mrf.mxu0 }
 0x39b   : > { %16270 = vst [vmem:[#allocation121_spill] sm:$0xff] %v14945_v32  ;;  %v14947_v60 = vpop.f32.mrf.mxu1 }
 0x39c   : > { %16271 = vst [vmem:[#allocation122_spill] sm:$0xff] %v14947_v60  ;;  %v14949_v46 = vpop.f32.mrf.mxu0 }
 0x39d   : > { %16272 = vst [vmem:[#allocation123_spill] sm:$0xff] %v14949_v46  ;;  %v14951_v37 = vpop.f32.mrf.mxu1 }
 0x39e   : > { %16273 = vst [vmem:[#allocation124_spill] sm:$0xff] %v14951_v37  ;;  %v14953_v21 = vpop.f32.mrf.mxu0 }
 0x39f   : > { %16274 = vst [vmem:[#allocation125_spill] sm:$0xff] %v14953_v21  ;;  %v14955_v26 = vpop.f32.mrf.mxu1 }
 0x3a0   : > { %16275 = vst [vmem:[#allocation126_spill] sm:$0xff] %v14955_v26  ;;  %v14957_v35 = vpop.f32.mrf.mxu0 }
 0x3a1   : > { %16276 = vst [vmem:[#allocation127_spill] sm:$0xff] %v14957_v35  ;;  %v14959_v57 = vpop.f32.mrf.mxu1 }
 0x3a2   : > { %16277 = vst [vmem:[#allocation128_spill] sm:$0xff] %v14959_v57  ;;  %v14961_v55 = vpop.f32.mrf.mxu0 }
 0x3a3   : > { %16278 = vst [vmem:[#allocation129_spill] sm:$0xff] %v14961_v55  ;;  %v14963_v14 = vpop.f32.mrf.mxu1 }
 0x3a4   : > { %16279 = vst [vmem:[#allocation130_spill] sm:$0xff] %v14963_v14  ;;  %v14965_v29 = vpop.f32.mrf.mxu0 }
 0x3a5   : > { %16280 = vst [vmem:[#allocation131_spill] sm:$0xff] %v14965_v29  ;;  %v14967_v32 = vpop.f32.mrf.mxu1 }
 0x3a6   : > { %16281 = vst [vmem:[#allocation132_spill] sm:$0xff] %v14967_v32  ;;  %v14969_v60 = vpop.f32.mrf.mxu0 }
 0x3a7   : > { %16282 = vst [vmem:[#allocation135_spill] sm:$0xff] %v14969_v60  ;;  %v14971_v46 = vpop.f32.mrf.mxu1 }
 0x3a8   : > { %16283 = vst [vmem:[#allocation136_spill] sm:$0xff] %v14971_v46  ;;  %v14973_v37 = vpop.f32.mrf.mxu0 }
 0x3a9   : > { %16284 = vst [vmem:[#allocation140_spill] sm:$0xff] %v14973_v37  ;;  %v14975_v21 = vpop.f32.mrf.mxu1  ;;  %v6737_v37 = vadd.f32 %v14891_v12, %v14796_v42 }
 0x3aa   : > { %v14977_v26 = vpop.f32.mrf.mxu0 }
 0x3ab   : > { %16285 = vst [vmem:[#allocation144_spill] sm:$0xff] %v14977_v26  ;;  %v14979_v35 = vpop.f32.mrf.mxu1 }
 0x3ac   : > { %16286 = vst [vmem:[#allocation8_spill] sm:$0xff] %v14979_v35  ;;  %v6978_v57 = vpop.f32.mrf.mxu0 }
 0x3ad   : > { %v6707_v55 = vpop.f32.mrf.mxu1 }
 0x3ae   : > { %v6762_v14 = vadd.f32 %v6707_v55, %v14877_v6  ;;  %v10700_v24 = vpop.f32.mrf.mxu0  ;;  %v6736_v6 = vadd.f32 %v14897_v19, %v14799_v22  ;;  %v6739_v55 = vadd.f32 %v10611_v54, %v14802_v23  ;;  %v7008_v22 = vadd.f32 %v14889_v56, %v6737_v37 }
 0x3af   : > { %v10650_v29 = vpop.f32.mrf.mxu1  ;;  %v6744_v23 = vadd.f32 %v6617_v11, %v14823_v1  ;;  %v6746_v1 = vadd.f32 %v14919_v2, %v14829_v58  ;;  %v16288_v2 = vld [vmem:[#allocation6_spill] sm:$0xff] }
 0x3b0   : > { %v14982_v36 = vadd.f32 %v6978_v57, %v6762_v14  ;;  %v6765_v60 = vadd.f32 %v10650_v29, %v14880_v25  ;;  %v14985_v32 = vpop.f32.mrf.mxu0  ;;  %v6738_v14 = vadd.f32 %v6587_v4, %v14805_v30  ;;  %v6741_v29 = vadd.f32 %v10614_v34, %v14808_v40 }
 0x3b1   : > { %v14987_v46 = vpop.f32.mrf.mxu1  ;;  %v6740_v57 = vadd.f32 %v6597_v61, %v14811_v50  ;;  %v6747_v30 = vadd.f32 %v10623_v20, %v14826_v8  ;;  %v7007_v19 = vadd.f32 %v14895_v53, %v6736_v6  ;;  %v7010_v50 = vadd.f32 %v14899_v44, %v6739_v55 }
 0x3b2   : > { %16287 = vst [vmem:[#allocation37_spill] sm:$0xff] %v14982_v36  ;;  %v14991_v26 = vadd.f32 %v10700_v24, %v6765_v60  ;;  %v14993_v35 = vpop.f32.mrf.mxu0  ;;  %v6743_v36 = vadd.f32 %v10617_v38, %v14814_v45  ;;  %v6742_v24 = vadd.f32 %v6607_v7, %v14817_v41  ;;  %v6745_v60 = vadd.f32 %v10620_v39, %v14820_v15 }
 0x3b3   : > { %v15000_v25 = vpop.f32.mrf.mxu1  ;;  %v7009_v45 = vadd.f32 %v14901_v5, %v6738_v14  ;;  %v7012_v54 = vadd.f32 %v14903_v0, %v6741_v29  ;;  %v7011_v15 = vadd.f32 %v14905_v63, %v6740_v57  ;;  %v6749_v44 = vadd.f32 %v14923_v17, %v14832_v28  ;;  %v15036_v0 = vld [vmem:[%s15266_s2] ss:$0 sm:$0xff]  ;;  %v16293_v14 = vld [vmem:[#allocation76_spill] sm:$0xff] }
 0x3b4   : > { %v15004_v42 = vpop.f32.mrf.mxu0  ;;  %v15019_v4 = vadd.f32 %v14907_v13, %v6743_v36  ;;  %v15024_v56 = vadd.f32 %v14909_v49, %v6742_v24  ;;  %v15027_v53 = vadd.f32 %v14911_v3, %v6745_v60  ;;  %v6748_v5 = vadd.f32 %v14927_v47, %v14835_v59  ;;  %v16289_v17 = vld [vmem:[#allocation38_spill] sm:$0xff]  ;;  %v16295_v24 = vld [vmem:[#allocation79_spill] sm:$0xff] }
 0x3b5   : > { %v15008_v12 = vpop.f32.mrf.mxu1  ;;  %v15039_v34 = vadd.f32 %v14913_v18, %v6744_v23  ;;  %v15042_v63 = vadd.f32 %v14915_v10, %v6747_v30  ;;  %v6751_v28 = vadd.f32 %v14931_v51, %v14838_v43  ;;  %v6750_v59 = vadd.f32 %v14935_v52, %v14841_v9  ;;  %v16291_v36 = vld [vmem:[#allocation70_spill] sm:$0xff] }
 0x3b6   : > { %v10758_v40 = vpop.f32.mrf.mxu0  ;;  %v6753_v49 = vadd.f32 %v14939_v33, %v14844_v16  ;;  %v6752_v7 = vadd.f32 %v14943_v31, %v14847_v48  ;;  %v15053_v39 = vadd.f32 %v14917_v27, %v6746_v1  ;;  %v15057_v43 = vadd.f32 %v14921_v62, %v6749_v44  ;;  %v16290_v16 = vld [vmem:[#allocation122_spill] sm:$0xff]  ;;  %v16292_v48 = vld [vmem:[#allocation124_spill] sm:$0xff]  ;;  %v16294_v62 = vld [vmem:[#allocation63_spill] sm:$0xff] }
 0x3b7   : > { %v10708_v41 = vpop.f32.mrf.mxu1  ;;  %v15060_v9 = vadd.f32 %v16288_v2, %v6748_v5  ;;  %v6755_v33 = vadd.f32 %v16290_v16, %v16289_v17  ;;  %v6754_v31 = vadd.f32 %v16292_v48, %v16291_v36  ;;  %v15068_v29 = vadd.f32 %v16293_v14, %v6751_v28  ;;  %v16297_v1 = vld [vmem:[#allocation121_spill] sm:$0xff]  ;;  %v16299_v5 = vld [vmem:[#allocation39_spill] sm:$0xff] }
 0x3b8   : > { %v7279_v37 = vadd.f32 %v10708_v41, %v7008_v22  ;;  %v7390_v8 = vpop.f32.mrf.mxu0  ;;  %v15071_v57 = vadd.f32 %v16294_v62, %v6750_v59  ;;  %v15074_v60 = vadd.f32 %v16295_v24, %v6753_v49  ;;  %v16296_v22 = vld [vmem:[#allocation120_spill] sm:$0xff] }
 0x3b9   : > { %v7119_v58 = vpop.f32.mrf.mxu1  ;;  %v15077_v23 = vadd.f32 %v16296_v22, %v6752_v7 }
 0x3ba   : > { %v7550_v61 = vadd.f32 %v10758_v40, %v7279_v37  ;;  %v7278_v13 = vadd.f32 %v7119_v58, %v7007_v19  ;;  %v10761_v38 = vpop.f32.mrf.mxu0  ;;  %v15081_v37 = vadd.f32 %v16297_v1, %v6755_v33  ;;  %v16300_v58 = vld [vmem:[#allocation126_spill] sm:$0xff] }
 0x3bb   : > { %v10711_v3 = vpop.f32.mrf.mxu1 }
 0x3bc   : > { %v7589_v18 = vadd.f32 %v15036_v0, %v7550_v61  ;;  %v7549_v11 = vadd.f32 %v7390_v8, %v7278_v13  ;;  %v7281_v10 = vadd.f32 %v10711_v3, %v7010_v50  ;;  %v7400_v20 = vpop.f32.mrf.mxu0  ;;  %v16298_v8 = vld [vmem:[#allocation123_spill] sm:$0xff]  ;;  %v6757_v61 = vadd.f32 %v16300_v58, %v16299_v5  ;;  %v16301_v3 = vld [vmem:[#allocation54_spill] sm:$0xff] }
 0x3bd   : > { %v7129_v47 = vpop.f32.mrf.mxu1  ;;  %v15084_v44 = vadd.f32 %v16298_v8, %v6754_v31 }
 0x3be   : > { %v7621_v27 = vsub.f32 0.0, %v7589_v18  ;;  %v7588_v51 = vadd.f32 %v15036_v0, %v7549_v11  ;;  %v7552_v52 = vadd.f32 %v10761_v38, %v7281_v10  ;;  %v7280_v6 = vadd.f32 %v7129_v47, %v7009_v45  ;;  %v10764_v55 = vpop.f32.mrf.mxu0  ;;  %v16302_v18 = vld [vmem:[#allocation128_spill] sm:$0xff]  ;;  %v16303_v10 = vld [vmem:[#allocation58_spill] sm:$0xff]  ;;  %v16305_v47 = vld [vmem:[#allocation125_spill] sm:$0xff] }
 0x3bf   : > { %v10714_v30 = vpop.f32.mrf.mxu1  ;;  %v6756_v11 = vadd.f32 %v16302_v18, %v16301_v3 }
 0x3c0   : > { %v7654_v40 = vmul.f32 1.442695, %v7621_v27  ;;  %v7620_v19 = vsub.f32 0.0, %v7588_v51  ;;  %v7591_v50 = vadd.f32 %v15036_v0, %v7552_v52  ;;  %v7551_v41 = vadd.f32 %v7400_v20, %v7280_v6  ;;  %v7410_v45 = vpop.f32.mrf.mxu0  ;;  %v16304_v20 = vld [vmem:[#allocation130_spill] sm:$0xff]  ;;  %v16307_v52 = vld [vmem:[#allocation132_spill] sm:$0xff] }
 0x3c1   : > { %v7283_v13 = vadd.f32 %v10714_v30, %v7012_v54  ;;  %v7139_v38 = vpop.f32.mrf.mxu1  ;;  %v6759_v2 = vadd.f32 %v16304_v20, %v16303_v10  ;;  %v15095_v27 = vadd.f32 %v16305_v47, %v6757_v61  ;;  %v16306_v51 = vld [vmem:[#allocation18_spill] sm:$0xff] }
 0x3c2   : > { %10815 = vpow2.f32 %v7654_v40  ;;  %v7652_v28 = vmul.f32 1.442695, %v7620_v19  ;;  %v7623_v59 = vsub.f32 0.0, %v7591_v50  ;;  %v7590_v49 = vadd.f32 %v15036_v0, %v7551_v41  ;;  %v10767_v7 = vpop.f32.mrf.mxu0  ;;  %v16308_v40 = vld [vmem:[#allocation127_spill] sm:$0xff] }
 0x3c3   : > { %v7554_v17 = vadd.f32 %v10764_v55, %v7283_v13  ;;  %v7282_v16 = vadd.f32 %v7139_v38, %v7011_v15  ;;  %v10717_v33 = vpop.f32.mrf.mxu1  ;;  %v6758_v6 = vadd.f32 %v16307_v52, %v16306_v51  ;;  %v15102_v19 = vadd.f32 %v16308_v40, %v6756_v11  ;;  %v16310_v13 = vld [vmem:[#allocation131_spill] sm:$0xff]  ;;  %v16311_v38 = vld [vmem:[#allocation60_spill] sm:$0xff] }
 0x3c4   : > { %10817 = vpow2.f32 %v7652_v28  ;;  %v7658_v36 = vmul.f32 1.442695, %v7623_v59  ;;  %v7622_v48 = vsub.f32 0.0, %v7590_v49  ;;  %v7285_v54 = vadd.f32 %v10717_v33, %v15019_v4  ;;  %v7420_v31 = vpop.f32.mrf.mxu0  ;;  %v16309_v4 = vld [vmem:[#allocation129_spill] sm:$0xff]  ;;  %v16312_v28 = vld [vmem:[#allocation136_spill] sm:$0xff] }
 0x3c5   : > { %v7593_v14 = vadd.f32 %v15036_v0, %v7554_v17  ;;  %v7553_v62 = vadd.f32 %v7410_v45, %v7282_v16  ;;  %v7149_v24 = vpop.f32.mrf.mxu1  ;;  %v15105_v50 = vadd.f32 %v16309_v4, %v6759_v2  ;;  %v6761_v59 = vadd.f32 %v16312_v28, %v16311_v38  ;;  %v16313_v17 = vld [vmem:[#allocation139_spill] sm:$0xff]  ;;  %v16314_v16 = vld [vmem:[#allocation68_spill] sm:$0xff] }
 0x3c6   : > { %10819 = vpow2.f32 %v7658_v36  ;;  %v7656_v55 = vmul.f32 1.442695, %v7622_v48  ;;  %v7556_v15 = vadd.f32 %v10767_v7, %v7285_v54  ;;  %v7284_v22 = vadd.f32 %v7149_v24, %v15024_v56  ;;  %v10770_v30 = vpop.f32.mrf.mxu0  ;;  %v16315_v33 = vld [vmem:[#allocation8_spill] sm:$0xff] }
 0x3c7   : > { %v7625_v41 = vsub.f32 0.0, %v7593_v14  ;;  %v7592_v1 = vadd.f32 %v15036_v0, %v7553_v62  ;;  %v10720_v8 = vpop.f32.mrf.mxu1  ;;  %v15111_v56 = vadd.f32 %v16310_v13, %v6758_v6  ;;  %v6763_v36 = vadd.f32 %v16315_v33, %v16314_v16  ;;  %v16316_v14 = vld [vmem:[#allocation135_spill] sm:$0xff] }
 0x3c8   : > { %10821 = vpow2.f32 %v7656_v55  ;;  %v7595_v45 = vadd.f32 %v15036_v0, %v7556_v15  ;;  %v7555_v5 = vadd.f32 %v7420_v31, %v7284_v22  ;;  %v7287_v58 = vadd.f32 %v10720_v8, %v15027_v53  ;;  %v7430_v61 = vpop.f32.mrf.mxu0  ;;  %v16319_v8 = vld [vmem:[#allocation144_spill] sm:$0xff] }
 0x3c9   : > { %v7662_v49 = vmul.f32 1.442695, %v7625_v41  ;;  %v7624_v7 = vsub.f32 0.0, %v7592_v1  ;;  %v7159_v3 = vpop.f32.mrf.mxu1  ;;  %v6760_v53 = vadd.f32 %v14975_v21, %v16313_v17  ;;  %v15123_v62 = vadd.f32 %v16316_v14, %v6761_v59  ;;  %v16318_v41 = vld [vmem:[#allocation140_spill] sm:$0xff] }
 0x3ca   : > { %v7627_v18 = vsub.f32 0.0, %v7595_v45  ;;  %v7594_v11 = vadd.f32 %v15036_v0, %v7555_v5  ;;  %v7558_v10 = vadd.f32 %v10770_v30, %v7287_v58  ;;  %v7286_v20 = vadd.f32 %v7159_v3, %v15039_v34  ;;  %v10773_v2 = vpop.f32.mrf.mxu0  ;;  %v16317_v34 = vld [vmem:[#allocation71_spill] sm:$0xff] }
 0x3cb   : > { %10823 = vpow2.f32 %v7662_v49  ;;  %v7660_v48 = vmul.f32 1.442695, %v7624_v7  ;;  %v10723_v54 = vpop.f32.mrf.mxu1  ;;  %v6764_v24 = vadd.f32 %v14987_v46, %v16317_v34  ;;  %v15130_v1 = vadd.f32 %v16318_v41, %v6760_v53 }
 0x3cc   : > { %v7666_v31 = vmul.f32 1.442695, %v7627_v18  ;;  %v7626_v47 = vsub.f32 0.0, %v7594_v11  ;;  %v7597_v51 = vadd.f32 %v15036_v0, %v7558_v10  ;;  %v7557_v52 = vadd.f32 %v7430_v61, %v7286_v20  ;;  %v7440_v6 = vpop.f32.mrf.mxu0 }
 0x3cd   : > { %10825 = vpow2.f32 %v7660_v48  ;;  %v7289_v21 = vadd.f32 %v10723_v54, %v15042_v63  ;;  %v7169_v55 = vpop.f32.mrf.mxu1  ;;  %v15133_v45 = vadd.f32 %v16319_v8, %v6763_v36  ;;  %v15137_v59 = vadd.f32 %v14985_v32, %v6764_v24 }
 0x3ce   : > { %10827 = vpow2.f32 %v7666_v31  ;;  %v7664_v15 = vmul.f32 1.442695, %v7626_v47  ;;  %v7629_v22 = vsub.f32 0.0, %v7597_v51  ;;  %v7596_v30 = vadd.f32 %v15036_v0, %v7557_v52  ;;  %v10776_v40 = vpop.f32.mrf.mxu0 }
 0x3cf   : > { %v10816_v4 = vpop.eup %10815  ;;  %v7560_v5 = vadd.f32 %v10773_v2, %v7289_v21  ;;  %v7288_v46 = vadd.f32 %v7169_v55, %v15053_v39  ;;  %v10726_v58 = vpop.f32.mrf.mxu1 }
 0x3d0   : > { %v7717_v61 = vadd.f32 1.0, %v10816_v4  ;;  %10829 = vpow2.f32 %v7664_v15  ;;  %v7670_v63 = vmul.f32 1.442695, %v7629_v22  ;;  %v7628_v13 = vsub.f32 0.0, %v7596_v30  ;;  %v7450_v38 = vpop.f32.mrf.mxu0 }
 0x3d1   : > { %v10818_v28 = vpop.eup %10817  ;;  %v7599_v49 = vadd.f32 %v15036_v0, %v7560_v5  ;;  %v7559_v7 = vadd.f32 %v7440_v6, %v7288_v46  ;;  %v7291_v3 = vadd.f32 %v10726_v58, %v15057_v43  ;;  %v7179_v18 = vpop.f32.mrf.mxu1 }
 0x3d2   : > { %10831 = vrcp.f32 %v7717_v61  ;;  %v7716_v11 = vadd.f32 1.0, %v10818_v28  ;;  %v7668_v10 = vmul.f32 1.442695, %v7628_v13  ;;  %v7290_v39 = vadd.f32 %v7179_v18, %v15060_v9  ;;  %v10779_v20 = vpop.f32.mrf.mxu0  ;;  %v16320_v61 = vld [vmem:[#allocation72_spill] sm:$0xff] }
 0x3d3   : > { %v10820_v2 = vpop.eup %10819  ;;  %10833 = vpow2.f32 %v7670_v63  ;;  %v7631_v17 = vsub.f32 0.0, %v7599_v49  ;;  %v7598_v53 = vadd.f32 %v15036_v0, %v7559_v7  ;;  %v7562_v16 = vadd.f32 %v10776_v40, %v7291_v3  ;;  %v10729_v32 = vpop.f32.mrf.mxu1 }
 0x3d4   : > { %10835 = vrcp.f32 %v7716_v11  ;;  %v7719_v33 = vadd.f32 1.0, %v10820_v2  ;;  %v7561_v36 = vadd.f32 %v7450_v38, %v7290_v39  ;;  %v7293_v48 = vadd.f32 %v10729_v32, %v15068_v29  ;;  %v7460_v43 = vpop.f32.mrf.mxu0 }
 0x3d5   : > { %v10822_v54 = vpop.eup %10821  ;;  %10837 = vpow2.f32 %v7668_v10  ;;  %v7674_v31 = vmul.f32 1.442695, %v7631_v17  ;;  %v7630_v47 = vsub.f32 0.0, %v7598_v53  ;;  %v7601_v9 = vadd.f32 %v15036_v0, %v7562_v16  ;;  %v7189_v51 = vpop.f32.mrf.mxu1 }
 0x3d6   : > { %10839 = vrcp.f32 %v7719_v33  ;;  %v7718_v52 = vadd.f32 1.0, %v10822_v54  ;;  %v7600_v6 = vadd.f32 %v15036_v0, %v7561_v36  ;;  %v7564_v14 = vadd.f32 %v10779_v20, %v7293_v48  ;;  %v10782_v34 = vpop.f32.mrf.mxu0 }
 0x3d7   : > { %10841 = vpow2.f32 %v7674_v31  ;;  %v7672_v24 = vmul.f32 1.442695, %v7630_v47  ;;  %v7633_v21 = vsub.f32 0.0, %v7601_v9  ;;  %v7292_v29 = vadd.f32 %v7189_v51, %v15071_v57  ;;  %v10732_v55 = vpop.f32.mrf.mxu1 }
 0x3d8   : > { %v10824_v15 = vpop.eup %10823  ;;  %10843 = vrcp.f32 %v7718_v52  ;;  %v7632_v22 = vsub.f32 0.0, %v7600_v6  ;;  %v7603_v30 = vadd.f32 %v15036_v0, %v7564_v14  ;;  %v7295_v40 = vadd.f32 %v10732_v55, %v15074_v60  ;;  %v7470_v4 = vpop.f32.mrf.mxu0 }
 0x3d9   : > { %v7721_v41 = vadd.f32 1.0, %v10824_v15  ;;  %10845 = vpow2.f32 %v7672_v24  ;;  %v7678_v8 = vmul.f32 1.442695, %v7633_v21  ;;  %v7563_v5 = vadd.f32 %v7460_v43, %v7292_v29  ;;  %v7199_v46 = vpop.f32.mrf.mxu1 }
 0x3da   : > { %v10826_v58 = vpop.eup %10825  ;;  %v15151_v63 = vadd.f32 %v15000_v25, %v16320_v61  ;;  %v7635_v57 = vsub.f32 0.0, %v7603_v30  ;;  %v7566_v13 = vadd.f32 %v10782_v34, %v7295_v40  ;;  %v7294_v38 = vadd.f32 %v7199_v46, %v15077_v23  ;;  %v10785_v28 = vpop.f32.mrf.mxu0 }
 0x3db   : > { %v10828_v49 = vpop.eup %10827  ;;  %10847 = vrcp.f32 %v7721_v41  ;;  %v7720_v60 = vadd.f32 1.0, %v10826_v58  ;;  %v7676_v7 = vmul.f32 1.442695, %v7632_v22  ;;  %v7602_v3 = vadd.f32 %v15036_v0, %v7563_v5  ;;  %v10735_v18 = vpop.f32.mrf.mxu1 }
 0x3dc   : > { %v7723_v11 = vadd.f32 1.0, %v10828_v49  ;;  %10849 = vpow2.f32 %v7678_v8  ;;  %v7682_v10 = vmul.f32 1.442695, %v7635_v57  ;;  %v7605_v39 = vadd.f32 %v15036_v0, %v7566_v13  ;;  %v7480_v25 = vpop.f32.mrf.mxu0 }
 0x3dd   : > { %v10830_v20 = vpop.eup %10829  ;;  %10851 = vrcp.f32 %v7720_v60  ;;  %v7634_v23 = vsub.f32 0.0, %v7602_v3  ;;  %v7565_v2 = vadd.f32 %v7470_v4, %v7294_v38  ;;  %v7297_v17 = vadd.f32 %v10735_v18, %v15081_v37  ;;  %v7209_v53 = vpop.f32.mrf.mxu1 }
 0x3de   : > { %10853 = vrcp.f32 %v7723_v11  ;;  %v7722_v16 = vadd.f32 1.0, %v10830_v20  ;;  %v7637_v32 = vsub.f32 0.0, %v7605_v39  ;;  %v7296_v33 = vadd.f32 %v7209_v53, %v15084_v44  ;;  %v10788_v36 = vpop.f32.mrf.mxu0 }
 0x3df   : > { %v10832_v48 = vpop.eup %10831  ;;  %10855 = vpow2.f32 %v7676_v7  ;;  %v7680_v43 = vmul.f32 1.442695, %v7634_v23  ;;  %v7604_v54 = vadd.f32 %v15036_v0, %v7565_v2  ;;  %v7568_v31 = vadd.f32 %v10785_v28, %v7297_v17  ;;  %v10738_v47 = vpop.f32.mrf.mxu1 }
 0x3e0   : > { %v10834_v9 = vpop.eup %10833  ;;  %7782 = vst.msk [vmem:[%s15160_s22 + $0x8] sm:$0xff] %vm7780_vm5, %v10832_v48  ;;  %10857 = vrcp.f32 %v7722_v16  ;;  %v7686_v37 = vmul.f32 1.442695, %v7637_v32  ;;  %v7567_v51 = vadd.f32 %v7480_v25, %v7296_v33  ;;  %v7299_v52 = vadd.f32 %v10738_v47, %v15095_v27  ;;  %v7490_v6 = vpop.f32.mrf.mxu0  ;;  %v16321_v32 = vld [vmem:[#allocation74_spill] sm:$0xff] }
 0x3e1   : > { %v10836_v14 = vpop.eup %10835  ;;  %v7725_v44 = vadd.f32 1.0, %v10834_v9  ;;  %10859 = vpow2.f32 %v7682_v10  ;;  %v7636_v34 = vsub.f32 0.0, %v7604_v54  ;;  %v7607_v24 = vadd.f32 %v15036_v0, %v7568_v31  ;;  %v7219_v21 = vpop.f32.mrf.mxu1 }
 0x3e2   : > { %v10838_v29 = vpop.eup %10837  ;;  %7781 = vst.msk [vmem:[%s15160_s22] sm:$0xff] %vm7780_vm5, %v10836_v14  ;;  %10861 = vpow2.f32 %v7680_v43  ;;  %v7606_v55 = vadd.f32 %v15036_v0, %v7567_v51  ;;  %v7570_v15 = vadd.f32 %v10788_v36, %v7299_v52  ;;  %v7298_v22 = vadd.f32 %v7219_v21, %v15102_v19  ;;  %v10791_v30 = vpop.f32.mrf.mxu0 }
 0x3e3   : > { %v10840_v27 = vpop.eup %10839  ;;  %10863 = vrcp.f32 %v7725_v44  ;;  %v7724_v40 = vadd.f32 1.0, %v10838_v29  ;;  %v7684_v4 = vmul.f32 1.442695, %v7636_v34  ;;  %v7639_v41 = vsub.f32 0.0, %v7607_v24  ;;  %v10741_v8 = vpop.f32.mrf.mxu1 }
 0x3e4   : > { %v10842_v5 = vpop.eup %10841  ;;  %7784 = vst.msk [vmem:[%s15160_s22 + $0x18] sm:$0xff] %vm7780_vm5, %v10840_v27  ;;  %10865 = vpow2.f32 %v7686_v37  ;;  %v7638_v46 = vsub.f32 0.0, %v7606_v55  ;;  %v7609_v58 = vadd.f32 %v15036_v0, %v7570_v15  ;;  %v7569_v61 = vadd.f32 %v7490_v6, %v7298_v22  ;;  %v7500_v57 = vpop.f32.mrf.mxu0  ;;  %v16322_v27 = vld [vmem:[#allocation37_spill] sm:$0xff] }
 0x3e5   : > { %v10844_v13 = vpop.eup %10843  ;;  %10867 = vrcp.f32 %v7724_v40  ;;  %v7727_v19 = vadd.f32 1.0, %v10842_v5  ;;  %v7690_v38 = vmul.f32 1.442695, %v7639_v41  ;;  %v7301_v28 = vadd.f32 %v10741_v8, %v15105_v50  ;;  %v7229_v49 = vpop.f32.mrf.mxu1 }
 0x3e6   : > { %v10846_v60 = vpop.eup %10845  ;;  %7783 = vst.msk [vmem:[%s15160_s22 + $0x10] sm:$0xff] %vm7780_vm5, %v10844_v13  ;;  %10869 = vpow2.f32 %v7684_v4  ;;  %v7688_v7 = vmul.f32 1.442695, %v7638_v46  ;;  %v7641_v3 = vsub.f32 0.0, %v7609_v58  ;;  %v7608_v18 = vadd.f32 %v15036_v0, %v7569_v61  ;;  %v10794_v11 = vpop.f32.mrf.mxu0 }
 0x3e7   : > { %10871 = vrcp.f32 %v7727_v19  ;;  %v7726_v10 = vadd.f32 1.0, %v10846_v60  ;;  %v7572_v39 = vadd.f32 %v10791_v30, %v7301_v28  ;;  %v7300_v25 = vadd.f32 %v7229_v49, %v15111_v56  ;;  %v10744_v20 = vpop.f32.mrf.mxu1 }
 0x3e8   : > { %v10848_v23 = vpop.eup %10847  ;;  %10873 = vpow2.f32 %v7690_v38  ;;  %v7694_v50 = vmul.f32 1.442695, %v7641_v3  ;;  %v7640_v2 = vsub.f32 0.0, %v7608_v18  ;;  %v7303_v17 = vadd.f32 %v10744_v20, %v15123_v62  ;;  %v7510_v53 = vpop.f32.mrf.mxu0 }
 0x3e9   : > { %v10850_v16 = vpop.eup %10849  ;;  %v6766_v33 = vadd.f32 %v15008_v12, %v16321_v32  ;;  %7786 = vst.msk [vmem:[%s15160_s22 + $0x28] sm:$0xff] %vm7780_vm5, %v10848_v23  ;;  %10875 = vrcp.f32 %v7726_v10  ;;  %v7611_v36 = vadd.f32 %v15036_v0, %v7572_v39  ;;  %v7571_v48 = vadd.f32 %v7500_v57, %v7300_v25  ;;  %v7239_v56 = vpop.f32.mrf.mxu1 }
 0x3ea   : > { %v10852_v43 = vpop.eup %10851  ;;  %v7729_v54 = vadd.f32 1.0, %v10850_v16  ;;  %10877 = vpow2.f32 %v7688_v7  ;;  %v7692_v31 = vmul.f32 1.442695, %v7640_v2  ;;  %v7574_v47 = vadd.f32 %v10794_v11, %v7303_v17  ;;  %v10797_v62 = vpop.f32.mrf.mxu0 }
 0x3eb   : > { %v10854_v9 = vpop.eup %10853  ;;  %7785 = vst.msk [vmem:[%s15160_s22 + $0x20] sm:$0xff] %vm7780_vm5, %v10852_v43  ;;  %10879 = vpow2.f32 %v7694_v50  ;;  %v7643_v37 = vsub.f32 0.0, %v7611_v36  ;;  %v7610_v12 = vadd.f32 %v15036_v0, %v7571_v48  ;;  %v7302_v51 = vadd.f32 %v7239_v56, %v15130_v1  ;;  %v10747_v52 = vpop.f32.mrf.mxu1 }
 0x3ec   : > { %v10856_v6 = vpop.eup %10855  ;;  %v15193_v14 = vadd.f32 %v14993_v35, %v15151_v63  ;;  %7788 = vst.msk [vmem:[%s15160_s22 + $0x38] sm:$0xff] %vm7780_vm5, %v10854_v9  ;;  %10881 = vrcp.f32 %v7729_v54  ;;  %v7613_v44 = vadd.f32 %v15036_v0, %v7574_v47  ;;  %v7305_v34 = vadd.f32 %v10747_v52, %v15133_v45  ;;  %v7520_v24 = vpop.f32.mrf.mxu0 }
 0x3ed   : > { %v10858_v21 = vpop.eup %10857  ;;  %v7728_v29 = vadd.f32 1.0, %v10856_v6  ;;  %10883 = vpow2.f32 %v7692_v31  ;;  %v7698_v55 = vmul.f32 1.442695, %v7643_v37  ;;  %v7642_v1 = vsub.f32 0.0, %v7610_v12  ;;  %v7249_v15 = vpop.f32.mrf.mxu1 }
 0x3ee   : > { %v10860_v22 = vpop.eup %10859  ;;  %7787 = vst.msk [vmem:[%s15160_s22 + $0x30] sm:$0xff] %vm7780_vm5, %v10858_v21  ;;  %v7645_v30 = vsub.f32 0.0, %v7613_v44  ;;  %v7573_v35 = vadd.f32 %v7510_v53, %v7302_v51  ;;  %v7576_v63 = vadd.f32 %v10797_v62, %v7305_v34  ;;  %v7304_v40 = vadd.f32 %v7249_v15, %v16322_v27  ;;  %v10800_v4 = vpop.f32.mrf.mxu0 }
 0x3ef   : > { %v10862_v41 = vpop.eup %10861  ;;  %v7037_v45 = vadd.f32 %v15004_v42, %v6766_v33  ;;  %10885 = vrcp.f32 %v7728_v29  ;;  %v7731_v8 = vadd.f32 1.0, %v10860_v22  ;;  %v7696_v5 = vmul.f32 1.442695, %v7642_v1  ;;  %v10750_v46 = vpop.f32.mrf.mxu1 }
 0x3f0   : > { %v10864_v58 = vpop.eup %10863  ;;  %v7730_v61 = vadd.f32 1.0, %v10862_v41  ;;  %10887 = vpow2.f32 %v7698_v55  ;;  %v7702_v57 = vmul.f32 1.442695, %v7645_v30  ;;  %v7612_v13 = vadd.f32 %v15036_v0, %v7573_v35  ;;  %v7530_v19 = vpop.f32.mrf.mxu0 }
 0x3f1   : > { %v10866_v38 = vpop.eup %10865  ;;  %7790 = vst.msk [vmem:[%s15160_s22 + $0x48] sm:$0xff] %vm7780_vm5, %v10864_v58  ;;  %10889 = vrcp.f32 %v7731_v8  ;;  %v7615_v28 = vadd.f32 %v15036_v0, %v7576_v63  ;;  %v7575_v49 = vadd.f32 %v7520_v24, %v7304_v40  ;;  %v7307_v42 = vadd.f32 %v10750_v46, %v14991_v26  ;;  %v7259_v60 = vpop.f32.mrf.mxu1 }
 0x3f2   : > { %v10868_v7 = vpop.eup %10867  ;;  %10891 = vrcp.f32 %v7730_v61  ;;  %v7733_v3 = vadd.f32 1.0, %v10866_v38  ;;  %v7644_v18 = vsub.f32 0.0, %v7612_v13  ;;  %v7306_v11 = vadd.f32 %v7259_v60, %v15137_v59  ;;  %v10803_v53 = vpop.f32.mrf.mxu0 }
 0x3f3   : > { %v10870_v10 = vpop.eup %10869  ;;  %7789 = vst.msk [vmem:[%s15160_s22 + $0x40] sm:$0xff] %vm7780_vm5, %v10868_v7  ;;  %10893 = vpow2.f32 %v7696_v5  ;;  %v7647_v39 = vsub.f32 0.0, %v7615_v28  ;;  %v7614_v25 = vadd.f32 %v15036_v0, %v7575_v49  ;;  %v7578_v20 = vadd.f32 %v10800_v4, %v7307_v42  ;;  %v10753_v23 = vpop.f32.mrf.mxu1 }
 0x3f4   : > { %v10872_v50 = vpop.eup %10871  ;;  %10895 = vrcp.f32 %v7733_v3  ;;  %v7732_v26 = vadd.f32 1.0, %v10870_v10  ;;  %v7700_v2 = vmul.f32 1.442695, %v7644_v18  ;;  %v7577_v17 = vadd.f32 %v7530_v19, %v7306_v11  ;;  %v7540_v6 = vpop.f32.mrf.mxu0 }
 0x3f5   : > { %v10874_v16 = vpop.eup %10873  ;;  %7792 = vst.msk [vmem:[%s15160_s22 + $0x58] sm:$0xff] %vm7780_vm5, %v10872_v50  ;;  %10897 = vpow2.f32 %v7702_v57  ;;  %v7706_v59 = vmul.f32 1.442695, %v7647_v39  ;;  %v7646_v32 = vsub.f32 0.0, %v7614_v25  ;;  %v7617_v33 = vadd.f32 %v15036_v0, %v7578_v20  ;;  %v7269_v36 = vpop.f32.mrf.mxu1 }
 0x3f6   : > { %v10876_v48 = vpop.eup %10875  ;;  %10899 = vrcp.f32 %v7732_v26  ;;  %v7735_v56 = vadd.f32 1.0, %v10874_v16  ;;  %v7616_v43 = vadd.f32 %v15036_v0, %v7577_v17  ;;  %v7309_v54 = vadd.f32 %v10753_v23, %v15193_v14 }
 0x3f7   : > { %v10878_v31 = vpop.eup %10877  ;;  %7791 = vst.msk [vmem:[%s15160_s22 + $0x50] sm:$0xff] %vm7780_vm5, %v10876_v48  ;;  %10901 = vpow2.f32 %v7700_v2  ;;  %v7704_v47 = vmul.f32 1.442695, %v7646_v32  ;;  %v7649_v62 = vsub.f32 0.0, %v7617_v33  ;;  %v7308_v9 = vadd.f32 %v7269_v36, %v7037_v45 }
 0x3f8   : > { %v10880_v37 = vpop.eup %10879  ;;  %10903 = vrcp.f32 %v7735_v56  ;;  %v7734_v12 = vadd.f32 1.0, %v10878_v31  ;;  %v7648_v51 = vsub.f32 0.0, %v7616_v43  ;;  %v7580_v52 = vadd.f32 %v10803_v53, %v7309_v54 }
 0x3f9   : > { %v10882_v44 = vpop.eup %10881  ;;  %v7737_v34 = vadd.f32 1.0, %v10880_v37  ;;  %10905 = vpow2.f32 %v7706_v59  ;;  %v7579_v24 = vadd.f32 %v7540_v6, %v7308_v9  ;;  %v7710_v21 = vmul.f32 1.442695, %v7649_v62 }
 0x3fa   : > { %v10884_v14 = vpop.eup %10883  ;;  %7794 = vst.msk [vmem:[%s15160_s22 + $0x68] sm:$0xff] %vm7780_vm5, %v10882_v44  ;;  %10907 = vrcp.f32 %v7734_v12  ;;  %v7619_v29 = vadd.f32 %v15036_v0, %v7580_v52  ;;  %v7708_v1 = vmul.f32 1.442695, %v7648_v51 }
 0x3fb   : > { %10909 = vrcp.f32 %v7737_v34  ;;  %v7736_v55 = vadd.f32 1.0, %v10884_v14  ;;  %v7618_v15 = vadd.f32 %v15036_v0, %v7579_v24 }
 0x3fc   : > { %v10886_v22 = vpop.eup %10885  ;;  %10911 = vpow2.f32 %v7704_v47  ;;  %v7651_v30 = vsub.f32 0.0, %v7619_v29 }
 0x3fd   : > { %v10888_v35 = vpop.eup %10887  ;;  %7793 = vst.msk [vmem:[%s15160_s22 + $0x60] sm:$0xff] %vm7780_vm5, %v10886_v22  ;;  %10913 = vrcp.f32 %v7736_v55  ;;  %v7650_v63 = vsub.f32 0.0, %v7618_v15 }
 0x3fe   : > { %v10890_v27 = vpop.eup %10889  ;;  %v7739_v40 = vadd.f32 1.0, %v10888_v35  ;;  %10915 = vpow2.f32 %v7710_v21  ;;  %v7714_v4 = vmul.f32 1.442695, %v7651_v30 }
 0x3ff   : > { %v10892_v41 = vpop.eup %10891  ;;  %7796 = vst.msk [vmem:[%s15160_s22 + $0x78] sm:$0xff] %vm7780_vm5, %v10890_v27  ;;  %10917 = vpow2.f32 %v7708_v1  ;;  %v7712_v0 = vmul.f32 1.442695, %v7650_v63 }
 0x400   : > { %v10894_v45 = vpop.eup %10893  ;;  %7795 = vst.msk [vmem:[%s15160_s22 + $0x70] sm:$0xff] %vm7780_vm5, %v10892_v41  ;;  %10919 = vrcp.f32 %v7739_v40 }
 0x401   : > { %v10896_v8 = vpop.eup %10895  ;;  %v7738_v5 = vadd.f32 1.0, %v10894_v45  ;;  %10921 = vpow2.f32 %v7714_v4 }
 0x402   : > { %v10898_v46 = vpop.eup %10897  ;;  %7798 = vst.msk [vmem:[%s15160_s22 + $0x88] sm:$0xff] %vm7780_vm5, %v10896_v8  ;;  %10923 = vpow2.f32 %v7712_v0 }
 0x403   : > { %v10900_v58 = vpop.eup %10899  ;;  %10925 = vrcp.f32 %v7738_v5  ;;  %v7741_v61 = vadd.f32 1.0, %v10898_v46 }
 0x404   : > { %v10902_v57 = vpop.eup %10901  ;;  %7797 = vst.msk [vmem:[%s15160_s22 + $0x80] sm:$0xff] %vm7780_vm5, %v10900_v58 }
 0x405   : > { %v10904_v13 = vpop.eup %10903  ;;  %10927 = vrcp.f32 %v7741_v61  ;;  %v7740_v19 = vadd.f32 1.0, %v10902_v57 }
 0x406   : > { %v10906_v38 = vpop.eup %10905  ;;  %7800 = vst.msk [vmem:[%s15160_s22 + $0x98] sm:$0xff] %vm7780_vm5, %v10904_v13 }
 0x407   : > { %v10908_v28 = vpop.eup %10907  ;;  %10929 = vrcp.f32 %v7740_v19  ;;  %v7743_v49 = vadd.f32 1.0, %v10906_v38 }
 0x408   : > { %v10910_v42 = vpop.eup %10909  ;;  %7799 = vst.msk [vmem:[%s15160_s22 + $0x90] sm:$0xff] %vm7780_vm5, %v10908_v28 }
 0x409   : > { %v10912_v60 = vpop.eup %10911  ;;  %7802 = vst.msk [vmem:[%s15160_s22 + $0xa8] sm:$0xff] %vm7780_vm5, %v10910_v42  ;;  %10931 = vrcp.f32 %v7743_v49 }
 0x40a   : > { %v10914_v7 = vpop.eup %10913  ;;  %v7742_v3 = vadd.f32 1.0, %v10912_v60 }
 0x40b   : > { %v10916_v18 = vpop.eup %10915  ;;  %7801 = vst.msk [vmem:[%s15160_s22 + $0xa0] sm:$0xff] %vm7780_vm5, %v10914_v7 }
 0x40c   : > { %v10918_v11 = vpop.eup %10917  ;;  %10933 = vrcp.f32 %v7742_v3  ;;  %v7745_v10 = vadd.f32 1.0, %v10916_v18 }
 0x40d   : > { %v10920_v39 = vpop.eup %10919  ;;  %v7744_v25 = vadd.f32 1.0, %v10918_v11 }
 0x40e   : > { %v10922_v20 = vpop.eup %10921  ;;  %7804 = vst.msk [vmem:[%s15160_s22 + $0xb8] sm:$0xff] %vm7780_vm5, %v10920_v39  ;;  %10935 = vrcp.f32 %v7745_v10 }
 0x40f   : > { %v10924_v23 = vpop.eup %10923  ;;  %10937 = vrcp.f32 %v7744_v25  ;;  %v7747_v50 = vadd.f32 1.0, %v10922_v20 }
 0x410   : > { %v10926_v26 = vpop.eup %10925  ;;  %v7746_v2 = vadd.f32 1.0, %v10924_v23 }
 0x411   : > { %7803 = vst.msk [vmem:[%s15160_s22 + $0xb0] sm:$0xff] %vm7780_vm5, %v10926_v26  ;;  %10939 = vrcp.f32 %v7747_v50 }
 0x412   : > { %v10928_v17 = vpop.eup %10927  ;;  %10941 = vrcp.f32 %v7746_v2 }
 0x413   : > { %7806 = vst.msk [vmem:[%s15160_s22 + $0xc8] sm:$0xff] %vm7780_vm5, %v10928_v17 }
 0x414   : > { %v10930_v53 = vpop.eup %10929 }
 0x415   : > { %7805 = vst.msk [vmem:[%s15160_s22 + $0xc0] sm:$0xff] %vm7780_vm5, %v10930_v53 }
 0x416   : > { %v10932_v16 = vpop.eup %10931 }
 0x417   : > { %7808 = vst.msk [vmem:[%s15160_s22 + $0xd8] sm:$0xff] %vm7780_vm5, %v10932_v16 }
 0x419   : > { %v10934_v59 = vpop.eup %10933 }
 0x41a   : > { %7807 = vst.msk [vmem:[%s15160_s22 + $0xd0] sm:$0xff] %vm7780_vm5, %v10934_v59 }
 0x41b   : > { %v10936_v32 = vpop.eup %10935 }
 0x41c   : > { %v10938_v33 = vpop.eup %10937  ;;  %7810 = vst.msk [vmem:[%s15160_s22 + $0xe8] sm:$0xff] %vm7780_vm5, %v10936_v32 }
 0x41d   : > { %7809 = vst.msk [vmem:[%s15160_s22 + $0xe0] sm:$0xff] %vm7780_vm5, %v10938_v33 }
 0x41e   : > { %v10940_v36 = vpop.eup %10939 }
 0x41f   : > { %v10942_v48 = vpop.eup %10941  ;;  %7812 = vst.msk [vmem:[%s15160_s22 + $0xf8] sm:$0xff] %vm7780_vm5, %v10940_v36 }
 0x420   : > { %7811 = vst.msk [vmem:[%s15160_s22 + $0xf0] sm:$0xff] %vm7780_vm5, %v10942_v48 }
 0x421 PF: > { %s13_s12 = sadd.s32 1, %s11009_s12  }
 0x422   : > { %p10_p4 = scmp.ge.s32.totalorder %s13_s12, 4  }
 0x424   :  { %12 = sbr.rel (!%p10_p4) target bundleno = 1 (0x1), region = 86 }

</bundles_post_ra>
